<compile_context>
chip_gen: v5e
topology: v5e:2x2
jax: 0.10.0
libtpu: 0.0.40
codegen_flags: <defaults>
</compile_context>

<pallas_src>
import functools

import jax
import jax.numpy as jnp
from jax.experimental import pallas as pl
from jax.experimental.pallas import tpu as pltpu

B = 2                      # batch
IN_FEATURES = 25088        # 512 * 7 * 7 (from nn.Linear(25088, 500))
HIDDEN = 500
NUM_CLASSES = 3

HID_PAD = 512              # 500 -> 512 (lane aligned)
CLS_PAD = 128              # 3   -> 128 (lane-dense output slab)


def get_config():
    """Generation-dependent tiling: 2-way hidden split only on dual-TC v7x."""
    kind = ""
    try:
        kind = jax.devices()[0].device_kind.lower()
    except Exception:
        pass
    if "v7" in kind:
        # Two TensorCores: split the hidden dim across them. With bf16 W1 a
        # TK of 12544 (2 reduction steps) double-buffers at ~12.9 MB per TC,
        # comfortably inside v7x's 64 MiB VMEM.
        return {"n_blocks": 2, "tk": 12544}      # 25088 = 2 * 12544
    # Single TensorCore (v5e / v6e): no split, full-width contiguous W1 tiles.
    return {"n_blocks": 1, "tk": 6272}           # 25088 = 4 * 6272


def _classifier_kernel(x_ref, w1_ref, b1_ref, w2_ref, o_ref, h_acc):
    k = pl.program_id(1)

    @pl.when(k == 0)
    def _():
        h_acc[...] = jnp.zeros_like(h_acc)

    # ReLU is applied to the flattened input *before* fc_1 (as in the module).
    # bf16 x * bf16 W1 on the MXU, accumulated in f32.
    xr = jnp.maximum(x_ref[...], 0.0).astype(jnp.bfloat16)
    h_acc[...] += jnp.dot(xr, w1_ref[0], preferred_element_type=jnp.float32)

    @pl.when(k == pl.num_programs(1) - 1)
    def _():
        # Dropout(p=0.3) is identity in eval mode.
        h = h_acc[...] + b1_ref[...]                       # fc_1 output slice
        o_ref[0] = jnp.dot(h, w2_ref[...],
                           preferred_element_type=jnp.float32).astype(o_ref.dtype)


def prepare_params(w1, b1, w2, b2, *, n_blocks):
    """One-time weight layout prep: transpose, zero-pad to lane widths, cast W1
    to bf16, and pre-shard W1 so each hidden block is one contiguous HBM slab.
    Call once and reuse; do NOT run this per forward pass."""
    hid_blk = HID_PAD // n_blocks
    w1t = jnp.zeros((IN_FEATURES, HID_PAD), jnp.float32).at[:, :HIDDEN].set(w1.T)
    # (n_blocks, IN_FEATURES, hid_blk): block n holds hidden cols [n*hid_blk, ...).
    w1s = (w1t.astype(jnp.bfloat16)
              .reshape(IN_FEATURES, n_blocks, hid_blk)
              .transpose(1, 0, 2))
    b1p = jnp.zeros((1, HID_PAD), jnp.float32).at[0, :HIDDEN].set(b1)
    w2t = jnp.zeros((HID_PAD, CLS_PAD), jnp.float32).at[:HIDDEN, :NUM_CLASSES].set(w2.T)
    b2p = jnp.zeros((1, CLS_PAD), jnp.float32).at[0, :NUM_CLASSES].set(b2)
    return w1s, b1p, w2t, b2p


def classifier_layer_forward(x_nchw, w1s, b1p, w2t, b2p, *, n_blocks, tk):
    """x_nchw: (B, 512, 7, 7) f32. Prepared params from prepare_params().
    Returns (B, 3) f32 logits."""
    bsz = x_nchw.shape[0]
    hid_blk = HID_PAD // n_blocks
    n_k = IN_FEATURES // tk
    x_flat = x_nchw.reshape(bsz, -1)            # nn.Flatten (row-major NCHW)
    assert x_flat.shape[1] == IN_FEATURES

    cost = pl.CostEstimate(
        flops=2 * bsz * IN_FEATURES * HID_PAD + 2 * bsz * HID_PAD * CLS_PAD,
        transcendentals=0,
        bytes_accessed=(IN_FEATURES * HID_PAD * 2           # W1 bf16 (dominant)
                        + n_blocks * bsz * IN_FEATURES * 4  # x (read per n block)
                        + HID_PAD * CLS_PAD * 4
                        + n_blocks * bsz * CLS_PAD * 4),
    )

    # VMEM budget derived from the actual tile bytes (+ headroom) instead of a
    # fixed number: > v5e's 16 MiB scoped default, modest on v7x's 64 MiB.
    tile_bytes = (2 * tk * hid_blk * 2          # W1 bf16, double-buffered
                  + 2 * bsz * tk * 4            # x f32, double-buffered
                  + 2 * hid_blk * CLS_PAD * 4   # W2 slice
                  + 2 * HID_PAD * 4             # b1
                  + 2 * bsz * CLS_PAD * 4       # output
                  + bsz * hid_blk * 4)          # f32 accumulator scratch
    vmem_limit = int(tile_bytes) + (8 << 20)

    partials = pl.pallas_call(
        _classifier_kernel,
        out_shape=jax.ShapeDtypeStruct((n_blocks, bsz, CLS_PAD), jnp.float32),
        grid_spec=pltpu.PrefetchScalarGridSpec(
            num_scalar_prefetch=0,
            grid=(n_blocks, n_k),                                    # (hidden split, K)
            in_specs=[
                pl.BlockSpec((bsz, tk), lambda n, k: (0, k)),            # x tile
                pl.BlockSpec((1, tk, hid_blk), lambda n, k: (n, k, 0)),  # W1 shard tile
                pl.BlockSpec((1, hid_blk), lambda n, k: (0, n)),         # b1 slice
                pl.BlockSpec((hid_blk, CLS_PAD), lambda n, k: (n, 0)),   # W2^T slice
            ],
            out_specs=pl.BlockSpec((1, bsz, CLS_PAD), lambda n, k: (n, 0, 0)),
            scratch_shapes=[pltpu.VMEM((bsz, hid_blk), jnp.float32)],
        ),
        compiler_params=pltpu.CompilerParams(
            dimension_semantics=("parallel", "arbitrary"),
            vmem_limit_bytes=vmem_limit,
        ),
        cost_estimate=cost,
    )(x_flat, w1s, b1p, w2t)

    # Sum per-hidden-block fc_2 partials (no-op when n_blocks == 1), add bias,
    # drop lane padding.
    out = partials[0] if n_blocks == 1 else jnp.sum(partials, axis=0)
    out = out + b2p
    return out[:, :NUM_CLASSES]


def init_params(key):
    """Deterministic init mimicking PyTorch nn.Linear defaults
    (uniform in +/- 1/sqrt(fan_in))."""
    k1, k2, k3, k4 = jax.random.split(key, 4)
    bound1 = 1.0 / jnp.sqrt(jnp.float32(IN_FEATURES))
    bound2 = 1.0 / jnp.sqrt(jnp.float32(HIDDEN))
    w1 = jax.random.uniform(k1, (HIDDEN, IN_FEATURES), jnp.float32, -bound1, bound1)
    b1 = jax.random.uniform(k2, (HIDDEN,), jnp.float32, -bound1, bound1)
    w2 = jax.random.uniform(k3, (NUM_CLASSES, HIDDEN), jnp.float32, -bound2, bound2)
    b2 = jax.random.uniform(k4, (NUM_CLASSES,), jnp.float32, -bound2, bound2)
    return w1, b1, w2, b2


if __name__ == "__main__":
    cfg = get_config()

    key = jax.random.PRNGKey(0)
    kx, kp = jax.random.split(key)

    # Input consistent with flatten -> 25088 features: (B, 512, 7, 7), NCHW.
    x = jax.random.normal(kx, (B, 512, 7, 7), jnp.float32)
    w1, b1, w2, b2 = init_params(kp)

    # One-time layout prep (transpose / pad / bf16 cast / pre-shard), hoisted
    # out of the per-call forward path.
    params = jax.block_until_ready(
        prepare_params(w1, b1, w2, b2, n_blocks=cfg["n_blocks"]))

    forward = jax.jit(functools.partial(
        classifier_layer_forward, n_blocks=cfg["n_blocks"], tk=cfg["tk"]))
    out = jax.block_until_ready(forward(x, *params))

    # Reference in plain JAX (eval-mode dropout = identity), applying the same
    # bf16 rounding to x / W1 so the only difference is f32 accumulation order.
    xf = jnp.maximum(x.reshape(B, -1), 0.0)
    h_ref = jnp.dot(xf.astype(jnp.bfloat16), w1.T.astype(jnp.bfloat16),
                    preferred_element_type=jnp.float32) + b1
    ref = h_ref @ w2.T + b2

    assert out.shape == (B, NUM_CLASSES)
    assert jnp.allclose(out, ref, atol=2e-3, rtol=2e-3), (
        float(jnp.max(jnp.abs(out - ref))))

    print("KERNEL_OK")
</pallas_src>

<mosaic_0001>
module attributes {stable_mosaic.version = 11 : i64} {
  func.func @_classifier_kernel(%arg0: i32, %arg1: i32, %arg2: memref<2x6272xf32, #tpu.memory_space<vmem>>, %arg3: memref<1x6272x512xbf16, #tpu.memory_space<vmem>>, %arg4: memref<1x512xf32, #tpu.memory_space<vmem>>, %arg5: memref<512x128xf32, #tpu.memory_space<vmem>>, %arg6: memref<1x2x128xf32, #tpu.memory_space<vmem>>, %arg7: memref<2x512xf32, #tpu.memory_space<vmem>>) attributes {dimension_semantics = [#tpu.dimension_semantics<parallel>, #tpu.dimension_semantics<arbitrary>], iteration_bounds = array<i64: 1, 4>, scalar_prefetch = 0 : i64, scratch_operands = 1 : i64, tpu.core_type = #tpu.core_type<tc>, window_params = [{transform_indices = @transform_0, window_bounds = array<i64: 2, 6272>}, {transform_indices = @transform_1, window_bounds = array<i64: 1, 6272, 512>}, {transform_indices = @transform_2, window_bounds = array<i64: 1, 512>}, {transform_indices = @transform_3, window_bounds = array<i64: 512, 128>}, {transform_indices = @transform_4, window_bounds = array<i64: 1, 2, 128>}]} {
    %c0_i32 = arith.constant 0 : i32
    %0 = arith.cmpi eq, %arg1, %c0_i32 : i32
    %1 = arith.extui %0 : i1 to i32
    %c0_i32_0 = arith.constant 0 : i32
    %2 = arith.cmpi ne, %1, %c0_i32_0 : i32
    scf.if %2 {
      %cst_11 = arith.constant 0.000000e+00 : f32
      %16 = vector.broadcast %cst_11 : f32 to vector<2x512xf32>
      %c0_12 = arith.constant 0 : index
      %c0_13 = arith.constant 0 : index
      %17 = vector.load %arg7[%c0_12, %c0_13] : memref<2x512xf32, #tpu.memory_space<vmem>>, vector<2x512xf32>
      tpu.vector_store %arg7[%c0_12, %c0_13], %16 {strides = array<i32>} : memref<2x512xf32, #tpu.memory_space<vmem>>, vector<2x512xf32>,
    } else {
    }
    %c0 = arith.constant 0 : index
    %c0_1 = arith.constant 0 : index
    %3 = vector.load %arg2[%c0, %c0_1] : memref<2x6272xf32, #tpu.memory_space<vmem>>, vector<2x6272xf32>
    %cst = arith.constant 0.000000e+00 : f32
    %4 = vector.broadcast %cst : f32 to vector<2x6272xf32>
    %5 = arith.maximumf %3, %4 : vector<2x6272xf32>
    %6 = arith.truncf %5 : vector<2x6272xf32> to vector<2x6272xbf16>
    %c0_2 = arith.constant 0 : index
    %c0_3 = arith.constant 0 : index
    %7 = vector.load %arg7[%c0_2, %c0_3] : memref<2x512xf32, #tpu.memory_space<vmem>>, vector<2x512xf32>
    %c0_4 = arith.constant 0 : index
    %c0_5 = arith.constant 0 : index
    %c0_6 = arith.constant 0 : index
    %8 = vector.load %arg3[%c0_4, %c0_5, %c0_6] : memref<1x6272x512xbf16, #tpu.memory_space<vmem>>, vector<1x6272x512xbf16>
    %9 = vector.shape_cast %8 : vector<1x6272x512xbf16> to vector<6272x512xbf16>
    %cst_7 = arith.constant dense<0.000000e+00> : vector<2x512xf32>
    %10 = tpu.matmul %6, %9, %cst_7 {dimension_numbers = #tpu.dot_dimension_numbers<[1], [0], [0], [1], [0, 0, 1, 1], [], []>} : vector<2x6272xbf16>, vector<6272x512xbf16>, vector<2x512xf32> -> vector<2x512xf32>
    %11 = arith.addf %7, %10 : vector<2x512xf32>
    %c0_8 = arith.constant 0 : index
    %c0_9 = arith.constant 0 : index
    %12 = vector.load %arg7[%c0_8, %c0_9] : memref<2x512xf32, #tpu.memory_space<vmem>>, vector<2x512xf32>
    tpu.vector_store %arg7[%c0_8, %c0_9], %11 {strides = array<i32>} : memref<2x512xf32, #tpu.memory_space<vmem>>, vector<2x512xf32>,
    %c3_i32 = arith.constant 3 : i32
    %13 = arith.cmpi eq, %arg1, %c3_i32 : i32
    %14 = arith.extui %13 : i1 to i32
    %c0_i32_10 = arith.constant 0 : i32
    %15 = arith.cmpi ne, %14, %c0_i32_10 : i32
    scf.if %15 {
      %c0_11 = arith.constant 0 : index
      %c0_12 = arith.constant 0 : index
      %16 = vector.load %arg7[%c0_11, %c0_12] : memref<2x512xf32, #tpu.memory_space<vmem>>, vector<2x512xf32>
      %c0_13 = arith.constant 0 : index
      %c0_14 = arith.constant 0 : index
      %17 = vector.load %arg4[%c0_13, %c0_14] : memref<1x512xf32, #tpu.memory_space<vmem>>, vector<1x512xf32>
      %18 = vector.broadcast %17 : vector<1x512xf32> to vector<2x512xf32>
      %19 = arith.addf %16, %18 : vector<2x512xf32>
      %c0_15 = arith.constant 0 : index
      %c0_16 = arith.constant 0 : index
      %20 = vector.load %arg5[%c0_15, %c0_16] : memref<512x128xf32, #tpu.memory_space<vmem>>, vector<512x128xf32>
      %cst_17 = arith.constant dense<0.000000e+00> : vector<2x128xf32>
      %21 = tpu.matmul %19, %20, %cst_17 {dimension_numbers = #tpu.dot_dimension_numbers<[1], [0], [0], [1], [0, 0, 1, 1], [], []>} : vector<2x512xf32>, vector<512x128xf32>, vector<2x128xf32> -> vector<2x128xf32>
      %c0_18 = arith.constant 0 : index
      %c0_19 = arith.constant 0 : index
      %c0_20 = arith.constant 0 : index
      %22 = vector.load %arg6[%c0_18, %c0_19, %c0_20] : memref<1x2x128xf32, #tpu.memory_space<vmem>>, vector<1x2x128xf32>
      %23 = vector.shape_cast %22 : vector<1x2x128xf32> to vector<2x128xf32>
      %24 = vector.shape_cast %21 : vector<2x128xf32> to vector<1x2x128xf32>
      tpu.vector_store %arg6[%c0_18, %c0_19, %c0_20], %24 {strides = array<i32>} : memref<1x2x128xf32, #tpu.memory_space<vmem>>, vector<1x2x128xf32>,
    } else {
    }
    return
  }
  func.func @transform_0(%arg0: i32, %arg1: i32) -> (i32, i32) {
    %c0_i32 = arith.constant 0 : i32
    %c0_i32_0 = arith.constant 0 : i32
    return %c0_i32, %arg1 : i32, i32
  }
  func.func @transform_1(%arg0: i32, %arg1: i32) -> (i32, i32, i32) {
    %c0_i32 = arith.constant 0 : i32
    %c0_i32_0 = arith.constant 0 : i32
    return %arg0, %arg1, %c0_i32 : i32, i32, i32
  }
  func.func @transform_2(%arg0: i32, %arg1: i32) -> (i32, i32) {
    %c0_i32 = arith.constant 0 : i32
    %c0_i32_0 = arith.constant 0 : i32
    return %c0_i32, %arg0 : i32, i32
  }
  func.func @transform_3(%arg0: i32, %arg1: i32) -> (i32, i32) {
    %c0_i32 = arith.constant 0 : i32
    %c0_i32_0 = arith.constant 0 : i32
    return %arg0, %c0_i32 : i32, i32
  }
  func.func @transform_4(%arg0: i32, %arg1: i32) -> (i32, i32, i32) {
    %c0_i32 = arith.constant 0 : i32
    %c0_i32_0 = arith.constant 0 : i32
    %c0_i32_1 = arith.constant 0 : i32
    return %arg0, %c0_i32, %c0_i32_0 : i32, i32, i32
  }
}

</mosaic_0001>

<bundles_post_ra>
// kernel: classifier_layer_forward.1
= control target key start
LH: loop header
LB: loop body
LE: loop exit
PB: predicated region body
PF: predicated region fallthrough
CT: control target
= control target key end

     0   :  { %9 = vsyncpa [#allocation4], 0  ;;  %s24632_s0 = inlined_call_operand.vmem [shape: f32[2,25088], index: 0, kind: input, shape index: {}]   ;;  %s24633_s1 = inlined_call_operand.hbm [shape: bf16[1,25088,512], index: 1, kind: input, shape index: {}]   ;;  %s24634_s2 = inlined_call_operand.hbm [shape: f32[1,512], index: 2, kind: input, shape index: {}]   ;;  %s24635_s3 = inlined_call_operand.hbm [shape: f32[512,128], index: 3, kind: input, shape index: {}]   ;;  %s24636_s4 = inlined_call_operand.vmem [shape: f32[1,2,128], index: 4, kind: output, shape index: {}]  }
   0x1   :  { %11 = vsyncpa [#allocation4 + $0x1], 0 }
   0x2   :  { %12 = vsyncpa [#allocation6], 0  ;;  %s20886_s15 = smov 0   ;;  %s20888_s16 = smov 0  }
   0x3   :  { %s20890_s17 = smov 0   ;;  %s20892_s18 = smov 0  }
   0x4   :  { %s20894_s19 = smov 0   ;;  %s20896_s20 = smov 0  }
   0x5 LB: > { %s12766_s21 = sadd.s32 4294967295, %s20852_s20   ;;  %s65_s22 = sadd.s32 1, %s20840_s17  ;;  %s20852_s20 = sphi %s20896_s20, %s18_s20   ;;  %s20848_s19 = sphi %s20894_s19, %s24739_s19   ;;  %s20844_s18 = sphi %s20892_s18, %s24738_s18   ;;  %s20840_s17 = sphi %s20890_s17, %s24737_s17   ;;  %s20836_s16 = sphi %s20888_s16, %s24736_s16   ;;  %s20832_s15 = sphi %s20886_s15, %s24735_s15  }
   0x6   : > { %p72_p0 = scmp.ne.s32.totalorder %s20840_s17, %s20836_s16  ;;  %p73_p1 = scmp.eq.s32.totalorder %s20852_s20, 0 }
   0x7   : > { %p78_p2 = scmp.ne.s32.totalorder %s20836_s16, %s20832_s15  ;;  %p20920_p3 = scmp.eq.s32.totalorder %s12766_s21, 0 }
   0x8   : > { %p20924_p4 = por %p73_p1, %p72_p0  ;;  %p12767_p5 = scmp.ge.s32.totalorder %s20852_s20, 1 }
   0x9   : > { %p20931_p6 = por %p20920_p3, %p78_p2  ;;  %p167_p7 = scmp.lt.s32.totalorder %s20852_s20, 5 }
   0xa   : > { %s181_s28 = sshll.u32 %s24634_s2, 4  ;;  %s20854_s30 = smov [#allocation5]   ;;  %s182_s28 = int_to_ptr.hbm [resolvable:$true] %s181_s28 }
   0xb   : > { %p20939_p8 = pnand %p12767_p5, %p167_p7  ;;  %s183_s5 = sshll.u32 %s20854_s30, 4  ;;  %s184_s5 = int_to_ptr.vmem [resolvable:$true] %s183_s5 }
   0xc   : > { %p20650_p10 = scmp.lt.s32.totalorder %s20852_s20, 4  ;;  %s195_s8 = sshll.u32 %s24635_s3, 4  ;;  %s196_s8 = int_to_ptr.hbm [resolvable:$true] %s195_s8 }
   0xd   : > { %p20637_p9 = pneg %p20939_p8  ;;  %s20855_s10 = smov [#allocation7]  }
   0xe   : > { %p20953_p12 = pnand %p20650_p10, %p20924_p4  ;;  %s197_s11 = sshll.u32 %s20855_s10, 4  ;;  %s198_s11 = int_to_ptr.vmem [resolvable:$true] %s197_s11 }
   0xf   : > { %p20638_p11 = pnand %p20637_p9, %p20920_p3  ;;  %s20856_s12 = smov 128  }
  0x10   : > { %s20857_s13 = smov 8   ;;  %s220_s14 = sand.u32 1, %s20840_s17  }
  0x11   : > { %20640 = dma.hbm_to_vmem [thread:$0]  (!%p20638_p11), %s182_s28, 64, %s184_s5, [#allocation6]  }
  0x12   : > { %20643 = dma.hbm_to_vmem [thread:$0]  (!%p20638_p11), %s196_s8, 8192, %s198_s11, [#allocation6], %s20856_s12, %s20856_s12, %s20857_s13  }
  0x13   : > { %s27_s15 = sadd.s32 1, %s20848_s19  ;;  %s20625_s21 = smul.u32 12544, %s220_s14 }
  0x14   : > { %p28_p13 = scmp.ge.s32.totalorder %s27_s15, 4  ;;  %s20624_s24 = smul.u32 12544, %s20848_s19 }
  0x15   : > { %s224_s6 = scalar_lea.vmem [#allocation3], %s20625_s21  ;;  %s221_s10 = scalar_lea.sflag [#allocation4], %s220_s14 }
  0x16   : > { %s24741_s15 = smov (%p28_p13, %s27_s15), 0  ;;  %s232_s28 = scalar_lea.hbm %s24633_s1, %s20624_s24 }
  0x17   : > { %s61_s30 = ssub.s32 %s20848_s19, %s24741_s15  ;;  %s233_s5 = sshll.u32 %s232_s28, 4  ;;  %s234_s5 = int_to_ptr.hbm [resolvable:$true] %s233_s5 }
  0x18   : > { %p63_p0 = scmp.eq.s32.totalorder %s61_s30, 0  ;;  %s235_s7 = sshll.u32 %s224_s6, 4  ;;  %s236_s7 = int_to_ptr.vmem [resolvable:$true] %s235_s7 }
  0x19   : > { %s20858_s11 = smov 256   ;;  %s20859_s12 = smov 16  }
  0x1a   : > { %s20970_s8 = scalar_select %p63_p0, %s20840_s17, %s65_s22  }
  0x1b   : > { %20647 = dma.hbm_to_vmem [thread:$0]  (!%p20953_p12), %s234_s5, 200704, %s236_s7, %s221_s10, %s20858_s11, %s20858_s11, %s20859_s12  }
  0x1c   : > { %247 = sbr.rel (%p20939_p8) target bundleno = 1958 (0x7a6), region = 36 }
  0x21   : > { %s249_s13 = sand.u32 1, %s20836_s16  }
  0x22   : > { %s20626_s24 = smul.u32 12544, %s249_s13  ;;  %s250_s26 = scalar_lea.sflag [#allocation4], %s249_s13 }
  0x24   : > { %s20977_s27 = scalar_lea.vmem [#allocation3], %s20626_s24 }
  0x25   : > { %20823 = dma.done.wait (%p20931_p6), %s250_s26, 200704  }
  0x26   : > { %20825 = vsyncadd (%p20931_p6), %s250_s26, 4294766592 }
  0x27   : > { %20827 = dma.done.wait (%p20920_p3), [#allocation6], 8256  }
  0x28   : > { %20829 = vsyncadd (%p20920_p3), [#allocation6], 4294959040  ;;  %s293_s22 = smul.u32 49, %s20844_s18  ;;  %p12777_p2 = scmp.ne.s32.totalorder %s20844_s18, 0 }
  0x2a   : > { %p294_p1 = scmp.lt.s32.totalorder %s293_s22, 195  ;;  %309 = sbr.rel (%p12777_p2) target bundleno = 49 (0x31), region = 52 }
  0x2c   : > { %s24743_s22 = smov (!%p294_p1, %s293_s22), 195 }
  0x2d   : > { %s12776_s29 = sshll.u32 %s24743_s22, 1 }
  0x2e   : > { %s20991_s21 = scalar_lea.vmem %s24632_s0, %s12776_s29 }
  0x2f   : > { %v20860_v0 = vmov 0.0  }
  0x30   : > { %310 = vst [vmem:[#allocation2] sm:$0xff] %v20860_v0 }
  0x31 PF: > { %v12892_v1 = vld [vmem:[%s20977_s27 + $0xe0] sm:$0xf]  ;;  %v19086_v2 = vld [vmem:[%s20977_s27 + $0xec] sm:$0xf0]  ;;  %vm12475_vm0 = vcmask 1041408   ;;  %vm12477_vm1 = vcmask 1045508  }
  0x32   : > { %v13020_v3 = vld [vmem:[%s20977_s27 + $0x1e0] sm:$0xf]  ;;  %v12893_v4 = vor.u32 %v19086_v2, %v12892_v1  ;;  %v19118_v5 = vld [vmem:[%s20977_s27 + $0x1ec] sm:$0xf0]  ;;  %vm12479_vm2 = vcmask 1043456   ;;  %p19050_p3 = scmp.ne.s32.totalorder %s20844_s18, 3 }
  0x33   : > { %v13148_v6 = vld [vmem:[%s20977_s27 + $0x2e0] sm:$0xf]  ;;  %v19150_v7 = vld [vmem:[%s20977_s27 + $0x2ec] sm:$0xf0]  ;;  %v13021_v8 = vor.u32 %v19118_v5, %v13020_v3 }
  0x34   : > { %v13149_v9 = vor.u32 %v19150_v7, %v13148_v6  ;;  %v13276_v10 = vld [vmem:[%s20977_s27 + $0x3e0] sm:$0xf]  ;;  %v19182_v11 = vld [vmem:[%s20977_s27 + $0x3ec] sm:$0xf0]  ;;  %9920 = vmatpush.bf16.msra.mxu0 %v12893_v4 }
  0x35   : > { %v12876_v12 = vld [vmem:[%s20977_s27 + $0xc0] sm:$0xf]  ;;  %v13277_v13 = vor.u32 %v19182_v11, %v13276_v10  ;;  %v19082_v14 = vld [vmem:[%s20977_s27 + $0xcc] sm:$0xf0]  ;;  %9933 = vmatpush.bf16.msra.mxu1 %v13021_v8 }
  0x36   : > { %v13004_v15 = vld [vmem:[%s20977_s27 + $0x1c0] sm:$0xf]  ;;  %v19114_v16 = vld [vmem:[%s20977_s27 + $0x1cc] sm:$0xf0]  ;;  %9946 = vmatpush.bf16.msra.mxu2 %v13149_v9  ;;  %v12877_v17 = vor.u32 %v19082_v14, %v12876_v12 }
  0x37   : > { %v13005_v18 = vor.u32 %v19114_v16, %v13004_v15  ;;  %v13132_v19 = vld [vmem:[%s20977_s27 + $0x2c0] sm:$0xf]  ;;  %v19146_v20 = vld [vmem:[%s20977_s27 + $0x2cc] sm:$0xf0]  ;;  %9959 = vmatpush.bf16.msra.mxu3 %v13277_v13 }
  0x38   : > { %v13260_v21 = vld [vmem:[%s20977_s27 + $0x3c0] sm:$0xf]  ;;  %v13133_v22 = vor.u32 %v19146_v20, %v13132_v19  ;;  %v19178_v23 = vld [vmem:[%s20977_s27 + $0x3cc] sm:$0xf0]  ;;  %9921 = vmatpush.bf16.msra.mxu0 %v12877_v17 }
  0x39   : > { %v12860_v24 = vld [vmem:[%s20977_s27 + $0xa0] sm:$0xf]  ;;  %v19078_v25 = vld [vmem:[%s20977_s27 + $0xac] sm:$0xf0]  ;;  %v13261_v26 = vor.u32 %v19178_v23, %v13260_v21  ;;  %9934 = vmatpush.bf16.msra.mxu1 %v13005_v18 }
  0x3a   : > { %v12988_v27 = vld [vmem:[%s20977_s27 + $0x1a0] sm:$0xf]  ;;  %v19110_v28 = vld [vmem:[%s20977_s27 + $0x1ac] sm:$0xf0]  ;;  %v12861_v30 = vor.u32 %v19078_v25, %v12860_v24  ;;  %9947 = vmatpush.bf16.msra.mxu2 %v13133_v22 }
  0x3b   : > { %v13116_v29 = vld [vmem:[%s20977_s27 + $0x2a0] sm:$0xf]  ;;  %v19142_v31 = vld [vmem:[%s20977_s27 + $0x2ac] sm:$0xf0]  ;;  %v12989_v34 = vor.u32 %v19110_v28, %v12988_v27  ;;  %9960 = vmatpush.bf16.msra.mxu3 %v13261_v26 }
  0x3c   : > { %v13244_v32 = vld [vmem:[%s20977_s27 + $0x3a0] sm:$0xf]  ;;  %v19174_v33 = vld [vmem:[%s20977_s27 + $0x3ac] sm:$0xf0]  ;;  %v13117_v35 = vor.u32 %v19142_v31, %v13116_v29  ;;  %9922 = vmatpush.bf16.msra.mxu0 %v12861_v30 }
  0x3d   : > { %v12844_v36 = vld [vmem:[%s20977_s27 + $0x80] sm:$0xf]  ;;  %v19074_v37 = vld [vmem:[%s20977_s27 + $0x8c] sm:$0xf0]  ;;  %v13245_v39 = vor.u32 %v19174_v33, %v13244_v32  ;;  %9935 = vmatpush.bf16.msra.mxu1 %v12989_v34 }
  0x3e   : > { %v12972_v38 = vld [vmem:[%s20977_s27 + $0x180] sm:$0xf]  ;;  %v19106_v40 = vld [vmem:[%s20977_s27 + $0x18c] sm:$0xf0]  ;;  %v12845_v45 = vor.u32 %v19074_v37, %v12844_v36  ;;  %9948 = vmatpush.bf16.msra.mxu2 %v13117_v35 }
  0x3f   : > { %v13100_v41 = vld [vmem:[%s20977_s27 + $0x280] sm:$0xf]  ;;  %v19138_v42 = vld [vmem:[%s20977_s27 + $0x28c] sm:$0xf0]  ;;  %v12973_v46 = vor.u32 %v19106_v40, %v12972_v38  ;;  %9961 = vmatpush.bf16.msra.mxu3 %v13245_v39 }
  0x40   : > { %v13228_v43 = vld [vmem:[%s20977_s27 + $0x380] sm:$0xf]  ;;  %v19170_v44 = vld [vmem:[%s20977_s27 + $0x38c] sm:$0xf0]  ;;  %v13101_v47 = vor.u32 %v19138_v42, %v13100_v41  ;;  %9923 = vmatpush.bf16.msra.mxu0 %v12845_v45 }
  0x41   : > { %v12828_v48 = vld [vmem:[%s20977_s27 + $0x60] sm:$0xf]  ;;  %v19070_v49 = vld [vmem:[%s20977_s27 + $0x6c] sm:$0xf0]  ;;  %v13229_v51 = vor.u32 %v19170_v44, %v13228_v43  ;;  %9936 = vmatpush.bf16.msra.mxu1 %v12973_v46 }
  0x42   : > { %v12956_v50 = vld [vmem:[%s20977_s27 + $0x160] sm:$0xf]  ;;  %v19102_v52 = vld [vmem:[%s20977_s27 + $0x16c] sm:$0xf0]  ;;  %v12829_v57 = vor.u32 %v19070_v49, %v12828_v48  ;;  %9949 = vmatpush.bf16.msra.mxu2 %v13101_v47 }
  0x43   : > { %v13084_v53 = vld [vmem:[%s20977_s27 + $0x260] sm:$0xf]  ;;  %v19134_v54 = vld [vmem:[%s20977_s27 + $0x26c] sm:$0xf0]  ;;  %v12957_v58 = vor.u32 %v19102_v52, %v12956_v50  ;;  %9962 = vmatpush.bf16.msra.mxu3 %v13229_v51 }
  0x44   : > { %v13212_v55 = vld [vmem:[%s20977_s27 + $0x360] sm:$0xf]  ;;  %v19166_v56 = vld [vmem:[%s20977_s27 + $0x36c] sm:$0xf0]  ;;  %v13085_v59 = vor.u32 %v19134_v54, %v13084_v53  ;;  %9924 = vmatpush.bf16.msra.mxu0 %v12829_v57 }
  0x45   : > { %v12812_v60 = vld [vmem:[%s20977_s27 + $0x40] sm:$0xf]  ;;  %v19066_v61 = vld [vmem:[%s20977_s27 + $0x4c] sm:$0xf0]  ;;  %v13213_v63 = vor.u32 %v19166_v56, %v13212_v55  ;;  %9937 = vmatpush.bf16.msra.mxu1 %v12957_v58 }
  0x46   : > { %v12940_v62 = vld [vmem:[%s20977_s27 + $0x140] sm:$0xf]  ;;  %v19098_v0 = vld [vmem:[%s20977_s27 + $0x14c] sm:$0xf0]  ;;  %v12813_v5 = vor.u32 %v19066_v61, %v12812_v60  ;;  %9950 = vmatpush.bf16.msra.mxu2 %v13085_v59 }
  0x47   : > { %v13068_v1 = vld [vmem:[%s20977_s27 + $0x240] sm:$0xf]  ;;  %v19130_v2 = vld [vmem:[%s20977_s27 + $0x24c] sm:$0xf0]  ;;  %v12941_v6 = vor.u32 %v19098_v0, %v12940_v62  ;;  %9963 = vmatpush.bf16.msra.mxu3 %v13213_v63 }
  0x48   : > { %v13196_v3 = vld [vmem:[%s20977_s27 + $0x340] sm:$0xf]  ;;  %v19162_v4 = vld [vmem:[%s20977_s27 + $0x34c] sm:$0xf0]  ;;  %v13069_v7 = vor.u32 %v19130_v2, %v13068_v1  ;;  %9925 = vmatpush.bf16.msra.mxu0 %v12813_v5 }
  0x49   : > { %v12796_v8 = vld [vmem:[%s20977_s27 + $0x20] sm:$0xf]  ;;  %v19062_v9 = vld [vmem:[%s20977_s27 + $0x2c] sm:$0xf0]  ;;  %v13197_v11 = vor.u32 %v19162_v4, %v13196_v3  ;;  %9938 = vmatpush.bf16.msra.mxu1 %v12941_v6 }
  0x4a   : > { %v12924_v10 = vld [vmem:[%s20977_s27 + $0x120] sm:$0xf]  ;;  %v19094_v12 = vld [vmem:[%s20977_s27 + $0x12c] sm:$0xf0]  ;;  %v12797_v17 = vor.u32 %v19062_v9, %v12796_v8  ;;  %9951 = vmatpush.bf16.msra.mxu2 %v13069_v7 }
  0x4b   : > { %v13052_v13 = vld [vmem:[%s20977_s27 + $0x220] sm:$0xf]  ;;  %v19126_v14 = vld [vmem:[%s20977_s27 + $0x22c] sm:$0xf0]  ;;  %v12925_v20 = vor.u32 %v19094_v12, %v12924_v10  ;;  %9964 = vmatpush.bf16.msra.mxu3 %v13197_v11 }
  0x4c   : > { %v13180_v15 = vld [vmem:[%s20977_s27 + $0x320] sm:$0xf]  ;;  %v19158_v16 = vld [vmem:[%s20977_s27 + $0x32c] sm:$0xf0]  ;;  %v13053_v21 = vor.u32 %v19126_v14, %v13052_v13  ;;  %9926 = vmatpush.bf16.msra.mxu0 %v12797_v17 }
  0x4d   : > { %v12780_v18 = vld [vmem:[%s20977_s27] sm:$0xf]  ;;  %v19058_v19 = vld [vmem:[%s20977_s27 + $0xc] sm:$0xf0]  ;;  %v13181_v25 = vor.u32 %v19158_v16, %v13180_v15  ;;  %9939 = vmatpush.bf16.msra.mxu1 %v12925_v20 }
  0x4e   : > { %v12908_v22 = vld [vmem:[%s20977_s27 + $0x100] sm:$0xf]  ;;  %v19090_v23 = vld [vmem:[%s20977_s27 + $0x10c] sm:$0xf0]  ;;  %v12781_v32 = vor.u32 %v19058_v19, %v12780_v18  ;;  %9952 = vmatpush.bf16.msra.mxu2 %v13053_v21 }
  0x4f   : > { %v13036_v24 = vld [vmem:[%s20977_s27 + $0x200] sm:$0xf]  ;;  %v19122_v26 = vld [vmem:[%s20977_s27 + $0x20c] sm:$0xf0]  ;;  %v12909_v36 = vor.u32 %v19090_v23, %v12908_v22  ;;  %9965 = vmatpush.bf16.msra.mxu3 %v13181_v25 }
  0x50   : > { %v13164_v27 = vld [vmem:[%s20977_s27 + $0x300] sm:$0xf]  ;;  %v19154_v28 = vld [vmem:[%s20977_s27 + $0x30c] sm:$0xf0]  ;;  %v13037_v37 = vor.u32 %v19122_v26, %v13036_v24  ;;  %9927 = vmatpush.bf16.msra.mxu0 %v12781_v32 }
  0x51   : > { %v13404_v29 = vld [vmem:[%s20977_s27 + $0x4e0] sm:$0xf]  ;;  %v19214_v30 = vld [vmem:[%s20977_s27 + $0x4ec] sm:$0xf0]  ;;  %v13165_v40 = vor.u32 %v19154_v28, %v13164_v27  ;;  %9940 = vmatpush.bf16.msra.mxu1 %v12909_v36 }
  0x52   : > { %v13532_v31 = vld [vmem:[%s20977_s27 + $0x5e0] sm:$0xf]  ;;  %v19246_v33 = vld [vmem:[%s20977_s27 + $0x5ec] sm:$0xf0]  ;;  %v13405_v41 = vor.u32 %v19214_v30, %v13404_v29  ;;  %9953 = vmatpush.bf16.msra.mxu2 %v13037_v37 }
  0x53   : > { %v13660_v34 = vld [vmem:[%s20977_s27 + $0x6e0] sm:$0xf]  ;;  %v19278_v35 = vld [vmem:[%s20977_s27 + $0x6ec] sm:$0xf0]  ;;  %v13533_v42 = vor.u32 %v19246_v33, %v13532_v31  ;;  %9966 = vmatpush.bf16.msra.mxu3 %v13165_v40 }
  0x54   : > { %v13788_v38 = vld [vmem:[%s20977_s27 + $0x7e0] sm:$0xf]  ;;  %v19310_v39 = vld [vmem:[%s20977_s27 + $0x7ec] sm:$0xf0]  ;;  %v13661_v43 = vor.u32 %v19278_v35, %v13660_v34  ;;  %9972 = vmatpush.bf16.msrb.mxu0 %v13405_v41 }
  0x55   : > { %v13388_v44 = vld [vmem:[%s20977_s27 + $0x4c0] sm:$0xf]  ;;  %v19210_v45 = vld [vmem:[%s20977_s27 + $0x4cc] sm:$0xf0]  ;;  %v13789_v47 = vor.u32 %v19310_v39, %v13788_v38  ;;  %9985 = vmatpush.bf16.msrb.mxu1 %v13533_v42 }
  0x56   : > { %v13516_v46 = vld [vmem:[%s20977_s27 + $0x5c0] sm:$0xf]  ;;  %v19242_v48 = vld [vmem:[%s20977_s27 + $0x5cc] sm:$0xf0]  ;;  %v13389_v53 = vor.u32 %v19210_v45, %v13388_v44  ;;  %9998 = vmatpush.bf16.msrb.mxu2 %v13661_v43 }
  0x57   : > { %v13644_v49 = vld [vmem:[%s20977_s27 + $0x6c0] sm:$0xf]  ;;  %v19274_v50 = vld [vmem:[%s20977_s27 + $0x6cc] sm:$0xf0]  ;;  %v13517_v56 = vor.u32 %v19242_v48, %v13516_v46  ;;  %10011 = vmatpush.bf16.msrb.mxu3 %v13789_v47 }
  0x58   : > { %v13772_v51 = vld [vmem:[%s20977_s27 + $0x7c0] sm:$0xf]  ;;  %v19306_v52 = vld [vmem:[%s20977_s27 + $0x7cc] sm:$0xf0]  ;;  %v13645_v57 = vor.u32 %v19274_v50, %v13644_v49  ;;  %9973 = vmatpush.bf16.msrb.mxu0 %v13389_v53  ;;  %v312_v49 = vld [vmem:[%s20991_s21 + $0x8] sm:$0xff] }
  0x59   : > { %v13372_v54 = vld [vmem:[%s20977_s27 + $0x4a0] sm:$0xf]  ;;  %v19206_v55 = vld [vmem:[%s20977_s27 + $0x4ac] sm:$0xf0]  ;;  %v13773_v61 = vor.u32 %v19306_v52, %v13772_v51  ;;  %9986 = vmatpush.bf16.msrb.mxu1 %v13517_v56 }
  0x5a   : > { %v13500_v58 = vld [vmem:[%s20977_s27 + $0x5a0] sm:$0xf]  ;;  %v19238_v59 = vld [vmem:[%s20977_s27 + $0x5ac] sm:$0xf0]  ;;  %v13373_v3 = vor.u32 %v19206_v55, %v13372_v54  ;;  %9999 = vmatpush.bf16.msrb.mxu2 %v13645_v57 }
  0x5b   : > { %v311_v60 = vld [vmem:[%s20991_s21] sm:$0xff]  ;;  %v13628_v62 = vld [vmem:[%s20977_s27 + $0x6a0] sm:$0xf]  ;;  %v13501_v5 = vor.u32 %v19238_v59, %v13500_v58  ;;  %10012 = vmatpush.bf16.msrb.mxu3 %v13773_v61  ;;  %v325_v61 = vmax.f32 %v312_v49, 0.0 }
  0x5c   : > { %v19270_v63 = vld [vmem:[%s20977_s27 + $0x6ac] sm:$0xf0]  ;;  %v324_v0 = vmax.f32 %v311_v60, 0.0  ;;  %v13756_v1 = vld [vmem:[%s20977_s27 + $0x7a0] sm:$0xf]  ;;  %9974 = vmatpush.bf16.msrb.mxu0 %v13373_v3 }
  0x5d   : > { %v19302_v2 = vld [vmem:[%s20977_s27 + $0x7ac] sm:$0xf0]  ;;  %v13356_v4 = vld [vmem:[%s20977_s27 + $0x480] sm:$0xf]  ;;  %v13629_v6 = vor.u32 %v19270_v63, %v13628_v62  ;;  %9987 = vmatpush.bf16.msrb.mxu1 %v13501_v5  ;;  %352 = vst [vmem:[#allocation1 + $0x20] ss:$4 sm:$0xff] %v325_v61 }
  0x5e   : > { %350 = vst [vmem:[#allocation1] ss:$4 sm:$0xff] %v324_v0  ;;  %v19202_v7 = vld [vmem:[%s20977_s27 + $0x48c] sm:$0xf0]  ;;  %v13484_v8 = vld [vmem:[%s20977_s27 + $0x580] sm:$0xf]  ;;  %v13757_v10 = vor.u32 %v19302_v2, %v13756_v1 }
  0x5f   : > { %v19234_v9 = vld [vmem:[%s20977_s27 + $0x58c] sm:$0xf0]  ;;  %v13612_v11 = vld [vmem:[%s20977_s27 + $0x680] sm:$0xf]  ;;  %v13357_v16 = vor.u32 %v19202_v7, %v13356_v4  ;;  %10000 = vmatpush.bf16.msrb.mxu2 %v13629_v6 }
  0x60   : > { %v19266_v12 = vld [vmem:[%s20977_s27 + $0x68c] sm:$0xf0]  ;;  %v313_v13 = vld [vmem:[%s20991_s21 + $0x10] sm:$0xff]  ;;  %v13485_v20 = vor.u32 %v19234_v9, %v13484_v8  ;;  %10013 = vmatpush.bf16.msrb.mxu3 %v13757_v10 }
  0x61   : > { %v13740_v14 = vld [vmem:[%s20977_s27 + $0x780] sm:$0xf]  ;;  %v19298_v15 = vld [vmem:[%s20977_s27 + $0x78c] sm:$0xf0]  ;;  %v13613_v21 = vor.u32 %v19266_v12, %v13612_v11  ;;  %v326_v24 = vmax.f32 %v313_v13, 0.0  ;;  %9975 = vmatpush.bf16.msrb.mxu0 %v13357_v16  ;;  %v314_v13 = vld [vmem:[%s20991_s21 + $0x18] sm:$0xff] }
  0x62   : > { %v13340_v17 = vld [vmem:[%s20977_s27 + $0x460] sm:$0xf]  ;;  %v19198_v18 = vld [vmem:[%s20977_s27 + $0x46c] sm:$0xf0]  ;;  %v13741_v25 = vor.u32 %v19298_v15, %v13740_v14  ;;  %9988 = vmatpush.bf16.msrb.mxu1 %v13485_v20 }
  0x63   : > { %v13468_v19 = vld [vmem:[%s20977_s27 + $0x560] sm:$0xf]  ;;  %v19230_v22 = vld [vmem:[%s20977_s27 + $0x56c] sm:$0xf0]  ;;  %v13341_v32 = vor.u32 %v19198_v18, %v13340_v17  ;;  %10001 = vmatpush.bf16.msrb.mxu2 %v13613_v21 }
  0x64   : > { %v13596_v23 = vld [vmem:[%s20977_s27 + $0x660] sm:$0xf]  ;;  %v19262_v26 = vld [vmem:[%s20977_s27 + $0x66c] sm:$0xf0]  ;;  %v13469_v33 = vor.u32 %v19230_v22, %v13468_v19  ;;  %10014 = vmatpush.bf16.msrb.mxu3 %v13741_v25  ;;  %v327_v25 = vmax.f32 %v314_v13, 0.0 }
  0x65   : > { %v13724_v27 = vld [vmem:[%s20977_s27 + $0x760] sm:$0xf]  ;;  %v19294_v28 = vld [vmem:[%s20977_s27 + $0x76c] sm:$0xf0]  ;;  %v13597_v38 = vor.u32 %v19262_v26, %v13596_v23  ;;  %9976 = vmatpush.bf16.msrb.mxu0 %v13341_v32 }
  0x66   : > { %v355_v29 = vld.sshfl [vmem:[#allocation1 + $0x10] sm:$0xff pattern:$0x73625140]  ;;  %v353_v31 = vld.sshfl [vmem:[#allocation1] sm:$0xff pattern:$0x73625140]  ;;  %v13725_v43 = vor.u32 %v19294_v28, %v13724_v27  ;;  %9989 = vmatpush.bf16.msrb.mxu1 %v13469_v33 }
  0x67   : > { %v13324_v30 = vld [vmem:[%s20977_s27 + $0x440] sm:$0xf]  ;;  %v21101_v34 = vpack.c.bf16 %v355_v29, %v355_v29  ;;  %v21103_v35 = vpack.c.bf16 %v353_v31, %v353_v31  ;;  %v356_v36 = vld.sshfl [vmem:[#allocation1 + $0x18] sm:$0xff pattern:$0x73625140]  ;;  %10002 = vmatpush.bf16.msrb.mxu2 %v13597_v38 }
  0x68   : > { %v354_v37 = vld.sshfl [vmem:[#allocation1 + $0x8] sm:$0xff pattern:$0x73625140]  ;;  %v19194_v39 = vld [vmem:[%s20977_s27 + $0x44c] sm:$0xf0]  ;;  %v21107_v41 = vpack.c.bf16 %v356_v36, %v356_v36  ;;  %10015 = vmatpush.bf16.msrb.mxu3 %v13725_v43 }
  0x69   : > { %v13452_v40 = vld [vmem:[%s20977_s27 + $0x540] sm:$0xf]  ;;  %361 = vst [vmem:[#allocation1] ss:$4 sm:$0xff] %v326_v24  ;;  %v21109_v42 = vpack.c.bf16 %v354_v37, %v354_v37  ;;  %9954 = vmatmul.bf16.vlgmr.msra.gmra.mxu2 %v21101_v34  ;;  %v19226_v44 = vld [vmem:[%s20977_s27 + $0x54c] sm:$0xf0]  ;;  %9928 = vmatmul.bf16.vlgmr.msra.gmra.mxu0 %v21103_v35  ;;  %v13325_v50 = vor.u32 %v19194_v39, %v13324_v30 }
  0x6a   : > { %v13580_v45 = vld [vmem:[%s20977_s27 + $0x640] sm:$0xf]  ;;  %v19258_v46 = vld [vmem:[%s20977_s27 + $0x64c] sm:$0xf0]  ;;  %9967 = vmatmul.bf16.vlgmr.msra.gmra.mxu3 %v21107_v41  ;;  %v13453_v53 = vor.u32 %v19226_v44, %v13452_v40 }
  0x6b   : > { %24676 = vst [vmem:[#allocation10_spill] sm:$0xff] %v21109_v42  ;;  %v13708_v47 = vld [vmem:[%s20977_s27 + $0x740] sm:$0xf]  ;;  %v19290_v48 = vld [vmem:[%s20977_s27 + $0x74c] sm:$0xf0]  ;;  %9941 = vmatmul.bf16.vlgmr.msra.gmra.mxu1 %v21109_v42  ;;  %v13581_v54 = vor.u32 %v19258_v46, %v13580_v45  ;;  %9977 = vmatpush.bf16.msrb.mxu0 %v13325_v50 }
  0x6c   : > { %v13308_v51 = vld [vmem:[%s20977_s27 + $0x420] sm:$0xf]  ;;  %v19190_v52 = vld [vmem:[%s20977_s27 + $0x42c] sm:$0xf0]  ;;  %v13709_v58 = vor.u32 %v19290_v48, %v13708_v47  ;;  %9990 = vmatpush.bf16.msrb.mxu1 %v13453_v53 }
  0x6d   : > { %v13436_v55 = vld [vmem:[%s20977_s27 + $0x520] sm:$0xf]  ;;  %v19222_v56 = vld [vmem:[%s20977_s27 + $0x52c] sm:$0xf0]  ;;  %v13309_v1 = vor.u32 %v19190_v52, %v13308_v51  ;;  %10003 = vmatpush.bf16.msrb.mxu2 %v13581_v54 }
  0x6e   : > { %v13564_v57 = vld [vmem:[%s20977_s27 + $0x620] sm:$0xf]  ;;  %v19254_v59 = vld [vmem:[%s20977_s27 + $0x62c] sm:$0xf0]  ;;  %v13437_v5 = vor.u32 %v19222_v56, %v13436_v55  ;;  %10016 = vmatpush.bf16.msrb.mxu3 %v13709_v58 }
  0x6f   : > { %v13692_v60 = vld [vmem:[%s20977_s27 + $0x720] sm:$0xf]  ;;  %v19286_v62 = vld [vmem:[%s20977_s27 + $0x72c] sm:$0xf0]  ;;  %v13565_v6 = vor.u32 %v19254_v59, %v13564_v57  ;;  %9978 = vmatpush.bf16.msrb.mxu0 %v13309_v1 }
  0x70   : > { %v13292_v63 = vld [vmem:[%s20977_s27 + $0x400] sm:$0xf]  ;;  %v19186_v0 = vld [vmem:[%s20977_s27 + $0x40c] sm:$0xf0]  ;;  %v13693_v10 = vor.u32 %v19286_v62, %v13692_v60  ;;  %9991 = vmatpush.bf16.msrb.mxu1 %v13437_v5 }
  0x71   : > { %v13420_v2 = vld [vmem:[%s20977_s27 + $0x500] sm:$0xf]  ;;  %v19218_v3 = vld [vmem:[%s20977_s27 + $0x50c] sm:$0xf0]  ;;  %v13293_v17 = vor.u32 %v19186_v0, %v13292_v63  ;;  %10004 = vmatpush.bf16.msrb.mxu2 %v13565_v6 }
  0x72   : > { %v13548_v4 = vld [vmem:[%s20977_s27 + $0x600] sm:$0xf]  ;;  %v19250_v7 = vld [vmem:[%s20977_s27 + $0x60c] sm:$0xf0]  ;;  %v13421_v21 = vor.u32 %v19218_v3, %v13420_v2  ;;  %10017 = vmatpush.bf16.msrb.mxu3 %v13693_v10 }
  0x73   : > { %v13676_v8 = vld [vmem:[%s20977_s27 + $0x700] sm:$0xf]  ;;  %v19282_v9 = vld [vmem:[%s20977_s27 + $0x70c] sm:$0xf0]  ;;  %v13549_v22 = vor.u32 %v19250_v7, %v13548_v4  ;;  %9979 = vmatpush.bf16.msrb.mxu0 %v13293_v17 }
  0x74   : > { %v13916_v11 = vld [vmem:[%s20977_s27 + $0x8e0] sm:$0xf]  ;;  %v19342_v12 = vld [vmem:[%s20977_s27 + $0x8ec] sm:$0xf0]  ;;  %v13677_v26 = vor.u32 %v19282_v9, %v13676_v8  ;;  %9992 = vmatpush.bf16.msrb.mxu1 %v13421_v21 }
  0x75   : > { %v14044_v14 = vld [vmem:[%s20977_s27 + $0x9e0] sm:$0xf]  ;;  %v19374_v15 = vld [vmem:[%s20977_s27 + $0x9ec] sm:$0xf0]  ;;  %v13917_v27 = vor.u32 %v19342_v12, %v13916_v11  ;;  %10005 = vmatpush.bf16.msrb.mxu2 %v13549_v22 }
  0x76   : > { %v14172_v16 = vld [vmem:[%s20977_s27 + $0xae0] sm:$0xf]  ;;  %v19406_v18 = vld [vmem:[%s20977_s27 + $0xaec] sm:$0xf0]  ;;  %v14045_v32 = vor.u32 %v19374_v15, %v14044_v14  ;;  %10018 = vmatpush.bf16.msrb.mxu3 %v13677_v26 }
  0x77   : > { %v14300_v19 = vld [vmem:[%s20977_s27 + $0xbe0] sm:$0xf]  ;;  %v19438_v20 = vld [vmem:[%s20977_s27 + $0xbec] sm:$0xf0]  ;;  %v14173_v33 = vor.u32 %v19406_v18, %v14172_v16  ;;  %10024 = vmatpush.bf16.msra.mxu0 %v13917_v27 }
  0x78   : > { %v13900_v23 = vld [vmem:[%s20977_s27 + $0x8c0] sm:$0xf]  ;;  %v19338_v24 = vld [vmem:[%s20977_s27 + $0x8cc] sm:$0xf0]  ;;  %v14301_v38 = vor.u32 %v19438_v20, %v14300_v19  ;;  %10037 = vmatpush.bf16.msra.mxu1 %v14045_v32 }
  0x79   : > { %v14028_v28 = vld [vmem:[%s20977_s27 + $0x9c0] sm:$0xf]  ;;  %v19370_v29 = vld [vmem:[%s20977_s27 + $0x9cc] sm:$0xf0]  ;;  %v13901_v48 = vor.u32 %v19338_v24, %v13900_v23  ;;  %10050 = vmatpush.bf16.msra.mxu2 %v14173_v33 }
  0x7a   : > { %v14156_v30 = vld [vmem:[%s20977_s27 + $0xac0] sm:$0xf]  ;;  %v19402_v31 = vld [vmem:[%s20977_s27 + $0xacc] sm:$0xf0]  ;;  %v14029_v50 = vor.u32 %v19370_v29, %v14028_v28  ;;  %10063 = vmatpush.bf16.msra.mxu3 %v14301_v38 }
  0x7b   : > { %v359_v36 = vld.sshfl [vmem:[#allocation1 + $0x30] sm:$0xff pattern:$0x73625140]  ;;  %v357_v37 = vld.sshfl [vmem:[#allocation1 + $0x20] sm:$0xff pattern:$0x73625140]  ;;  %v14157_v51 = vor.u32 %v19402_v31, %v14156_v30  ;;  %10025 = vmatpush.bf16.msra.mxu0 %v13901_v48 }
  0x7c   : > { %v21152_v39 = vpack.c.bf16 %v359_v36, %v359_v36  ;;  %v360_v40 = vld.sshfl [vmem:[#allocation1 + $0x38] sm:$0xff pattern:$0x73625140]  ;;  %v358_v43 = vld.sshfl [vmem:[#allocation1 + $0x28] sm:$0xff pattern:$0x73625140]  ;;  %v21156_v46 = vpack.c.bf16 %v357_v37, %v357_v37  ;;  %10038 = vmatpush.bf16.msra.mxu1 %v14029_v50 }
  0x7d   : > { %v14284_v44 = vld [vmem:[%s20977_s27 + $0xbc0] sm:$0xf]  ;;  %v19434_v45 = vld [vmem:[%s20977_s27 + $0xbcc] sm:$0xf0]  ;;  %v21158_v47 = vpack.c.bf16 %v360_v40, %v360_v40  ;;  %362 = vst [vmem:[#allocation1 + $0x20] ss:$4 sm:$0xff] %v327_v25  ;;  %v21160_v49 = vpack.c.bf16 %v358_v43, %v358_v43  ;;  %10051 = vmatpush.bf16.msra.mxu2 %v14157_v51 }
  0x7e   : > { %v13884_v52 = vld [vmem:[%s20977_s27 + $0x8a0] sm:$0xf]  ;;  %v19334_v53 = vld [vmem:[%s20977_s27 + $0x8ac] sm:$0xf0]  ;;  %v14285_v55 = vor.u32 %v19434_v45, %v14284_v44  ;;  %10006 = vmatmul.bf16.vlgmr.msrb.gmra.mxu2 %v21152_v39  ;;  %9980 = vmatmul.bf16.vlgmr.msrb.gmra.mxu0 %v21156_v46 }
  0x7f   : > { %v14012_v54 = vld [vmem:[%s20977_s27 + $0x9a0] sm:$0xf]  ;;  %v19366_v56 = vld [vmem:[%s20977_s27 + $0x9ac] sm:$0xf0]  ;;  %10019 = vmatmul.bf16.vlgmr.msrb.gmra.mxu3 %v21158_v47  ;;  %v13885_v61 = vor.u32 %v19334_v53, %v13884_v52  ;;  %9993 = vmatmul.bf16.vlgmr.msrb.gmra.mxu1 %v21160_v49 }
  0x80   : > { %v14140_v57 = vld [vmem:[%s20977_s27 + $0xaa0] sm:$0xf]  ;;  %v19398_v58 = vld [vmem:[%s20977_s27 + $0xaac] sm:$0xf0]  ;;  %v14013_v62 = vor.u32 %v19366_v56, %v14012_v54  ;;  %10064 = vmatpush.bf16.msra.mxu3 %v14285_v55 }
  0x81   : > { %v14268_v59 = vld [vmem:[%s20977_s27 + $0xba0] sm:$0xf]  ;;  %v19430_v60 = vld [vmem:[%s20977_s27 + $0xbac] sm:$0xf0]  ;;  %v14141_v63 = vor.u32 %v19398_v58, %v14140_v57  ;;  %10026 = vmatpush.bf16.msra.mxu0 %v13885_v61 }
  0x82   : > { %v13868_v0 = vld [vmem:[%s20977_s27 + $0x880] sm:$0xf]  ;;  %v19330_v1 = vld [vmem:[%s20977_s27 + $0x88c] sm:$0xf0]  ;;  %v14269_v3 = vor.u32 %v19430_v60, %v14268_v59  ;;  %10039 = vmatpush.bf16.msra.mxu1 %v14013_v62 }
  0x83   : > { %v13996_v2 = vld [vmem:[%s20977_s27 + $0x980] sm:$0xf]  ;;  %v19362_v4 = vld [vmem:[%s20977_s27 + $0x98c] sm:$0xf0]  ;;  %v13869_v9 = vor.u32 %v19330_v1, %v13868_v0  ;;  %10052 = vmatpush.bf16.msra.mxu2 %v14141_v63 }
  0x84   : > { %v14124_v5 = vld [vmem:[%s20977_s27 + $0xa80] sm:$0xf]  ;;  %v19394_v6 = vld [vmem:[%s20977_s27 + $0xa8c] sm:$0xf0]  ;;  %v13997_v13 = vor.u32 %v19362_v4, %v13996_v2  ;;  %10065 = vmatpush.bf16.msra.mxu3 %v14269_v3 }
  0x85   : > { %v14252_v7 = vld [vmem:[%s20977_s27 + $0xb80] sm:$0xf]  ;;  %v19426_v8 = vld [vmem:[%s20977_s27 + $0xb8c] sm:$0xf0]  ;;  %v14125_v14 = vor.u32 %v19394_v6, %v14124_v5  ;;  %10027 = vmatpush.bf16.msra.mxu0 %v13869_v9 }
  0x86   : > { %v13852_v10 = vld [vmem:[%s20977_s27 + $0x860] sm:$0xf]  ;;  %v19326_v11 = vld [vmem:[%s20977_s27 + $0x86c] sm:$0xf0]  ;;  %v14253_v18 = vor.u32 %v19426_v8, %v14252_v7  ;;  %10040 = vmatpush.bf16.msra.mxu1 %v13997_v13 }
  0x87   : > { %v13980_v12 = vld [vmem:[%s20977_s27 + $0x960] sm:$0xf]  ;;  %v19358_v15 = vld [vmem:[%s20977_s27 + $0x96c] sm:$0xf0]  ;;  %v13853_v25 = vor.u32 %v19326_v11, %v13852_v10  ;;  %10053 = vmatpush.bf16.msra.mxu2 %v14125_v14 }
  0x88   : > { %v14108_v16 = vld [vmem:[%s20977_s27 + $0xa60] sm:$0xf]  ;;  %v19390_v17 = vld [vmem:[%s20977_s27 + $0xa6c] sm:$0xf0]  ;;  %v13981_v30 = vor.u32 %v19358_v15, %v13980_v12  ;;  %10066 = vmatpush.bf16.msra.mxu3 %v14253_v18 }
  0x89   : > { %v14236_v19 = vld [vmem:[%s20977_s27 + $0xb60] sm:$0xf]  ;;  %v19422_v20 = vld [vmem:[%s20977_s27 + $0xb6c] sm:$0xf0]  ;;  %v14109_v31 = vor.u32 %v19390_v17, %v14108_v16  ;;  %10028 = vmatpush.bf16.msra.mxu0 %v13853_v25 }
  0x8a   : > { %v315_v21 = vld [vmem:[%s20991_s21 + $0x20] sm:$0xff]  ;;  %v13836_v22 = vld [vmem:[%s20977_s27 + $0x840] sm:$0xf]  ;;  %v21199_v32 = vld.sshfl [vmem:[#allocation1 + $0x8] sm:$0xff pattern:$0x73625140]  ;;  %v14237_v36 = vor.u32 %v19422_v20, %v14236_v19  ;;  %10041 = vmatpush.bf16.msra.mxu1 %v13981_v30 }
  0x8b   : > { %v19322_v23 = vld [vmem:[%s20977_s27 + $0x84c] sm:$0xf0]  ;;  %v13964_v26 = vld [vmem:[%s20977_s27 + $0x940] sm:$0xf]  ;;  %v328_v29 = vmax.f32 %v315_v21, 0.0  ;;  %10054 = vmatpush.bf16.msra.mxu2 %v14109_v31 }
  0x8c   : > { %v21193_v24 = vld.sshfl [vmem:[#allocation1] sm:$0xff pattern:$0x73625140]  ;;  %v21197_v28 = vld.sshfl [vmem:[#allocation1 + $0x10] sm:$0xff pattern:$0x73625140]  ;;  %v13837_v44 = vor.u32 %v19322_v23, %v13836_v22  ;;  %10067 = vmatpush.bf16.msra.mxu3 %v14237_v36 }
  0x8d   : > { %v19354_v27 = vld [vmem:[%s20977_s27 + $0x94c] sm:$0xf0]  ;;  %v21201_v33 = vld.sshfl [vmem:[#allocation1 + $0x18] sm:$0xff pattern:$0x73625140]  ;;  %v21243_v36 = vpack.c.bf16 %v21197_v28, %v21197_v28 }
  0x8e   : > { %v14092_v37 = vld [vmem:[%s20977_s27 + $0xa40] sm:$0xf]  ;;  %v19386_v38 = vld [vmem:[%s20977_s27 + $0xa4c] sm:$0xf0]  ;;  %371 = vst [vmem:[#allocation1] ss:$4 sm:$0xff] %v328_v29  ;;  %v13965_v45 = vor.u32 %v19354_v27, %v13964_v26  ;;  %10029 = vmatpush.bf16.msra.mxu0 %v13837_v44  ;;  %v21236_v27 = vpack.c.bf16 %v21193_v24, %v21193_v24 }
  0x8f   : > { %v14220_v40 = vld [vmem:[%s20977_s27 + $0xb40] sm:$0xf]  ;;  %v19418_v43 = vld [vmem:[%s20977_s27 + $0xb4c] sm:$0xf0]  ;;  %v14093_v48 = vor.u32 %v19386_v38, %v14092_v37  ;;  %v21247_v37 = vpack.c.bf16 %v21199_v32, %v21199_v32 }
  0x90   : > { %v13820_v50 = vld [vmem:[%s20977_s27 + $0x820] sm:$0xf]  ;;  %v19318_v51 = vld [vmem:[%s20977_s27 + $0x82c] sm:$0xf0]  ;;  %v14221_v53 = vor.u32 %v19418_v43, %v14220_v40  ;;  %10042 = vmatpush.bf16.msra.mxu1 %v13965_v45  ;;  %v21253_v40 = vpack.c.bf16 %v21201_v33, %v21201_v33 }
  0x91   : > { %v13948_v52 = vld [vmem:[%s20977_s27 + $0x920] sm:$0xf]  ;;  %v19350_v54 = vld [vmem:[%s20977_s27 + $0x92c] sm:$0xf0]  ;;  %v13821_v59 = vor.u32 %v19318_v51, %v13820_v50  ;;  %10055 = vmatpush.bf16.msra.mxu2 %v14093_v48 }
  0x92   : > { %v14076_v55 = vld [vmem:[%s20977_s27 + $0xa20] sm:$0xf]  ;;  %v19382_v56 = vld [vmem:[%s20977_s27 + $0xa2c] sm:$0xf0]  ;;  %v13949_v62 = vor.u32 %v19350_v54, %v13948_v52  ;;  %10068 = vmatpush.bf16.msra.mxu3 %v14221_v53 }
  0x93   : > { %v14204_v57 = vld [vmem:[%s20977_s27 + $0xb20] sm:$0xf]  ;;  %v19414_v58 = vld [vmem:[%s20977_s27 + $0xb2c] sm:$0xf0]  ;;  %v14077_v63 = vor.u32 %v19382_v56, %v14076_v55  ;;  %10030 = vmatpush.bf16.msra.mxu0 %v13821_v59 }
  0x94   : > { %v13804_v60 = vld [vmem:[%s20977_s27 + $0x800] sm:$0xf]  ;;  %v19314_v61 = vld [vmem:[%s20977_s27 + $0x80c] sm:$0xf0]  ;;  %v14205_v3 = vor.u32 %v19414_v58, %v14204_v57  ;;  %10043 = vmatpush.bf16.msra.mxu1 %v13949_v62 }
  0x95   : > { %v13932_v0 = vld [vmem:[%s20977_s27 + $0x900] sm:$0xf]  ;;  %v19346_v1 = vld [vmem:[%s20977_s27 + $0x90c] sm:$0xf0]  ;;  %v13805_v10 = vor.u32 %v19314_v61, %v13804_v60  ;;  %10056 = vmatpush.bf16.msra.mxu2 %v14077_v63 }
  0x96   : > { %v14060_v2 = vld [vmem:[%s20977_s27 + $0xa00] sm:$0xf]  ;;  %v19378_v4 = vld [vmem:[%s20977_s27 + $0xa0c] sm:$0xf0]  ;;  %v13933_v14 = vor.u32 %v19346_v1, %v13932_v0  ;;  %10069 = vmatpush.bf16.msra.mxu3 %v14205_v3 }
  0x97   : > { %v14188_v5 = vld [vmem:[%s20977_s27 + $0xb00] sm:$0xf]  ;;  %v19410_v6 = vld [vmem:[%s20977_s27 + $0xb0c] sm:$0xf0]  ;;  %v14061_v15 = vor.u32 %v19378_v4, %v14060_v2  ;;  %10031 = vmatpush.bf16.msra.mxu0 %v13805_v10  ;;  %v316_v4 = vld [vmem:[%s20991_s21 + $0x28] sm:$0xff] }
  0x98   : > { %v14428_v7 = vld [vmem:[%s20977_s27 + $0xce0] sm:$0xf]  ;;  %v19470_v8 = vld [vmem:[%s20977_s27 + $0xcec] sm:$0xf0]  ;;  %v14189_v18 = vor.u32 %v19410_v6, %v14188_v5  ;;  %10044 = vmatpush.bf16.msra.mxu1 %v13933_v14 }
  0x99   : > { %v14556_v9 = vld [vmem:[%s20977_s27 + $0xde0] sm:$0xf]  ;;  %v19502_v11 = vld [vmem:[%s20977_s27 + $0xdec] sm:$0xf0]  ;;  %v14429_v19 = vor.u32 %v19470_v8, %v14428_v7  ;;  %10057 = vmatpush.bf16.msra.mxu2 %v14061_v15  ;;  %v329_v7 = vmax.f32 %v316_v4, 0.0 }
  0x9a   : > { %v14684_v12 = vld [vmem:[%s20977_s27 + $0xee0] sm:$0xf]  ;;  %v19534_v13 = vld [vmem:[%s20977_s27 + $0xeec] sm:$0xf0]  ;;  %v14557_v20 = vor.u32 %v19502_v11, %v14556_v9  ;;  %10070 = vmatpush.bf16.msra.mxu3 %v14189_v18  ;;  %10032 = vmatmul.bf16.vlgmr.msra.gmra.mxu0 %v21236_v27 }
  0x9b   : > { %v14812_v16 = vld [vmem:[%s20977_s27 + $0xfe0] sm:$0xf]  ;;  %v19566_v17 = vld [vmem:[%s20977_s27 + $0xfec] sm:$0xf0]  ;;  %v14685_v21 = vor.u32 %v19534_v13, %v14684_v12  ;;  %10076 = vmatpush.bf16.msrb.mxu0 %v14429_v19  ;;  %10045 = vmatmul.bf16.vlgmr.msra.gmra.mxu1 %v21247_v37 }
  0x9c   : > { %v14412_v22 = vld [vmem:[%s20977_s27 + $0xcc0] sm:$0xf]  ;;  %v19466_v23 = vld [vmem:[%s20977_s27 + $0xccc] sm:$0xf0]  ;;  %v14813_v26 = vor.u32 %v19566_v17, %v14812_v16  ;;  %10089 = vmatpush.bf16.msrb.mxu1 %v14557_v20  ;;  %10058 = vmatmul.bf16.vlgmr.msra.gmra.mxu2 %v21243_v36 }
  0x9d   : > { %v14540_v25 = vld [vmem:[%s20977_s27 + $0xdc0] sm:$0xf]  ;;  %v19498_v29 = vld [vmem:[%s20977_s27 + $0xdcc] sm:$0xf0]  ;;  %v14413_v43 = vor.u32 %v19466_v23, %v14412_v22  ;;  %10102 = vmatpush.bf16.msrb.mxu2 %v14685_v21  ;;  %10071 = vmatmul.bf16.vlgmr.msra.gmra.mxu3 %v21253_v40 }
  0x9e   : > { %v14668_v30 = vld [vmem:[%s20977_s27 + $0xec0] sm:$0xf]  ;;  %v19530_v31 = vld [vmem:[%s20977_s27 + $0xecc] sm:$0xf0]  ;;  %v14541_v28 = vor.u32 %v19498_v29, %v14540_v25  ;;  %10115 = vmatpush.bf16.msrb.mxu3 %v14813_v26 }
  0x9f   : > { %v14796_v38 = vld [vmem:[%s20977_s27 + $0xfc0] sm:$0xf]  ;;  %v19562_v24 = vld [vmem:[%s20977_s27 + $0xfcc] sm:$0xf0]  ;;  %v14669_v32 = vor.u32 %v19530_v31, %v14668_v30  ;;  %10077 = vmatpush.bf16.msrb.mxu0 %v14413_v43 }
  0xa0   : > { %v14396_v44 = vld [vmem:[%s20977_s27 + $0xca0] sm:$0xf]  ;;  %v19462_v45 = vld [vmem:[%s20977_s27 + $0xcac] sm:$0xf0]  ;;  %v14797_v50 = vor.u32 %v19562_v24, %v14796_v38  ;;  %10090 = vmatpush.bf16.msrb.mxu1 %v14541_v28 }
  0xa1   : > { %v14524_v48 = vld [vmem:[%s20977_s27 + $0xda0] sm:$0xf]  ;;  %v19494_v33 = vld [vmem:[%s20977_s27 + $0xdac] sm:$0xf0]  ;;  %v14397_v56 = vor.u32 %v19462_v45, %v14396_v44  ;;  %10103 = vmatpush.bf16.msrb.mxu2 %v14669_v32 }
  0xa2   : > { %v14652_v51 = vld [vmem:[%s20977_s27 + $0xea0] sm:$0xf]  ;;  %v19526_v52 = vld [vmem:[%s20977_s27 + $0xeac] sm:$0xf0]  ;;  %v14525_v60 = vor.u32 %v19494_v33, %v14524_v48  ;;  %10116 = vmatpush.bf16.msrb.mxu3 %v14797_v50 }
  0xa3   : > { %v14780_v53 = vld [vmem:[%s20977_s27 + $0xfa0] sm:$0xf]  ;;  %v19558_v54 = vld [vmem:[%s20977_s27 + $0xfac] sm:$0xf0]  ;;  %v14653_v61 = vor.u32 %v19526_v52, %v14652_v51  ;;  %10078 = vmatpush.bf16.msrb.mxu0 %v14397_v56 }
  0xa4   : > { %v14380_v55 = vld [vmem:[%s20977_s27 + $0xc80] sm:$0xf]  ;;  %v19458_v57 = vld [vmem:[%s20977_s27 + $0xc8c] sm:$0xf0]  ;;  %v14781_v1 = vor.u32 %v19558_v54, %v14780_v53  ;;  %10091 = vmatpush.bf16.msrb.mxu1 %v14525_v60 }
  0xa5   : > { %v14508_v58 = vld [vmem:[%s20977_s27 + $0xd80] sm:$0xf]  ;;  %v19490_v59 = vld [vmem:[%s20977_s27 + $0xd8c] sm:$0xf0]  ;;  %v14381_v8 = vor.u32 %v19458_v57, %v14380_v55  ;;  %10104 = vmatpush.bf16.msrb.mxu2 %v14653_v61 }
  0xa6   : > { %v14636_v62 = vld [vmem:[%s20977_s27 + $0xe80] sm:$0xf]  ;;  %v19522_v63 = vld [vmem:[%s20977_s27 + $0xe8c] sm:$0xf0]  ;;  %v14509_v11 = vor.u32 %v19490_v59, %v14508_v58  ;;  %10117 = vmatpush.bf16.msrb.mxu3 %v14781_v1 }
  0xa7   : > { %v14764_v0 = vld [vmem:[%s20977_s27 + $0xf80] sm:$0xf]  ;;  %v19554_v2 = vld [vmem:[%s20977_s27 + $0xf8c] sm:$0xf0]  ;;  %v14637_v12 = vor.u32 %v19522_v63, %v14636_v62  ;;  %10079 = vmatpush.bf16.msrb.mxu0 %v14381_v8 }
  0xa8   : > { %v21275_v3 = vld.sshfl [vmem:[#allocation1 + $0x20] sm:$0xff pattern:$0x73625140]  ;;  %v14364_v5 = vld [vmem:[%s20977_s27 + $0xc60] sm:$0xf]  ;;  %v14765_v15 = vor.u32 %v19554_v2, %v14764_v0  ;;  %10092 = vmatpush.bf16.msrb.mxu1 %v14509_v11 }
  0xa9   : > { %v21279_v6 = vld.sshfl [vmem:[#allocation1 + $0x30] sm:$0xff pattern:$0x73625140]  ;;  %v21281_v9 = vld.sshfl [vmem:[#allocation1 + $0x28] sm:$0xff pattern:$0x73625140]  ;;  %10105 = vmatpush.bf16.msrb.mxu2 %v14637_v12 }
  0xaa   : > { %v21283_v10 = vld.sshfl [vmem:[#allocation1 + $0x38] sm:$0xff pattern:$0x73625140]  ;;  %v19454_v13 = vld [vmem:[%s20977_s27 + $0xc6c] sm:$0xf0]  ;;  %10118 = vmatpush.bf16.msrb.mxu3 %v14765_v15 }
  0xab   : > { %v14492_v14 = vld [vmem:[%s20977_s27 + $0xd60] sm:$0xf]  ;;  %372 = vst [vmem:[#allocation1 + $0x20] ss:$4 sm:$0xff] %v329_v7  ;;  %v19486_v16 = vld [vmem:[%s20977_s27 + $0xd6c] sm:$0xf0]  ;;  %v14365_v21 = vor.u32 %v19454_v13, %v14364_v5 }
  0xac   : > { %v14620_v17 = vld [vmem:[%s20977_s27 + $0xe60] sm:$0xf]  ;;  %v19518_v18 = vld [vmem:[%s20977_s27 + $0xe6c] sm:$0xf0]  ;;  %v14493_v22 = vor.u32 %v19486_v16, %v14492_v14 }
  0xad   : > { %v14748_v19 = vld [vmem:[%s20977_s27 + $0xf60] sm:$0xf]  ;;  %v19550_v20 = vld [vmem:[%s20977_s27 + $0xf6c] sm:$0xf0]  ;;  %v14621_v23 = vor.u32 %v19518_v18, %v14620_v17  ;;  %10080 = vmatpush.bf16.msrb.mxu0 %v14365_v21 }
  0xae   : > { %v14348_v25 = vld [vmem:[%s20977_s27 + $0xc40] sm:$0xf]  ;;  %v19450_v26 = vld [vmem:[%s20977_s27 + $0xc4c] sm:$0xf0]  ;;  %v14749_v30 = vor.u32 %v19550_v20, %v14748_v19  ;;  %10093 = vmatpush.bf16.msrb.mxu1 %v14493_v22 }
  0xaf   : > { %v14476_v29 = vld [vmem:[%s20977_s27 + $0xd40] sm:$0xf]  ;;  %v19482_v31 = vld [vmem:[%s20977_s27 + $0xd4c] sm:$0xf0]  ;;  %v14349_v32 = vor.u32 %v19450_v26, %v14348_v25  ;;  %10106 = vmatpush.bf16.msrb.mxu2 %v14621_v23 }
  0xb0   : > { %v14604_v38 = vld [vmem:[%s20977_s27 + $0xe40] sm:$0xf]  ;;  %v19514_v24 = vld [vmem:[%s20977_s27 + $0xe4c] sm:$0xf0]  ;;  %v14477_v44 = vor.u32 %v19482_v31, %v14476_v29  ;;  %10119 = vmatpush.bf16.msrb.mxu3 %v14749_v30  ;;  %v21329_v31 = vpack.c.bf16 %v21275_v3, %v21275_v3 }
  0xb1   : > { %v14732_v43 = vld [vmem:[%s20977_s27 + $0xf40] sm:$0xf]  ;;  %v19546_v28 = vld [vmem:[%s20977_s27 + $0xf4c] sm:$0xf0]  ;;  %v14605_v45 = vor.u32 %v19514_v24, %v14604_v38  ;;  %10081 = vmatpush.bf16.msrb.mxu0 %v14349_v32  ;;  %v21340_v32 = vpack.c.bf16 %v21281_v9, %v21281_v9 }
  0xb2   : > { %v14332_v48 = vld [vmem:[%s20977_s27 + $0xc20] sm:$0xf]  ;;  %v19446_v50 = vld [vmem:[%s20977_s27 + $0xc2c] sm:$0xf0]  ;;  %v14733_v51 = vor.u32 %v19546_v28, %v14732_v43  ;;  %10094 = vmatpush.bf16.msrb.mxu1 %v14477_v44  ;;  %v21336_v28 = vpack.c.bf16 %v21279_v6, %v21279_v6 }
  0xb3   : > { %v14460_v33 = vld [vmem:[%s20977_s27 + $0xd20] sm:$0xf]  ;;  %v19478_v52 = vld [vmem:[%s20977_s27 + $0xd2c] sm:$0xf0]  ;;  %v14333_v57 = vor.u32 %v19446_v50, %v14332_v48  ;;  %10107 = vmatpush.bf16.msrb.mxu2 %v14605_v45  ;;  %v21346_v45 = vpack.c.bf16 %v21283_v10, %v21283_v10 }
  0xb4   : > { %v14588_v53 = vld [vmem:[%s20977_s27 + $0xe20] sm:$0xf]  ;;  %v19510_v54 = vld [vmem:[%s20977_s27 + $0xe2c] sm:$0xf0]  ;;  %v14461_v60 = vor.u32 %v19478_v52, %v14460_v33  ;;  %10120 = vmatpush.bf16.msrb.mxu3 %v14733_v51 }
  0xb5   : > { %v14716_v55 = vld [vmem:[%s20977_s27 + $0xf20] sm:$0xf]  ;;  %v19542_v56 = vld [vmem:[%s20977_s27 + $0xf2c] sm:$0xf0]  ;;  %v14589_v61 = vor.u32 %v19510_v54, %v14588_v53  ;;  %10082 = vmatpush.bf16.msrb.mxu0 %v14333_v57 }
  0xb6   : > { %v14316_v58 = vld [vmem:[%s20977_s27 + $0xc00] sm:$0xf]  ;;  %v19442_v59 = vld [vmem:[%s20977_s27 + $0xc0c] sm:$0xf0]  ;;  %v14717_v1 = vor.u32 %v19542_v56, %v14716_v55  ;;  %10095 = vmatpush.bf16.msrb.mxu1 %v14461_v60 }
  0xb7   : > { %v14444_v62 = vld [vmem:[%s20977_s27 + $0xd00] sm:$0xf]  ;;  %v19474_v63 = vld [vmem:[%s20977_s27 + $0xd0c] sm:$0xf0]  ;;  %v14317_v12 = vor.u32 %v19442_v59, %v14316_v58  ;;  %10108 = vmatpush.bf16.msrb.mxu2 %v14589_v61 }
  0xb8   : > { %v14572_v0 = vld [vmem:[%s20977_s27 + $0xe00] sm:$0xf]  ;;  %v19506_v2 = vld [vmem:[%s20977_s27 + $0xe0c] sm:$0xf0]  ;;  %v14445_v16 = vor.u32 %v19474_v63, %v14444_v62  ;;  %10121 = vmatpush.bf16.msrb.mxu3 %v14717_v1 }
  0xb9   : > { %v14700_v4 = vld [vmem:[%s20977_s27 + $0xf00] sm:$0xf]  ;;  %v19538_v5 = vld [vmem:[%s20977_s27 + $0xf0c] sm:$0xf0]  ;;  %v14573_v17 = vor.u32 %v19506_v2, %v14572_v0  ;;  %10083 = vmatpush.bf16.msrb.mxu0 %v14317_v12 }
  0xba   : > { %v14940_v7 = vld [vmem:[%s20977_s27 + $0x10e0] sm:$0xf]  ;;  %v19598_v8 = vld [vmem:[%s20977_s27 + $0x10ec] sm:$0xf0]  ;;  %v14701_v20 = vor.u32 %v19538_v5, %v14700_v4  ;;  %10096 = vmatpush.bf16.msrb.mxu1 %v14445_v16 }
  0xbb   : > { %v15068_v11 = vld [vmem:[%s20977_s27 + $0x11e0] sm:$0xf]  ;;  %v19630_v13 = vld [vmem:[%s20977_s27 + $0x11ec] sm:$0xf0]  ;;  %v14941_v21 = vor.u32 %v19598_v8, %v14940_v7  ;;  %10109 = vmatpush.bf16.msrb.mxu2 %v14573_v17 }
  0xbc   : > { %v15196_v14 = vld [vmem:[%s20977_s27 + $0x12e0] sm:$0xf]  ;;  %v19662_v15 = vld [vmem:[%s20977_s27 + $0x12ec] sm:$0xf0]  ;;  %v15069_v22 = vor.u32 %v19630_v13, %v15068_v11  ;;  %10122 = vmatpush.bf16.msrb.mxu3 %v14701_v20  ;;  %10084 = vmatmul.bf16.vlgmr.msrb.gmra.mxu0 %v21329_v31 }
  0xbd   : > { %v15324_v18 = vld [vmem:[%s20977_s27 + $0x13e0] sm:$0xf]  ;;  %v19694_v19 = vld [vmem:[%s20977_s27 + $0x13ec] sm:$0xf0]  ;;  %v15197_v23 = vor.u32 %v19662_v15, %v15196_v14  ;;  %10128 = vmatpush.bf16.msra.mxu0 %v14941_v21  ;;  %10097 = vmatmul.bf16.vlgmr.msrb.gmra.mxu1 %v21340_v32 }
  0xbe   : > { %v14924_v25 = vld [vmem:[%s20977_s27 + $0x10c0] sm:$0xf]  ;;  %v19594_v26 = vld [vmem:[%s20977_s27 + $0x10cc] sm:$0xf0]  ;;  %v15325_v30 = vor.u32 %v19694_v19, %v15324_v18  ;;  %10141 = vmatpush.bf16.msra.mxu1 %v15069_v22  ;;  %10110 = vmatmul.bf16.vlgmr.msrb.gmra.mxu2 %v21336_v28 }
  0xbf   : > { %v15052_v29 = vld [vmem:[%s20977_s27 + $0x11c0] sm:$0xf]  ;;  %v19626_v38 = vld [vmem:[%s20977_s27 + $0x11cc] sm:$0xf0]  ;;  %v14925_v48 = vor.u32 %v19594_v26, %v14924_v25  ;;  %10154 = vmatpush.bf16.msra.mxu2 %v15197_v23  ;;  %10123 = vmatmul.bf16.vlgmr.msrb.gmra.mxu3 %v21346_v45 }
  0xc0   : > { %v15180_v24 = vld [vmem:[%s20977_s27 + $0x12c0] sm:$0xf]  ;;  %v19658_v43 = vld [vmem:[%s20977_s27 + $0x12cc] sm:$0xf0]  ;;  %v15053_v6 = vor.u32 %v19626_v38, %v15052_v29  ;;  %10167 = vmatpush.bf16.msra.mxu3 %v15325_v30 }
  0xc1   : > { %v15308_v44 = vld [vmem:[%s20977_s27 + $0x13c0] sm:$0xf]  ;;  %v19690_v3 = vld [vmem:[%s20977_s27 + $0x13cc] sm:$0xf0]  ;;  %v15181_v50 = vor.u32 %v19658_v43, %v15180_v24  ;;  %10129 = vmatpush.bf16.msra.mxu0 %v14925_v48 }
  0xc2   : > { %v14908_v9 = vld [vmem:[%s20977_s27 + $0x10a0] sm:$0xf]  ;;  %v19590_v33 = vld [vmem:[%s20977_s27 + $0x10ac] sm:$0xf0]  ;;  %v15309_v52 = vor.u32 %v19690_v3, %v15308_v44  ;;  %10142 = vmatpush.bf16.msra.mxu1 %v15053_v6 }
  0xc3   : > { %v15036_v51 = vld [vmem:[%s20977_s27 + $0x11a0] sm:$0xf]  ;;  %v19622_v53 = vld [vmem:[%s20977_s27 + $0x11ac] sm:$0xf0]  ;;  %v14909_v57 = vor.u32 %v19590_v33, %v14908_v9  ;;  %10155 = vmatpush.bf16.msra.mxu2 %v15181_v50 }
  0xc4   : > { %v15164_v10 = vld [vmem:[%s20977_s27 + $0x12a0] sm:$0xf]  ;;  %v19654_v54 = vld [vmem:[%s20977_s27 + $0x12ac] sm:$0xf0]  ;;  %v15037_v58 = vor.u32 %v19622_v53, %v15036_v51  ;;  %10168 = vmatpush.bf16.msra.mxu3 %v15309_v52 }
  0xc5   : > { %v15292_v55 = vld [vmem:[%s20977_s27 + $0x13a0] sm:$0xf]  ;;  %v19686_v56 = vld [vmem:[%s20977_s27 + $0x13ac] sm:$0xf0]  ;;  %v15165_v59 = vor.u32 %v19654_v54, %v15164_v10  ;;  %10130 = vmatpush.bf16.msra.mxu0 %v14909_v57 }
  0xc6   : > { %v14892_v60 = vld [vmem:[%s20977_s27 + $0x1080] sm:$0xf]  ;;  %v19586_v61 = vld [vmem:[%s20977_s27 + $0x108c] sm:$0xf0]  ;;  %v15293_v63 = vor.u32 %v19686_v56, %v15292_v55  ;;  %10143 = vmatpush.bf16.msra.mxu1 %v15037_v58 }
  0xc7   : > { %v15020_v62 = vld [vmem:[%s20977_s27 + $0x1180] sm:$0xf]  ;;  %v19618_v0 = vld [vmem:[%s20977_s27 + $0x118c] sm:$0xf0]  ;;  %v14893_v7 = vor.u32 %v19586_v61, %v14892_v60  ;;  %10156 = vmatpush.bf16.msra.mxu2 %v15165_v59 }
  0xc8   : > { %v15148_v1 = vld [vmem:[%s20977_s27 + $0x1280] sm:$0xf]  ;;  %v19650_v2 = vld [vmem:[%s20977_s27 + $0x128c] sm:$0xf0]  ;;  %v15021_v8 = vor.u32 %v19618_v0, %v15020_v62  ;;  %10169 = vmatpush.bf16.msra.mxu3 %v15293_v63 }
  0xc9   : > { %v15276_v4 = vld [vmem:[%s20977_s27 + $0x1380] sm:$0xf]  ;;  %v19682_v5 = vld [vmem:[%s20977_s27 + $0x138c] sm:$0xf0]  ;;  %v15149_v11 = vor.u32 %v19650_v2, %v15148_v1  ;;  %10131 = vmatpush.bf16.msra.mxu0 %v14893_v7 }
  0xca   : > { %v14876_v12 = vld [vmem:[%s20977_s27 + $0x1060] sm:$0xf]  ;;  %v19582_v13 = vld [vmem:[%s20977_s27 + $0x106c] sm:$0xf0]  ;;  %v15277_v15 = vor.u32 %v19682_v5, %v15276_v4  ;;  %10144 = vmatpush.bf16.msra.mxu1 %v15021_v8 }
  0xcb   : > { %v15004_v14 = vld [vmem:[%s20977_s27 + $0x1160] sm:$0xf]  ;;  %v19614_v16 = vld [vmem:[%s20977_s27 + $0x116c] sm:$0xf0]  ;;  %v14877_v21 = vor.u32 %v19582_v13, %v14876_v12  ;;  %10157 = vmatpush.bf16.msra.mxu2 %v15149_v11 }
  0xcc   : > { %v15132_v17 = vld [vmem:[%s20977_s27 + $0x1260] sm:$0xf]  ;;  %v19646_v18 = vld [vmem:[%s20977_s27 + $0x126c] sm:$0xf0]  ;;  %v15005_v22 = vor.u32 %v19614_v16, %v15004_v14  ;;  %10170 = vmatpush.bf16.msra.mxu3 %v15277_v15 }
  0xcd   : > { %v15260_v19 = vld [vmem:[%s20977_s27 + $0x1360] sm:$0xf]  ;;  %v19678_v20 = vld [vmem:[%s20977_s27 + $0x136c] sm:$0xf0]  ;;  %v15133_v23 = vor.u32 %v19646_v18, %v15132_v17  ;;  %10132 = vmatpush.bf16.msra.mxu0 %v14877_v21 }
  0xce   : > { %v14860_v25 = vld [vmem:[%s20977_s27 + $0x1040] sm:$0xf]  ;;  %v19578_v26 = vld [vmem:[%s20977_s27 + $0x104c] sm:$0xf0]  ;;  %v15261_v30 = vor.u32 %v19678_v20, %v15260_v19  ;;  %10145 = vmatpush.bf16.msra.mxu1 %v15005_v22 }
  0xcf   : > { %v14988_v29 = vld [vmem:[%s20977_s27 + $0x1140] sm:$0xf]  ;;  %v19610_v38 = vld [vmem:[%s20977_s27 + $0x114c] sm:$0xf0]  ;;  %v14861_v48 = vor.u32 %v19578_v26, %v14860_v25  ;;  %10158 = vmatpush.bf16.msra.mxu2 %v15133_v23 }
  0xd0   : > { %v15116_v24 = vld [vmem:[%s20977_s27 + $0x1240] sm:$0xf]  ;;  %v19642_v43 = vld [vmem:[%s20977_s27 + $0x124c] sm:$0xf0]  ;;  %v14989_v6 = vor.u32 %v19610_v38, %v14988_v29  ;;  %10171 = vmatpush.bf16.msra.mxu3 %v15261_v30 }
  0xd1   : > { %v15244_v44 = vld [vmem:[%s20977_s27 + $0x1340] sm:$0xf]  ;;  %v19674_v3 = vld [vmem:[%s20977_s27 + $0x134c] sm:$0xf0]  ;;  %v15117_v50 = vor.u32 %v19642_v43, %v15116_v24  ;;  %10133 = vmatpush.bf16.msra.mxu0 %v14861_v48 }
  0xd2   : > { %v14844_v9 = vld [vmem:[%s20977_s27 + $0x1020] sm:$0xf]  ;;  %v19574_v33 = vld [vmem:[%s20977_s27 + $0x102c] sm:$0xf0]  ;;  %v15245_v52 = vor.u32 %v19674_v3, %v15244_v44  ;;  %10146 = vmatpush.bf16.msra.mxu1 %v14989_v6 }
  0xd3   : > { %v14972_v51 = vld [vmem:[%s20977_s27 + $0x1120] sm:$0xf]  ;;  %v19606_v53 = vld [vmem:[%s20977_s27 + $0x112c] sm:$0xf0]  ;;  %v14845_v58 = vor.u32 %v19574_v33, %v14844_v9  ;;  %10159 = vmatpush.bf16.msra.mxu2 %v15117_v50 }
  0xd4   : > { %v15100_v10 = vld [vmem:[%s20977_s27 + $0x1220] sm:$0xf]  ;;  %v19638_v54 = vld [vmem:[%s20977_s27 + $0x122c] sm:$0xf0]  ;;  %v14973_v62 = vor.u32 %v19606_v53, %v14972_v51  ;;  %10172 = vmatpush.bf16.msra.mxu3 %v15245_v52 }
  0xd5   : > { %v15228_v55 = vld [vmem:[%s20977_s27 + $0x1320] sm:$0xf]  ;;  %v19670_v56 = vld [vmem:[%s20977_s27 + $0x132c] sm:$0xf0]  ;;  %v15101_v63 = vor.u32 %v19638_v54, %v15100_v10  ;;  %10134 = vmatpush.bf16.msra.mxu0 %v14845_v58 }
  0xd6   : > { %v14828_v57 = vld [vmem:[%s20977_s27 + $0x1000] sm:$0xf]  ;;  %v19570_v59 = vld [vmem:[%s20977_s27 + $0x100c] sm:$0xf0]  ;;  %v15229_v4 = vor.u32 %v19670_v56, %v15228_v55  ;;  %10147 = vmatpush.bf16.msra.mxu1 %v14973_v62 }
  0xd7   : > { %v14956_v60 = vld [vmem:[%s20977_s27 + $0x1100] sm:$0xf]  ;;  %v19602_v61 = vld [vmem:[%s20977_s27 + $0x110c] sm:$0xf0]  ;;  %v14829_v14 = vor.u32 %v19570_v59, %v14828_v57  ;;  %10160 = vmatpush.bf16.msra.mxu2 %v15101_v63 }
  0xd8   : > { %v15084_v0 = vld [vmem:[%s20977_s27 + $0x1200] sm:$0xf]  ;;  %v19634_v1 = vld [vmem:[%s20977_s27 + $0x120c] sm:$0xf0]  ;;  %v14957_v18 = vor.u32 %v19602_v61, %v14956_v60  ;;  %10173 = vmatpush.bf16.msra.mxu3 %v15229_v4 }
  0xd9   : > { %v15212_v2 = vld [vmem:[%s20977_s27 + $0x1300] sm:$0xf]  ;;  %v19666_v5 = vld [vmem:[%s20977_s27 + $0x130c] sm:$0xf0]  ;;  %v15085_v19 = vor.u32 %v19634_v1, %v15084_v0  ;;  %10135 = vmatpush.bf16.msra.mxu0 %v14829_v14 }
  0xda   : > { %v15452_v7 = vld [vmem:[%s20977_s27 + $0x14e0] sm:$0xf]  ;;  %v19726_v8 = vld [vmem:[%s20977_s27 + $0x14ec] sm:$0xf0]  ;;  %v15213_v22 = vor.u32 %v19666_v5, %v15212_v2  ;;  %10148 = vmatpush.bf16.msra.mxu1 %v14957_v18 }
  0xdb   : > { %v15580_v11 = vld [vmem:[%s20977_s27 + $0x15e0] sm:$0xf]  ;;  %v19758_v12 = vld [vmem:[%s20977_s27 + $0x15ec] sm:$0xf0]  ;;  %v15453_v23 = vor.u32 %v19726_v8, %v15452_v7  ;;  %10161 = vmatpush.bf16.msra.mxu2 %v15085_v19 }
  0xdc   : > { %v15708_v13 = vld [vmem:[%s20977_s27 + $0x16e0] sm:$0xf]  ;;  %v19790_v15 = vld [vmem:[%s20977_s27 + $0x16ec] sm:$0xf0]  ;;  %v15581_v29 = vor.u32 %v19758_v12, %v15580_v11  ;;  %10174 = vmatpush.bf16.msra.mxu3 %v15213_v22 }
  0xdd   : > { %v15836_v16 = vld [vmem:[%s20977_s27 + $0x17e0] sm:$0xf]  ;;  %v19822_v17 = vld [vmem:[%s20977_s27 + $0x17ec] sm:$0xf0]  ;;  %v15709_v30 = vor.u32 %v19790_v15, %v15708_v13  ;;  %10180 = vmatpush.bf16.msrb.mxu0 %v15453_v23 }
  0xde   : > { %v373_v20 = vld.sshfl [vmem:[#allocation1] sm:$0xff pattern:$0x73625140]  ;;  %v375_v21 = vld.sshfl [vmem:[#allocation1 + $0x10] sm:$0xff pattern:$0x73625140]  ;;  %v15837_v44 = vor.u32 %v19822_v17, %v15836_v16  ;;  %10193 = vmatpush.bf16.msrb.mxu1 %v15581_v29 }
  0xdf   : > { %v374_v25 = vld.sshfl [vmem:[#allocation1 + $0x8] sm:$0xff pattern:$0x73625140]  ;;  %v376_v26 = vld.sshfl [vmem:[#allocation1 + $0x18] sm:$0xff pattern:$0x73625140]  ;;  %v21411_v3 = vpack.c.bf16 %v373_v20, %v373_v20  ;;  %v21416_v9 = vpack.c.bf16 %v375_v21, %v375_v21  ;;  %10206 = vmatpush.bf16.msrb.mxu2 %v15709_v30 }
  0xe0   : > { %v15436_v38 = vld [vmem:[%s20977_s27 + $0x14c0] sm:$0xf]  ;;  %v19722_v24 = vld [vmem:[%s20977_s27 + $0x14cc] sm:$0xf0]  ;;  %v21418_v33 = vpack.c.bf16 %v374_v25, %v374_v25  ;;  %v21422_v53 = vpack.c.bf16 %v376_v26, %v376_v26  ;;  %10219 = vmatpush.bf16.msrb.mxu3 %v15837_v44 }
  0xe1   : > { %v15564_v43 = vld [vmem:[%s20977_s27 + $0x15c0] sm:$0xf]  ;;  %v19754_v48 = vld [vmem:[%s20977_s27 + $0x15cc] sm:$0xf0]  ;;  %24677 = vst [vmem:[#allocation11_spill] sm:$0xff] %v21416_v9  ;;  %v15437_v10 = vor.u32 %v19722_v24, %v15436_v38  ;;  %10136 = vmatmul.bf16.vlgmr.msra.gmra.mxu0 %v21411_v3  ;;  %10162 = vmatmul.bf16.vlgmr.msra.gmra.mxu2 %v21416_v9 }
  0xe2   : > { %v15692_v6 = vld [vmem:[%s20977_s27 + $0x16c0] sm:$0xf]  ;;  %v19786_v50 = vld [vmem:[%s20977_s27 + $0x16cc] sm:$0xf0]  ;;  %v15565_v54 = vor.u32 %v19754_v48, %v15564_v43  ;;  %10149 = vmatmul.bf16.vlgmr.msra.gmra.mxu1 %v21418_v33  ;;  %10175 = vmatmul.bf16.vlgmr.msra.gmra.mxu3 %v21422_v53 }
  0xe3   : > { %v15820_v51 = vld [vmem:[%s20977_s27 + $0x17c0] sm:$0xf]  ;;  %v19818_v52 = vld [vmem:[%s20977_s27 + $0x17cc] sm:$0xf0]  ;;  %v15693_v55 = vor.u32 %v19786_v50, %v15692_v6  ;;  %10181 = vmatpush.bf16.msrb.mxu0 %v15437_v10 }
  0xe4   : > { %v15420_v56 = vld [vmem:[%s20977_s27 + $0x14a0] sm:$0xf]  ;;  %v19718_v57 = vld [vmem:[%s20977_s27 + $0x14ac] sm:$0xf0]  ;;  %v15821_v59 = vor.u32 %v19818_v52, %v15820_v51  ;;  %10194 = vmatpush.bf16.msrb.mxu1 %v15565_v54 }
  0xe5   : > { %v15548_v58 = vld [vmem:[%s20977_s27 + $0x15a0] sm:$0xf]  ;;  %v19750_v60 = vld [vmem:[%s20977_s27 + $0x15ac] sm:$0xf0]  ;;  %v15421_v1 = vor.u32 %v19718_v57, %v15420_v56  ;;  %10207 = vmatpush.bf16.msrb.mxu2 %v15693_v55 }
  0xe6   : > { %v15676_v61 = vld [vmem:[%s20977_s27 + $0x16a0] sm:$0xf]  ;;  %v19782_v62 = vld [vmem:[%s20977_s27 + $0x16ac] sm:$0xf0]  ;;  %v15549_v2 = vor.u32 %v19750_v60, %v15548_v58  ;;  %10220 = vmatpush.bf16.msrb.mxu3 %v15821_v59 }
  0xe7   : > { %v15804_v63 = vld [vmem:[%s20977_s27 + $0x17a0] sm:$0xf]  ;;  %v19814_v0 = vld [vmem:[%s20977_s27 + $0x17ac] sm:$0xf0]  ;;  %v15677_v4 = vor.u32 %v19782_v62, %v15676_v61  ;;  %10182 = vmatpush.bf16.msrb.mxu0 %v15421_v1 }
  0xe8   : > { %v15404_v5 = vld [vmem:[%s20977_s27 + $0x1480] sm:$0xf]  ;;  %v19714_v7 = vld [vmem:[%s20977_s27 + $0x148c] sm:$0xf0]  ;;  %v15805_v11 = vor.u32 %v19814_v0, %v15804_v63  ;;  %10195 = vmatpush.bf16.msrb.mxu1 %v15549_v2 }
  0xe9   : > { %v15532_v8 = vld [vmem:[%s20977_s27 + $0x1580] sm:$0xf]  ;;  %v19746_v12 = vld [vmem:[%s20977_s27 + $0x158c] sm:$0xf0]  ;;  %v15405_v17 = vor.u32 %v19714_v7, %v15404_v5  ;;  %10208 = vmatpush.bf16.msrb.mxu2 %v15677_v4 }
  0xea   : > { %v15660_v13 = vld [vmem:[%s20977_s27 + $0x1680] sm:$0xf]  ;;  %v19778_v14 = vld [vmem:[%s20977_s27 + $0x168c] sm:$0xf0]  ;;  %v15533_v18 = vor.u32 %v19746_v12, %v15532_v8  ;;  %10221 = vmatpush.bf16.msrb.mxu3 %v15805_v11 }
  0xeb   : > { %v15788_v15 = vld [vmem:[%s20977_s27 + $0x1780] sm:$0xf]  ;;  %v19810_v16 = vld [vmem:[%s20977_s27 + $0x178c] sm:$0xf0]  ;;  %v15661_v19 = vor.u32 %v19778_v14, %v15660_v13  ;;  %10183 = vmatpush.bf16.msrb.mxu0 %v15405_v17 }
  0xec   : > { %v15388_v20 = vld [vmem:[%s20977_s27 + $0x1460] sm:$0xf]  ;;  %v19710_v21 = vld [vmem:[%s20977_s27 + $0x146c] sm:$0xf0]  ;;  %v15789_v23 = vor.u32 %v19810_v16, %v15788_v15  ;;  %10196 = vmatpush.bf16.msrb.mxu1 %v15533_v18  ;;  %v9929_v16 = vpop.f32.mrf.mxu0 }
  0xed   : > { %v15516_v22 = vld [vmem:[%s20977_s27 + $0x1560] sm:$0xf]  ;;  %v19742_v25 = vld [vmem:[%s20977_s27 + $0x156c] sm:$0xf0]  ;;  %v15389_v24 = vor.u32 %v19710_v21, %v15388_v20  ;;  %10209 = vmatpush.bf16.msrb.mxu2 %v15661_v19 }
  0xee   : > { %v15644_v26 = vld [vmem:[%s20977_s27 + $0x1660] sm:$0xf]  ;;  %v19774_v29 = vld [vmem:[%s20977_s27 + $0x166c] sm:$0xf0]  ;;  %v15517_v43 = vor.u32 %v19742_v25, %v15516_v22  ;;  %10222 = vmatpush.bf16.msrb.mxu3 %v15789_v23  ;;  %v9942_v23 = vpop.f32.mrf.mxu1 }
  0xef   : > { %v15772_v30 = vld [vmem:[%s20977_s27 + $0x1760] sm:$0xf]  ;;  %v19806_v38 = vld [vmem:[%s20977_s27 + $0x176c] sm:$0xf0]  ;;  %v15645_v44 = vor.u32 %v19774_v29, %v15644_v26  ;;  %10184 = vmatpush.bf16.msrb.mxu0 %v15389_v24 }
  0xf0   : > { %v15372_v48 = vld [vmem:[%s20977_s27 + $0x1440] sm:$0xf]  ;;  %v19706_v6 = vld [vmem:[%s20977_s27 + $0x144c] sm:$0xf0]  ;;  %v15773_v51 = vor.u32 %v19806_v38, %v15772_v30  ;;  %10197 = vmatpush.bf16.msrb.mxu1 %v15517_v43  ;;  %v9943_v38 = vadd.f32 %v9942_v23, %v9929_v16 }
  0xf1   : > { %v15500_v50 = vld [vmem:[%s20977_s27 + $0x1540] sm:$0xf]  ;;  %v19738_v52 = vld [vmem:[%s20977_s27 + $0x154c] sm:$0xf0]  ;;  %v15373_v57 = vor.u32 %v19706_v6, %v15372_v48  ;;  %10210 = vmatpush.bf16.msrb.mxu2 %v15645_v44 }
  0xf2   : > { %v15628_v10 = vld [vmem:[%s20977_s27 + $0x1640] sm:$0xf]  ;;  %v19770_v54 = vld [vmem:[%s20977_s27 + $0x164c] sm:$0xf0]  ;;  %v15501_v60 = vor.u32 %v19738_v52, %v15500_v50  ;;  %10223 = vmatpush.bf16.msrb.mxu3 %v15773_v51 }
  0xf3   : > { %v15756_v55 = vld [vmem:[%s20977_s27 + $0x1740] sm:$0xf]  ;;  %v19802_v56 = vld [vmem:[%s20977_s27 + $0x174c] sm:$0xf0]  ;;  %v15629_v61 = vor.u32 %v19770_v54, %v15628_v10  ;;  %10185 = vmatpush.bf16.msrb.mxu0 %v15373_v57 }
  0xf4   : > { %v15356_v58 = vld [vmem:[%s20977_s27 + $0x1420] sm:$0xf]  ;;  %v19702_v59 = vld [vmem:[%s20977_s27 + $0x142c] sm:$0xf0]  ;;  %v15757_v1 = vor.u32 %v19802_v56, %v15756_v55  ;;  %10198 = vmatpush.bf16.msrb.mxu1 %v15501_v60  ;;  %v9955_v55 = vpop.f32.mrf.mxu2 }
  0xf5   : > { %v15484_v62 = vld [vmem:[%s20977_s27 + $0x1520] sm:$0xf]  ;;  %v19734_v63 = vld [vmem:[%s20977_s27 + $0x152c] sm:$0xf0]  ;;  %v15357_v12 = vor.u32 %v19702_v59, %v15356_v58  ;;  %10211 = vmatpush.bf16.msrb.mxu2 %v15629_v61  ;;  %v9956_v60 = vadd.f32 %v9955_v55, %v9943_v38  ;;  %v9968_v61 = vpop.f32.mrf.mxu3 }
  0xf6   : > { %v15612_v0 = vld [vmem:[%s20977_s27 + $0x1620] sm:$0xf]  ;;  %v19766_v2 = vld [vmem:[%s20977_s27 + $0x162c] sm:$0xf0]  ;;  %v15485_v18 = vor.u32 %v19734_v63, %v15484_v62  ;;  %10224 = vmatpush.bf16.msrb.mxu3 %v15757_v1 }
  0xf7   : > { %v15740_v4 = vld [vmem:[%s20977_s27 + $0x1720] sm:$0xf]  ;;  %v19798_v5 = vld [vmem:[%s20977_s27 + $0x172c] sm:$0xf0]  ;;  %v15613_v19 = vor.u32 %v19766_v2, %v15612_v0  ;;  %10186 = vmatpush.bf16.msrb.mxu0 %v15357_v12  ;;  %v9969_v12 = vadd.f32 %v9968_v61, %v9956_v60 }
  0xf8   : > { %v15340_v7 = vld [vmem:[%s20977_s27 + $0x1400] sm:$0xf]  ;;  %v19698_v8 = vld [vmem:[%s20977_s27 + $0x140c] sm:$0xf0]  ;;  %v15741_v25 = vor.u32 %v19798_v5, %v15740_v4  ;;  %10199 = vmatpush.bf16.msrb.mxu1 %v15485_v18  ;;  %v9944_v18 = vpop.f32.mrf.mxu1 }
  0xf9   : > { %v317_v11 = vld [vmem:[%s20991_s21 + $0x30] sm:$0xff]  ;;  %v19730_v14 = vld [vmem:[%s20977_s27 + $0x150c] sm:$0xf0]  ;;  %v15341_v44 = vor.u32 %v19698_v8, %v15340_v7  ;;  %10212 = vmatpush.bf16.msrb.mxu2 %v15613_v19  ;;  %v378_v58 = vld.sshfl [vmem:[#allocation1 + $0x28] sm:$0xff pattern:$0x73625140] }
  0xfa   : > { %v15468_v13 = vld [vmem:[%s20977_s27 + $0x1500] sm:$0xf]  ;;  %v330_v17 = vmax.f32 %v317_v11, 0.0  ;;  %v19762_v20 = vld [vmem:[%s20977_s27 + $0x160c] sm:$0xf0]  ;;  %10225 = vmatpush.bf16.msrb.mxu3 %v15741_v25 }
  0xfb   : > { %v15596_v15 = vld [vmem:[%s20977_s27 + $0x1600] sm:$0xf]  ;;  %v19794_v22 = vld [vmem:[%s20977_s27 + $0x170c] sm:$0xf0]  ;;  %v15469_v51 = vor.u32 %v19730_v14, %v15468_v13  ;;  %10187 = vmatpush.bf16.msrb.mxu0 %v15341_v44  ;;  %v9931_v13 = vpop.f32.mrf.mxu0 }
  0xfc   : > { %v15724_v21 = vld [vmem:[%s20977_s27 + $0x1700] sm:$0xf]  ;;  %v19854_v29 = vld [vmem:[%s20977_s27 + $0x18ec] sm:$0xf0]  ;;  %381 = vst [vmem:[#allocation1] ss:$4 sm:$0xff] %v330_v17  ;;  %v15597_v52 = vor.u32 %v19762_v20, %v15596_v15  ;;  %v21495_v15 = vpack.c.bf16 %v378_v58, %v378_v58 }
  0xfd   : > { %v15964_v26 = vld [vmem:[%s20977_s27 + $0x18e0] sm:$0xf]  ;;  %v19886_v24 = vld [vmem:[%s20977_s27 + $0x19ec] sm:$0xf0]  ;;  %v15725_v56 = vor.u32 %v19794_v22, %v15724_v21  ;;  %10200 = vmatpush.bf16.msrb.mxu1 %v15469_v51 }
  0xfe   : > { %v16092_v30 = vld [vmem:[%s20977_s27 + $0x19e0] sm:$0xf]  ;;  %v19918_v48 = vld [vmem:[%s20977_s27 + $0x1aec] sm:$0xf0]  ;;  %v15965_v57 = vor.u32 %v19854_v29, %v15964_v26  ;;  %10213 = vmatpush.bf16.msrb.mxu2 %v15597_v52 }
  0xff   : > { %v16220_v43 = vld [vmem:[%s20977_s27 + $0x1ae0] sm:$0xf]  ;;  %v19950_v50 = vld [vmem:[%s20977_s27 + $0x1bec] sm:$0xf0]  ;;  %v16093_v62 = vor.u32 %v19886_v24, %v16092_v30  ;;  %10226 = vmatpush.bf16.msrb.mxu3 %v15725_v56 }
 0x100   : > { %v16348_v6 = vld [vmem:[%s20977_s27 + $0x1be0] sm:$0xf]  ;;  %v377_v10 = vld.sshfl [vmem:[#allocation1 + $0x20] sm:$0xff pattern:$0x73625140]  ;;  %v16221_v63 = vor.u32 %v19918_v48, %v16220_v43  ;;  %10232 = vmatpush.bf16.msra.mxu0 %v15965_v57  ;;  %10201 = vmatmul.bf16.vlgmr.msrb.gmra.mxu1 %v21495_v15  ;;  %v9957_v48 = vpop.f32.mrf.mxu2 }
 0x101   : > { %v379_v54 = vld.sshfl [vmem:[#allocation1 + $0x30] sm:$0xff pattern:$0x73625140]  ;;  %v380_v59 = vld.sshfl [vmem:[#allocation1 + $0x38] sm:$0xff pattern:$0x73625140]  ;;  %v16349_v4 = vor.u32 %v19950_v50, %v16348_v6  ;;  %v21488_v5 = vpack.c.bf16 %v377_v10, %v377_v10  ;;  %10245 = vmatpush.bf16.msra.mxu1 %v16093_v62  ;;  %v9970_v50 = vpop.f32.mrf.mxu3 }
 0x102   : > { %v15948_v0 = vld [vmem:[%s20977_s27 + $0x18c0] sm:$0xf]  ;;  %v19850_v1 = vld [vmem:[%s20977_s27 + $0x18cc] sm:$0xf0]  ;;  %v21493_v14 = vpack.c.bf16 %v379_v54, %v379_v54  ;;  %v21499_v19 = vpack.c.bf16 %v380_v59, %v380_v59  ;;  %10258 = vmatpush.bf16.msra.mxu2 %v16221_v63 }
 0x103   : > { %v16076_v2 = vld [vmem:[%s20977_s27 + $0x19c0] sm:$0xf]  ;;  %v19882_v7 = vld [vmem:[%s20977_s27 + $0x19cc] sm:$0xf0]  ;;  %v15949_v20 = vor.u32 %v19850_v1, %v15948_v0  ;;  %10271 = vmatpush.bf16.msra.mxu3 %v16349_v4  ;;  %10188 = vmatmul.bf16.vlgmr.msrb.gmra.mxu0 %v21488_v5  ;;  %v9981_v63 = vpop.f32.mrf.mxu0 }
 0x104   : > { %v16204_v8 = vld [vmem:[%s20977_s27 + $0x1ac0] sm:$0xf]  ;;  %v19914_v11 = vld [vmem:[%s20977_s27 + $0x1acc] sm:$0xf0]  ;;  %v16077_v21 = vor.u32 %v19882_v7, %v16076_v2  ;;  %10214 = vmatmul.bf16.vlgmr.msrb.gmra.mxu2 %v21493_v14  ;;  %10227 = vmatmul.bf16.vlgmr.msrb.gmra.mxu3 %v21499_v19 }
 0x105   : > { %v16332_v16 = vld [vmem:[%s20977_s27 + $0x1bc0] sm:$0xf]  ;;  %v19946_v17 = vld [vmem:[%s20977_s27 + $0x1bcc] sm:$0xf0]  ;;  %v16205_v22 = vor.u32 %v19914_v11, %v16204_v8  ;;  %10233 = vmatpush.bf16.msra.mxu0 %v15949_v20  ;;  %v9982_v8 = vadd.f32 %v9981_v63, %v9969_v12  ;;  %v9994_v11 = vpop.f32.mrf.mxu1 }
 0x106   : > { %v15932_v23 = vld [vmem:[%s20977_s27 + $0x18a0] sm:$0xf]  ;;  %v19846_v25 = vld [vmem:[%s20977_s27 + $0x18ac] sm:$0xf0]  ;;  %v16333_v29 = vor.u32 %v19946_v17, %v16332_v16  ;;  %10246 = vmatpush.bf16.msra.mxu1 %v16077_v21 }
 0x107   : > { %v16060_v26 = vld [vmem:[%s20977_s27 + $0x19a0] sm:$0xf]  ;;  %v19878_v30 = vld [vmem:[%s20977_s27 + $0x19ac] sm:$0xf0]  ;;  %v15933_v6 = vor.u32 %v19846_v25, %v15932_v23  ;;  %10259 = vmatpush.bf16.msra.mxu2 %v16205_v22  ;;  %v9995_v22 = vadd.f32 %v9994_v11, %v9982_v8  ;;  %v318_v11 = vld [vmem:[%s20991_s21 + $0x38] sm:$0xff] }
 0x108   : > { %v16188_v38 = vld [vmem:[%s20977_s27 + $0x1aa0] sm:$0xf]  ;;  %v19910_v24 = vld [vmem:[%s20977_s27 + $0x1aac] sm:$0xf0]  ;;  %v16061_v51 = vor.u32 %v19878_v30, %v16060_v26  ;;  %10272 = vmatpush.bf16.msra.mxu3 %v16333_v29 }
 0x109   : > { %v16316_v43 = vld [vmem:[%s20977_s27 + $0x1ba0] sm:$0xf]  ;;  %v19942_v44 = vld [vmem:[%s20977_s27 + $0x1bac] sm:$0xf0]  ;;  %v16189_v52 = vor.u32 %v19910_v24, %v16188_v38  ;;  %10234 = vmatpush.bf16.msra.mxu0 %v15933_v6  ;;  %v10007_v38 = vpop.f32.mrf.mxu2  ;;  %v10020_v50 = vpop.f32.mrf.mxu3 }
 0x10a   : > { %v15916_v10 = vld [vmem:[%s20977_s27 + $0x1880] sm:$0xf]  ;;  %v19842_v54 = vld [vmem:[%s20977_s27 + $0x188c] sm:$0xf0]  ;;  %v16317_v56 = vor.u32 %v19942_v44, %v16316_v43  ;;  %10247 = vmatpush.bf16.msra.mxu1 %v16061_v51  ;;  %v10008_v6 = vadd.f32 %v10007_v38, %v9995_v22 }
 0x10b   : > { %v16044_v55 = vld [vmem:[%s20977_s27 + $0x1980] sm:$0xf]  ;;  %v19874_v57 = vld [vmem:[%s20977_s27 + $0x198c] sm:$0xf0]  ;;  %v15917_v62 = vor.u32 %v19842_v54, %v15916_v10  ;;  %10260 = vmatpush.bf16.msra.mxu2 %v16189_v52 }
 0x10c   : > { %v16172_v58 = vld [vmem:[%s20977_s27 + $0x1a80] sm:$0xf]  ;;  %v19906_v59 = vld [vmem:[%s20977_s27 + $0x1a8c] sm:$0xf0]  ;;  %v16045_v0 = vor.u32 %v19874_v57, %v16044_v55  ;;  %10273 = vmatpush.bf16.msra.mxu3 %v16317_v56  ;;  %v21537_v54 = vadd.f32 %v10020_v50, %v10008_v6  ;;  %v9983_v57 = vpop.f32.mrf.mxu0 }
 0x10d   : > { %v16300_v60 = vld [vmem:[%s20977_s27 + $0x1b80] sm:$0xf]  ;;  %v19938_v61 = vld [vmem:[%s20977_s27 + $0x1b8c] sm:$0xf0]  ;;  %v16173_v1 = vor.u32 %v19906_v59, %v16172_v58  ;;  %10235 = vmatpush.bf16.msra.mxu0 %v15917_v62  ;;  %v9996_v63 = vpop.f32.mrf.mxu1 }
 0x10e   : > { %v15900_v2 = vld [vmem:[%s20977_s27 + $0x1860] sm:$0xf]  ;;  %v19838_v4 = vld [vmem:[%s20977_s27 + $0x186c] sm:$0xf0]  ;;  %v16301_v13 = vor.u32 %v19938_v61, %v16300_v60  ;;  %10248 = vmatpush.bf16.msra.mxu1 %v16045_v0 }
 0x10f   : > { %v16028_v7 = vld [vmem:[%s20977_s27 + $0x1960] sm:$0xf]  ;;  %v19870_v16 = vld [vmem:[%s20977_s27 + $0x196c] sm:$0xf0]  ;;  %v15901_v23 = vor.u32 %v19838_v4, %v15900_v2  ;;  %10261 = vmatpush.bf16.msra.mxu2 %v16173_v1 }
 0x110   : > { %v16156_v17 = vld [vmem:[%s20977_s27 + $0x1a60] sm:$0xf]  ;;  %v19902_v18 = vld [vmem:[%s20977_s27 + $0x1a6c] sm:$0xf0]  ;;  %v16029_v12 = vor.u32 %v19870_v16, %v16028_v7  ;;  %10274 = vmatpush.bf16.msra.mxu3 %v16301_v13 }
 0x111   : > { %v16284_v20 = vld [vmem:[%s20977_s27 + $0x1b60] sm:$0xf]  ;;  %v19934_v21 = vld [vmem:[%s20977_s27 + $0x1b6c] sm:$0xf0]  ;;  %v16157_v25 = vor.u32 %v19902_v18, %v16156_v17  ;;  %10236 = vmatpush.bf16.msra.mxu0 %v15901_v23 }
 0x112   : > { %v15884_v26 = vld [vmem:[%s20977_s27 + $0x1840] sm:$0xf]  ;;  %v19834_v29 = vld [vmem:[%s20977_s27 + $0x184c] sm:$0xf0]  ;;  %v16285_v24 = vor.u32 %v19934_v21, %v16284_v20  ;;  %10249 = vmatpush.bf16.msra.mxu1 %v16029_v12  ;;  %v331_v20 = vmax.f32 %v318_v11, 0.0 }
 0x113   : > { %v16012_v30 = vld [vmem:[%s20977_s27 + $0x1940] sm:$0xf]  ;;  %v19866_v43 = vld [vmem:[%s20977_s27 + $0x194c] sm:$0xf0]  ;;  %v15885_v10 = vor.u32 %v19834_v29, %v15884_v26  ;;  %10262 = vmatpush.bf16.msra.mxu2 %v16157_v25  ;;  %v10009_v26 = vpop.f32.mrf.mxu2 }
 0x114   : > { %v16140_v44 = vld [vmem:[%s20977_s27 + $0x1a40] sm:$0xf]  ;;  %v19898_v48 = vld [vmem:[%s20977_s27 + $0x1a4c] sm:$0xf0]  ;;  %v16013_v58 = vor.u32 %v19866_v43, %v16012_v30  ;;  %10275 = vmatpush.bf16.msra.mxu3 %v16285_v24  ;;  %v10022_v43 = vpop.f32.mrf.mxu3  ;;  %382 = vst [vmem:[#allocation1 + $0x20] ss:$4 sm:$0xff] %v331_v20 }
 0x115   : > { %v16268_v51 = vld [vmem:[%s20977_s27 + $0x1b40] sm:$0xf]  ;;  %v19930_v52 = vld [vmem:[%s20977_s27 + $0x1b4c] sm:$0xf0]  ;;  %v16141_v59 = vor.u32 %v19898_v48, %v16140_v44  ;;  %10237 = vmatpush.bf16.msra.mxu0 %v15885_v10 }
 0x116   : > { %v15868_v55 = vld [vmem:[%s20977_s27 + $0x1820] sm:$0xf]  ;;  %v19830_v56 = vld [vmem:[%s20977_s27 + $0x182c] sm:$0xf0]  ;;  %v16269_v0 = vor.u32 %v19930_v52, %v16268_v51  ;;  %10250 = vmatpush.bf16.msra.mxu1 %v16013_v58 }
 0x117   : > { %v15996_v60 = vld [vmem:[%s20977_s27 + $0x1920] sm:$0xf]  ;;  %v19862_v61 = vld [vmem:[%s20977_s27 + $0x192c] sm:$0xf0]  ;;  %v15869_v13 = vor.u32 %v19830_v56, %v15868_v55  ;;  %10263 = vmatpush.bf16.msra.mxu2 %v16141_v59 }
 0x118   : > { %v16124_v62 = vld [vmem:[%s20977_s27 + $0x1a20] sm:$0xf]  ;;  %v19894_v1 = vld [vmem:[%s20977_s27 + $0x1a2c] sm:$0xf0]  ;;  %v15997_v21 = vor.u32 %v19862_v61, %v15996_v60  ;;  %10276 = vmatpush.bf16.msra.mxu3 %v16269_v0 }
 0x119   : > { %v16252_v2 = vld [vmem:[%s20977_s27 + $0x1b20] sm:$0xf]  ;;  %v19926_v4 = vld [vmem:[%s20977_s27 + $0x1b2c] sm:$0xf0]  ;;  %v16125_v22 = vor.u32 %v19894_v1, %v16124_v62  ;;  %10238 = vmatpush.bf16.msra.mxu0 %v15869_v13 }
 0x11a   : > { %v15852_v7 = vld [vmem:[%s20977_s27 + $0x1800] sm:$0xf]  ;;  %v19826_v8 = vld [vmem:[%s20977_s27 + $0x180c] sm:$0xf0]  ;;  %v16253_v29 = vor.u32 %v19926_v4, %v16252_v2  ;;  %10251 = vmatpush.bf16.msra.mxu1 %v15997_v21 }
 0x11b   : > { %v15980_v16 = vld [vmem:[%s20977_s27 + $0x1900] sm:$0xf]  ;;  %v19858_v17 = vld [vmem:[%s20977_s27 + $0x190c] sm:$0xf0]  ;;  %v15853_v6 = vor.u32 %v19826_v8, %v15852_v7  ;;  %10264 = vmatpush.bf16.msra.mxu2 %v16125_v22 }
 0x11c   : > { %v16108_v18 = vld [vmem:[%s20977_s27 + $0x1a00] sm:$0xf]  ;;  %v19890_v23 = vld [vmem:[%s20977_s27 + $0x1a0c] sm:$0xf0]  ;;  %v15981_v10 = vor.u32 %v19858_v17, %v15980_v16  ;;  %10277 = vmatpush.bf16.msra.mxu3 %v16253_v29 }
 0x11d   : > { %v16236_v12 = vld [vmem:[%s20977_s27 + $0x1b00] sm:$0xf]  ;;  %v19922_v25 = vld [vmem:[%s20977_s27 + $0x1b0c] sm:$0xf0]  ;;  %v16109_v55 = vor.u32 %v19890_v23, %v16108_v18  ;;  %10239 = vmatpush.bf16.msra.mxu0 %v15853_v6 }
 0x11e   : > { %v16476_v30 = vld [vmem:[%s20977_s27 + $0x1ce0] sm:$0xf]  ;;  %v19982_v38 = vld [vmem:[%s20977_s27 + $0x1cec] sm:$0xf0]  ;;  %v16237_v58 = vor.u32 %v19922_v25, %v16236_v12  ;;  %10252 = vmatpush.bf16.msra.mxu1 %v15981_v10 }
 0x11f   : > { %v16604_v24 = vld [vmem:[%s20977_s27 + $0x1de0] sm:$0xf]  ;;  %v20014_v44 = vld [vmem:[%s20977_s27 + $0x1dec] sm:$0xf0]  ;;  %v16477_v59 = vor.u32 %v19982_v38, %v16476_v30  ;;  %10265 = vmatpush.bf16.msra.mxu2 %v16109_v55 }
 0x120   : > { %v16732_v48 = vld [vmem:[%s20977_s27 + $0x1ee0] sm:$0xf]  ;;  %v20046_v50 = vld [vmem:[%s20977_s27 + $0x1eec] sm:$0xf0]  ;;  %v16605_v62 = vor.u32 %v20014_v44, %v16604_v24  ;;  %10278 = vmatpush.bf16.msra.mxu3 %v16237_v58 }
 0x121   : > { %v16860_v51 = vld [vmem:[%s20977_s27 + $0x1fe0] sm:$0xf]  ;;  %v20078_v52 = vld [vmem:[%s20977_s27 + $0x1fec] sm:$0xf0]  ;;  %v16733_v63 = vor.u32 %v20046_v50, %v16732_v48  ;;  %10284 = vmatpush.bf16.msrb.mxu0 %v16477_v59 }
 0x122   : > { %v383_v56 = vld.sshfl [vmem:[#allocation1] sm:$0xff pattern:$0x73625140]  ;;  %v385_v57 = vld.sshfl [vmem:[#allocation1 + $0x10] sm:$0xff pattern:$0x73625140]  ;;  %v16861_v4 = vor.u32 %v20078_v52, %v16860_v51  ;;  %10297 = vmatpush.bf16.msrb.mxu1 %v16605_v62 }
 0x123   : > { %v384_v60 = vld.sshfl [vmem:[#allocation1 + $0x8] sm:$0xff pattern:$0x73625140]  ;;  %v386_v61 = vld.sshfl [vmem:[#allocation1 + $0x18] sm:$0xff pattern:$0x73625140]  ;;  %v21567_v7 = vpack.c.bf16 %v383_v56, %v383_v56  ;;  %v21572_v16 = vpack.c.bf16 %v385_v57, %v385_v57  ;;  %10310 = vmatpush.bf16.msrb.mxu2 %v16733_v63 }
 0x124   : > { %v16460_v0 = vld [vmem:[%s20977_s27 + $0x1cc0] sm:$0xf]  ;;  %v19978_v1 = vld [vmem:[%s20977_s27 + $0x1ccc] sm:$0xf0]  ;;  %v21574_v17 = vpack.c.bf16 %v384_v60, %v384_v60  ;;  %v21578_v21 = vpack.c.bf16 %v386_v61, %v386_v61  ;;  %10323 = vmatpush.bf16.msrb.mxu3 %v16861_v4  ;;  %v10033_v60 = vpop.f32.mrf.mxu0 }
 0x125   : > { %v16588_v2 = vld [vmem:[%s20977_s27 + $0x1dc0] sm:$0xf]  ;;  %v20010_v8 = vld [vmem:[%s20977_s27 + $0x1dcc] sm:$0xf0]  ;;  %v16461_v22 = vor.u32 %v19978_v1, %v16460_v0  ;;  %10240 = vmatmul.bf16.vlgmr.msra.gmra.mxu0 %v21567_v7  ;;  %10266 = vmatmul.bf16.vlgmr.msra.gmra.mxu2 %v21572_v16  ;;  %v10034_v63 = vadd.f32 %v10033_v60, %v21537_v54  ;;  %v10046_v1 = vpop.f32.mrf.mxu1 }
 0x126   : > { %v16716_v11 = vld [vmem:[%s20977_s27 + $0x1ec0] sm:$0xf]  ;;  %v20042_v13 = vld [vmem:[%s20977_s27 + $0x1ecc] sm:$0xf0]  ;;  %v16589_v23 = vor.u32 %v20010_v8, %v16588_v2  ;;  %10253 = vmatmul.bf16.vlgmr.msra.gmra.mxu1 %v21574_v17  ;;  %10279 = vmatmul.bf16.vlgmr.msra.gmra.mxu3 %v21578_v21 }
 0x127   : > { %v16844_v18 = vld [vmem:[%s20977_s27 + $0x1fc0] sm:$0xf]  ;;  %v20074_v20 = vld [vmem:[%s20977_s27 + $0x1fcc] sm:$0xf0]  ;;  %v16717_v12 = vor.u32 %v20042_v13, %v16716_v11  ;;  %10285 = vmatpush.bf16.msrb.mxu0 %v16461_v22 }
 0x128   : > { %v16444_v25 = vld [vmem:[%s20977_s27 + $0x1ca0] sm:$0xf]  ;;  %v19974_v26 = vld [vmem:[%s20977_s27 + $0x1cac] sm:$0xf0]  ;;  %v16845_v30 = vor.u32 %v20074_v20, %v16844_v18  ;;  %10298 = vmatpush.bf16.msrb.mxu1 %v16589_v23  ;;  %v10047_v20 = vadd.f32 %v10046_v1, %v10034_v63 }
 0x129   : > { %v16572_v29 = vld [vmem:[%s20977_s27 + $0x1da0] sm:$0xf]  ;;  %v20006_v38 = vld [vmem:[%s20977_s27 + $0x1dac] sm:$0xf0]  ;;  %v16445_v6 = vor.u32 %v19974_v26, %v16444_v25  ;;  %10311 = vmatpush.bf16.msrb.mxu2 %v16717_v12 }
 0x12a   : > { %v16700_v24 = vld [vmem:[%s20977_s27 + $0x1ea0] sm:$0xf]  ;;  %v20038_v43 = vld [vmem:[%s20977_s27 + $0x1eac] sm:$0xf0]  ;;  %v16573_v50 = vor.u32 %v20006_v38, %v16572_v29  ;;  %10324 = vmatpush.bf16.msrb.mxu3 %v16845_v30 }
 0x12b   : > { %v16828_v44 = vld [vmem:[%s20977_s27 + $0x1fa0] sm:$0xf]  ;;  %v20070_v48 = vld [vmem:[%s20977_s27 + $0x1fac] sm:$0xf0]  ;;  %v16701_v51 = vor.u32 %v20038_v43, %v16700_v24  ;;  %10286 = vmatpush.bf16.msrb.mxu0 %v16445_v6 }
 0x12c   : > { %v16428_v52 = vld [vmem:[%s20977_s27 + $0x1c80] sm:$0xf]  ;;  %v19970_v10 = vld [vmem:[%s20977_s27 + $0x1c8c] sm:$0xf0]  ;;  %v16829_v56 = vor.u32 %v20070_v48, %v16828_v44  ;;  %10299 = vmatpush.bf16.msrb.mxu1 %v16573_v50  ;;  %v10059_v48 = vpop.f32.mrf.mxu2 }
 0x12d   : > { %v16556_v55 = vld [vmem:[%s20977_s27 + $0x1d80] sm:$0xf]  ;;  %v20002_v57 = vld [vmem:[%s20977_s27 + $0x1d8c] sm:$0xf0]  ;;  %v16429_v0 = vor.u32 %v19970_v10, %v16428_v52  ;;  %10312 = vmatpush.bf16.msrb.mxu2 %v16701_v51  ;;  %v10060_v52 = vadd.f32 %v10059_v48, %v10047_v20  ;;  %v10072_v10 = vpop.f32.mrf.mxu3 }
 0x12e   : > { %v16684_v58 = vld [vmem:[%s20977_s27 + $0x1e80] sm:$0xf]  ;;  %v20034_v59 = vld [vmem:[%s20977_s27 + $0x1e8c] sm:$0xf0]  ;;  %v16557_v2 = vor.u32 %v20002_v57, %v16556_v55  ;;  %10325 = vmatpush.bf16.msrb.mxu3 %v16829_v56  ;;  %v10035_v57 = vpop.f32.mrf.mxu0 }
 0x12f   : > { %v16812_v61 = vld [vmem:[%s20977_s27 + $0x1f80] sm:$0xf]  ;;  %v20066_v62 = vld [vmem:[%s20977_s27 + $0x1f8c] sm:$0xf0]  ;;  %v16685_v4 = vor.u32 %v20034_v59, %v16684_v58  ;;  %10287 = vmatpush.bf16.msrb.mxu0 %v16429_v0 }
 0x130   : > { %v16412_v8 = vld [vmem:[%s20977_s27 + $0x1c60] sm:$0xf]  ;;  %v19966_v11 = vld [vmem:[%s20977_s27 + $0x1c6c] sm:$0xf0]  ;;  %v16813_v18 = vor.u32 %v20066_v62, %v16812_v61  ;;  %10300 = vmatpush.bf16.msrb.mxu1 %v16557_v2  ;;  %v10048_v61 = vpop.f32.mrf.mxu1  ;;  %v21619_v62 = vadd.f32 %v10072_v10, %v10060_v52 }
 0x131   : > { %v16540_v13 = vld [vmem:[%s20977_s27 + $0x1d60] sm:$0xf]  ;;  %v19998_v22 = vld [vmem:[%s20977_s27 + $0x1d6c] sm:$0xf0]  ;;  %v16413_v26 = vor.u32 %v19966_v11, %v16412_v8  ;;  %10313 = vmatpush.bf16.msrb.mxu2 %v16685_v4 }
 0x132   : > { %v16668_v23 = vld [vmem:[%s20977_s27 + $0x1e60] sm:$0xf]  ;;  %v20030_v54 = vld [vmem:[%s20977_s27 + $0x1e6c] sm:$0xf0]  ;;  %v16541_v29 = vor.u32 %v19998_v22, %v16540_v13  ;;  %10326 = vmatpush.bf16.msrb.mxu3 %v16813_v18 }
 0x133   : > { %v16796_v12 = vld [vmem:[%s20977_s27 + $0x1f60] sm:$0xf]  ;;  %v20062_v25 = vld [vmem:[%s20977_s27 + $0x1f6c] sm:$0xf0]  ;;  %v16669_v30 = vor.u32 %v20030_v54, %v16668_v23  ;;  %10288 = vmatpush.bf16.msrb.mxu0 %v16413_v26 }
 0x134   : > { %v16396_v38 = vld [vmem:[%s20977_s27 + $0x1c40] sm:$0xf]  ;;  %v19962_v24 = vld [vmem:[%s20977_s27 + $0x1c4c] sm:$0xf0]  ;;  %v16797_v44 = vor.u32 %v20062_v25, %v16796_v12  ;;  %10301 = vmatpush.bf16.msrb.mxu1 %v16541_v29  ;;  %v10061_v52 = vpop.f32.mrf.mxu2 }
 0x135   : > { %v16524_v43 = vld [vmem:[%s20977_s27 + $0x1d40] sm:$0xf]  ;;  %v19994_v6 = vld [vmem:[%s20977_s27 + $0x1d4c] sm:$0xf0]  ;;  %v16397_v58 = vor.u32 %v19962_v24, %v16396_v38  ;;  %10314 = vmatpush.bf16.msrb.mxu2 %v16669_v30 }
 0x136   : > { %v16652_v50 = vld [vmem:[%s20977_s27 + $0x1e40] sm:$0xf]  ;;  %v20026_v51 = vld [vmem:[%s20977_s27 + $0x1e4c] sm:$0xf0]  ;;  %v16525_v63 = vor.u32 %v19994_v6, %v16524_v43  ;;  %10327 = vmatpush.bf16.msrb.mxu3 %v16797_v44 }
 0x137   : > { %v16780_v55 = vld [vmem:[%s20977_s27 + $0x1f40] sm:$0xf]  ;;  %v20058_v56 = vld [vmem:[%s20977_s27 + $0x1f4c] sm:$0xf0]  ;;  %v16653_v0 = vor.u32 %v20026_v51, %v16652_v50  ;;  %10289 = vmatpush.bf16.msrb.mxu0 %v16397_v58 }
 0x138   : > { %v16380_v59 = vld [vmem:[%s20977_s27 + $0x1c20] sm:$0xf]  ;;  %v19958_v60 = vld [vmem:[%s20977_s27 + $0x1c2c] sm:$0xf0]  ;;  %v16781_v8 = vor.u32 %v20058_v56, %v16780_v55  ;;  %10302 = vmatpush.bf16.msrb.mxu1 %v16525_v63  ;;  %v10074_v56 = vpop.f32.mrf.mxu3 }
 0x139   : > { %v16508_v1 = vld [vmem:[%s20977_s27 + $0x1d20] sm:$0xf]  ;;  %v19990_v2 = vld [vmem:[%s20977_s27 + $0x1d2c] sm:$0xf0]  ;;  %v16381_v54 = vor.u32 %v19958_v60, %v16380_v59  ;;  %10315 = vmatpush.bf16.msrb.mxu2 %v16653_v0 }
 0x13a   : > { %v16636_v4 = vld [vmem:[%s20977_s27 + $0x1e20] sm:$0xf]  ;;  %v20022_v11 = vld [vmem:[%s20977_s27 + $0x1e2c] sm:$0xf0]  ;;  %v16509_v30 = vor.u32 %v19990_v2, %v16508_v1  ;;  %10328 = vmatpush.bf16.msrb.mxu3 %v16781_v8 }
 0x13b   : > { %v16764_v13 = vld [vmem:[%s20977_s27 + $0x1f20] sm:$0xf]  ;;  %v20054_v18 = vld [vmem:[%s20977_s27 + $0x1f2c] sm:$0xf0]  ;;  %v16637_v38 = vor.u32 %v20022_v11, %v16636_v4  ;;  %10290 = vmatpush.bf16.msrb.mxu0 %v16381_v54 }
 0x13c   : > { %v16364_v20 = vld [vmem:[%s20977_s27 + $0x1c00] sm:$0xf]  ;;  %v19954_v22 = vld [vmem:[%s20977_s27 + $0x1c0c] sm:$0xf0]  ;;  %v16765_v48 = vor.u32 %v20054_v18, %v16764_v13  ;;  %10303 = vmatpush.bf16.msrb.mxu1 %v16509_v30 }
 0x13d   : > { %v319_v23 = vld [vmem:[%s20991_s21 + $0x40] sm:$0xff]  ;;  %v16492_v12 = vld [vmem:[%s20977_s27 + $0x1d00] sm:$0xf]  ;;  %v16365_v57 = vor.u32 %v19954_v22, %v16364_v20  ;;  %10316 = vmatpush.bf16.msrb.mxu2 %v16637_v38  ;;  %v388_v8 = vld.sshfl [vmem:[#allocation1 + $0x28] sm:$0xff pattern:$0x73625140] }
 0x13e   : > { %v19986_v25 = vld [vmem:[%s20977_s27 + $0x1d0c] sm:$0xf0]  ;;  %v16620_v26 = vld [vmem:[%s20977_s27 + $0x1e00] sm:$0xf]  ;;  %v332_v29 = vmax.f32 %v319_v23, 0.0  ;;  %10329 = vmatpush.bf16.msrb.mxu3 %v16765_v48  ;;  %v21654_v38 = vpack.c.bf16 %v388_v8, %v388_v8 }
 0x13f   : > { %v20018_v24 = vld [vmem:[%s20977_s27 + $0x1e0c] sm:$0xf0]  ;;  %v16748_v43 = vld [vmem:[%s20977_s27 + $0x1f00] sm:$0xf]  ;;  %v16493_v61 = vor.u32 %v19986_v25, %v16492_v12  ;;  %10291 = vmatpush.bf16.msrb.mxu0 %v16365_v57 }
 0x140   : > { %v20050_v44 = vld [vmem:[%s20977_s27 + $0x1f0c] sm:$0xf0]  ;;  %v16988_v6 = vld [vmem:[%s20977_s27 + $0x20e0] sm:$0xf]  ;;  %391 = vst [vmem:[#allocation1] ss:$4 sm:$0xff] %v332_v29  ;;  %v16621_v63 = vor.u32 %v20018_v24, %v16620_v26 }
 0x141   : > { %v20110_v50 = vld [vmem:[%s20977_s27 + $0x20ec] sm:$0xf0]  ;;  %v17116_v51 = vld [vmem:[%s20977_s27 + $0x21e0] sm:$0xf]  ;;  %v16749_v2 = vor.u32 %v20050_v44, %v16748_v43  ;;  %10304 = vmatpush.bf16.msrb.mxu1 %v16493_v61 }
 0x142   : > { %v20142_v10 = vld [vmem:[%s20977_s27 + $0x21ec] sm:$0xf0]  ;;  %v17244_v55 = vld [vmem:[%s20977_s27 + $0x22e0] sm:$0xf]  ;;  %v16989_v4 = vor.u32 %v20110_v50, %v16988_v6  ;;  %10317 = vmatpush.bf16.msrb.mxu2 %v16621_v63 }
 0x143   : > { %v20174_v58 = vld [vmem:[%s20977_s27 + $0x22ec] sm:$0xf0]  ;;  %v17372_v59 = vld [vmem:[%s20977_s27 + $0x23e0] sm:$0xf]  ;;  %v17117_v13 = vor.u32 %v20142_v10, %v17116_v51  ;;  %10330 = vmatpush.bf16.msrb.mxu3 %v16749_v2 }
 0x144   : > { %v20206_v60 = vld [vmem:[%s20977_s27 + $0x23ec] sm:$0xf0]  ;;  %v389_v1 = vld.sshfl [vmem:[#allocation1 + $0x30] sm:$0xff pattern:$0x73625140]  ;;  %v17245_v18 = vor.u32 %v20174_v58, %v17244_v55  ;;  %10336 = vmatpush.bf16.msra.mxu0 %v16989_v4  ;;  %10305 = vmatmul.bf16.vlgmr.msrb.gmra.mxu1 %v21654_v38 }
 0x145   : > { %v387_v0 = vld.sshfl [vmem:[#allocation1 + $0x20] sm:$0xff pattern:$0x73625140]  ;;  %v390_v11 = vld.sshfl [vmem:[#allocation1 + $0x38] sm:$0xff pattern:$0x73625140]  ;;  %v17373_v54 = vor.u32 %v20206_v60, %v17372_v59  ;;  %v21652_v30 = vpack.c.bf16 %v389_v1, %v389_v1  ;;  %10349 = vmatpush.bf16.msra.mxu1 %v17117_v13 }
 0x146   : > { %v16972_v20 = vld [vmem:[%s20977_s27 + $0x20c0] sm:$0xf]  ;;  %v20106_v22 = vld [vmem:[%s20977_s27 + $0x20cc] sm:$0xf0]  ;;  %v21647_v12 = vpack.c.bf16 %v387_v0, %v387_v0  ;;  %v21658_v44 = vpack.c.bf16 %v390_v11, %v390_v11  ;;  %10362 = vmatpush.bf16.msra.mxu2 %v17245_v18 }
 0x147   : > { %v17100_v23 = vld [vmem:[%s20977_s27 + $0x21c0] sm:$0xf]  ;;  %v20138_v25 = vld [vmem:[%s20977_s27 + $0x21cc] sm:$0xf0]  ;;  %v16973_v48 = vor.u32 %v20106_v22, %v16972_v20  ;;  %10375 = vmatpush.bf16.msra.mxu3 %v17373_v54  ;;  %10318 = vmatmul.bf16.vlgmr.msrb.gmra.mxu2 %v21652_v30  ;;  %v10085_v20 = vpop.f32.mrf.mxu0 }
 0x148   : > { %v17228_v26 = vld [vmem:[%s20977_s27 + $0x22c0] sm:$0xf]  ;;  %v20170_v29 = vld [vmem:[%s20977_s27 + $0x22cc] sm:$0xf0]  ;;  %v17101_v6 = vor.u32 %v20138_v25, %v17100_v23  ;;  %10292 = vmatmul.bf16.vlgmr.msrb.gmra.mxu0 %v21647_v12  ;;  %10331 = vmatmul.bf16.vlgmr.msrb.gmra.mxu3 %v21658_v44  ;;  %v10086_v54 = vadd.f32 %v10085_v20, %v21619_v62 }
 0x149   : > { %v17356_v24 = vld [vmem:[%s20977_s27 + $0x23c0] sm:$0xf]  ;;  %v20202_v43 = vld [vmem:[%s20977_s27 + $0x23cc] sm:$0xf0]  ;;  %v17229_v50 = vor.u32 %v20170_v29, %v17228_v26  ;;  %10337 = vmatpush.bf16.msra.mxu0 %v16973_v48  ;;  %v10098_v26 = vpop.f32.mrf.mxu1 }
 0x14a   : > { %v16956_v51 = vld [vmem:[%s20977_s27 + $0x20a0] sm:$0xf]  ;;  %v20102_v52 = vld [vmem:[%s20977_s27 + $0x20ac] sm:$0xf0]  ;;  %v17357_v55 = vor.u32 %v20202_v43, %v17356_v24  ;;  %10350 = vmatpush.bf16.msra.mxu1 %v17101_v6 }
 0x14b   : > { %v17084_v10 = vld [vmem:[%s20977_s27 + $0x21a0] sm:$0xf]  ;;  %v20134_v56 = vld [vmem:[%s20977_s27 + $0x21ac] sm:$0xf0]  ;;  %v16957_v61 = vor.u32 %v20102_v52, %v16956_v51  ;;  %10363 = vmatpush.bf16.msra.mxu2 %v17229_v50  ;;  %v10099_v51 = vadd.f32 %v10098_v26, %v10086_v54 }
 0x14c   : > { %v17212_v57 = vld [vmem:[%s20977_s27 + $0x22a0] sm:$0xf]  ;;  %v20166_v58 = vld [vmem:[%s20977_s27 + $0x22ac] sm:$0xf0]  ;;  %v17085_v63 = vor.u32 %v20134_v56, %v17084_v10  ;;  %10376 = vmatpush.bf16.msra.mxu3 %v17357_v55 }
 0x14d   : > { %v17340_v59 = vld [vmem:[%s20977_s27 + $0x23a0] sm:$0xf]  ;;  %v20198_v60 = vld [vmem:[%s20977_s27 + $0x23ac] sm:$0xf0]  ;;  %v17213_v0 = vor.u32 %v20166_v58, %v17212_v57  ;;  %10338 = vmatpush.bf16.msra.mxu0 %v16957_v61 }
 0x14e   : > { %v16940_v1 = vld [vmem:[%s20977_s27 + $0x2080] sm:$0xf]  ;;  %v20098_v2 = vld [vmem:[%s20977_s27 + $0x208c] sm:$0xf0]  ;;  %v17341_v8 = vor.u32 %v20198_v60, %v17340_v59  ;;  %10351 = vmatpush.bf16.msra.mxu1 %v17085_v63 }
 0x14f   : > { %v17068_v4 = vld [vmem:[%s20977_s27 + $0x2180] sm:$0xf]  ;;  %v20130_v11 = vld [vmem:[%s20977_s27 + $0x218c] sm:$0xf0]  ;;  %v16941_v25 = vor.u32 %v20098_v2, %v16940_v1  ;;  %10364 = vmatpush.bf16.msra.mxu2 %v17213_v0  ;;  %v10111_v1 = vpop.f32.mrf.mxu2 }
 0x150   : > { %v17196_v13 = vld [vmem:[%s20977_s27 + $0x2280] sm:$0xf]  ;;  %v20162_v18 = vld [vmem:[%s20977_s27 + $0x228c] sm:$0xf0]  ;;  %v17069_v29 = vor.u32 %v20130_v11, %v17068_v4  ;;  %10377 = vmatpush.bf16.msra.mxu3 %v17341_v8  ;;  %v10112_v11 = vadd.f32 %v10111_v1, %v10099_v51 }
 0x151   : > { %v17324_v22 = vld [vmem:[%s20977_s27 + $0x2380] sm:$0xf]  ;;  %v20194_v23 = vld [vmem:[%s20977_s27 + $0x238c] sm:$0xf0]  ;;  %v17197_v24 = vor.u32 %v20162_v18, %v17196_v13  ;;  %10339 = vmatpush.bf16.msra.mxu0 %v16941_v25  ;;  %v10124_v13 = vpop.f32.mrf.mxu3  ;;  %v10100_v26 = vpop.f32.mrf.mxu1 }
 0x152   : > { %v16924_v43 = vld [vmem:[%s20977_s27 + $0x2060] sm:$0xf]  ;;  %v20094_v48 = vld [vmem:[%s20977_s27 + $0x206c] sm:$0xf0]  ;;  %v17325_v50 = vor.u32 %v20194_v23, %v17324_v22  ;;  %10352 = vmatpush.bf16.msra.mxu1 %v17069_v29  ;;  %v10087_v22 = vpop.f32.mrf.mxu0  ;;  %v21699_v29 = vadd.f32 %v10124_v13, %v10112_v11 }
 0x153   : > { %v17052_v6 = vld [vmem:[%s20977_s27 + $0x2160] sm:$0xf]  ;;  %v20126_v52 = vld [vmem:[%s20977_s27 + $0x216c] sm:$0xf0]  ;;  %v16925_v57 = vor.u32 %v20094_v48, %v16924_v43  ;;  %10365 = vmatpush.bf16.msra.mxu2 %v17197_v24 }
 0x154   : > { %v17180_v10 = vld [vmem:[%s20977_s27 + $0x2260] sm:$0xf]  ;;  %v20158_v62 = vld [vmem:[%s20977_s27 + $0x226c] sm:$0xf0]  ;;  %v17053_v58 = vor.u32 %v20126_v52, %v17052_v6  ;;  %10378 = vmatpush.bf16.msra.mxu3 %v17325_v50 }
 0x155   : > { %v17308_v55 = vld [vmem:[%s20977_s27 + $0x2360] sm:$0xf]  ;;  %v20190_v56 = vld [vmem:[%s20977_s27 + $0x236c] sm:$0xf0]  ;;  %v17181_v59 = vor.u32 %v20158_v62, %v17180_v10  ;;  %10340 = vmatpush.bf16.msra.mxu0 %v16925_v57  ;;  %v320_v57 = vld [vmem:[%s20991_s21 + $0x48] sm:$0xff] }
 0x156   : > { %v16908_v60 = vld [vmem:[%s20977_s27 + $0x2040] sm:$0xf]  ;;  %v20090_v61 = vld [vmem:[%s20977_s27 + $0x204c] sm:$0xf0]  ;;  %v17309_v0 = vor.u32 %v20190_v56, %v17308_v55  ;;  %10353 = vmatpush.bf16.msra.mxu1 %v17053_v58 }
 0x157   : > { %v17036_v63 = vld [vmem:[%s20977_s27 + $0x2140] sm:$0xf]  ;;  %v20122_v2 = vld [vmem:[%s20977_s27 + $0x214c] sm:$0xf0]  ;;  %v16909_v23 = vor.u32 %v20090_v61, %v16908_v60  ;;  %10366 = vmatpush.bf16.msra.mxu2 %v17181_v59  ;;  %v10113_v22 = vpop.f32.mrf.mxu2 }
 0x158   : > { %v17164_v4 = vld [vmem:[%s20977_s27 + $0x2240] sm:$0xf]  ;;  %v20154_v8 = vld [vmem:[%s20977_s27 + $0x224c] sm:$0xf0]  ;;  %v17037_v24 = vor.u32 %v20122_v2, %v17036_v63  ;;  %10379 = vmatpush.bf16.msra.mxu3 %v17309_v0  ;;  %v333_v63 = vmax.f32 %v320_v57, 0.0 }
 0x159   : > { %v17292_v18 = vld [vmem:[%s20977_s27 + $0x2340] sm:$0xf]  ;;  %v20186_v20 = vld [vmem:[%s20977_s27 + $0x234c] sm:$0xf0]  ;;  %v17165_v43 = vor.u32 %v20154_v8, %v17164_v4  ;;  %10341 = vmatpush.bf16.msra.mxu0 %v16909_v23 }
 0x15a   : > { %v16892_v54 = vld [vmem:[%s20977_s27 + $0x2020] sm:$0xf]  ;;  %v20086_v25 = vld [vmem:[%s20977_s27 + $0x202c] sm:$0xf0]  ;;  %v17293_v51 = vor.u32 %v20186_v20, %v17292_v18  ;;  %10354 = vmatpush.bf16.msra.mxu1 %v17037_v24  ;;  %392 = vst [vmem:[#allocation1 + $0x20] ss:$4 sm:$0xff] %v333_v63 }
 0x15b   : > { %v17020_v48 = vld [vmem:[%s20977_s27 + $0x2120] sm:$0xf]  ;;  %v20118_v6 = vld [vmem:[%s20977_s27 + $0x212c] sm:$0xf0]  ;;  %v16893_v58 = vor.u32 %v20086_v25, %v16892_v54  ;;  %10367 = vmatpush.bf16.msra.mxu2 %v17165_v43  ;;  %v10126_v25 = vpop.f32.mrf.mxu3 }
 0x15c   : > { %v17148_v50 = vld [vmem:[%s20977_s27 + $0x2220] sm:$0xf]  ;;  %v20150_v52 = vld [vmem:[%s20977_s27 + $0x222c] sm:$0xf0]  ;;  %v17021_v0 = vor.u32 %v20118_v6, %v17020_v48  ;;  %10380 = vmatpush.bf16.msra.mxu3 %v17293_v51 }
 0x15d   : > { %v17276_v10 = vld [vmem:[%s20977_s27 + $0x2320] sm:$0xf]  ;;  %v20182_v62 = vld [vmem:[%s20977_s27 + $0x232c] sm:$0xf0]  ;;  %v17149_v1 = vor.u32 %v20150_v52, %v17148_v50  ;;  %10342 = vmatpush.bf16.msra.mxu0 %v16893_v58 }
 0x15e   : > { %v16876_v55 = vld [vmem:[%s20977_s27 + $0x2000] sm:$0xf]  ;;  %v20082_v56 = vld [vmem:[%s20977_s27 + $0x200c] sm:$0xf0]  ;;  %v17277_v11 = vor.u32 %v20182_v62, %v17276_v10  ;;  %10355 = vmatpush.bf16.msra.mxu1 %v17021_v0 }
 0x15f   : > { %v17004_v59 = vld [vmem:[%s20977_s27 + $0x2100] sm:$0xf]  ;;  %v20114_v60 = vld [vmem:[%s20977_s27 + $0x210c] sm:$0xf0]  ;;  %v16877_v26 = vor.u32 %v20082_v56, %v16876_v55  ;;  %10368 = vmatpush.bf16.msra.mxu2 %v17149_v1 }
 0x160   : > { %v17132_v61 = vld [vmem:[%s20977_s27 + $0x2200] sm:$0xf]  ;;  %v20146_v2 = vld [vmem:[%s20977_s27 + $0x220c] sm:$0xf0]  ;;  %v17005_v6 = vor.u32 %v20114_v60, %v17004_v59  ;;  %10381 = vmatpush.bf16.msra.mxu3 %v17277_v11 }
 0x161   : > { %v17260_v4 = vld [vmem:[%s20977_s27 + $0x2300] sm:$0xf]  ;;  %v20178_v8 = vld [vmem:[%s20977_s27 + $0x230c] sm:$0xf0]  ;;  %v17133_v50 = vor.u32 %v20146_v2, %v17132_v61  ;;  %10343 = vmatpush.bf16.msra.mxu0 %v16877_v26 }
 0x162   : > { %v17500_v13 = vld [vmem:[%s20977_s27 + $0x24e0] sm:$0xf]  ;;  %v20238_v18 = vld [vmem:[%s20977_s27 + $0x24ec] sm:$0xf0]  ;;  %v17261_v10 = vor.u32 %v20178_v8, %v17260_v4  ;;  %10356 = vmatpush.bf16.msra.mxu1 %v17005_v6 }
 0x163   : > { %v17628_v20 = vld [vmem:[%s20977_s27 + $0x25e0] sm:$0xf]  ;;  %v20270_v23 = vld [vmem:[%s20977_s27 + $0x25ec] sm:$0xf0]  ;;  %v17501_v62 = vor.u32 %v20238_v18, %v17500_v13  ;;  %10369 = vmatpush.bf16.msra.mxu2 %v17133_v50 }
 0x164   : > { %v17756_v54 = vld [vmem:[%s20977_s27 + $0x26e0] sm:$0xf]  ;;  %v20302_v24 = vld [vmem:[%s20977_s27 + $0x26ec] sm:$0xf0]  ;;  %v17629_v56 = vor.u32 %v20270_v23, %v17628_v20  ;;  %10382 = vmatpush.bf16.msra.mxu3 %v17261_v10 }
 0x165   : > { %v17884_v43 = vld [vmem:[%s20977_s27 + $0x27e0] sm:$0xf]  ;;  %v20334_v48 = vld [vmem:[%s20977_s27 + $0x27ec] sm:$0xf0]  ;;  %v17757_v58 = vor.u32 %v20302_v24, %v17756_v54  ;;  %10388 = vmatpush.bf16.msrb.mxu0 %v17501_v62 }
 0x166   : > { %v393_v51 = vld.sshfl [vmem:[#allocation1] sm:$0xff pattern:$0x73625140]  ;;  %v395_v52 = vld.sshfl [vmem:[#allocation1 + $0x10] sm:$0xff pattern:$0x73625140]  ;;  %v17885_v59 = vor.u32 %v20334_v48, %v17884_v43  ;;  %10401 = vmatpush.bf16.msrb.mxu1 %v17629_v56 }
 0x167   : > { %v394_v57 = vld.sshfl [vmem:[#allocation1 + $0x8] sm:$0xff pattern:$0x73625140]  ;;  %v396_v55 = vld.sshfl [vmem:[#allocation1 + $0x18] sm:$0xff pattern:$0x73625140]  ;;  %v21727_v60 = vpack.c.bf16 %v393_v51, %v393_v51  ;;  %v21732_v4 = vpack.c.bf16 %v395_v52, %v395_v52  ;;  %10414 = vmatpush.bf16.msrb.mxu2 %v17757_v58 }
 0x168   : > { %v17484_v63 = vld [vmem:[%s20977_s27 + $0x24c0] sm:$0xf]  ;;  %v20234_v22 = vld [vmem:[%s20977_s27 + $0x24cc] sm:$0xf0]  ;;  %v21734_v8 = vpack.c.bf16 %v394_v57, %v394_v57  ;;  %v21738_v18 = vpack.c.bf16 %v396_v55, %v396_v55  ;;  %10427 = vmatpush.bf16.msrb.mxu3 %v17885_v59 }
 0x169   : > { %v17612_v0 = vld [vmem:[%s20977_s27 + $0x25c0] sm:$0xf]  ;;  %24678 = vst [vmem:[#allocation12_spill] sm:$0xff] %v21727_v60  ;;  %v20266_v61 = vld [vmem:[%s20977_s27 + $0x25cc] sm:$0xf0]  ;;  %v17485_v20 = vor.u32 %v20234_v22, %v17484_v63  ;;  %10344 = vmatmul.bf16.vlgmr.msra.gmra.mxu0 %v21727_v60  ;;  %10370 = vmatmul.bf16.vlgmr.msra.gmra.mxu2 %v21732_v4 }
 0x16a   : > { %v17740_v1 = vld [vmem:[%s20977_s27 + $0x26c0] sm:$0xf]  ;;  %v20298_v2 = vld [vmem:[%s20977_s27 + $0x26cc] sm:$0xf0]  ;;  %24679 = vst [vmem:[#allocation13_spill] sm:$0xff] %v21732_v4  ;;  %v17613_v23 = vor.u32 %v20266_v61, %v17612_v0  ;;  %10357 = vmatmul.bf16.vlgmr.msra.gmra.mxu1 %v21734_v8  ;;  %10383 = vmatmul.bf16.vlgmr.msra.gmra.mxu3 %v21738_v18  ;;  %v10137_v61 = vpop.f32.mrf.mxu0 }
 0x16b   : > { %24680 = vst [vmem:[#allocation14_spill] sm:$0xff] %v21734_v8  ;;  %v17868_v11 = vld [vmem:[%s20977_s27 + $0x27c0] sm:$0xf]  ;;  %v20330_v13 = vld [vmem:[%s20977_s27 + $0x27cc] sm:$0xf0]  ;;  %v17741_v54 = vor.u32 %v20298_v2, %v17740_v1  ;;  %10389 = vmatpush.bf16.msrb.mxu0 %v17485_v20  ;;  %v10150_v20 = vpop.f32.mrf.mxu1 }
 0x16c   : > { %24681 = vst [vmem:[#allocation15_spill] sm:$0xff] %v21738_v18  ;;  %v17468_v25 = vld [vmem:[%s20977_s27 + $0x24a0] sm:$0xf]  ;;  %v20230_v26 = vld [vmem:[%s20977_s27 + $0x24ac] sm:$0xf0]  ;;  %v17869_v43 = vor.u32 %v20330_v13, %v17868_v11  ;;  %10402 = vmatpush.bf16.msrb.mxu1 %v17613_v23  ;;  %v10138_v11 = vadd.f32 %v10137_v61, %v21699_v29 }
 0x16d   : > { %v17596_v24 = vld [vmem:[%s20977_s27 + $0x25a0] sm:$0xf]  ;;  %v20262_v48 = vld [vmem:[%s20977_s27 + $0x25ac] sm:$0xf0]  ;;  %v17469_v10 = vor.u32 %v20230_v26, %v17468_v25  ;;  %10415 = vmatpush.bf16.msrb.mxu2 %v17741_v54 }
 0x16e   : > { %v17724_v6 = vld [vmem:[%s20977_s27 + $0x26a0] sm:$0xf]  ;;  %v20294_v50 = vld [vmem:[%s20977_s27 + $0x26ac] sm:$0xf0]  ;;  %v17597_v62 = vor.u32 %v20262_v48, %v17596_v24  ;;  %10428 = vmatpush.bf16.msrb.mxu3 %v17869_v43  ;;  %v10151_v48 = vadd.f32 %v10150_v20, %v10138_v11 }
 0x16f   : > { %v17852_v51 = vld [vmem:[%s20977_s27 + $0x27a0] sm:$0xf]  ;;  %v20326_v52 = vld [vmem:[%s20977_s27 + $0x27ac] sm:$0xf0]  ;;  %v17725_v57 = vor.u32 %v20294_v50, %v17724_v6  ;;  %10390 = vmatpush.bf16.msrb.mxu0 %v17469_v10 }
 0x170   : > { %v17452_v55 = vld [vmem:[%s20977_s27 + $0x2480] sm:$0xf]  ;;  %v20226_v56 = vld [vmem:[%s20977_s27 + $0x248c] sm:$0xf0]  ;;  %v17853_v63 = vor.u32 %v20326_v52, %v17852_v51  ;;  %10403 = vmatpush.bf16.msrb.mxu1 %v17597_v62 }
 0x171   : > { %v17580_v58 = vld [vmem:[%s20977_s27 + $0x2580] sm:$0xf]  ;;  %v20258_v22 = vld [vmem:[%s20977_s27 + $0x258c] sm:$0xf0]  ;;  %v17453_v13 = vor.u32 %v20226_v56, %v17452_v55  ;;  %10416 = vmatpush.bf16.msrb.mxu2 %v17725_v57 }
 0x172   : > { %v17708_v0 = vld [vmem:[%s20977_s27 + $0x2680] sm:$0xf]  ;;  %v20290_v59 = vld [vmem:[%s20977_s27 + $0x268c] sm:$0xf0]  ;;  %v17581_v23 = vor.u32 %v20258_v22, %v17580_v58  ;;  %10429 = vmatpush.bf16.msrb.mxu3 %v17853_v63  ;;  %v10163_v22 = vpop.f32.mrf.mxu2  ;;  %v10139_v20 = vpop.f32.mrf.mxu0 }
 0x173   : > { %v17836_v1 = vld [vmem:[%s20977_s27 + $0x2780] sm:$0xf]  ;;  %v20322_v2 = vld [vmem:[%s20977_s27 + $0x278c] sm:$0xf0]  ;;  %v17709_v54 = vor.u32 %v20290_v59, %v17708_v0  ;;  %10391 = vmatpush.bf16.msrb.mxu0 %v17453_v13 }
 0x174   : > { %v17436_v25 = vld [vmem:[%s20977_s27 + $0x2460] sm:$0xf]  ;;  %v20222_v26 = vld [vmem:[%s20977_s27 + $0x246c] sm:$0xf0]  ;;  %v17837_v43 = vor.u32 %v20322_v2, %v17836_v1  ;;  %10404 = vmatpush.bf16.msrb.mxu1 %v17581_v23  ;;  %v10164_v1 = vadd.f32 %v10163_v22, %v10151_v48  ;;  %v10176_v2 = vpop.f32.mrf.mxu3 }
 0x175   : > { %v17564_v24 = vld [vmem:[%s20977_s27 + $0x2560] sm:$0xf]  ;;  %v20254_v6 = vld [vmem:[%s20977_s27 + $0x256c] sm:$0xf0]  ;;  %v17437_v10 = vor.u32 %v20222_v26, %v17436_v25  ;;  %10417 = vmatpush.bf16.msrb.mxu2 %v17709_v54  ;;  %v10152_v26 = vpop.f32.mrf.mxu1 }
 0x176   : > { %v17692_v50 = vld [vmem:[%s20977_s27 + $0x2660] sm:$0xf]  ;;  %v20286_v29 = vld [vmem:[%s20977_s27 + $0x266c] sm:$0xf0]  ;;  %v17565_v62 = vor.u32 %v20254_v6, %v17564_v24  ;;  %10430 = vmatpush.bf16.msrb.mxu3 %v17837_v43  ;;  %v21779_v24 = vadd.f32 %v10176_v2, %v10164_v1 }
 0x177   : > { %v17820_v51 = vld [vmem:[%s20977_s27 + $0x2760] sm:$0xf]  ;;  %v20318_v52 = vld [vmem:[%s20977_s27 + $0x276c] sm:$0xf0]  ;;  %v17693_v57 = vor.u32 %v20286_v29, %v17692_v50  ;;  %10392 = vmatpush.bf16.msrb.mxu0 %v17437_v10 }
 0x178   : > { %v17420_v55 = vld [vmem:[%s20977_s27 + $0x2440] sm:$0xf]  ;;  %v20218_v56 = vld [vmem:[%s20977_s27 + $0x244c] sm:$0xf0]  ;;  %v17821_v63 = vor.u32 %v20318_v52, %v17820_v51  ;;  %10405 = vmatpush.bf16.msrb.mxu1 %v17565_v62 }
 0x179   : > { %v17548_v58 = vld [vmem:[%s20977_s27 + $0x2540] sm:$0xf]  ;;  %v20250_v0 = vld [vmem:[%s20977_s27 + $0x254c] sm:$0xf0]  ;;  %v17421_v23 = vor.u32 %v20218_v56, %v17420_v55  ;;  %10418 = vmatpush.bf16.msrb.mxu2 %v17693_v57 }
 0x17a   : > { %v17676_v59 = vld [vmem:[%s20977_s27 + $0x2640] sm:$0xf]  ;;  %v20282_v61 = vld [vmem:[%s20977_s27 + $0x264c] sm:$0xf0]  ;;  %v17549_v43 = vor.u32 %v20250_v0, %v17548_v58  ;;  %10431 = vmatpush.bf16.msrb.mxu3 %v17821_v63  ;;  %v10165_v26 = vpop.f32.mrf.mxu2 }
 0x17b   : > { %v17804_v11 = vld [vmem:[%s20977_s27 + $0x2740] sm:$0xf]  ;;  %v20314_v13 = vld [vmem:[%s20977_s27 + $0x274c] sm:$0xf0]  ;;  %v17677_v48 = vor.u32 %v20282_v61, %v17676_v59  ;;  %10393 = vmatpush.bf16.msrb.mxu0 %v17421_v23 }
 0x17c   : > { %v17404_v54 = vld [vmem:[%s20977_s27 + $0x2420] sm:$0xf]  ;;  %v20214_v25 = vld [vmem:[%s20977_s27 + $0x242c] sm:$0xf0]  ;;  %v17805_v51 = vor.u32 %v20314_v13, %v17804_v11  ;;  %10406 = vmatpush.bf16.msrb.mxu1 %v17549_v43  ;;  %v10178_v60 = vpop.f32.mrf.mxu3 }
 0x17d   : > { %v17532_v6 = vld [vmem:[%s20977_s27 + $0x2520] sm:$0xf]  ;;  %v20246_v50 = vld [vmem:[%s20977_s27 + $0x252c] sm:$0xf0]  ;;  %v17405_v58 = vor.u32 %v20214_v25, %v17404_v54  ;;  %10419 = vmatpush.bf16.msrb.mxu2 %v17677_v48 }
 0x17e   : > { %v17660_v29 = vld [vmem:[%s20977_s27 + $0x2620] sm:$0xf]  ;;  %v20278_v52 = vld [vmem:[%s20977_s27 + $0x262c] sm:$0xf0]  ;;  %v17533_v61 = vor.u32 %v20246_v50, %v17532_v6  ;;  %10432 = vmatpush.bf16.msrb.mxu3 %v17805_v51 }
 0x17f   : > { %v17788_v10 = vld [vmem:[%s20977_s27 + $0x2720] sm:$0xf]  ;;  %v20310_v55 = vld [vmem:[%s20977_s27 + $0x272c] sm:$0xf0]  ;;  %v17661_v1 = vor.u32 %v20278_v52, %v17660_v29  ;;  %10394 = vmatpush.bf16.msrb.mxu0 %v17405_v58 }
 0x180   : > { %v17388_v62 = vld [vmem:[%s20977_s27 + $0x2400] sm:$0xf]  ;;  %v20210_v57 = vld [vmem:[%s20977_s27 + $0x240c] sm:$0xf0]  ;;  %v17789_v20 = vor.u32 %v20310_v55, %v17788_v10  ;;  %10407 = vmatpush.bf16.msrb.mxu1 %v17533_v61 }
 0x181   : > { %v321_v56 = vld [vmem:[%s20991_s21 + $0x50] sm:$0xff]  ;;  %v20242_v0 = vld [vmem:[%s20977_s27 + $0x250c] sm:$0xf0]  ;;  %v17389_v43 = vor.u32 %v20210_v57, %v17388_v62  ;;  %10420 = vmatpush.bf16.msrb.mxu2 %v17661_v1  ;;  %v400_v62 = vld.sshfl [vmem:[#allocation1 + $0x38] sm:$0xff pattern:$0x73625140] }
 0x182   : > { %v17516_v22 = vld [vmem:[%s20977_s27 + $0x2500] sm:$0xf]  ;;  %v334_v63 = vmax.f32 %v321_v56, 0.0  ;;  %v20274_v2 = vld [vmem:[%s20977_s27 + $0x260c] sm:$0xf0]  ;;  %10433 = vmatpush.bf16.msrb.mxu3 %v17789_v20  ;;  %v21818_v20 = vpack.c.bf16 %v400_v62, %v400_v62 }
 0x183   : > { %v17644_v59 = vld [vmem:[%s20977_s27 + $0x2600] sm:$0xf]  ;;  %v20306_v13 = vld [vmem:[%s20977_s27 + $0x270c] sm:$0xf0]  ;;  %v17517_v29 = vor.u32 %v20242_v0, %v17516_v22  ;;  %10395 = vmatpush.bf16.msrb.mxu0 %v17389_v43 }
 0x184   : > { %v17772_v11 = vld [vmem:[%s20977_s27 + $0x2700] sm:$0xf]  ;;  %v20366_v54 = vld [vmem:[%s20977_s27 + $0x28ec] sm:$0xf0]  ;;  %401 = vst [vmem:[#allocation1] ss:$4 sm:$0xff] %v334_v63  ;;  %v17645_v51 = vor.u32 %v20274_v2, %v17644_v59 }
 0x185   : > { %v18012_v23 = vld [vmem:[%s20977_s27 + $0x28e0] sm:$0xf]  ;;  %v20398_v18 = vld [vmem:[%s20977_s27 + $0x29ec] sm:$0xf0]  ;;  %v17773_v60 = vor.u32 %v20306_v13, %v17772_v11  ;;  %10408 = vmatpush.bf16.msrb.mxu1 %v17517_v29  ;;  %24685 = vst [vmem:[#allocation19_spill] sm:$0xff] %v21818_v20 }
 0x186   : > { %v18140_v25 = vld [vmem:[%s20977_s27 + $0x29e0] sm:$0xf]  ;;  %v20430_v48 = vld [vmem:[%s20977_s27 + $0x2aec] sm:$0xf0]  ;;  %v18013_v55 = vor.u32 %v20366_v54, %v18012_v23  ;;  %10421 = vmatpush.bf16.msrb.mxu2 %v17645_v51 }
 0x187   : > { %v18268_v4 = vld [vmem:[%s20977_s27 + $0x2ae0] sm:$0xf]  ;;  %v20462_v50 = vld [vmem:[%s20977_s27 + $0x2bec] sm:$0xf0]  ;;  %v18141_v57 = vor.u32 %v20398_v18, %v18140_v25  ;;  %10434 = vmatpush.bf16.msrb.mxu3 %v17773_v60 }
 0x188   : > { %v18396_v6 = vld [vmem:[%s20977_s27 + $0x2be0] sm:$0xf]  ;;  %v397_v52 = vld.sshfl [vmem:[#allocation1 + $0x20] sm:$0xff pattern:$0x73625140]  ;;  %v18269_v58 = vor.u32 %v20430_v48, %v18268_v4  ;;  %10440 = vmatpush.bf16.msra.mxu0 %v18013_v55 }
 0x189   : > { %v399_v10 = vld.sshfl [vmem:[#allocation1 + $0x30] sm:$0xff pattern:$0x73625140]  ;;  %v398_v56 = vld.sshfl [vmem:[#allocation1 + $0x28] sm:$0xff pattern:$0x73625140]  ;;  %v18397_v22 = vor.u32 %v20462_v50, %v18396_v6  ;;  %v21807_v0 = vpack.c.bf16 %v397_v52, %v397_v52  ;;  %10453 = vmatpush.bf16.msra.mxu1 %v18141_v57 }
 0x18a   : > { %v17996_v63 = vld [vmem:[%s20977_s27 + $0x28c0] sm:$0xf]  ;;  %v20362_v26 = vld [vmem:[%s20977_s27 + $0x28cc] sm:$0xf0]  ;;  %v21812_v11 = vpack.c.bf16 %v399_v10, %v399_v10  ;;  %v21814_v18 = vpack.c.bf16 %v398_v56, %v398_v56  ;;  %10466 = vmatpush.bf16.msra.mxu2 %v18269_v58  ;;  %10435 = vmatmul.bf16.vlgmr.msrb.gmra.mxu3 %v21818_v20 }
 0x18b   : > { %v18124_v61 = vld [vmem:[%s20977_s27 + $0x29c0] sm:$0xf]  ;;  %24682 = vst [vmem:[#allocation16_spill] sm:$0xff] %v21807_v0  ;;  %v20394_v59 = vld [vmem:[%s20977_s27 + $0x29cc] sm:$0xf0]  ;;  %v17997_v23 = vor.u32 %v20362_v26, %v17996_v63  ;;  %10479 = vmatpush.bf16.msra.mxu3 %v18397_v22  ;;  %10396 = vmatmul.bf16.vlgmr.msrb.gmra.mxu0 %v21807_v0 }
 0x18c   : > { %v18252_v1 = vld [vmem:[%s20977_s27 + $0x2ac0] sm:$0xf]  ;;  %v20426_v2 = vld [vmem:[%s20977_s27 + $0x2acc] sm:$0xf0]  ;;  %24683 = vst [vmem:[#allocation17_spill] sm:$0xff] %v21812_v11  ;;  %v18125_v54 = vor.u32 %v20394_v59, %v18124_v61  ;;  %10422 = vmatmul.bf16.vlgmr.msrb.gmra.mxu2 %v21812_v11  ;;  %10409 = vmatmul.bf16.vlgmr.msrb.gmra.mxu1 %v21814_v18 }
 0x18d   : > { %24684 = vst [vmem:[#allocation18_spill] sm:$0xff] %v21814_v18  ;;  %v18380_v4 = vld [vmem:[%s20977_s27 + $0x2bc0] sm:$0xf]  ;;  %v20458_v13 = vld [vmem:[%s20977_s27 + $0x2bcc] sm:$0xf0]  ;;  %v18253_v25 = vor.u32 %v20426_v2, %v18252_v1  ;;  %10441 = vmatpush.bf16.msra.mxu0 %v17997_v23  ;;  %v10189_v1 = vpop.f32.mrf.mxu0 }
 0x18e   : > { %v17980_v43 = vld [vmem:[%s20977_s27 + $0x28a0] sm:$0xf]  ;;  %v20358_v48 = vld [vmem:[%s20977_s27 + $0x28ac] sm:$0xf0]  ;;  %v18381_v50 = vor.u32 %v20458_v13, %v18380_v4  ;;  %10454 = vmatpush.bf16.msra.mxu1 %v18125_v54  ;;  %v10190_v13 = vadd.f32 %v10189_v1, %v21779_v24  ;;  %v10202_v54 = vpop.f32.mrf.mxu1 }
 0x18f   : > { %v18108_v6 = vld [vmem:[%s20977_s27 + $0x29a0] sm:$0xf]  ;;  %v20390_v29 = vld [vmem:[%s20977_s27 + $0x29ac] sm:$0xf0]  ;;  %v17981_v55 = vor.u32 %v20358_v48, %v17980_v43  ;;  %10467 = vmatpush.bf16.msra.mxu2 %v18253_v25 }
 0x190   : > { %v18236_v51 = vld [vmem:[%s20977_s27 + $0x2aa0] sm:$0xf]  ;;  %v20422_v52 = vld [vmem:[%s20977_s27 + $0x2aac] sm:$0xf0]  ;;  %v18109_v56 = vor.u32 %v20390_v29, %v18108_v6  ;;  %10480 = vmatpush.bf16.msra.mxu3 %v18381_v50 }
 0x191   : > { %v18364_v10 = vld [vmem:[%s20977_s27 + $0x2ba0] sm:$0xf]  ;;  %v20454_v60 = vld [vmem:[%s20977_s27 + $0x2bac] sm:$0xf0]  ;;  %v18237_v62 = vor.u32 %v20422_v52, %v18236_v51  ;;  %10442 = vmatpush.bf16.msra.mxu0 %v17981_v55  ;;  %v10203_v51 = vadd.f32 %v10202_v54, %v10190_v13  ;;  %v10228_v13 = vpop.f32.mrf.mxu3 }
 0x192   : > { %v17964_v57 = vld [vmem:[%s20977_s27 + $0x2880] sm:$0xf]  ;;  %v20354_v58 = vld [vmem:[%s20977_s27 + $0x288c] sm:$0xf0]  ;;  %v18365_v26 = vor.u32 %v20454_v60, %v18364_v10  ;;  %10455 = vmatpush.bf16.msra.mxu1 %v18109_v56 }
 0x193   : > { %v18092_v63 = vld [vmem:[%s20977_s27 + $0x2980] sm:$0xf]  ;;  %v20386_v61 = vld [vmem:[%s20977_s27 + $0x298c] sm:$0xf0]  ;;  %v17965_v23 = vor.u32 %v20354_v58, %v17964_v57  ;;  %10468 = vmatpush.bf16.msra.mxu2 %v18237_v62 }
 0x194   : > { %v18220_v22 = vld [vmem:[%s20977_s27 + $0x2a80] sm:$0xf]  ;;  %v20418_v59 = vld [vmem:[%s20977_s27 + $0x2a8c] sm:$0xf0]  ;;  %v18093_v25 = vor.u32 %v20386_v61, %v18092_v63  ;;  %10481 = vmatpush.bf16.msra.mxu3 %v18365_v26 }
 0x195   : > { %v18348_v2 = vld [vmem:[%s20977_s27 + $0x2b80] sm:$0xf]  ;;  %v20450_v4 = vld [vmem:[%s20977_s27 + $0x2b8c] sm:$0xf0]  ;;  %v18221_v43 = vor.u32 %v20418_v59, %v18220_v22  ;;  %10443 = vmatpush.bf16.msra.mxu0 %v17965_v23  ;;  %v10215_v22 = vpop.f32.mrf.mxu2 }
 0x196   : > { %v17948_v48 = vld [vmem:[%s20977_s27 + $0x2860] sm:$0xf]  ;;  %v20350_v6 = vld [vmem:[%s20977_s27 + $0x286c] sm:$0xf0]  ;;  %v18349_v29 = vor.u32 %v20450_v4, %v18348_v2  ;;  %10456 = vmatpush.bf16.msra.mxu1 %v18093_v25  ;;  %v10216_v4 = vadd.f32 %v10215_v22, %v10203_v51  ;;  %v10191_v25 = vpop.f32.mrf.mxu0  ;;  %v322_v22 = vld [vmem:[%s20991_s21 + $0x58] sm:$0xff] }
 0x197   : > { %v18076_v50 = vld [vmem:[%s20977_s27 + $0x2960] sm:$0xf]  ;;  %v20382_v52 = vld [vmem:[%s20977_s27 + $0x296c] sm:$0xf0]  ;;  %v17949_v56 = vor.u32 %v20350_v6, %v17948_v48  ;;  %10469 = vmatpush.bf16.msra.mxu2 %v18221_v43 }
 0x198   : > { %v18204_v10 = vld [vmem:[%s20977_s27 + $0x2a60] sm:$0xf]  ;;  %v20414_v24 = vld [vmem:[%s20977_s27 + $0x2a6c] sm:$0xf0]  ;;  %v18077_v62 = vor.u32 %v20382_v52, %v18076_v50  ;;  %10482 = vmatpush.bf16.msra.mxu3 %v18349_v29  ;;  %v10204_v50 = vpop.f32.mrf.mxu1  ;;  %v21859_v29 = vadd.f32 %v10228_v13, %v10216_v4 }
 0x199   : > { %v18332_v60 = vld [vmem:[%s20977_s27 + $0x2b60] sm:$0xf]  ;;  %v20446_v55 = vld [vmem:[%s20977_s27 + $0x2b6c] sm:$0xf0]  ;;  %v18205_v57 = vor.u32 %v20414_v24, %v18204_v10  ;;  %10444 = vmatpush.bf16.msra.mxu0 %v17949_v56  ;;  %v10230_v18 = vpop.f32.mrf.mxu3 }
 0x19a   : > { %v17932_v58 = vld [vmem:[%s20977_s27 + $0x2840] sm:$0xf]  ;;  %v20346_v63 = vld [vmem:[%s20977_s27 + $0x284c] sm:$0xf0]  ;;  %v18333_v61 = vor.u32 %v20446_v55, %v18332_v60  ;;  %10457 = vmatpush.bf16.msra.mxu1 %v18077_v62 }
 0x19b   : > { %v18060_v26 = vld [vmem:[%s20977_s27 + $0x2940] sm:$0xf]  ;;  %v20378_v59 = vld [vmem:[%s20977_s27 + $0x294c] sm:$0xf0]  ;;  %v17933_v43 = vor.u32 %v20346_v63, %v17932_v58  ;;  %10470 = vmatpush.bf16.msra.mxu2 %v18205_v57 }
 0x19c   : > { %v18188_v1 = vld [vmem:[%s20977_s27 + $0x2a40] sm:$0xf]  ;;  %v20410_v2 = vld [vmem:[%s20977_s27 + $0x2a4c] sm:$0xf0]  ;;  %v18061_v51 = vor.u32 %v20378_v59, %v18060_v26  ;;  %10483 = vmatpush.bf16.msra.mxu3 %v18333_v61  ;;  %v335_v61 = vmax.f32 %v322_v22, 0.0 }
 0x19d   : > { %v18316_v23 = vld [vmem:[%s20977_s27 + $0x2b40] sm:$0xf]  ;;  %v20442_v54 = vld [vmem:[%s20977_s27 + $0x2b4c] sm:$0xf0]  ;;  %v18189_v52 = vor.u32 %v20410_v2, %v18188_v1  ;;  %10445 = vmatpush.bf16.msra.mxu0 %v17933_v43  ;;  %v10217_v20 = vpop.f32.mrf.mxu2 }
 0x19e   : > { %v17916_v48 = vld [vmem:[%s20977_s27 + $0x2820] sm:$0xf]  ;;  %v20342_v6 = vld [vmem:[%s20977_s27 + $0x282c] sm:$0xf0]  ;;  %v18317_v55 = vor.u32 %v20442_v54, %v18316_v23  ;;  %10458 = vmatpush.bf16.msra.mxu1 %v18061_v51  ;;  %402 = vst [vmem:[#allocation1 + $0x20] ss:$4 sm:$0xff] %v335_v61 }
 0x19f   : > { %v18044_v10 = vld [vmem:[%s20977_s27 + $0x2920] sm:$0xf]  ;;  %v20374_v24 = vld [vmem:[%s20977_s27 + $0x292c] sm:$0xf0]  ;;  %v17917_v26 = vor.u32 %v20342_v6, %v17916_v48  ;;  %10471 = vmatpush.bf16.msra.mxu2 %v18189_v52 }
 0x1a0   : > { %v18172_v60 = vld [vmem:[%s20977_s27 + $0x2a20] sm:$0xf]  ;;  %v20406_v56 = vld [vmem:[%s20977_s27 + $0x2a2c] sm:$0xf0]  ;;  %v18045_v4 = vor.u32 %v20374_v24, %v18044_v10  ;;  %10484 = vmatpush.bf16.msra.mxu3 %v18317_v55 }
 0x1a1   : > { %v18300_v58 = vld [vmem:[%s20977_s27 + $0x2b20] sm:$0xf]  ;;  %v20438_v63 = vld [vmem:[%s20977_s27 + $0x2b2c] sm:$0xf0]  ;;  %v18173_v13 = vor.u32 %v20406_v56, %v18172_v60  ;;  %10446 = vmatpush.bf16.msra.mxu0 %v17917_v26 }
 0x1a2   : > { %v17900_v62 = vld [vmem:[%s20977_s27 + $0x2800] sm:$0xf]  ;;  %v20338_v57 = vld [vmem:[%s20977_s27 + $0x280c] sm:$0xf0]  ;;  %v18301_v43 = vor.u32 %v20438_v63, %v18300_v58  ;;  %10459 = vmatpush.bf16.msra.mxu1 %v18045_v4 }
 0x1a3   : > { %v18028_v59 = vld [vmem:[%s20977_s27 + $0x2900] sm:$0xf]  ;;  %v20370_v1 = vld [vmem:[%s20977_s27 + $0x290c] sm:$0xf0]  ;;  %v17901_v51 = vor.u32 %v20338_v57, %v17900_v62  ;;  %10472 = vmatpush.bf16.msra.mxu2 %v18173_v13 }
 0x1a4   : > { %v18156_v2 = vld [vmem:[%s20977_s27 + $0x2a00] sm:$0xf]  ;;  %v20402_v23 = vld [vmem:[%s20977_s27 + $0x2a0c] sm:$0xf0]  ;;  %v18029_v60 = vor.u32 %v20370_v1, %v18028_v59  ;;  %10485 = vmatpush.bf16.msra.mxu3 %v18301_v43 }
 0x1a5   : > { %v18284_v54 = vld [vmem:[%s20977_s27 + $0x2b00] sm:$0xf]  ;;  %v20434_v25 = vld [vmem:[%s20977_s27 + $0x2b0c] sm:$0xf0]  ;;  %v18157_v55 = vor.u32 %v20402_v23, %v18156_v2  ;;  %10447 = vmatpush.bf16.msra.mxu0 %v17901_v51 }
 0x1a6   : > { %v18524_v48 = vld [vmem:[%s20977_s27 + $0x2ce0] sm:$0xf]  ;;  %v20494_v6 = vld [vmem:[%s20977_s27 + $0x2cec] sm:$0xf0]  ;;  %v18285_v18 = vor.u32 %v20434_v25, %v18284_v54  ;;  %10460 = vmatpush.bf16.msra.mxu1 %v18029_v60 }
 0x1a7   : > { %v18652_v50 = vld [vmem:[%s20977_s27 + $0x2de0] sm:$0xf]  ;;  %v20526_v11 = vld [vmem:[%s20977_s27 + $0x2dec] sm:$0xf0]  ;;  %v18525_v58 = vor.u32 %v20494_v6, %v18524_v48  ;;  %10473 = vmatpush.bf16.msra.mxu2 %v18157_v55 }
 0x1a8   : > { %v18780_v0 = vld [vmem:[%s20977_s27 + $0x2ee0] sm:$0xf]  ;;  %v20558_v52 = vld [vmem:[%s20977_s27 + $0x2eec] sm:$0xf0]  ;;  %v18653_v57 = vor.u32 %v20526_v11, %v18652_v50  ;;  %10486 = vmatpush.bf16.msra.mxu3 %v18285_v18 }
 0x1a9   : > { %v18908_v10 = vld [vmem:[%s20977_s27 + $0x2fe0] sm:$0xf]  ;;  %v20590_v24 = vld [vmem:[%s20977_s27 + $0x2fec] sm:$0xf0]  ;;  %v18781_v22 = vor.u32 %v20558_v52, %v18780_v0  ;;  %10492 = vmatpush.bf16.msrb.mxu0 %v18525_v58 }
 0x1aa   : > { %v403_v56 = vld.sshfl [vmem:[#allocation1] sm:$0xff pattern:$0x73625140]  ;;  %v405_v20 = vld.sshfl [vmem:[#allocation1 + $0x10] sm:$0xff pattern:$0x73625140]  ;;  %v18909_v59 = vor.u32 %v20590_v24, %v18908_v10  ;;  %10505 = vmatpush.bf16.msrb.mxu1 %v18653_v57 }
 0x1ab   : > { %v404_v63 = vld.sshfl [vmem:[#allocation1 + $0x8] sm:$0xff pattern:$0x73625140]  ;;  %v406_v62 = vld.sshfl [vmem:[#allocation1 + $0x18] sm:$0xff pattern:$0x73625140]  ;;  %v21887_v1 = vpack.c.bf16 %v403_v56, %v403_v56  ;;  %v21892_v54 = vpack.c.bf16 %v405_v20, %v405_v20  ;;  %10518 = vmatpush.bf16.msrb.mxu2 %v18781_v22 }
 0x1ac   : > { %v18508_v26 = vld [vmem:[%s20977_s27 + $0x2cc0] sm:$0xf]  ;;  %v20490_v61 = vld [vmem:[%s20977_s27 + $0x2ccc] sm:$0xf0]  ;;  %v21894_v11 = vpack.c.bf16 %v404_v63, %v404_v63  ;;  %v21898_v43 = vpack.c.bf16 %v406_v62, %v406_v62  ;;  %10531 = vmatpush.bf16.msrb.mxu3 %v18909_v59 }
 0x1ad   : > { %v18636_v4 = vld [vmem:[%s20977_s27 + $0x2dc0] sm:$0xf]  ;;  %24686 = vst [vmem:[#allocation20_spill] sm:$0xff] %v21887_v1  ;;  %v20522_v2 = vld [vmem:[%s20977_s27 + $0x2dcc] sm:$0xf0]  ;;  %v18509_v48 = vor.u32 %v20490_v61, %v18508_v26  ;;  %10448 = vmatmul.bf16.vlgmr.msra.gmra.mxu0 %v21887_v1  ;;  %10474 = vmatmul.bf16.vlgmr.msra.gmra.mxu2 %v21892_v54 }
 0x1ae   : > { %v18764_v13 = vld [vmem:[%s20977_s27 + $0x2ec0] sm:$0xf]  ;;  %v20554_v23 = vld [vmem:[%s20977_s27 + $0x2ecc] sm:$0xf0]  ;;  %24687 = vst [vmem:[#allocation21_spill] sm:$0xff] %v21892_v54  ;;  %v18637_v6 = vor.u32 %v20522_v2, %v18636_v4  ;;  %10461 = vmatmul.bf16.vlgmr.msra.gmra.mxu1 %v21894_v11  ;;  %10487 = vmatmul.bf16.vlgmr.msra.gmra.mxu3 %v21898_v43 }
 0x1af   : > { %24688 = vst [vmem:[#allocation22_spill] sm:$0xff] %v21894_v11  ;;  %v18892_v0 = vld [vmem:[%s20977_s27 + $0x2fc0] sm:$0xf]  ;;  %v20586_v25 = vld [vmem:[%s20977_s27 + $0x2fcc] sm:$0xf0]  ;;  %v18765_v50 = vor.u32 %v20554_v23, %v18764_v13  ;;  %10493 = vmatpush.bf16.msrb.mxu0 %v18509_v48  ;;  %v10241_v13 = vpop.f32.mrf.mxu0 }
 0x1b0   : > { %24689 = vst [vmem:[#allocation23_spill] sm:$0xff] %v21898_v43  ;;  %v18492_v51 = vld [vmem:[%s20977_s27 + $0x2ca0] sm:$0xf]  ;;  %v20486_v52 = vld [vmem:[%s20977_s27 + $0x2cac] sm:$0xf0]  ;;  %v18893_v24 = vor.u32 %v20586_v25, %v18892_v0  ;;  %10506 = vmatpush.bf16.msrb.mxu1 %v18637_v6  ;;  %v10242_v25 = vadd.f32 %v10241_v13, %v21859_v29  ;;  %v10254_v6 = vpop.f32.mrf.mxu1 }
 0x1b1   : > { %v18620_v10 = vld [vmem:[%s20977_s27 + $0x2da0] sm:$0xf]  ;;  %v20518_v60 = vld [vmem:[%s20977_s27 + $0x2dac] sm:$0xf0]  ;;  %v18493_v58 = vor.u32 %v20486_v52, %v18492_v51  ;;  %10519 = vmatpush.bf16.msrb.mxu2 %v18765_v50  ;;  %v12894_v54 = vld [vmem:[%s20977_s27 + $0xf0] sm:$0xf0] }
 0x1b2   : > { %v18748_v55 = vld [vmem:[%s20977_s27 + $0x2ea0] sm:$0xf]  ;;  %v20550_v56 = vld [vmem:[%s20977_s27 + $0x2eac] sm:$0xf0]  ;;  %v18621_v63 = vor.u32 %v20518_v60, %v18620_v10  ;;  %10532 = vmatpush.bf16.msrb.mxu3 %v18893_v24  ;;  %v19116_v1 = vld [vmem:[%s20977_s27 + $0x1e4] sm:$0xf] }
 0x1b3   : > { %v18876_v20 = vld [vmem:[%s20977_s27 + $0x2fa0] sm:$0xf]  ;;  %v20582_v18 = vld [vmem:[%s20977_s27 + $0x2fac] sm:$0xf0]  ;;  %v18749_v62 = vor.u32 %v20550_v56, %v18748_v55  ;;  %10494 = vmatpush.bf16.msrb.mxu0 %v18493_v58  ;;  %v10255_v55 = vadd.f32 %v10254_v6, %v10242_v25  ;;  %v10280_v25 = vpop.f32.mrf.mxu3 }
 0x1b4   : > { %v18476_v57 = vld [vmem:[%s20977_s27 + $0x2c80] sm:$0xf]  ;;  %v20482_v22 = vld [vmem:[%s20977_s27 + $0x2c8c] sm:$0xf0]  ;;  %v18877_v61 = vor.u32 %v20582_v18, %v18876_v20  ;;  %10507 = vmatpush.bf16.msrb.mxu1 %v18621_v63 }
 0x1b5   : > { %v18604_v26 = vld [vmem:[%s20977_s27 + $0x2d80] sm:$0xf]  ;;  %v20514_v4 = vld [vmem:[%s20977_s27 + $0x2d8c] sm:$0xf0]  ;;  %v18477_v48 = vor.u32 %v20482_v22, %v18476_v57  ;;  %10520 = vmatpush.bf16.msrb.mxu2 %v18749_v62 }
 0x1b6   : > { %v18732_v59 = vld [vmem:[%s20977_s27 + $0x2e80] sm:$0xf]  ;;  %v20546_v2 = vld [vmem:[%s20977_s27 + $0x2e8c] sm:$0xf0]  ;;  %v18605_v50 = vor.u32 %v20514_v4, %v18604_v26  ;;  %10533 = vmatpush.bf16.msrb.mxu3 %v18877_v61 }
 0x1b7   : > { %v18860_v23 = vld [vmem:[%s20977_s27 + $0x2f80] sm:$0xf]  ;;  %v20578_v0 = vld [vmem:[%s20977_s27 + $0x2f8c] sm:$0xf0]  ;;  %v18733_v51 = vor.u32 %v20546_v2, %v18732_v59  ;;  %10495 = vmatpush.bf16.msrb.mxu0 %v18477_v48  ;;  %v10267_v59 = vpop.f32.mrf.mxu2 }
 0x1b8   : > { %v18460_v52 = vld [vmem:[%s20977_s27 + $0x2c60] sm:$0xf]  ;;  %v20478_v10 = vld [vmem:[%s20977_s27 + $0x2c6c] sm:$0xf0]  ;;  %v18861_v60 = vor.u32 %v20578_v0, %v18860_v23  ;;  %10508 = vmatpush.bf16.msrb.mxu1 %v18605_v50  ;;  %v10268_v0 = vadd.f32 %v10267_v59, %v10255_v55  ;;  %v10243_v50 = vpop.f32.mrf.mxu0 }
 0x1b9   : > { %v18588_v24 = vld [vmem:[%s20977_s27 + $0x2d60] sm:$0xf]  ;;  %v20510_v56 = vld [vmem:[%s20977_s27 + $0x2d6c] sm:$0xf0]  ;;  %v18461_v63 = vor.u32 %v20478_v10, %v18460_v52  ;;  %10521 = vmatpush.bf16.msrb.mxu2 %v18733_v51 }
 0x1ba   : > { %v18716_v20 = vld [vmem:[%s20977_s27 + $0x2e60] sm:$0xf]  ;;  %v20542_v29 = vld [vmem:[%s20977_s27 + $0x2e6c] sm:$0xf0]  ;;  %v18589_v62 = vor.u32 %v20510_v56, %v18588_v24  ;;  %10534 = vmatpush.bf16.msrb.mxu3 %v18861_v60  ;;  %v10256_v24 = vpop.f32.mrf.mxu1  ;;  %v21939_v60 = vadd.f32 %v10280_v25, %v10268_v0 }
 0x1bb   : > { %v18844_v18 = vld [vmem:[%s20977_s27 + $0x2f60] sm:$0xf]  ;;  %v20574_v58 = vld [vmem:[%s20977_s27 + $0x2f6c] sm:$0xf0]  ;;  %v18717_v57 = vor.u32 %v20542_v29, %v18716_v20  ;;  %10496 = vmatpush.bf16.msrb.mxu0 %v18461_v63  ;;  %v19084_v24 = vld [vmem:[%s20977_s27 + $0xe4] sm:$0xf]  ;;  %v10282_v11 = vpop.f32.mrf.mxu3 }
 0x1bc   : > { %v18444_v22 = vld [vmem:[%s20977_s27 + $0x2c40] sm:$0xf]  ;;  %v20474_v26 = vld [vmem:[%s20977_s27 + $0x2c4c] sm:$0xf0]  ;;  %v18845_v4 = vor.u32 %v20574_v58, %v18844_v18  ;;  %10509 = vmatpush.bf16.msrb.mxu1 %v18589_v62 }
 0x1bd   : > { %v18572_v61 = vld [vmem:[%s20977_s27 + $0x2d40] sm:$0xf]  ;;  %v20506_v2 = vld [vmem:[%s20977_s27 + $0x2d4c] sm:$0xf0]  ;;  %v18445_v51 = vor.u32 %v20474_v26, %v18444_v22  ;;  %10522 = vmatpush.bf16.msrb.mxu2 %v18717_v57 }
 0x1be   : > { %v18700_v13 = vld [vmem:[%s20977_s27 + $0x2e40] sm:$0xf]  ;;  %v20538_v23 = vld [vmem:[%s20977_s27 + $0x2e4c] sm:$0xf0]  ;;  %v18573_v55 = vor.u32 %v20506_v2, %v18572_v61  ;;  %10535 = vmatpush.bf16.msrb.mxu3 %v18845_v4 }
 0x1bf   : > { %v18828_v48 = vld [vmem:[%s20977_s27 + $0x2f40] sm:$0xf]  ;;  %v20570_v6 = vld [vmem:[%s20977_s27 + $0x2f4c] sm:$0xf0]  ;;  %v18701_v56 = vor.u32 %v20538_v23, %v18700_v13  ;;  %10497 = vmatpush.bf16.msrb.mxu0 %v18445_v51  ;;  %v10269_v43 = vpop.f32.mrf.mxu2 }
 0x1c0   : > { %v18428_v52 = vld [vmem:[%s20977_s27 + $0x2c20] sm:$0xf]  ;;  %v20470_v10 = vld [vmem:[%s20977_s27 + $0x2c2c] sm:$0xf0]  ;;  %v18829_v58 = vor.u32 %v20570_v6, %v18828_v48  ;;  %10510 = vmatpush.bf16.msrb.mxu1 %v18573_v55 }
 0x1c1   : > { %v18556_v20 = vld [vmem:[%s20977_s27 + $0x2d20] sm:$0xf]  ;;  %v20502_v29 = vld [vmem:[%s20977_s27 + $0x2d2c] sm:$0xf0]  ;;  %v18429_v61 = vor.u32 %v20470_v10, %v18428_v52  ;;  %10523 = vmatpush.bf16.msrb.mxu2 %v18701_v56  ;;  %v13022_v56 = vld [vmem:[%s20977_s27 + $0x1f0] sm:$0xf0] }
 0x1c2   : > { %v18684_v18 = vld [vmem:[%s20977_s27 + $0x2e20] sm:$0xf]  ;;  %v20534_v63 = vld [vmem:[%s20977_s27 + $0x2e2c] sm:$0xf0]  ;;  %v18557_v0 = vor.u32 %v20502_v29, %v18556_v20  ;;  %10536 = vmatpush.bf16.msrb.mxu3 %v18829_v58  ;;  %v19148_v20 = vld [vmem:[%s20977_s27 + $0x2e4] sm:$0xf] }
 0x1c3   : > { %v18812_v22 = vld [vmem:[%s20977_s27 + $0x2f20] sm:$0xf]  ;;  %v20566_v26 = vld [vmem:[%s20977_s27 + $0x2f2c] sm:$0xf0]  ;;  %v18685_v25 = vor.u32 %v20534_v63, %v18684_v18  ;;  %10498 = vmatpush.bf16.msrb.mxu0 %v18429_v61  ;;  %v13150_v29 = vld [vmem:[%s20977_s27 + $0x2f0] sm:$0xf0] }
 0x1c4   : > { %v18412_v62 = vld [vmem:[%s20977_s27 + $0x2c00] sm:$0xf]  ;;  %v20466_v57 = vld [vmem:[%s20977_s27 + $0x2c0c] sm:$0xf0]  ;;  %v18813_v51 = vor.u32 %v20566_v26, %v18812_v22  ;;  %10511 = vmatpush.bf16.msrb.mxu1 %v18557_v0  ;;  %v19080_v0 = vld [vmem:[%s20977_s27 + $0xc4] sm:$0xf] }
 0x1c5   : > { %v323_v59 = vld [vmem:[%s20991_s21 + $0x60] sm:$0x3]  ;;  %v18540_v2 = vld [vmem:[%s20977_s27 + $0x2d00] sm:$0xf]  ;;  %v18413_v55 = vor.u32 %v20466_v57, %v18412_v62  ;;  %10524 = vmatpush.bf16.msrb.mxu2 %v18685_v25  ;;  %v12897_v57 = vor.u32 %v19084_v24, %v12894_v54  ;;  %v19112_v25 = vld [vmem:[%s20977_s27 + $0x1c4] sm:$0xf] }
 0x1c6   : > { %v20498_v13 = vld [vmem:[%s20977_s27 + $0x2d0c] sm:$0xf0]  ;;  %v18668_v23 = vld [vmem:[%s20977_s27 + $0x2e00] sm:$0xf]  ;;  %v336_v4 = vmax.f32 %v323_v59, 0.0  ;;  %10537 = vmatpush.bf16.msrb.mxu3 %v18813_v51  ;;  %v13025_v59 = vor.u32 %v19116_v1, %v13022_v56 }
 0x1c7   : > { %v20530_v48 = vld [vmem:[%s20977_s27 + $0x2e0c] sm:$0xf0]  ;;  %v18796_v6 = vld [vmem:[%s20977_s27 + $0x2f00] sm:$0xf]  ;;  %v18541_v18 = vor.u32 %v20498_v13, %v18540_v2  ;;  %10499 = vmatpush.bf16.msrb.mxu0 %v18413_v55  ;;  %v13153_v2 = vor.u32 %v19148_v20, %v13150_v29  ;;  %v19144_v1 = vld [vmem:[%s20977_s27 + $0x2c4] sm:$0xf] }
 0x1c8   : > { %v20562_v50 = vld [vmem:[%s20977_s27 + $0x2f0c] sm:$0xf0]  ;;  %v19036_v52 = vld [vmem:[%s20977_s27 + $0x30e0] sm:$0xf]  ;;  %411 = vst [vmem:[#allocation1] ss:$4 sm:$0xff] %v336_v4  ;;  %v18669_v58 = vor.u32 %v20530_v48, %v18668_v23 }
 0x1c9   : > { %v20622_v10 = vld [vmem:[%s20977_s27 + $0x30ec] sm:$0xf0]  ;;  %v409_v43 = vld.sshfl [vmem:[#allocation1 + $0x30] sm:$0xff pattern:$0x73625140]  ;;  %v18797_v11 = vor.u32 %v20562_v50, %v18796_v6  ;;  %10512 = vmatpush.bf16.msrb.mxu1 %v18541_v18 }
 0x1ca   : > { %v407_v63 = vld.sshfl [vmem:[#allocation1 + $0x20] sm:$0xff pattern:$0x73625140]  ;;  %v19037_v22 = vor.u32 %v20622_v10, %v19036_v52  ;;  %v408_v26 = vld.sshfl [vmem:[#allocation1 + $0x28] sm:$0xff pattern:$0x73625140]  ;;  %10525 = vmatpush.bf16.msrb.mxu2 %v18669_v58  ;;  %v21972_v6 = vpack.c.bf16 %v409_v43, %v409_v43 }
 0x1cb   : > { %v410_v62 = vld.sshfl [vmem:[#allocation1 + $0x38] sm:$0xff pattern:$0x73625140]  ;;  %v19020_v61 = vld [vmem:[%s20977_s27 + $0x30c0] sm:$0xf]  ;;  %v21967_v13 = vpack.c.bf16 %v407_v63, %v407_v63  ;;  %v21974_v54 = vpack.c.bf16 %v408_v26, %v408_v26  ;;  %10538 = vmatpush.bf16.msrb.mxu3 %v18797_v11 }
 0x1cc   : > { %v20618_v4 = vld [vmem:[%s20977_s27 + $0x30cc] sm:$0xf0]  ;;  %v12878_v23 = vld [vmem:[%s20977_s27 + $0xd0] sm:$0xf0]  ;;  %24691 = vst [vmem:[#allocation25_spill] sm:$0xff] %v21972_v6  ;;  %10544 = vmatpush.bf16.msra.mxu0 %v19037_v22  ;;  %v21978_v51 = vpack.c.bf16 %v410_v62, %v410_v62 }
 0x1cd   : > { %24690 = vst [vmem:[#allocation24_spill] sm:$0xff] %v21967_v13  ;;  %v13006_v48 = vld [vmem:[%s20977_s27 + $0x1d0] sm:$0xf0]  ;;  %v19021_v52 = vor.u32 %v20618_v4, %v19020_v61  ;;  %10557 = vmatpush.bf16.msra.mxu1 %v12897_v57  ;;  %v12881_v10 = vor.u32 %v19080_v0, %v12878_v23  ;;  %v19004_v55 = vld [vmem:[%s20977_s27 + $0x30a0] sm:$0xf]  ;;  %10500 = vmatmul.bf16.vlgmr.msrb.gmra.mxu0 %v21967_v13 }
 0x1ce   : > { %24692 = vst [vmem:[#allocation26_spill] sm:$0xff] %v21974_v54  ;;  %v13134_v50 = vld [vmem:[%s20977_s27 + $0x2d0] sm:$0xf0]  ;;  %10570 = vmatpush.bf16.msra.mxu2 %v13025_v59  ;;  %v13009_v24 = vor.u32 %v19112_v25, %v13006_v48  ;;  %v20614_v56 = vld [vmem:[%s20977_s27 + $0x30ac] sm:$0xf0]  ;;  %10513 = vmatmul.bf16.vlgmr.msrb.gmra.mxu1 %v21974_v54  ;;  %v10293_v25 = vpop.f32.mrf.mxu0 }
 0x1cf   : > { %24693 = vst [vmem:[#allocation27_spill] sm:$0xff] %v21978_v51  ;;  %v19076_v20 = vld [vmem:[%s20977_s27 + $0xa4] sm:$0xf]  ;;  %10583 = vmatpush.bf16.msra.mxu3 %v13153_v2  ;;  %v13137_v29 = vor.u32 %v19144_v1, %v13134_v50  ;;  %v12862_v18 = vld [vmem:[%s20977_s27 + $0xb0] sm:$0xf0]  ;;  %10526 = vmatmul.bf16.vlgmr.msrb.gmra.mxu2 %v21972_v6  ;;  %v19005_v22 = vor.u32 %v20614_v56, %v19004_v55 }
 0x1d0   : > { %v19108_v58 = vld [vmem:[%s20977_s27 + $0x1a4] sm:$0xf]  ;;  %v12990_v63 = vld [vmem:[%s20977_s27 + $0x1b0] sm:$0xf0]  ;;  %10539 = vmatmul.bf16.vlgmr.msrb.gmra.mxu3 %v21978_v51  ;;  %10545 = vmatpush.bf16.msra.mxu0 %v19021_v52  ;;  %v12865_v26 = vor.u32 %v19076_v20, %v12862_v18  ;;  %v18988_v57 = vld [vmem:[%s20977_s27 + $0x3080] sm:$0xf]  ;;  %v10294_v50 = vadd.f32 %v10293_v25, %v21939_v60 }
 0x1d1   : > { %v19140_v43 = vld [vmem:[%s20977_s27 + $0x2a4] sm:$0xf]  ;;  %v13118_v11 = vld [vmem:[%s20977_s27 + $0x2b0] sm:$0xf0]  ;;  %10558 = vmatpush.bf16.msra.mxu1 %v12881_v10  ;;  %v12993_v62 = vor.u32 %v19108_v58, %v12990_v63  ;;  %v20610_v59 = vld [vmem:[%s20977_s27 + $0x308c] sm:$0xf0]  ;;  %v10306_v10 = vpop.f32.mrf.mxu1 }
 0x1d2   : > { %10571 = vmatpush.bf16.msra.mxu2 %v13009_v24  ;;  %v19072_v61 = vld [vmem:[%s20977_s27 + $0x84] sm:$0xf]  ;;  %v13121_v4 = vor.u32 %v19140_v43, %v13118_v11  ;;  %v12846_v0 = vld [vmem:[%s20977_s27 + $0x90] sm:$0xf0]  ;;  %v18989_v52 = vor.u32 %v20610_v59, %v18988_v57  ;;  %v18972_v56 = vld [vmem:[%s20977_s27 + $0x3060] sm:$0xf]  ;;  %v10307_v58 = vadd.f32 %v10306_v10, %v10294_v50  ;;  %v10332_v50 = vpop.f32.mrf.mxu3 }
 0x1d3   : > { %10584 = vmatpush.bf16.msra.mxu3 %v13137_v29  ;;  %v19104_v2 = vld [vmem:[%s20977_s27 + $0x184] sm:$0xf]  ;;  %v12974_v23 = vld [vmem:[%s20977_s27 + $0x190] sm:$0xf0]  ;;  %v12849_v24 = vor.u32 %v19072_v61, %v12846_v0  ;;  %v20606_v20 = vld [vmem:[%s20977_s27 + $0x306c] sm:$0xf0] }
 0x1d4   : > { %v19136_v48 = vld [vmem:[%s20977_s27 + $0x284] sm:$0xf]  ;;  %v13102_v1 = vld [vmem:[%s20977_s27 + $0x290] sm:$0xf0]  ;;  %10546 = vmatpush.bf16.msra.mxu0 %v19005_v22  ;;  %v12977_v55 = vor.u32 %v19104_v2, %v12974_v23  ;;  %v18956_v59 = vld [vmem:[%s20977_s27 + $0x3040] sm:$0xf]  ;;  %v10319_v2 = vpop.f32.mrf.mxu2 }
 0x1d5   : > { %10559 = vmatpush.bf16.msra.mxu1 %v12865_v26  ;;  %v19068_v29 = vld [vmem:[%s20977_s27 + $0x64] sm:$0xf]  ;;  %v13105_v18 = vor.u32 %v19136_v48, %v13102_v1  ;;  %v12830_v63 = vld [vmem:[%s20977_s27 + $0x70] sm:$0xf0]  ;;  %v18973_v26 = vor.u32 %v20606_v20, %v18972_v56  ;;  %v20602_v61 = vld [vmem:[%s20977_s27 + $0x304c] sm:$0xf0]  ;;  %v10320_v1 = vadd.f32 %v10319_v2, %v10307_v58 }
 0x1d6   : > { %10572 = vmatpush.bf16.msra.mxu2 %v12993_v62  ;;  %v19100_v43 = vld [vmem:[%s20977_s27 + $0x164] sm:$0xf]  ;;  %v12958_v60 = vld [vmem:[%s20977_s27 + $0x170] sm:$0xf0]  ;;  %v12833_v62 = vor.u32 %v19068_v29, %v12830_v63  ;;  %v18940_v58 = vld [vmem:[%s20977_s27 + $0x3020] sm:$0xf] }
 0x1d7   : > { %10585 = vmatpush.bf16.msra.mxu3 %v13121_v4  ;;  %v19132_v11 = vld [vmem:[%s20977_s27 + $0x264] sm:$0xf]  ;;  %v13086_v22 = vld [vmem:[%s20977_s27 + $0x270] sm:$0xf0]  ;;  %v12961_v57 = vor.u32 %v19100_v43, %v12958_v60  ;;  %v22017_v20 = vadd.f32 %v10332_v50, %v10320_v1  ;;  %v20598_v63 = vld [vmem:[%s20977_s27 + $0x302c] sm:$0xf0] }
 0x1d8   : > { %10547 = vmatpush.bf16.msra.mxu0 %v18989_v52  ;;  %v19064_v4 = vld [vmem:[%s20977_s27 + $0x44] sm:$0xf]  ;;  %v13089_v0 = vor.u32 %v19132_v11, %v13086_v22  ;;  %v12814_v23 = vld [vmem:[%s20977_s27 + $0x50] sm:$0xf0] }
 0x1d9   : > { %10560 = vmatpush.bf16.msra.mxu1 %v12849_v24  ;;  %v19096_v25 = vld [vmem:[%s20977_s27 + $0x144] sm:$0xf]  ;;  %v12942_v48 = vld [vmem:[%s20977_s27 + $0x150] sm:$0xf0]  ;;  %v10295_v24 = vpop.f32.mrf.mxu0  ;;  %v10308_v56 = vpop.f32.mrf.mxu1  ;;  %v12817_v29 = vor.u32 %v19064_v4, %v12814_v23  ;;  %v20594_v4 = vld [vmem:[%s20977_s27 + $0x300c] sm:$0xf0] }
 0x1da   : > { %10573 = vmatpush.bf16.msra.mxu2 %v12977_v55  ;;  %v19128_v52 = vld [vmem:[%s20977_s27 + $0x244] sm:$0xf]  ;;  %v13070_v10 = vld [vmem:[%s20977_s27 + $0x250] sm:$0xf0]  ;;  %v18957_v55 = vor.u32 %v20602_v61, %v18956_v59  ;;  %v18941_v59 = vor.u32 %v20598_v63, %v18940_v58  ;;  %v18924_v61 = vld [vmem:[%s20977_s27 + $0x3000] sm:$0xf] }
 0x1db   : > { %10586 = vmatpush.bf16.msra.mxu3 %v13105_v18  ;;  %v12945_v18 = vor.u32 %v19096_v25, %v12942_v48  ;;  %v19060_v43 = vld [vmem:[%s20977_s27 + $0x24] sm:$0xf]  ;;  %v13073_v60 = vor.u32 %v19128_v52, %v13070_v10  ;;  %v12798_v11 = vld [vmem:[%s20977_s27 + $0x30] sm:$0xf0] }
 0x1dc   : > { %10548 = vmatpush.bf16.msra.mxu0 %v18973_v26  ;;  %v19092_v22 = vld [vmem:[%s20977_s27 + $0x124] sm:$0xf]  ;;  %v12926_v26 = vld [vmem:[%s20977_s27 + $0x130] sm:$0xf0] }
 0x1dd   : > { %10561 = vmatpush.bf16.msra.mxu1 %v12833_v62  ;;  %v19124_v62 = vld [vmem:[%s20977_s27 + $0x224] sm:$0xf]  ;;  %v12929_v23 = vor.u32 %v19092_v22, %v12926_v26  ;;  %v12782_v25 = vld [vmem:[%s20977_s27 + $0x10] sm:$0xf0] }
 0x1de   : > { %10574 = vmatpush.bf16.msra.mxu2 %v12961_v57  ;;  %v13054_v57 = vld [vmem:[%s20977_s27 + $0x230] sm:$0xf0]  ;;  %v19056_v2 = vld [vmem:[%s20977_s27 + $0x4] sm:$0xf] }
 0x1df   : > { %10587 = vmatpush.bf16.msra.mxu3 %v13089_v0  ;;  %v12801_v0 = vor.u32 %v19060_v43, %v12798_v11  ;;  %v19088_v48 = vld [vmem:[%s20977_s27 + $0x104] sm:$0xf]  ;;  %v12910_v1 = vld [vmem:[%s20977_s27 + $0x110] sm:$0xf0]  ;;  %v13057_v50 = vor.u32 %v19124_v62, %v13054_v57 }
 0x1e0   : > { %10549 = vmatpush.bf16.msra.mxu0 %v18957_v55  ;;  %v19120_v52 = vld [vmem:[%s20977_s27 + $0x204] sm:$0xf]  ;;  %v13038_v10 = vld [vmem:[%s20977_s27 + $0x210] sm:$0xf0]  ;;  %v10321_v55 = vpop.f32.mrf.mxu2  ;;  %v12913_v26 = vor.u32 %v19088_v48, %v12910_v1 }
 0x1e1   : > { %10562 = vmatpush.bf16.msra.mxu1 %v12817_v29  ;;  %v19180_v24 = vld [vmem:[%s20977_s27 + $0x3e4] sm:$0xf]  ;;  %v13278_v56 = vld [vmem:[%s20977_s27 + $0x3f0] sm:$0xf0]  ;;  %v10334_v29 = vpop.f32.mrf.mxu3  ;;  %v13041_v55 = vor.u32 %v19120_v52, %v13038_v10 }
 0x1e2   : > { %10575 = vmatpush.bf16.msra.mxu2 %v12945_v18  ;;  %v19212_v58 = vld [vmem:[%s20977_s27 + $0x4e4] sm:$0xf]  ;;  %v13406_v63 = vld [vmem:[%s20977_s27 + $0x4f0] sm:$0xf0]  ;;  %v18925_v18 = vor.u32 %v20594_v4, %v18924_v61 }
 0x1e3   : > { %10588 = vmatpush.bf16.msra.mxu3 %v13073_v60  ;;  %v19244_v43 = vld [vmem:[%s20977_s27 + $0x5e4] sm:$0xf]  ;;  %v13534_v11 = vld [vmem:[%s20977_s27 + $0x5f0] sm:$0xf0]  ;;  %v12785_v60 = vor.u32 %v19056_v2, %v12782_v25  ;;  %v13409_v61 = vor.u32 %v19212_v58, %v13406_v63 }
 0x1e4   : > { %10550 = vmatpush.bf16.msra.mxu0 %v18941_v59  ;;  %v19276_v22 = vld [vmem:[%s20977_s27 + $0x6e4] sm:$0xf]  ;;  %v13662_v62 = vld [vmem:[%s20977_s27 + $0x6f0] sm:$0xf0]  ;;  %v13281_v59 = vor.u32 %v19180_v24, %v13278_v56  ;;  %v13537_v4 = vor.u32 %v19244_v43, %v13534_v11 }
 0x1e5   : > { %10563 = vmatpush.bf16.msra.mxu1 %v12801_v0  ;;  %v412_v57 = vld.sshfl [vmem:[#allocation1] sm:$0xff pattern:$0x73625140]  ;;  %v19176_v29 = vld [vmem:[%s20977_s27 + $0x3c4] sm:$0xf]  ;;  %v13665_v0 = vor.u32 %v19276_v22, %v13662_v62 }
 0x1e6   : > { %10576 = vmatpush.bf16.msra.mxu2 %v12929_v23  ;;  %v13262_v51 = vld [vmem:[%s20977_s27 + $0x3d0] sm:$0xf0]  ;;  %v19208_v6 = vld [vmem:[%s20977_s27 + $0x4c4] sm:$0xf]  ;;  %v22046_v23 = vpack.c.bf16 %v412_v57, %v412_v57 }
 0x1e7   : > { %10589 = vmatpush.bf16.msra.mxu3 %v13057_v50  ;;  %v13390_v2 = vld [vmem:[%s20977_s27 + $0x4d0] sm:$0xf0]  ;;  %v19240_v25 = vld [vmem:[%s20977_s27 + $0x5c4] sm:$0xf]  ;;  %v13265_v52 = vor.u32 %v19176_v29, %v13262_v51 }
 0x1e8   : > { %10551 = vmatpush.bf16.msra.mxu0 %v18925_v18  ;;  %v13518_v48 = vld [vmem:[%s20977_s27 + $0x5d0] sm:$0xf0]  ;;  %v19272_v1 = vld [vmem:[%s20977_s27 + $0x6c4] sm:$0xf]  ;;  %v13393_v10 = vor.u32 %v19208_v6, %v13390_v2  ;;  %v10345_v2 = vpop.f32.mrf.mxu0 }
 0x1e9   : > { %10564 = vmatpush.bf16.msra.mxu1 %v12785_v60  ;;  %v13646_v50 = vld [vmem:[%s20977_s27 + $0x6d0] sm:$0xf0]  ;;  %v13521_v24 = vor.u32 %v19240_v25, %v13518_v48  ;;  %v19172_v56 = vld [vmem:[%s20977_s27 + $0x3a4] sm:$0xf] }
 0x1ea   : > { %10577 = vmatpush.bf16.msra.mxu2 %v12913_v26  ;;  %v13246_v58 = vld [vmem:[%s20977_s27 + $0x3b0] sm:$0xf0]  ;;  %v19204_v63 = vld [vmem:[%s20977_s27 + $0x4a4] sm:$0xf]  ;;  %v13649_v18 = vor.u32 %v19272_v1, %v13646_v50  ;;  %v10346_v1 = vadd.f32 %v10345_v2, %v22017_v20 }
 0x1eb   : > { %10590 = vmatpush.bf16.msra.mxu3 %v13041_v55  ;;  %10552 = vmatmul.bf16.vlgmr.msra.gmra.mxu0 %v22046_v23  ;;  %v13374_v43 = vld [vmem:[%s20977_s27 + $0x4b0] sm:$0xf0]  ;;  %v19236_v11 = vld [vmem:[%s20977_s27 + $0x5a4] sm:$0xf]  ;;  %v13249_v6 = vor.u32 %v19172_v56, %v13246_v58 }
 0x1ec   : > { %10596 = vmatpush.bf16.msrb.mxu0 %v13281_v59  ;;  %v13502_v22 = vld [vmem:[%s20977_s27 + $0x5b0] sm:$0xf0]  ;;  %v19268_v60 = vld [vmem:[%s20977_s27 + $0x6a4] sm:$0xf]  ;;  %10565 = vmatmul.bf16.vlgmr.msra.gmra.mxu1 %v21103_v35  ;;  %v13377_v26 = vor.u32 %v19204_v63, %v13374_v43 }
 0x1ed   : > { %10609 = vmatpush.bf16.msrb.mxu1 %v13409_v61  ;;  %v13630_v51 = vld [vmem:[%s20977_s27 + $0x6b0] sm:$0xf0]  ;;  %10578 = vmatmul.bf16.vlgmr.msra.gmra.mxu2 %v21109_v42  ;;  %v13505_v62 = vor.u32 %v19236_v11, %v13502_v22  ;;  %v19168_v57 = vld [vmem:[%s20977_s27 + $0x384] sm:$0xf] }
 0x1ee   : > { %10622 = vmatpush.bf16.msrb.mxu2 %v13537_v4  ;;  %10591 = vmatmul.bf16.vlgmr.msra.gmra.mxu3 %v21101_v34  ;;  %v13230_v55 = vld [vmem:[%s20977_s27 + $0x390] sm:$0xf0]  ;;  %v19200_v59 = vld [vmem:[%s20977_s27 + $0x484] sm:$0xf]  ;;  %v13633_v61 = vor.u32 %v19268_v60, %v13630_v51 }
 0x1ef   : > { %10635 = vmatpush.bf16.msrb.mxu3 %v13665_v0  ;;  %v13358_v4 = vld [vmem:[%s20977_s27 + $0x490] sm:$0xf0]  ;;  %v19232_v29 = vld [vmem:[%s20977_s27 + $0x584] sm:$0xf]  ;;  %v13233_v50 = vor.u32 %v19168_v57, %v13230_v55 }
 0x1f0   : > { %10597 = vmatpush.bf16.msrb.mxu0 %v13265_v52  ;;  %v13486_v0 = vld [vmem:[%s20977_s27 + $0x590] sm:$0xf0]  ;;  %v19264_v25 = vld [vmem:[%s20977_s27 + $0x684] sm:$0xf]  ;;  %v10358_v52 = vpop.f32.mrf.mxu1 }
 0x1f1   : > { %10610 = vmatpush.bf16.msrb.mxu1 %v13393_v10  ;;  %v13614_v48 = vld [vmem:[%s20977_s27 + $0x690] sm:$0xf0]  ;;  %v13361_v10 = vor.u32 %v19200_v59, %v13358_v4  ;;  %v19164_v56 = vld [vmem:[%s20977_s27 + $0x364] sm:$0xf]  ;;  %v10359_v43 = vadd.f32 %v10358_v52, %v10346_v1  ;;  %v10371_v4 = vpop.f32.mrf.mxu2  ;;  %v10347_v52 = vpop.f32.mrf.mxu0 }
 0x1f2   : > { %10623 = vmatpush.bf16.msrb.mxu2 %v13521_v24  ;;  %v13489_v24 = vor.u32 %v19232_v29, %v13486_v0  ;;  %v13214_v58 = vld [vmem:[%s20977_s27 + $0x370] sm:$0xf0]  ;;  %v19196_v63 = vld [vmem:[%s20977_s27 + $0x464] sm:$0xf] }
 0x1f3   : > { %10636 = vmatpush.bf16.msrb.mxu3 %v13649_v18  ;;  %v13617_v18 = vor.u32 %v19264_v25, %v13614_v48  ;;  %v13342_v11 = vld [vmem:[%s20977_s27 + $0x470] sm:$0xf0]  ;;  %v19228_v22 = vld [vmem:[%s20977_s27 + $0x564] sm:$0xf]  ;;  %v10372_v25 = vadd.f32 %v10371_v4, %v10359_v43  ;;  %v10384_v48 = vpop.f32.mrf.mxu3 }
 0x1f4   : > { %10598 = vmatpush.bf16.msrb.mxu0 %v13249_v6  ;;  %v13470_v20 = vld [vmem:[%s20977_s27 + $0x570] sm:$0xf0]  ;;  %v19260_v60 = vld [vmem:[%s20977_s27 + $0x664] sm:$0xf]  ;;  %v13217_v6 = vor.u32 %v19164_v56, %v13214_v58 }
 0x1f5   : > { %10611 = vmatpush.bf16.msrb.mxu1 %v13377_v26  ;;  %v13598_v51 = vld [vmem:[%s20977_s27 + $0x670] sm:$0xf0]  ;;  %v13345_v26 = vor.u32 %v19196_v63, %v13342_v11  ;;  %v19160_v57 = vld [vmem:[%s20977_s27 + $0x344] sm:$0xf]  ;;  %v22090_v56 = vadd.f32 %v10384_v48, %v10372_v25 }
 0x1f6   : > { %10624 = vmatpush.bf16.msrb.mxu2 %v13505_v62  ;;  %v13473_v62 = vor.u32 %v19228_v22, %v13470_v20  ;;  %v13198_v55 = vld [vmem:[%s20977_s27 + $0x350] sm:$0xf0]  ;;  %v19192_v59 = vld [vmem:[%s20977_s27 + $0x444] sm:$0xf] }
 0x1f7   : > { %10637 = vmatpush.bf16.msrb.mxu3 %v13633_v61  ;;  %v13601_v61 = vor.u32 %v19260_v60, %v13598_v51  ;;  %v13326_v29 = vld [vmem:[%s20977_s27 + $0x450] sm:$0xf0]  ;;  %v19224_v0 = vld [vmem:[%s20977_s27 + $0x544] sm:$0xf] }
 0x1f8   : > { %10599 = vmatpush.bf16.msrb.mxu0 %v13233_v50  ;;  %v13454_v2 = vld [vmem:[%s20977_s27 + $0x550] sm:$0xf0]  ;;  %v19256_v1 = vld [vmem:[%s20977_s27 + $0x644] sm:$0xf]  ;;  %v13329_v58 = vor.u32 %v19192_v59, %v13326_v29 }
 0x1f9   : > { %10612 = vmatpush.bf16.msrb.mxu1 %v13361_v10  ;;  %v13582_v50 = vld [vmem:[%s20977_s27 + $0x650] sm:$0xf0]  ;;  %v13201_v10 = vor.u32 %v19160_v57, %v13198_v55  ;;  %v13457_v63 = vor.u32 %v19224_v0, %v13454_v2  ;;  %v19188_v11 = vld [vmem:[%s20977_s27 + $0x424] sm:$0xf] }
 0x1fa   : > { %10625 = vmatpush.bf16.msrb.mxu2 %v13489_v24  ;;  %v10360_v24 = vpop.f32.mrf.mxu1  ;;  %v13182_v43 = vld [vmem:[%s20977_s27 + $0x330] sm:$0xf0]  ;;  %v13585_v22 = vor.u32 %v19256_v1, %v13582_v50  ;;  %v19220_v60 = vld [vmem:[%s20977_s27 + $0x524] sm:$0xf]  ;;  %v10373_v50 = vpop.f32.mrf.mxu2 }
 0x1fb   : > { %10638 = vmatpush.bf16.msrb.mxu3 %v13617_v18  ;;  %v19156_v18 = vld [vmem:[%s20977_s27 + $0x324] sm:$0xf]  ;;  %v13310_v20 = vld [vmem:[%s20977_s27 + $0x430] sm:$0xf0] }
 0x1fc   : > { %10600 = vmatpush.bf16.msrb.mxu0 %v13217_v6  ;;  %v13438_v51 = vld [vmem:[%s20977_s27 + $0x530] sm:$0xf0]  ;;  %v19252_v6 = vld [vmem:[%s20977_s27 + $0x624] sm:$0xf]  ;;  %v13313_v59 = vor.u32 %v19188_v11, %v13310_v20 }
 0x1fd   : > { %10613 = vmatpush.bf16.msrb.mxu1 %v13345_v26  ;;  %v13566_v26 = vld [vmem:[%s20977_s27 + $0x630] sm:$0xf0]  ;;  %v19152_v57 = vld [vmem:[%s20977_s27 + $0x304] sm:$0xf] }
 0x1fe   : > { %10626 = vmatpush.bf16.msrb.mxu2 %v13473_v62  ;;  %v13185_v62 = vor.u32 %v19156_v18, %v13182_v43  ;;  %v13166_v55 = vld [vmem:[%s20977_s27 + $0x310] sm:$0xf0]  ;;  %v19184_v4 = vld [vmem:[%s20977_s27 + $0x404] sm:$0xf]  ;;  %v13569_v2 = vor.u32 %v19252_v6, %v13566_v26 }
 0x1ff   : > { %10639 = vmatpush.bf16.msrb.mxu3 %v13601_v61  ;;  %v13441_v61 = vor.u32 %v19220_v60, %v13438_v51  ;;  %v13294_v29 = vld [vmem:[%s20977_s27 + $0x410] sm:$0xf0]  ;;  %v19216_v0 = vld [vmem:[%s20977_s27 + $0x504] sm:$0xf] }
 0x200   : > { %10601 = vmatpush.bf16.msrb.mxu0 %v13201_v10  ;;  %v13422_v25 = vld [vmem:[%s20977_s27 + $0x510] sm:$0xf0]  ;;  %v19248_v48 = vld [vmem:[%s20977_s27 + $0x604] sm:$0xf] }
 0x201   : > { %10614 = vmatpush.bf16.msrb.mxu1 %v13329_v58  ;;  %v13550_v1 = vld [vmem:[%s20977_s27 + $0x610] sm:$0xf0]  ;;  %v19308_v52 = vld [vmem:[%s20977_s27 + $0x7e4] sm:$0xf]  ;;  %v10386_v58 = vpop.f32.mrf.mxu3  ;;  %v13425_v20 = vor.u32 %v19216_v0, %v13422_v25 }
 0x202   : > { %10627 = vmatpush.bf16.msrb.mxu2 %v13457_v63  ;;  %v13790_v10 = vld [vmem:[%s20977_s27 + $0x7f0] sm:$0xf0]  ;;  %v19340_v24 = vld [vmem:[%s20977_s27 + $0x8e4] sm:$0xf]  ;;  %v13169_v63 = vor.u32 %v19152_v57, %v13166_v55  ;;  %v13553_v6 = vor.u32 %v19248_v48, %v13550_v1 }
 0x203   : > { %10640 = vmatpush.bf16.msrb.mxu3 %v13585_v22  ;;  %v13918_v18 = vld [vmem:[%s20977_s27 + $0x8f0] sm:$0xf0]  ;;  %v19372_v43 = vld [vmem:[%s20977_s27 + $0x9e4] sm:$0xf]  ;;  %v13297_v22 = vor.u32 %v19184_v4, %v13294_v29  ;;  %v13793_v26 = vor.u32 %v19308_v52, %v13790_v10 }
 0x204   : > { %10602 = vmatpush.bf16.msrb.mxu0 %v13185_v62  ;;  %v14046_v11 = vld [vmem:[%s20977_s27 + $0x9f0] sm:$0xf0]  ;;  %v19404_v60 = vld [vmem:[%s20977_s27 + $0xae4] sm:$0xf]  ;;  %v13921_v62 = vor.u32 %v19340_v24, %v13918_v18 }
 0x205   : > { %10615 = vmatpush.bf16.msrb.mxu1 %v13313_v59  ;;  %v14174_v51 = vld [vmem:[%s20977_s27 + $0xaf0] sm:$0xf0]  ;;  %v14049_v57 = vor.u32 %v19372_v43, %v14046_v11  ;;  %v19304_v55 = vld [vmem:[%s20977_s27 + $0x7c4] sm:$0xf] }
 0x206   : > { %10628 = vmatpush.bf16.msrb.mxu2 %v13441_v61  ;;  %v13774_v50 = vld [vmem:[%s20977_s27 + $0x7d0] sm:$0xf0]  ;;  %v19336_v58 = vld [vmem:[%s20977_s27 + $0x8c4] sm:$0xf]  ;;  %v14177_v59 = vor.u32 %v19404_v60, %v14174_v51 }
 0x207   : > { %10641 = vmatpush.bf16.msrb.mxu3 %v13569_v2  ;;  %v13902_v61 = vld [vmem:[%s20977_s27 + $0x8d0] sm:$0xf0]  ;;  %v19368_v4 = vld [vmem:[%s20977_s27 + $0x9c4] sm:$0xf]  ;;  %v13777_v25 = vor.u32 %v19304_v55, %v13774_v50 }
 0x208   : > { %10603 = vmatpush.bf16.msrb.mxu0 %v13169_v63  ;;  %v14030_v29 = vld [vmem:[%s20977_s27 + $0x9d0] sm:$0xf0]  ;;  %v19400_v0 = vld [vmem:[%s20977_s27 + $0xac4] sm:$0xf]  ;;  %v13905_v48 = vor.u32 %v19336_v58, %v13902_v61  ;;  %v10397_v61 = vpop.f32.mrf.mxu0 }
 0x209   : > { %10616 = vmatpush.bf16.msrb.mxu1 %v13297_v22  ;;  %v14158_v2 = vld [vmem:[%s20977_s27 + $0xad0] sm:$0xf0]  ;;  %v14033_v1 = vor.u32 %v19368_v4, %v14030_v29  ;;  %v19300_v52 = vld [vmem:[%s20977_s27 + $0x7a4] sm:$0xf] }
 0x20a   : > { %10629 = vmatpush.bf16.msrb.mxu2 %v13425_v20  ;;  %v13758_v10 = vld [vmem:[%s20977_s27 + $0x7b0] sm:$0xf0]  ;;  %v19332_v24 = vld [vmem:[%s20977_s27 + $0x8a4] sm:$0xf]  ;;  %v14161_v63 = vor.u32 %v19400_v0, %v14158_v2  ;;  %v10398_v0 = vadd.f32 %v10397_v61, %v22090_v56 }
 0x20b   : > { %10642 = vmatpush.bf16.msrb.mxu3 %v13553_v6  ;;  %v13886_v18 = vld [vmem:[%s20977_s27 + $0x8b0] sm:$0xf0]  ;;  %v19364_v43 = vld [vmem:[%s20977_s27 + $0x9a4] sm:$0xf]  ;;  %10604 = vmatmul.bf16.vlgmr.msrb.gmra.mxu0 %v21107_v41  ;;  %v13761_v60 = vor.u32 %v19300_v52, %v13758_v10 }
 0x20c   : > { %10648 = vmatpush.bf16.msra.mxu0 %v13793_v26  ;;  %v14014_v11 = vld [vmem:[%s20977_s27 + $0x9b0] sm:$0xf0]  ;;  %v19396_v22 = vld [vmem:[%s20977_s27 + $0xaa4] sm:$0xf]  ;;  %10617 = vmatmul.bf16.vlgmr.msrb.gmra.mxu1 %v21156_v46  ;;  %v13889_v51 = vor.u32 %v19332_v24, %v13886_v18 }
 0x20d   : > { %10661 = vmatpush.bf16.msra.mxu1 %v13921_v62  ;;  %10630 = vmatmul.bf16.vlgmr.msrb.gmra.mxu2 %v21160_v49  ;;  %v14142_v20 = vld [vmem:[%s20977_s27 + $0xab0] sm:$0xf0]  ;;  %v14017_v6 = vor.u32 %v19364_v43, %v14014_v11  ;;  %v19296_v26 = vld [vmem:[%s20977_s27 + $0x784] sm:$0xf] }
 0x20e   : > { %10674 = vmatpush.bf16.msra.mxu2 %v14049_v57  ;;  %10643 = vmatmul.bf16.vlgmr.msrb.gmra.mxu3 %v21152_v39  ;;  %v13742_v62 = vld [vmem:[%s20977_s27 + $0x790] sm:$0xf0]  ;;  %v19328_v57 = vld [vmem:[%s20977_s27 + $0x884] sm:$0xf]  ;;  %v14145_v55 = vor.u32 %v19396_v22, %v14142_v20 }
 0x20f   : > { %10687 = vmatpush.bf16.msra.mxu3 %v14177_v59  ;;  %v13870_v50 = vld [vmem:[%s20977_s27 + $0x890] sm:$0xf0]  ;;  %v19360_v58 = vld [vmem:[%s20977_s27 + $0x984] sm:$0xf]  ;;  %v13745_v2 = vor.u32 %v19296_v26, %v13742_v62 }
 0x210   : > { %10649 = vmatpush.bf16.msra.mxu0 %v13777_v25  ;;  %v13998_v59 = vld [vmem:[%s20977_s27 + $0x990] sm:$0xf0]  ;;  %v19392_v4 = vld [vmem:[%s20977_s27 + $0xa84] sm:$0xf]  ;;  %v10410_v25 = vpop.f32.mrf.mxu1 }
 0x211   : > { %10662 = vmatpush.bf16.msra.mxu1 %v13905_v48  ;;  %v14126_v29 = vld [vmem:[%s20977_s27 + $0xa90] sm:$0xf0]  ;;  %v13873_v48 = vor.u32 %v19328_v57, %v13870_v50  ;;  %v19292_v52 = vld [vmem:[%s20977_s27 + $0x764] sm:$0xf]  ;;  %v10411_v18 = vadd.f32 %v10410_v25, %v10398_v0  ;;  %v10423_v50 = vpop.f32.mrf.mxu2  ;;  %v10399_v25 = vpop.f32.mrf.mxu0 }
 0x212   : > { %10675 = vmatpush.bf16.msra.mxu2 %v14033_v1  ;;  %v14001_v1 = vor.u32 %v19360_v58, %v13998_v59  ;;  %v13726_v10 = vld [vmem:[%s20977_s27 + $0x770] sm:$0xf0]  ;;  %v19324_v24 = vld [vmem:[%s20977_s27 + $0x864] sm:$0xf] }
 0x213   : > { %10688 = vmatpush.bf16.msra.mxu3 %v14161_v63  ;;  %v14129_v63 = vor.u32 %v19392_v4, %v14126_v29  ;;  %v13854_v43 = vld [vmem:[%s20977_s27 + $0x870] sm:$0xf0]  ;;  %v19356_v11 = vld [vmem:[%s20977_s27 + $0x964] sm:$0xf]  ;;  %v10424_v4 = vadd.f32 %v10423_v50, %v10411_v18  ;;  %v10436_v29 = vpop.f32.mrf.mxu3 }
 0x214   : > { %10650 = vmatpush.bf16.msra.mxu0 %v13761_v60  ;;  %v13982_v56 = vld [vmem:[%s20977_s27 + $0x970] sm:$0xf0]  ;;  %v19388_v22 = vld [vmem:[%s20977_s27 + $0xa64] sm:$0xf]  ;;  %v13729_v60 = vor.u32 %v19292_v52, %v13726_v10 }
 0x215   : > { %10663 = vmatpush.bf16.msra.mxu1 %v13889_v51  ;;  %v14110_v20 = vld [vmem:[%s20977_s27 + $0xa70] sm:$0xf0]  ;;  %v13857_v51 = vor.u32 %v19324_v24, %v13854_v43  ;;  %v19288_v26 = vld [vmem:[%s20977_s27 + $0x744] sm:$0xf]  ;;  %v22161_v52 = vadd.f32 %v10436_v29, %v10424_v4 }
 0x216   : > { %10676 = vmatpush.bf16.msra.mxu2 %v14017_v6  ;;  %v13985_v6 = vor.u32 %v19356_v11, %v13982_v56  ;;  %v13710_v62 = vld [vmem:[%s20977_s27 + $0x750] sm:$0xf0]  ;;  %v19320_v57 = vld [vmem:[%s20977_s27 + $0x844] sm:$0xf] }
 0x217   : > { %10689 = vmatpush.bf16.msra.mxu3 %v14145_v55  ;;  %v14113_v55 = vor.u32 %v19388_v22, %v14110_v20  ;;  %v13838_v58 = vld [vmem:[%s20977_s27 + $0x850] sm:$0xf0]  ;;  %v19352_v59 = vld [vmem:[%s20977_s27 + $0x944] sm:$0xf] }
 0x218   : > { %10651 = vmatpush.bf16.msra.mxu0 %v13745_v2  ;;  %v13966_v61 = vld [vmem:[%s20977_s27 + $0x950] sm:$0xf0]  ;;  %v19384_v0 = vld [vmem:[%s20977_s27 + $0xa44] sm:$0xf]  ;;  %v13841_v10 = vor.u32 %v19320_v57, %v13838_v58 }
 0x219   : > { %10664 = vmatpush.bf16.msra.mxu1 %v13873_v48  ;;  %v14094_v2 = vld [vmem:[%s20977_s27 + $0xa50] sm:$0xf0]  ;;  %v13713_v48 = vor.u32 %v19288_v26, %v13710_v62  ;;  %v13969_v24 = vor.u32 %v19352_v59, %v13966_v61  ;;  %v19316_v43 = vld [vmem:[%s20977_s27 + $0x824] sm:$0xf] }
 0x21a   : > { %10677 = vmatpush.bf16.msra.mxu2 %v14001_v1  ;;  %v10412_v1 = vpop.f32.mrf.mxu1  ;;  %v13694_v18 = vld [vmem:[%s20977_s27 + $0x730] sm:$0xf0]  ;;  %v14097_v11 = vor.u32 %v19384_v0, %v14094_v2  ;;  %v19348_v22 = vld [vmem:[%s20977_s27 + $0x924] sm:$0xf]  ;;  %v10425_v2 = vpop.f32.mrf.mxu2 }
 0x21b   : > { %10690 = vmatpush.bf16.msra.mxu3 %v14129_v63  ;;  %v19284_v63 = vld [vmem:[%s20977_s27 + $0x724] sm:$0xf]  ;;  %v13822_v56 = vld [vmem:[%s20977_s27 + $0x830] sm:$0xf0] }
 0x21c   : > { %10652 = vmatpush.bf16.msra.mxu0 %v13729_v60  ;;  %v13950_v20 = vld [vmem:[%s20977_s27 + $0x930] sm:$0xf0]  ;;  %v19380_v60 = vld [vmem:[%s20977_s27 + $0xa24] sm:$0xf]  ;;  %v13825_v57 = vor.u32 %v19316_v43, %v13822_v56 }
 0x21d   : > { %10665 = vmatpush.bf16.msra.mxu1 %v13857_v51  ;;  %v14078_v51 = vld [vmem:[%s20977_s27 + $0xa30] sm:$0xf0]  ;;  %v19280_v26 = vld [vmem:[%s20977_s27 + $0x704] sm:$0xf] }
 0x21e   : > { %10678 = vmatpush.bf16.msra.mxu2 %v13985_v6  ;;  %v13697_v6 = vor.u32 %v19284_v63, %v13694_v18  ;;  %v13678_v62 = vld [vmem:[%s20977_s27 + $0x710] sm:$0xf0]  ;;  %v19312_v50 = vld [vmem:[%s20977_s27 + $0x804] sm:$0xf]  ;;  %v14081_v61 = vor.u32 %v19380_v60, %v14078_v51 }
 0x21f   : > { %10691 = vmatpush.bf16.msra.mxu3 %v14113_v55  ;;  %v13953_v55 = vor.u32 %v19348_v22, %v13950_v20  ;;  %v13806_v58 = vld [vmem:[%s20977_s27 + $0x810] sm:$0xf0]  ;;  %v19344_v59 = vld [vmem:[%s20977_s27 + $0x904] sm:$0xf] }
 0x220   : > { %10653 = vmatpush.bf16.msra.mxu0 %v13713_v48  ;;  %v13934_v4 = vld [vmem:[%s20977_s27 + $0x910] sm:$0xf0]  ;;  %v19376_v29 = vld [vmem:[%s20977_s27 + $0xa04] sm:$0xf] }
 0x221   : > { %10666 = vmatpush.bf16.msra.mxu1 %v13841_v10  ;;  %v14062_v0 = vld [vmem:[%s20977_s27 + $0xa10] sm:$0xf0]  ;;  %v19436_v25 = vld [vmem:[%s20977_s27 + $0xbe4] sm:$0xf]  ;;  %v10438_v10 = vpop.f32.mrf.mxu3  ;;  %v13937_v56 = vor.u32 %v19344_v59, %v13934_v4 }
 0x222   : > { %10679 = vmatpush.bf16.msra.mxu2 %v13969_v24  ;;  %v14302_v48 = vld [vmem:[%s20977_s27 + $0xbf0] sm:$0xf0]  ;;  %v19468_v1 = vld [vmem:[%s20977_s27 + $0xce4] sm:$0xf]  ;;  %v13681_v24 = vor.u32 %v19280_v26, %v13678_v62  ;;  %v14065_v60 = vor.u32 %v19376_v29, %v14062_v0 }
 0x223   : > { %10692 = vmatpush.bf16.msra.mxu3 %v14097_v11  ;;  %v14430_v63 = vld [vmem:[%s20977_s27 + $0xcf0] sm:$0xf0]  ;;  %v19500_v18 = vld [vmem:[%s20977_s27 + $0xde4] sm:$0xf]  ;;  %v13809_v11 = vor.u32 %v19312_v50, %v13806_v58  ;;  %v14305_v51 = vor.u32 %v19436_v25, %v14302_v48 }
 0x224   : > { %10654 = vmatpush.bf16.msra.mxu0 %v13697_v6  ;;  %v14558_v43 = vld [vmem:[%s20977_s27 + $0xdf0] sm:$0xf0]  ;;  %v19532_v22 = vld [vmem:[%s20977_s27 + $0xee4] sm:$0xf]  ;;  %v14433_v6 = vor.u32 %v19468_v1, %v14430_v63 }
 0x225   : > { %10667 = vmatpush.bf16.msra.mxu1 %v13825_v57  ;;  %v14686_v20 = vld [vmem:[%s20977_s27 + $0xef0] sm:$0xf0]  ;;  %v14561_v26 = vor.u32 %v19500_v18, %v14558_v43  ;;  %v19432_v62 = vld [vmem:[%s20977_s27 + $0xbc4] sm:$0xf] }
 0x226   : > { %10680 = vmatpush.bf16.msra.mxu2 %v13953_v55  ;;  %v14286_v2 = vld [vmem:[%s20977_s27 + $0xbd0] sm:$0xf0]  ;;  %v19464_v10 = vld [vmem:[%s20977_s27 + $0xcc4] sm:$0xf]  ;;  %v14689_v57 = vor.u32 %v19532_v22, %v14686_v20 }
 0x227   : > { %10693 = vmatpush.bf16.msra.mxu3 %v14081_v61  ;;  %v14414_v55 = vld [vmem:[%s20977_s27 + $0xcd0] sm:$0xf0]  ;;  %v19496_v50 = vld [vmem:[%s20977_s27 + $0xdc4] sm:$0xf]  ;;  %v14289_v4 = vor.u32 %v19432_v62, %v14286_v2 }
 0x228   : > { %10655 = vmatpush.bf16.msra.mxu0 %v13681_v24  ;;  %v14542_v58 = vld [vmem:[%s20977_s27 + $0xdd0] sm:$0xf0]  ;;  %v19528_v59 = vld [vmem:[%s20977_s27 + $0xec4] sm:$0xf]  ;;  %v14417_v29 = vor.u32 %v19464_v10, %v14414_v55 }
 0x229   : > { %10668 = vmatpush.bf16.msra.mxu1 %v13809_v11  ;;  %v14670_v61 = vld [vmem:[%s20977_s27 + $0xed0] sm:$0xf0]  ;;  %v14545_v0 = vor.u32 %v19496_v50, %v14542_v58  ;;  %v19428_v25 = vld [vmem:[%s20977_s27 + $0xba4] sm:$0xf] }
 0x22a   : > { %10681 = vmatpush.bf16.msra.mxu2 %v13937_v56  ;;  %v14270_v48 = vld [vmem:[%s20977_s27 + $0xbb0] sm:$0xf0]  ;;  %v19460_v1 = vld [vmem:[%s20977_s27 + $0xca4] sm:$0xf]  ;;  %v14673_v24 = vor.u32 %v19528_v59, %v14670_v61  ;;  %v10449_v55 = vpop.f32.mrf.mxu0 }
 0x22b   : > { %10694 = vmatpush.bf16.msra.mxu3 %v14065_v60  ;;  %10656 = vmatmul.bf16.vlgmr.msra.gmra.mxu0 %v21158_v47  ;;  %v14398_v63 = vld [vmem:[%s20977_s27 + $0xcb0] sm:$0xf0]  ;;  %v19492_v18 = vld [vmem:[%s20977_s27 + $0xda4] sm:$0xf]  ;;  %v14273_v22 = vor.u32 %v19428_v25, %v14270_v48  ;;  %v10450_v59 = vadd.f32 %v10449_v55, %v22161_v52 }
 0x22c   : > { %10700 = vmatpush.bf16.msrb.mxu0 %v14305_v51  ;;  %v14526_v43 = vld [vmem:[%s20977_s27 + $0xdb0] sm:$0xf0]  ;;  %10669 = vmatmul.bf16.vlgmr.msra.gmra.mxu1 %v21236_v27  ;;  %v19524_v11 = vld [vmem:[%s20977_s27 + $0xea4] sm:$0xf]  ;;  %v14401_v20 = vor.u32 %v19460_v1, %v14398_v63 }
 0x22d   : > { %10713 = vmatpush.bf16.msrb.mxu1 %v14433_v6  ;;  %10682 = vmatmul.bf16.vlgmr.msra.gmra.mxu2 %v21247_v37  ;;  %v14654_v56 = vld [vmem:[%s20977_s27 + $0xeb0] sm:$0xf0]  ;;  %v14529_v60 = vor.u32 %v19492_v18, %v14526_v43  ;;  %v19424_v51 = vld [vmem:[%s20977_s27 + $0xb84] sm:$0xf] }
 0x22e   : > { %10726 = vmatpush.bf16.msrb.mxu2 %v14561_v26  ;;  %10695 = vmatmul.bf16.vlgmr.msra.gmra.mxu3 %v21243_v36  ;;  %v14254_v6 = vld [vmem:[%s20977_s27 + $0xb90] sm:$0xf0]  ;;  %v19456_v26 = vld [vmem:[%s20977_s27 + $0xc84] sm:$0xf]  ;;  %v14657_v62 = vor.u32 %v19524_v11, %v14654_v56 }
 0x22f   : > { %10739 = vmatpush.bf16.msrb.mxu3 %v14689_v57  ;;  %v14382_v2 = vld [vmem:[%s20977_s27 + $0xc90] sm:$0xf0]  ;;  %v19488_v10 = vld [vmem:[%s20977_s27 + $0xd84] sm:$0xf]  ;;  %v14257_v61 = vor.u32 %v19424_v51, %v14254_v6 }
 0x230   : > { %10701 = vmatpush.bf16.msrb.mxu0 %v14289_v4  ;;  %v14510_v57 = vld [vmem:[%s20977_s27 + $0xd90] sm:$0xf0]  ;;  %v19520_v50 = vld [vmem:[%s20977_s27 + $0xe84] sm:$0xf]  ;;  %v10462_v4 = vpop.f32.mrf.mxu1 }
 0x231   : > { %10714 = vmatpush.bf16.msrb.mxu1 %v14417_v29  ;;  %v14638_v58 = vld [vmem:[%s20977_s27 + $0xe90] sm:$0xf0]  ;;  %v14385_v29 = vor.u32 %v19456_v26, %v14382_v2  ;;  %v19420_v25 = vld [vmem:[%s20977_s27 + $0xb64] sm:$0xf]  ;;  %v10463_v63 = vadd.f32 %v10462_v4, %v10450_v59  ;;  %v10475_v2 = vpop.f32.mrf.mxu2 }
 0x232   : > { %10727 = vmatpush.bf16.msrb.mxu2 %v14545_v0  ;;  %v14513_v0 = vor.u32 %v19488_v10, %v14510_v57  ;;  %v14238_v48 = vld [vmem:[%s20977_s27 + $0xb70] sm:$0xf0]  ;;  %v19452_v1 = vld [vmem:[%s20977_s27 + $0xc64] sm:$0xf]  ;;  %v10451_v4 = vpop.f32.mrf.mxu0 }
 0x233   : > { %10740 = vmatpush.bf16.msrb.mxu3 %v14673_v24  ;;  %v14641_v24 = vor.u32 %v19520_v50, %v14638_v58  ;;  %v14366_v18 = vld [vmem:[%s20977_s27 + $0xc70] sm:$0xf0]  ;;  %v19484_v43 = vld [vmem:[%s20977_s27 + $0xd64] sm:$0xf]  ;;  %v10476_v50 = vadd.f32 %v10475_v2, %v10463_v63  ;;  %v10488_v58 = vpop.f32.mrf.mxu3 }
 0x234   : > { %10702 = vmatpush.bf16.msrb.mxu0 %v14273_v22  ;;  %v14494_v52 = vld [vmem:[%s20977_s27 + $0xd70] sm:$0xf0]  ;;  %v19516_v11 = vld [vmem:[%s20977_s27 + $0xe64] sm:$0xf]  ;;  %v14241_v22 = vor.u32 %v19420_v25, %v14238_v48 }
 0x235   : > { %10715 = vmatpush.bf16.msrb.mxu1 %v14401_v20  ;;  %v14622_v56 = vld [vmem:[%s20977_s27 + $0xe70] sm:$0xf0]  ;;  %v14369_v20 = vor.u32 %v19452_v1, %v14366_v18  ;;  %v19416_v51 = vld [vmem:[%s20977_s27 + $0xb44] sm:$0xf]  ;;  %v22232_v25 = vadd.f32 %v10488_v58, %v10476_v50 }
 0x236   : > { %10728 = vmatpush.bf16.msrb.mxu2 %v14529_v60  ;;  %v14497_v60 = vor.u32 %v19484_v43, %v14494_v52  ;;  %v14222_v6 = vld [vmem:[%s20977_s27 + $0xb50] sm:$0xf0]  ;;  %v19448_v26 = vld [vmem:[%s20977_s27 + $0xc44] sm:$0xf] }
 0x237   : > { %10741 = vmatpush.bf16.msrb.mxu3 %v14657_v62  ;;  %v14625_v62 = vor.u32 %v19516_v11, %v14622_v56  ;;  %v14350_v10 = vld [vmem:[%s20977_s27 + $0xc50] sm:$0xf0]  ;;  %v19480_v57 = vld [vmem:[%s20977_s27 + $0xd44] sm:$0xf] }
 0x238   : > { %10703 = vmatpush.bf16.msrb.mxu0 %v14257_v61  ;;  %v14478_v55 = vld [vmem:[%s20977_s27 + $0xd50] sm:$0xf0]  ;;  %v19512_v59 = vld [vmem:[%s20977_s27 + $0xe44] sm:$0xf]  ;;  %v14353_v48 = vor.u32 %v19448_v26, %v14350_v10 }
 0x239   : > { %10716 = vmatpush.bf16.msrb.mxu1 %v14385_v29  ;;  %v14606_v61 = vld [vmem:[%s20977_s27 + $0xe50] sm:$0xf0]  ;;  %v14225_v29 = vor.u32 %v19416_v51, %v14222_v6  ;;  %v14481_v1 = vor.u32 %v19480_v57, %v14478_v55  ;;  %v19444_v18 = vld [vmem:[%s20977_s27 + $0xc24] sm:$0xf] }
 0x23a   : > { %10729 = vmatpush.bf16.msrb.mxu2 %v14513_v0  ;;  %v10464_v0 = vpop.f32.mrf.mxu1  ;;  %v14206_v63 = vld [vmem:[%s20977_s27 + $0xb30] sm:$0xf0]  ;;  %v14609_v43 = vor.u32 %v19512_v59, %v14606_v61  ;;  %v19476_v11 = vld [vmem:[%s20977_s27 + $0xd24] sm:$0xf]  ;;  %v10477_v61 = vpop.f32.mrf.mxu2 }
 0x23b   : > { %10742 = vmatpush.bf16.msrb.mxu3 %v14641_v24  ;;  %v19412_v24 = vld [vmem:[%s20977_s27 + $0xb24] sm:$0xf]  ;;  %v14334_v52 = vld [vmem:[%s20977_s27 + $0xc30] sm:$0xf0] }
 0x23c   : > { %10704 = vmatpush.bf16.msrb.mxu0 %v14241_v22  ;;  %v14462_v56 = vld [vmem:[%s20977_s27 + $0xd30] sm:$0xf0]  ;;  %v19508_v22 = vld [vmem:[%s20977_s27 + $0xe24] sm:$0xf]  ;;  %v14337_v26 = vor.u32 %v19444_v18, %v14334_v52 }
 0x23d   : > { %10717 = vmatpush.bf16.msrb.mxu1 %v14369_v20  ;;  %v14590_v20 = vld [vmem:[%s20977_s27 + $0xe30] sm:$0xf0]  ;;  %v19408_v51 = vld [vmem:[%s20977_s27 + $0xb04] sm:$0xf] }
 0x23e   : > { %10730 = vmatpush.bf16.msrb.mxu2 %v14497_v60  ;;  %v14209_v60 = vor.u32 %v19412_v24, %v14206_v63  ;;  %v14190_v6 = vld [vmem:[%s20977_s27 + $0xb10] sm:$0xf0]  ;;  %v19440_v2 = vld [vmem:[%s20977_s27 + $0xc04] sm:$0xf]  ;;  %v14593_v55 = vor.u32 %v19508_v22, %v14590_v20 }
 0x23f   : > { %10743 = vmatpush.bf16.msrb.mxu3 %v14625_v62  ;;  %v14465_v62 = vor.u32 %v19476_v11, %v14462_v56  ;;  %v14318_v10 = vld [vmem:[%s20977_s27 + $0xc10] sm:$0xf0]  ;;  %v19472_v57 = vld [vmem:[%s20977_s27 + $0xd04] sm:$0xf] }
 0x240   : > { %10705 = vmatpush.bf16.msrb.mxu0 %v14225_v29  ;;  %v14446_v50 = vld [vmem:[%s20977_s27 + $0xd10] sm:$0xf0]  ;;  %v19504_v58 = vld [vmem:[%s20977_s27 + $0xe04] sm:$0xf] }
 0x241   : > { %10718 = vmatpush.bf16.msrb.mxu1 %v14353_v48  ;;  %v14574_v59 = vld [vmem:[%s20977_s27 + $0xe10] sm:$0xf0]  ;;  %v19564_v4 = vld [vmem:[%s20977_s27 + $0xfe4] sm:$0xf]  ;;  %v10490_v48 = vpop.f32.mrf.mxu3  ;;  %v14449_v52 = vor.u32 %v19472_v57, %v14446_v50 }
 0x242   : > { %10731 = vmatpush.bf16.msrb.mxu2 %v14481_v1  ;;  %v14814_v29 = vld [vmem:[%s20977_s27 + $0xff0] sm:$0xf0]  ;;  %v19596_v0 = vld [vmem:[%s20977_s27 + $0x10e4] sm:$0xf]  ;;  %v14193_v1 = vor.u32 %v19408_v51, %v14190_v6  ;;  %v14577_v22 = vor.u32 %v19504_v58, %v14574_v59 }
 0x243   : > { %10744 = vmatpush.bf16.msrb.mxu3 %v14609_v43  ;;  %v14942_v24 = vld [vmem:[%s20977_s27 + $0x10f0] sm:$0xf0]  ;;  %v19628_v63 = vld [vmem:[%s20977_s27 + $0x11e4] sm:$0xf]  ;;  %v14321_v43 = vor.u32 %v19440_v2, %v14318_v10  ;;  %v14817_v20 = vor.u32 %v19564_v4, %v14814_v29 }
 0x244   : > { %10706 = vmatpush.bf16.msrb.mxu0 %v14209_v60  ;;  %v15070_v18 = vld [vmem:[%s20977_s27 + $0x11f0] sm:$0xf0]  ;;  %v19660_v11 = vld [vmem:[%s20977_s27 + $0x12e4] sm:$0xf]  ;;  %v14945_v60 = vor.u32 %v19596_v0, %v14942_v24 }
 0x245   : > { %10719 = vmatpush.bf16.msrb.mxu1 %v14337_v26  ;;  %v15198_v56 = vld [vmem:[%s20977_s27 + $0x12f0] sm:$0xf0]  ;;  %v15073_v51 = vor.u32 %v19628_v63, %v15070_v18  ;;  %v19560_v6 = vld [vmem:[%s20977_s27 + $0xfc4] sm:$0xf] }
 0x246   : > { %10732 = vmatpush.bf16.msrb.mxu2 %v14465_v62  ;;  %v14798_v61 = vld [vmem:[%s20977_s27 + $0xfd0] sm:$0xf0]  ;;  %v19592_v48 = vld [vmem:[%s20977_s27 + $0x10c4] sm:$0xf]  ;;  %v15201_v26 = vor.u32 %v19660_v11, %v15198_v56 }
 0x247   : > { %10745 = vmatpush.bf16.msrb.mxu3 %v14593_v55  ;;  %v14926_v62 = vld [vmem:[%s20977_s27 + $0x10d0] sm:$0xf0]  ;;  %v19624_v2 = vld [vmem:[%s20977_s27 + $0x11c4] sm:$0xf]  ;;  %v14801_v50 = vor.u32 %v19560_v6, %v14798_v61 }
 0x248   : > { %10707 = vmatpush.bf16.msrb.mxu0 %v14193_v1  ;;  %v15054_v10 = vld [vmem:[%s20977_s27 + $0x11d0] sm:$0xf0]  ;;  %v19656_v57 = vld [vmem:[%s20977_s27 + $0x12c4] sm:$0xf]  ;;  %v14929_v58 = vor.u32 %v19592_v48, %v14926_v62 }
 0x249   : > { %10720 = vmatpush.bf16.msrb.mxu1 %v14321_v43  ;;  %v15182_v55 = vld [vmem:[%s20977_s27 + $0x12d0] sm:$0xf0]  ;;  %v15057_v59 = vor.u32 %v19624_v2, %v15054_v10  ;;  %v19556_v4 = vld [vmem:[%s20977_s27 + $0xfa4] sm:$0xf] }
 0x24a   : > { %10733 = vmatpush.bf16.msrb.mxu2 %v14449_v52  ;;  %v14782_v29 = vld [vmem:[%s20977_s27 + $0xfb0] sm:$0xf0]  ;;  %v19588_v0 = vld [vmem:[%s20977_s27 + $0x10a4] sm:$0xf]  ;;  %v15185_v1 = vor.u32 %v19656_v57, %v15182_v55  ;;  %v10501_v62 = vpop.f32.mrf.mxu0 }
 0x24b   : > { %10746 = vmatpush.bf16.msrb.mxu3 %v14577_v22  ;;  %10708 = vmatmul.bf16.vlgmr.msrb.gmra.mxu0 %v21253_v40  ;;  %v14910_v24 = vld [vmem:[%s20977_s27 + $0x10b0] sm:$0xf0]  ;;  %v19620_v63 = vld [vmem:[%s20977_s27 + $0x11a4] sm:$0xf]  ;;  %v14785_v11 = vor.u32 %v19556_v4, %v14782_v29  ;;  %v10502_v57 = vadd.f32 %v10501_v62, %v22232_v25 }
 0x24c   : > { %10752 = vmatpush.bf16.msra.mxu0 %v14817_v20  ;;  %v15038_v18 = vld [vmem:[%s20977_s27 + $0x11b0] sm:$0xf0]  ;;  %10721 = vmatmul.bf16.vlgmr.msrb.gmra.mxu1 %v21329_v31  ;;  %v19652_v43 = vld [vmem:[%s20977_s27 + $0x12a4] sm:$0xf]  ;;  %v14913_v56 = vor.u32 %v19588_v0, %v14910_v24 }
 0x24d   : > { %10765 = vmatpush.bf16.msra.mxu1 %v14945_v60  ;;  %10734 = vmatmul.bf16.vlgmr.msrb.gmra.mxu2 %v21340_v32  ;;  %v15166_v52 = vld [vmem:[%s20977_s27 + $0x12b0] sm:$0xf0]  ;;  %v15041_v22 = vor.u32 %v19620_v63, %v15038_v18  ;;  %v19552_v20 = vld [vmem:[%s20977_s27 + $0xf84] sm:$0xf] }
 0x24e   : > { %10778 = vmatpush.bf16.msra.mxu2 %v15073_v51  ;;  %10747 = vmatmul.bf16.vlgmr.msrb.gmra.mxu3 %v21336_v28  ;;  %v14766_v60 = vld [vmem:[%s20977_s27 + $0xf90] sm:$0xf0]  ;;  %v19584_v51 = vld [vmem:[%s20977_s27 + $0x1084] sm:$0xf]  ;;  %v15169_v6 = vor.u32 %v19652_v43, %v15166_v52 }
 0x24f   : > { %10791 = vmatpush.bf16.msra.mxu3 %v15201_v26  ;;  %v14894_v61 = vld [vmem:[%s20977_s27 + $0x1090] sm:$0xf0]  ;;  %v19616_v48 = vld [vmem:[%s20977_s27 + $0x1184] sm:$0xf]  ;;  %v14769_v55 = vor.u32 %v19552_v20, %v14766_v60 }
 0x250   : > { %10753 = vmatpush.bf16.msra.mxu0 %v14801_v50  ;;  %v15022_v26 = vld [vmem:[%s20977_s27 + $0x1190] sm:$0xf0]  ;;  %v19648_v2 = vld [vmem:[%s20977_s27 + $0x1284] sm:$0xf]  ;;  %v10514_v50 = vpop.f32.mrf.mxu1 }
 0x251   : > { %10766 = vmatpush.bf16.msra.mxu1 %v14929_v58  ;;  %v15150_v10 = vld [vmem:[%s20977_s27 + $0x1290] sm:$0xf0]  ;;  %v14897_v58 = vor.u32 %v19584_v51, %v14894_v61  ;;  %v19548_v4 = vld [vmem:[%s20977_s27 + $0xf64] sm:$0xf]  ;;  %v10515_v24 = vadd.f32 %v10514_v50, %v10502_v57 }
 0x252   : > { %10779 = vmatpush.bf16.msra.mxu2 %v15057_v59  ;;  %v15025_v59 = vor.u32 %v19616_v48, %v15022_v26  ;;  %v14750_v29 = vld [vmem:[%s20977_s27 + $0xf70] sm:$0xf0]  ;;  %v19580_v0 = vld [vmem:[%s20977_s27 + $0x1064] sm:$0xf]  ;;  %v10527_v61 = vpop.f32.mrf.mxu2  ;;  %v10503_v50 = vpop.f32.mrf.mxu0 }
 0x253   : > { %10792 = vmatpush.bf16.msra.mxu3 %v15185_v1  ;;  %v15153_v1 = vor.u32 %v19648_v2, %v15150_v10  ;;  %v14878_v63 = vld [vmem:[%s20977_s27 + $0x1070] sm:$0xf0]  ;;  %v19612_v18 = vld [vmem:[%s20977_s27 + $0x1164] sm:$0xf]  ;;  %v10528_v2 = vadd.f32 %v10527_v61, %v10515_v24  ;;  %v10540_v10 = vpop.f32.mrf.mxu3 }
 0x254   : > { %10754 = vmatpush.bf16.msra.mxu0 %v14785_v11  ;;  %v15006_v25 = vld [vmem:[%s20977_s27 + $0x1170] sm:$0xf0]  ;;  %v19644_v43 = vld [vmem:[%s20977_s27 + $0x1264] sm:$0xf]  ;;  %v14753_v11 = vor.u32 %v19548_v4, %v14750_v29 }
 0x255   : > { %10767 = vmatpush.bf16.msra.mxu1 %v14913_v56  ;;  %v15134_v52 = vld [vmem:[%s20977_s27 + $0x1270] sm:$0xf0]  ;;  %v14881_v56 = vor.u32 %v19580_v0, %v14878_v63  ;;  %v19544_v20 = vld [vmem:[%s20977_s27 + $0xf44] sm:$0xf]  ;;  %v22303_v4 = vadd.f32 %v10540_v10, %v10528_v2 }
 0x256   : > { %10780 = vmatpush.bf16.msra.mxu2 %v15041_v22  ;;  %v15009_v22 = vor.u32 %v19612_v18, %v15006_v25  ;;  %v14734_v60 = vld [vmem:[%s20977_s27 + $0xf50] sm:$0xf0]  ;;  %v19576_v51 = vld [vmem:[%s20977_s27 + $0x1044] sm:$0xf] }
 0x257   : > { %10793 = vmatpush.bf16.msra.mxu3 %v15169_v6  ;;  %v15137_v6 = vor.u32 %v19644_v43, %v15134_v52  ;;  %v14862_v48 = vld [vmem:[%s20977_s27 + $0x1050] sm:$0xf0]  ;;  %v19608_v26 = vld [vmem:[%s20977_s27 + $0x1144] sm:$0xf] }
 0x258   : > { %10755 = vmatpush.bf16.msra.mxu0 %v14769_v55  ;;  %v14990_v62 = vld [vmem:[%s20977_s27 + $0x1150] sm:$0xf0]  ;;  %v19640_v57 = vld [vmem:[%s20977_s27 + $0x1244] sm:$0xf]  ;;  %v14865_v29 = vor.u32 %v19576_v51, %v14862_v48 }
 0x259   : > { %10768 = vmatpush.bf16.msra.mxu1 %v14897_v58  ;;  %v15118_v55 = vld [vmem:[%s20977_s27 + $0x1250] sm:$0xf0]  ;;  %v14737_v58 = vor.u32 %v19544_v20, %v14734_v60  ;;  %v14993_v0 = vor.u32 %v19608_v26, %v14990_v62  ;;  %v19572_v63 = vld [vmem:[%s20977_s27 + $0x1024] sm:$0xf] }
 0x25a   : > { %10781 = vmatpush.bf16.msra.mxu2 %v15025_v59  ;;  %v10516_v59 = vpop.f32.mrf.mxu1  ;;  %v14718_v24 = vld [vmem:[%s20977_s27 + $0xf30] sm:$0xf0]  ;;  %v15121_v18 = vor.u32 %v19640_v57, %v15118_v55  ;;  %v19604_v43 = vld [vmem:[%s20977_s27 + $0x1124] sm:$0xf]  ;;  %v10529_v55 = vpop.f32.mrf.mxu2 }
 0x25b   : > { %10794 = vmatpush.bf16.msra.mxu3 %v15153_v1  ;;  %v19540_v1 = vld [vmem:[%s20977_s27 + $0xf24] sm:$0xf]  ;;  %v14846_v25 = vld [vmem:[%s20977_s27 + $0x1030] sm:$0xf0] }
 0x25c   : > { %10756 = vmatpush.bf16.msra.mxu0 %v14753_v11  ;;  %v14974_v52 = vld [vmem:[%s20977_s27 + $0x1130] sm:$0xf0]  ;;  %v19636_v11 = vld [vmem:[%s20977_s27 + $0x1224] sm:$0xf]  ;;  %v14849_v51 = vor.u32 %v19572_v63, %v14846_v25 }
 0x25d   : > { %10769 = vmatpush.bf16.msra.mxu1 %v14881_v56  ;;  %v15102_v56 = vld [vmem:[%s20977_s27 + $0x1230] sm:$0xf0]  ;;  %v19536_v20 = vld [vmem:[%s20977_s27 + $0xf04] sm:$0xf] }
 0x25e   : > { %10782 = vmatpush.bf16.msra.mxu2 %v15009_v22  ;;  %v14721_v22 = vor.u32 %v19540_v1, %v14718_v24  ;;  %v14702_v60 = vld [vmem:[%s20977_s27 + $0xf10] sm:$0xf0]  ;;  %v19568_v61 = vld [vmem:[%s20977_s27 + $0x1004] sm:$0xf]  ;;  %v15105_v62 = vor.u32 %v19636_v11, %v15102_v56 }
 0x25f   : > { %10795 = vmatpush.bf16.msra.mxu3 %v15137_v6  ;;  %v14977_v6 = vor.u32 %v19604_v43, %v14974_v52  ;;  %v14830_v48 = vld [vmem:[%s20977_s27 + $0x1010] sm:$0xf0]  ;;  %v19600_v26 = vld [vmem:[%s20977_s27 + $0x1104] sm:$0xf] }
 0x260   : > { %10757 = vmatpush.bf16.msra.mxu0 %v14737_v58  ;;  %v14958_v2 = vld [vmem:[%s20977_s27 + $0x1110] sm:$0xf0]  ;;  %v19632_v10 = vld [vmem:[%s20977_s27 + $0x1204] sm:$0xf] }
 0x261   : > { %10770 = vmatpush.bf16.msra.mxu1 %v14865_v29  ;;  %v15086_v57 = vld [vmem:[%s20977_s27 + $0x1210] sm:$0xf0]  ;;  %v19692_v50 = vld [vmem:[%s20977_s27 + $0x13e4] sm:$0xf]  ;;  %v10542_v29 = vpop.f32.mrf.mxu3  ;;  %v14961_v25 = vor.u32 %v19600_v26, %v14958_v2 }
 0x262   : > { %10783 = vmatpush.bf16.msra.mxu2 %v14993_v0  ;;  %v15326_v58 = vld [vmem:[%s20977_s27 + $0x13f0] sm:$0xf0]  ;;  %v19724_v59 = vld [vmem:[%s20977_s27 + $0x14e4] sm:$0xf]  ;;  %v14705_v0 = vor.u32 %v19536_v20, %v14702_v60  ;;  %v15089_v11 = vor.u32 %v19632_v10, %v15086_v57 }
 0x263   : > { %10796 = vmatpush.bf16.msra.mxu3 %v15121_v18  ;;  %v15454_v1 = vld [vmem:[%s20977_s27 + $0x14f0] sm:$0xf0]  ;;  %v19756_v24 = vld [vmem:[%s20977_s27 + $0x15e4] sm:$0xf]  ;;  %v14833_v18 = vor.u32 %v19568_v61, %v14830_v48  ;;  %v15329_v56 = vor.u32 %v19692_v50, %v15326_v58 }
 0x264   : > { %10758 = vmatpush.bf16.msra.mxu0 %v14721_v22  ;;  %v15582_v63 = vld [vmem:[%s20977_s27 + $0x15f0] sm:$0xf0]  ;;  %v19788_v43 = vld [vmem:[%s20977_s27 + $0x16e4] sm:$0xf]  ;;  %v15457_v22 = vor.u32 %v19724_v59, %v15454_v1 }
 0x265   : > { %10771 = vmatpush.bf16.msra.mxu1 %v14849_v51  ;;  %v15710_v52 = vld [vmem:[%s20977_s27 + $0x16f0] sm:$0xf0]  ;;  %v15585_v20 = vor.u32 %v19756_v24, %v15582_v63  ;;  %v19688_v60 = vld [vmem:[%s20977_s27 + $0x13c4] sm:$0xf] }
 0x266   : > { %10784 = vmatpush.bf16.msra.mxu2 %v14977_v6  ;;  %v15310_v55 = vld [vmem:[%s20977_s27 + $0x13d0] sm:$0xf0]  ;;  %v19720_v29 = vld [vmem:[%s20977_s27 + $0x14c4] sm:$0xf]  ;;  %v15713_v51 = vor.u32 %v19788_v43, %v15710_v52 }
 0x267   : > { %10797 = vmatpush.bf16.msra.mxu3 %v15105_v62  ;;  %v15438_v6 = vld [vmem:[%s20977_s27 + $0x14d0] sm:$0xf0]  ;;  %v19752_v61 = vld [vmem:[%s20977_s27 + $0x15c4] sm:$0xf]  ;;  %v15313_v2 = vor.u32 %v19688_v60, %v15310_v55 }
 0x268   : > { %10759 = vmatpush.bf16.msra.mxu0 %v14705_v0  ;;  %v15566_v48 = vld [vmem:[%s20977_s27 + $0x15d0] sm:$0xf0]  ;;  %v19784_v26 = vld [vmem:[%s20977_s27 + $0x16c4] sm:$0xf]  ;;  %v15441_v10 = vor.u32 %v19720_v29, %v15438_v6  ;;  %v10553_v6 = vpop.f32.mrf.mxu0 }
 0x269   : > { %10772 = vmatpush.bf16.msra.mxu1 %v14833_v18  ;;  %v15694_v62 = vld [vmem:[%s20977_s27 + $0x16d0] sm:$0xf0]  ;;  %v15569_v57 = vor.u32 %v19752_v61, %v15566_v48  ;;  %v19684_v50 = vld [vmem:[%s20977_s27 + $0x13a4] sm:$0xf] }
 0x26a   : > { %10785 = vmatpush.bf16.msra.mxu2 %v14961_v25  ;;  %v15294_v58 = vld [vmem:[%s20977_s27 + $0x13b0] sm:$0xf0]  ;;  %v19716_v59 = vld [vmem:[%s20977_s27 + $0x14a4] sm:$0xf]  ;;  %v15697_v0 = vor.u32 %v19784_v26, %v15694_v62  ;;  %v22358_v26 = vadd.f32 %v10553_v6, %v22303_v4 }
 0x26b   : > { %10798 = vmatpush.bf16.msra.mxu3 %v15089_v11  ;;  %10760 = vmatmul.bf16.vlgmr.msra.gmra.mxu0 %v21346_v45  ;;  %v15422_v1 = vld [vmem:[%s20977_s27 + $0x14b0] sm:$0xf0]  ;;  %v19748_v24 = vld [vmem:[%s20977_s27 + $0x15a4] sm:$0xf]  ;;  %v15297_v43 = vor.u32 %v19684_v50, %v15294_v58 }
 0x26c   : > { %10804 = vmatpush.bf16.msrb.mxu0 %v15329_v56  ;;  %v15550_v63 = vld [vmem:[%s20977_s27 + $0x15b0] sm:$0xf0]  ;;  %10773 = vmatmul.bf16.vlgmr.msra.gmra.mxu1 %v21411_v3  ;;  %v19780_v18 = vld [vmem:[%s20977_s27 + $0x16a4] sm:$0xf]  ;;  %v15425_v52 = vor.u32 %v19716_v59, %v15422_v1  ;;  %v10566_v59 = vpop.f32.mrf.mxu1 }
 0x26d   : > { %10817 = vmatpush.bf16.msrb.mxu1 %v15457_v22  ;;  %10786 = vmatmul.bf16.vlgmr.msra.gmra.mxu2 %v21418_v33  ;;  %v15678_v25 = vld [vmem:[%s20977_s27 + $0x16b0] sm:$0xf0]  ;;  %v15553_v11 = vor.u32 %v19748_v24, %v15550_v63  ;;  %v19680_v56 = vld [vmem:[%s20977_s27 + $0x1384] sm:$0xf] }
 0x26e   : > { %10830 = vmatpush.bf16.msrb.mxu2 %v15585_v20  ;;  %10799 = vmatmul.bf16.vlgmr.msra.gmra.mxu3 %v21416_v9  ;;  %v15278_v22 = vld [vmem:[%s20977_s27 + $0x1390] sm:$0xf0]  ;;  %v19712_v20 = vld [vmem:[%s20977_s27 + $0x1484] sm:$0xf]  ;;  %v15681_v60 = vor.u32 %v19780_v18, %v15678_v25 }
 0x26f   : > { %10843 = vmatpush.bf16.msrb.mxu3 %v15713_v51  ;;  %v15406_v55 = vld [vmem:[%s20977_s27 + $0x1490] sm:$0xf0]  ;;  %v19744_v29 = vld [vmem:[%s20977_s27 + $0x1584] sm:$0xf]  ;;  %v15281_v62 = vor.u32 %v19680_v56, %v15278_v22 }
 0x270   : > { %10805 = vmatpush.bf16.msrb.mxu0 %v15313_v2  ;;  %v15534_v51 = vld [vmem:[%s20977_s27 + $0x1590] sm:$0xf0]  ;;  %v19776_v61 = vld [vmem:[%s20977_s27 + $0x1684] sm:$0xf]  ;;  %v15409_v2 = vor.u32 %v19712_v20, %v15406_v55 }
 0x271   : > { %10818 = vmatpush.bf16.msrb.mxu1 %v15441_v10  ;;  %v15662_v48 = vld [vmem:[%s20977_s27 + $0x1690] sm:$0xf0]  ;;  %v15537_v10 = vor.u32 %v19744_v29, %v15534_v51  ;;  %v19708_v58 = vld [vmem:[%s20977_s27 + $0x1464] sm:$0xf]  ;;  %v10579_v51 = vpop.f32.mrf.mxu2  ;;  %v10592_v6 = vpop.f32.mrf.mxu3 }
 0x272   : > { %10831 = vmatpush.bf16.msrb.mxu2 %v15569_v57  ;;  %v19676_v57 = vld [vmem:[%s20977_s27 + $0x1364] sm:$0xf]  ;;  %v15262_v50 = vld [vmem:[%s20977_s27 + $0x1370] sm:$0xf0] }
 0x273   : > { %10844 = vmatpush.bf16.msrb.mxu3 %v15697_v0  ;;  %v15665_v0 = vor.u32 %v19776_v61, %v15662_v48  ;;  %v15390_v1 = vld [vmem:[%s20977_s27 + $0x1470] sm:$0xf0]  ;;  %v19740_v24 = vld [vmem:[%s20977_s27 + $0x1564] sm:$0xf]  ;;  %v15265_v25 = vor.u32 %v19676_v57, %v15262_v50 }
 0x274   : > { %10806 = vmatpush.bf16.msrb.mxu0 %v15297_v43  ;;  %v15518_v4 = vld [vmem:[%s20977_s27 + $0x1570] sm:$0xf0]  ;;  %v19772_v63 = vld [vmem:[%s20977_s27 + $0x1664] sm:$0xf]  ;;  %v15393_v43 = vor.u32 %v19708_v58, %v15390_v1 }
 0x275   : > { %10819 = vmatpush.bf16.msrb.mxu1 %v15425_v52  ;;  %v15646_v18 = vld [vmem:[%s20977_s27 + $0x1670] sm:$0xf0]  ;;  %v15521_v52 = vor.u32 %v19740_v24, %v15518_v4  ;;  %v19704_v22 = vld [vmem:[%s20977_s27 + $0x1444] sm:$0xf]  ;;  %v10568_v4 = vpop.f32.mrf.mxu1 }
 0x276   : > { %10832 = vmatpush.bf16.msrb.mxu2 %v15553_v11  ;;  %v19672_v11 = vld [vmem:[%s20977_s27 + $0x1344] sm:$0xf]  ;;  %v15246_v56 = vld [vmem:[%s20977_s27 + $0x1350] sm:$0xf0]  ;;  %v15649_v20 = vor.u32 %v19772_v63, %v15646_v18 }
 0x277   : > { %10845 = vmatpush.bf16.msrb.mxu3 %v15681_v60  ;;  %v15374_v60 = vld [vmem:[%s20977_s27 + $0x1450] sm:$0xf0]  ;;  %v19736_v55 = vld [vmem:[%s20977_s27 + $0x1544] sm:$0xf] }
 0x278   : > { %10807 = vmatpush.bf16.msrb.mxu0 %v15281_v62  ;;  %v15502_v29 = vld [vmem:[%s20977_s27 + $0x1550] sm:$0xf0]  ;;  %v19768_v61 = vld [vmem:[%s20977_s27 + $0x1644] sm:$0xf]  ;;  %v10580_v62 = vadd.f32 %v10579_v51, %v10566_v59  ;;  %v15377_v57 = vor.u32 %v19704_v22, %v15374_v60 }
 0x279   : > { %10820 = vmatpush.bf16.msrb.mxu1 %v15409_v2  ;;  %v15630_v48 = vld [vmem:[%s20977_s27 + $0x1650] sm:$0xf0]  ;;  %v10555_v2 = vpop.f32.mrf.mxu0  ;;  %v15505_v50 = vor.u32 %v19736_v55, %v15502_v29  ;;  %v19668_v58 = vld [vmem:[%s20977_s27 + $0x1324] sm:$0xf] }
 0x27a   : > { %10833 = vmatpush.bf16.msrb.mxu2 %v15537_v10  ;;  %v15249_v10 = vor.u32 %v19672_v11, %v15246_v56  ;;  %v19700_v1 = vld [vmem:[%s20977_s27 + $0x1424] sm:$0xf]  ;;  %v22379_v24 = vadd.f32 %v10592_v6, %v10580_v62  ;;  %v15633_v59 = vor.u32 %v19768_v61, %v15630_v48  ;;  %v15358_v63 = vld [vmem:[%s20977_s27 + $0x1430] sm:$0xf0]  ;;  %v10581_v2 = vpop.f32.mrf.mxu2 }
 0x27b   : > { %10846 = vmatpush.bf16.msrb.mxu3 %v15665_v0  ;;  %v15230_v0 = vld [vmem:[%s20977_s27 + $0x1330] sm:$0xf0]  ;;  %v19732_v18 = vld [vmem:[%s20977_s27 + $0x1524] sm:$0xf] }
 0x27c   : > { %10808 = vmatpush.bf16.msrb.mxu0 %v15265_v25  ;;  %v15486_v25 = vld [vmem:[%s20977_s27 + $0x1530] sm:$0xf0]  ;;  %v15233_v11 = vor.u32 %v19668_v58, %v15230_v0  ;;  %v19664_v56 = vld [vmem:[%s20977_s27 + $0x1304] sm:$0xf] }
 0x27d   : > { %10821 = vmatpush.bf16.msrb.mxu1 %v15393_v43  ;;  %v19764_v43 = vld [vmem:[%s20977_s27 + $0x1624] sm:$0xf]  ;;  %v15214_v22 = vld [vmem:[%s20977_s27 + $0x1310] sm:$0xf0]  ;;  %v15489_v60 = vor.u32 %v19732_v18, %v15486_v25 }
 0x27e   : > { %10834 = vmatpush.bf16.msrb.mxu2 %v15521_v52  ;;  %v15614_v52 = vld [vmem:[%s20977_s27 + $0x1630] sm:$0xf0]  ;;  %v19696_v55 = vld [vmem:[%s20977_s27 + $0x1404] sm:$0xf]  ;;  %v15217_v0 = vor.u32 %v19664_v56, %v15214_v22 }
 0x27f   : > { %10847 = vmatpush.bf16.msrb.mxu3 %v15649_v20  ;;  %v15361_v20 = vor.u32 %v19700_v1, %v15358_v63  ;;  %v15342_v29 = vld [vmem:[%s20977_s27 + $0x1410] sm:$0xf0]  ;;  %v19728_v51 = vld [vmem:[%s20977_s27 + $0x1504] sm:$0xf]  ;;  %v15617_v6 = vor.u32 %v19764_v43, %v15614_v52 }
 0x280   : > { %10809 = vmatpush.bf16.msrb.mxu0 %v15249_v10  ;;  %v15470_v61 = vld [vmem:[%s20977_s27 + $0x1510] sm:$0xf0]  ;;  %v19760_v48 = vld [vmem:[%s20977_s27 + $0x1604] sm:$0xf]  ;;  %v10594_v10 = vpop.f32.mrf.mxu3 }
 0x281   : > { %10822 = vmatpush.bf16.msrb.mxu1 %v15377_v57  ;;  %v15598_v62 = vld [vmem:[%s20977_s27 + $0x1610] sm:$0xf0]  ;;  %v19820_v57 = vld [vmem:[%s20977_s27 + $0x17e4] sm:$0xf]  ;;  %v15473_v18 = vor.u32 %v19728_v51, %v15470_v61 }
 0x282   : > { %10835 = vmatpush.bf16.msrb.mxu2 %v15505_v50  ;;  %v15838_v58 = vld [vmem:[%s20977_s27 + $0x17f0] sm:$0xf0]  ;;  %v19852_v50 = vld [vmem:[%s20977_s27 + $0x18e4] sm:$0xf]  ;;  %v15601_v52 = vor.u32 %v19760_v48, %v15598_v62 }
 0x283   : > { %10848 = vmatpush.bf16.msrb.mxu3 %v15633_v59  ;;  %v15966_v1 = vld [vmem:[%s20977_s27 + $0x18f0] sm:$0xf0]  ;;  %v19884_v4 = vld [vmem:[%s20977_s27 + $0x19e4] sm:$0xf]  ;;  %v15345_v59 = vor.u32 %v19696_v55, %v15342_v29 }
 0x284   : > { %10810 = vmatpush.bf16.msrb.mxu0 %v15233_v11  ;;  %v16094_v63 = vld [vmem:[%s20977_s27 + $0x19f0] sm:$0xf0]  ;;  %v19916_v25 = vld [vmem:[%s20977_s27 + $0x1ae4] sm:$0xf]  ;;  %v15841_v11 = vor.u32 %v19820_v57, %v15838_v58  ;;  %v15969_v56 = vor.u32 %v19852_v50, %v15966_v1 }
 0x285   : > { %10823 = vmatpush.bf16.msrb.mxu1 %v15361_v20  ;;  %v16222_v43 = vld [vmem:[%s20977_s27 + $0x1af0] sm:$0xf0]  ;;  %v16097_v22 = vor.u32 %v19884_v4, %v16094_v63  ;;  %v19816_v2 = vld [vmem:[%s20977_s27 + $0x17c4] sm:$0xf] }
 0x286   : > { %10836 = vmatpush.bf16.msrb.mxu2 %v15489_v60  ;;  %v15822_v10 = vld [vmem:[%s20977_s27 + $0x17d0] sm:$0xf0]  ;;  %v19848_v9 = vld [vmem:[%s20977_s27 + $0x18c4] sm:$0xf]  ;;  %v16225_v20 = vor.u32 %v19916_v25, %v16222_v43 }
 0x287   : > { %10849 = vmatpush.bf16.msrb.mxu3 %v15617_v6  ;;  %v15950_v60 = vld [vmem:[%s20977_s27 + $0x18d0] sm:$0xf0]  ;;  %v19880_v55 = vld [vmem:[%s20977_s27 + $0x19c4] sm:$0xf]  ;;  %v15825_v61 = vor.u32 %v19816_v2, %v15822_v10 }
 0x288   : > { %10811 = vmatpush.bf16.msrb.mxu0 %v15217_v0  ;;  %v16078_v29 = vld [vmem:[%s20977_s27 + $0x19d0] sm:$0xf0]  ;;  %v19912_v51 = vld [vmem:[%s20977_s27 + $0x1ac4] sm:$0xf]  ;;  %v15953_v48 = vor.u32 %v19848_v9, %v15950_v60 }
 0x289   : > { %10824 = vmatpush.bf16.msrb.mxu1 %v15345_v59  ;;  %v16206_v6 = vld [vmem:[%s20977_s27 + $0x1ad0] sm:$0xf0]  ;;  %v16081_v62 = vor.u32 %v19880_v55, %v16078_v29  ;;  %v19812_v57 = vld [vmem:[%s20977_s27 + $0x17a4] sm:$0xf] }
 0x28a   : > { %10837 = vmatpush.bf16.msrb.mxu2 %v15473_v18  ;;  %v15806_v58 = vld [vmem:[%s20977_s27 + $0x17b0] sm:$0xf0]  ;;  %v19844_v50 = vld [vmem:[%s20977_s27 + $0x18a4] sm:$0xf]  ;;  %v16209_v0 = vor.u32 %v19912_v51, %v16206_v6  ;;  %v10605_v51 = vpop.f32.mrf.mxu0 }
 0x28b   : > { %10850 = vmatpush.bf16.msrb.mxu3 %v15601_v52  ;;  %10812 = vmatmul.bf16.vlgmr.msrb.gmra.mxu0 %v21422_v53  ;;  %v15934_v1 = vld [vmem:[%s20977_s27 + $0x18b0] sm:$0xf0]  ;;  %v19876_v4 = vld [vmem:[%s20977_s27 + $0x19a4] sm:$0xf]  ;;  %v15809_v18 = vor.u32 %v19812_v57, %v15806_v58  ;;  %v10606_v58 = vadd.f32 %v10605_v51, %v22379_v24 }
 0x28c   : > { %10856 = vmatpush.bf16.msra.mxu0 %v15841_v11  ;;  %v16062_v63 = vld [vmem:[%s20977_s27 + $0x19b0] sm:$0xf0]  ;;  %10825 = vmatmul.bf16.vlgmr.msrb.gmra.mxu1 %v21488_v5  ;;  %v19908_v9 = vld [vmem:[%s20977_s27 + $0x1aa4] sm:$0xf]  ;;  %v15937_v25 = vor.u32 %v19844_v50, %v15934_v1  ;;  %v10618_v50 = vpop.f32.mrf.mxu1 }
 0x28d   : > { %10869 = vmatpush.bf16.msra.mxu1 %v15969_v56  ;;  %10838 = vmatmul.bf16.vlgmr.msrb.gmra.mxu2 %v21495_v15  ;;  %v16190_v59 = vld [vmem:[%s20977_s27 + $0x1ab0] sm:$0xf0]  ;;  %v16065_v43 = vor.u32 %v19876_v4, %v16062_v63  ;;  %v19808_v52 = vld [vmem:[%s20977_s27 + $0x1784] sm:$0xf] }
 0x28e   : > { %10882 = vmatpush.bf16.msra.mxu2 %v16097_v22  ;;  %10851 = vmatmul.bf16.vlgmr.msrb.gmra.mxu3 %v21493_v14  ;;  %v15790_v11 = vld [vmem:[%s20977_s27 + $0x1790] sm:$0xf0]  ;;  %v19840_v56 = vld [vmem:[%s20977_s27 + $0x1884] sm:$0xf]  ;;  %v16193_v22 = vor.u32 %v19908_v9, %v16190_v59 }
 0x28f   : > { %10895 = vmatpush.bf16.msra.mxu3 %v16225_v20  ;;  %v15918_v2 = vld [vmem:[%s20977_s27 + $0x1890] sm:$0xf0]  ;;  %v19872_v10 = vld [vmem:[%s20977_s27 + $0x1984] sm:$0xf]  ;;  %v15793_v29 = vor.u32 %v19808_v52, %v15790_v11 }
 0x290   : > { %10857 = vmatpush.bf16.msra.mxu0 %v15825_v61  ;;  %v16046_v20 = vld [vmem:[%s20977_s27 + $0x1990] sm:$0xf0]  ;;  %v19904_v60 = vld [vmem:[%s20977_s27 + $0x1a84] sm:$0xf]  ;;  %v15921_v6 = vor.u32 %v19840_v56, %v15918_v2 }
 0x291   : > { %10870 = vmatpush.bf16.msra.mxu1 %v15953_v48  ;;  %v16174_v55 = vld [vmem:[%s20977_s27 + $0x1a90] sm:$0xf0]  ;;  %v16049_v61 = vor.u32 %v19872_v10, %v16046_v20  ;;  %v19804_v48 = vld [vmem:[%s20977_s27 + $0x1764] sm:$0xf] }
 0x292   : > { %10883 = vmatpush.bf16.msra.mxu2 %v16081_v62  ;;  %v15774_v62 = vld [vmem:[%s20977_s27 + $0x1770] sm:$0xf0]  ;;  %v19836_v57 = vld [vmem:[%s20977_s27 + $0x1864] sm:$0xf] }
 0x293   : > { %10896 = vmatpush.bf16.msra.mxu3 %v16209_v0  ;;  %v16177_v0 = vor.u32 %v19904_v60, %v16174_v55  ;;  %v15902_v1 = vld [vmem:[%s20977_s27 + $0x1870] sm:$0xf0]  ;;  %v19868_v4 = vld [vmem:[%s20977_s27 + $0x1964] sm:$0xf] }
 0x294   : > { %10858 = vmatpush.bf16.msra.mxu0 %v15809_v18  ;;  %v16030_v63 = vld [vmem:[%s20977_s27 + $0x1970] sm:$0xf0]  ;;  %v19900_v9 = vld [vmem:[%s20977_s27 + $0x1a64] sm:$0xf]  ;;  %v10619_v18 = vadd.f32 %v10618_v50, %v10606_v58  ;;  %v15905_v24 = vor.u32 %v19836_v57, %v15902_v1 }
 0x295   : > { %10871 = vmatpush.bf16.msra.mxu1 %v15937_v25  ;;  %v16158_v59 = vld [vmem:[%s20977_s27 + $0x1a70] sm:$0xf0]  ;;  %v15777_v25 = vor.u32 %v19804_v48, %v15774_v62  ;;  %v19800_v52 = vld [vmem:[%s20977_s27 + $0x1744] sm:$0xf]  ;;  %v10607_v62 = vpop.f32.mrf.mxu0 }
 0x296   : > { %10884 = vmatpush.bf16.msra.mxu2 %v16065_v43  ;;  %v16033_v43 = vor.u32 %v19868_v4, %v16030_v63  ;;  %v15758_v11 = vld [vmem:[%s20977_s27 + $0x1750] sm:$0xf0]  ;;  %v19832_v56 = vld [vmem:[%s20977_s27 + $0x1844] sm:$0xf]  ;;  %v16161_v2 = vor.u32 %v19900_v9, %v16158_v59  ;;  %v10620_v4 = vpop.f32.mrf.mxu1 }
 0x297   : > { %10897 = vmatpush.bf16.msra.mxu3 %v16193_v22  ;;  %v10631_v22 = vpop.f32.mrf.mxu2  ;;  %v15886_v10 = vld [vmem:[%s20977_s27 + $0x1850] sm:$0xf0]  ;;  %v19864_v20 = vld [vmem:[%s20977_s27 + $0x1944] sm:$0xf] }
 0x298   : > { %10859 = vmatpush.bf16.msra.mxu0 %v15793_v29  ;;  %v16014_v60 = vld [vmem:[%s20977_s27 + $0x1950] sm:$0xf0]  ;;  %v10632_v55 = vadd.f32 %v10631_v22, %v10619_v18  ;;  %v10644_v29 = vpop.f32.mrf.mxu3  ;;  %v19896_v51 = vld [vmem:[%s20977_s27 + $0x1a44] sm:$0xf]  ;;  %v15889_v57 = vor.u32 %v19832_v56, %v15886_v10 }
 0x299   : > { %10872 = vmatpush.bf16.msra.mxu1 %v15921_v6  ;;  %v16142_v6 = vld [vmem:[%s20977_s27 + $0x1a50] sm:$0xf0]  ;;  %v16017_v58 = vor.u32 %v19864_v20, %v16014_v60  ;;  %v19796_v50 = vld [vmem:[%s20977_s27 + $0x1724] sm:$0xf] }
 0x29a   : > { %10885 = vmatpush.bf16.msra.mxu2 %v16049_v61  ;;  %v15761_v61 = vor.u32 %v19800_v52, %v15758_v11  ;;  %v22447_v48 = vadd.f32 %v10644_v29, %v10632_v55  ;;  %v19828_v1 = vld [vmem:[%s20977_s27 + $0x1824] sm:$0xf]  ;;  %v16145_v63 = vor.u32 %v19896_v51, %v16142_v6  ;;  %v15870_v9 = vld [vmem:[%s20977_s27 + $0x1830] sm:$0xf0] }
 0x29b   : > { %10898 = vmatpush.bf16.msra.mxu3 %v16177_v0  ;;  %v15742_v0 = vld [vmem:[%s20977_s27 + $0x1730] sm:$0xf0]  ;;  %v19860_v59 = vld [vmem:[%s20977_s27 + $0x1924] sm:$0xf]  ;;  %v15873_v56 = vor.u32 %v19828_v1, %v15870_v9 }
 0x29c   : > { %10860 = vmatpush.bf16.msra.mxu0 %v15777_v25  ;;  %v15998_v18 = vld [vmem:[%s20977_s27 + $0x1930] sm:$0xf0]  ;;  %v19892_v25 = vld [vmem:[%s20977_s27 + $0x1a24] sm:$0xf] }
 0x29d   : > { %10873 = vmatpush.bf16.msra.mxu1 %v15905_v24  ;;  %v16126_v24 = vld [vmem:[%s20977_s27 + $0x1a30] sm:$0xf0]  ;;  %v19792_v52 = vld [vmem:[%s20977_s27 + $0x1704] sm:$0xf]  ;;  %v16001_v22 = vor.u32 %v19860_v59, %v15998_v18 }
 0x29e   : > { %10886 = vmatpush.bf16.msra.mxu2 %v16033_v43  ;;  %v15745_v43 = vor.u32 %v19796_v50, %v15742_v0  ;;  %v15726_v11 = vld [vmem:[%s20977_s27 + $0x1710] sm:$0xf0]  ;;  %v19856_v20 = vld [vmem:[%s20977_s27 + $0x1904] sm:$0xf]  ;;  %v16129_v55 = vor.u32 %v19892_v25, %v16126_v24 }
 0x29f   : > { %10899 = vmatpush.bf16.msra.mxu3 %v16161_v2  ;;  %v19824_v2 = vld [vmem:[%s20977_s27 + $0x1804] sm:$0xf]  ;;  %v15854_v10 = vld [vmem:[%s20977_s27 + $0x1810] sm:$0xf0]  ;;  %v10633_v60 = vpop.f32.mrf.mxu2  ;;  %v15729_v50 = vor.u32 %v19792_v52, %v15726_v11 }
 0x2a0   : > { %10861 = vmatpush.bf16.msra.mxu0 %v15761_v61  ;;  %v15982_v29 = vld [vmem:[%s20977_s27 + $0x1910] sm:$0xf0]  ;;  %v19888_v51 = vld [vmem:[%s20977_s27 + $0x1a04] sm:$0xf]  ;;  %v10646_v61 = vpop.f32.mrf.mxu3 }
 0x2a1   : > { %10874 = vmatpush.bf16.msra.mxu1 %v15889_v57  ;;  %v16110_v6 = vld [vmem:[%s20977_s27 + $0x1a10] sm:$0xf0]  ;;  %v19948_v62 = vld [vmem:[%s20977_s27 + $0x1be4] sm:$0xf]  ;;  %v15985_v9 = vor.u32 %v19856_v20, %v15982_v29 }
 0x2a2   : > { %10887 = vmatpush.bf16.msra.mxu2 %v16017_v58  ;;  %v16350_v57 = vld [vmem:[%s20977_s27 + $0x1bf0] sm:$0xf0]  ;;  %v19980_v58 = vld [vmem:[%s20977_s27 + $0x1ce4] sm:$0xf]  ;;  %v16113_v25 = vor.u32 %v19888_v51, %v16110_v6 }
 0x2a3   : > { %10900 = vmatpush.bf16.msra.mxu3 %v16145_v63  ;;  %v16478_v0 = vld [vmem:[%s20977_s27 + $0x1cf0] sm:$0xf0]  ;;  %v20012_v1 = vld [vmem:[%s20977_s27 + $0x1de4] sm:$0xf]  ;;  %v15857_v63 = vor.u32 %v19824_v2, %v15854_v10  ;;  %v16353_v24 = vor.u32 %v19948_v62, %v16350_v57 }
 0x2a4   : > { %10862 = vmatpush.bf16.msra.mxu0 %v15745_v43  ;;  %v16606_v4 = vld [vmem:[%s20977_s27 + $0x1df0] sm:$0xf0]  ;;  %v20044_v59 = vld [vmem:[%s20977_s27 + $0x1ee4] sm:$0xf]  ;;  %v16481_v43 = vor.u32 %v19980_v58, %v16478_v0 }
 0x2a5   : > { %10875 = vmatpush.bf16.msra.mxu1 %v15873_v56  ;;  %v16734_v18 = vld [vmem:[%s20977_s27 + $0x1ef0] sm:$0xf0]  ;;  %v16609_v52 = vor.u32 %v20012_v1, %v16606_v4  ;;  %v19944_v11 = vld [vmem:[%s20977_s27 + $0x1bc4] sm:$0xf] }
 0x2a6   : > { %10888 = vmatpush.bf16.msra.mxu2 %v16001_v22  ;;  %v16334_v60 = vld [vmem:[%s20977_s27 + $0x1bd0] sm:$0xf0]  ;;  %v19976_v61 = vld [vmem:[%s20977_s27 + $0x1cc4] sm:$0xf]  ;;  %v16737_v56 = vor.u32 %v20044_v59, %v16734_v18 }
 0x2a7   : > { %10901 = vmatpush.bf16.msra.mxu3 %v16129_v55  ;;  %v16462_v22 = vld [vmem:[%s20977_s27 + $0x1cd0] sm:$0xf0]  ;;  %v20008_v2 = vld [vmem:[%s20977_s27 + $0x1dc4] sm:$0xf]  ;;  %v16337_v29 = vor.u32 %v19944_v11, %v16334_v60 }
 0x2a8   : > { %10863 = vmatpush.bf16.msra.mxu0 %v15729_v50  ;;  %v16590_v10 = vld [vmem:[%s20977_s27 + $0x1dd0] sm:$0xf0]  ;;  %v20040_v20 = vld [vmem:[%s20977_s27 + $0x1ec4] sm:$0xf]  ;;  %v16465_v51 = vor.u32 %v19976_v61, %v16462_v22  ;;  %v10657_v22 = vpop.f32.mrf.mxu0 }
 0x2a9   : > { %10876 = vmatpush.bf16.msra.mxu1 %v15857_v63  ;;  %v16718_v55 = vld [vmem:[%s20977_s27 + $0x1ed0] sm:$0xf0]  ;;  %v16593_v6 = vor.u32 %v20008_v2, %v16590_v10  ;;  %v19940_v62 = vld [vmem:[%s20977_s27 + $0x1ba4] sm:$0xf] }
 0x2aa   : > { %10889 = vmatpush.bf16.msra.mxu2 %v15985_v9  ;;  %v16318_v57 = vld [vmem:[%s20977_s27 + $0x1bb0] sm:$0xf0]  ;;  %v19972_v58 = vld [vmem:[%s20977_s27 + $0x1ca4] sm:$0xf]  ;;  %v16721_v50 = vor.u32 %v20040_v20, %v16718_v55  ;;  %v10658_v20 = vadd.f32 %v10657_v22, %v22447_v48 }
 0x2ab   : > { %10902 = vmatpush.bf16.msra.mxu3 %v16113_v25  ;;  %10864 = vmatmul.bf16.vlgmr.msra.gmra.mxu0 %v21499_v19  ;;  %v16446_v0 = vld [vmem:[%s20977_s27 + $0x1cb0] sm:$0xf0]  ;;  %v20004_v1 = vld [vmem:[%s20977_s27 + $0x1da4] sm:$0xf]  ;;  %v16321_v59 = vor.u32 %v19940_v62, %v16318_v57 }
 0x2ac   : > { %10908 = vmatpush.bf16.msrb.mxu0 %v16353_v24  ;;  %v16574_v4 = vld [vmem:[%s20977_s27 + $0x1db0] sm:$0xf0]  ;;  %10877 = vmatmul.bf16.vlgmr.msra.gmra.mxu1 %v21567_v7  ;;  %v20036_v63 = vld [vmem:[%s20977_s27 + $0x1ea4] sm:$0xf]  ;;  %v16449_v18 = vor.u32 %v19972_v58, %v16446_v0 }
 0x2ad   : > { %10921 = vmatpush.bf16.msrb.mxu1 %v16481_v43  ;;  %10890 = vmatmul.bf16.vlgmr.msra.gmra.mxu2 %v21574_v17  ;;  %v16702_v9 = vld [vmem:[%s20977_s27 + $0x1eb0] sm:$0xf0]  ;;  %v16577_v25 = vor.u32 %v20004_v1, %v16574_v4  ;;  %v19936_v24 = vld [vmem:[%s20977_s27 + $0x1b84] sm:$0xf] }
 0x2ae   : > { %10934 = vmatpush.bf16.msrb.mxu2 %v16609_v52  ;;  %10903 = vmatmul.bf16.vlgmr.msra.gmra.mxu3 %v21572_v16  ;;  %v16302_v43 = vld [vmem:[%s20977_s27 + $0x1b90] sm:$0xf0]  ;;  %v19968_v52 = vld [vmem:[%s20977_s27 + $0x1c84] sm:$0xf]  ;;  %v16705_v11 = vor.u32 %v20036_v63, %v16702_v9 }
 0x2af   : > { %10947 = vmatpush.bf16.msrb.mxu3 %v16737_v56  ;;  %v16430_v60 = vld [vmem:[%s20977_s27 + $0x1c90] sm:$0xf0]  ;;  %v20000_v61 = vld [vmem:[%s20977_s27 + $0x1d84] sm:$0xf]  ;;  %v16305_v55 = vor.u32 %v19936_v24, %v16302_v43 }
 0x2b0   : > { %10909 = vmatpush.bf16.msrb.mxu0 %v16337_v29  ;;  %v16558_v56 = vld [vmem:[%s20977_s27 + $0x1d90] sm:$0xf0]  ;;  %v20032_v2 = vld [vmem:[%s20977_s27 + $0x1e84] sm:$0xf]  ;;  %v10670_v29 = vpop.f32.mrf.mxu1 }
 0x2b1   : > { %10922 = vmatpush.bf16.msrb.mxu1 %v16465_v51  ;;  %v16686_v10 = vld [vmem:[%s20977_s27 + $0x1e90] sm:$0xf0]  ;;  %v16433_v51 = vor.u32 %v19968_v52, %v16430_v60  ;;  %v19932_v62 = vld [vmem:[%s20977_s27 + $0x1b64] sm:$0xf]  ;;  %v10671_v0 = vadd.f32 %v10670_v29, %v10658_v20  ;;  %v10683_v60 = vpop.f32.mrf.mxu2  ;;  %v10659_v29 = vpop.f32.mrf.mxu0 }
 0x2b2   : > { %10935 = vmatpush.bf16.msrb.mxu2 %v16593_v6  ;;  %v16561_v6 = vor.u32 %v20000_v61, %v16558_v56  ;;  %v16286_v57 = vld [vmem:[%s20977_s27 + $0x1b70] sm:$0xf0]  ;;  %v19964_v58 = vld [vmem:[%s20977_s27 + $0x1c64] sm:$0xf] }
 0x2b3   : > { %10948 = vmatpush.bf16.msrb.mxu3 %v16721_v50  ;;  %v16689_v50 = vor.u32 %v20032_v2, %v16686_v10  ;;  %v16414_v1 = vld [vmem:[%s20977_s27 + $0x1c70] sm:$0xf0]  ;;  %v19996_v4 = vld [vmem:[%s20977_s27 + $0x1d64] sm:$0xf]  ;;  %v10684_v2 = vadd.f32 %v10683_v60, %v10671_v0  ;;  %v10696_v10 = vpop.f32.mrf.mxu3 }
 0x2b4   : > { %10910 = vmatpush.bf16.msrb.mxu0 %v16321_v59  ;;  %v16542_v48 = vld [vmem:[%s20977_s27 + $0x1d70] sm:$0xf0]  ;;  %v20028_v63 = vld [vmem:[%s20977_s27 + $0x1e64] sm:$0xf]  ;;  %v16289_v59 = vor.u32 %v19932_v62, %v16286_v57 }
 0x2b5   : > { %10923 = vmatpush.bf16.msrb.mxu1 %v16449_v18  ;;  %v16670_v9 = vld [vmem:[%s20977_s27 + $0x1e70] sm:$0xf0]  ;;  %v16417_v18 = vor.u32 %v19964_v58, %v16414_v1  ;;  %v19928_v24 = vld [vmem:[%s20977_s27 + $0x1b44] sm:$0xf]  ;;  %v22518_v62 = vadd.f32 %v10696_v10, %v10684_v2 }
 0x2b6   : > { %10936 = vmatpush.bf16.msrb.mxu2 %v16577_v25  ;;  %v16545_v25 = vor.u32 %v19996_v4, %v16542_v48  ;;  %v16270_v43 = vld [vmem:[%s20977_s27 + $0x1b50] sm:$0xf0]  ;;  %v19960_v52 = vld [vmem:[%s20977_s27 + $0x1c44] sm:$0xf] }
 0x2b7   : > { %10949 = vmatpush.bf16.msrb.mxu3 %v16705_v11  ;;  %v16673_v11 = vor.u32 %v20028_v63, %v16670_v9  ;;  %v16398_v61 = vld [vmem:[%s20977_s27 + $0x1c50] sm:$0xf0]  ;;  %v19992_v56 = vld [vmem:[%s20977_s27 + $0x1d44] sm:$0xf] }
 0x2b8   : > { %10911 = vmatpush.bf16.msrb.mxu0 %v16305_v55  ;;  %v16526_v22 = vld [vmem:[%s20977_s27 + $0x1d50] sm:$0xf0]  ;;  %v20024_v20 = vld [vmem:[%s20977_s27 + $0x1e44] sm:$0xf]  ;;  %v16401_v57 = vor.u32 %v19960_v52, %v16398_v61 }
 0x2b9   : > { %10924 = vmatpush.bf16.msrb.mxu1 %v16433_v51  ;;  %v16654_v55 = vld [vmem:[%s20977_s27 + $0x1e50] sm:$0xf0]  ;;  %v16273_v51 = vor.u32 %v19928_v24, %v16270_v43  ;;  %v16529_v58 = vor.u32 %v19992_v56, %v16526_v22  ;;  %v19956_v1 = vld [vmem:[%s20977_s27 + $0x1c24] sm:$0xf] }
 0x2ba   : > { %10937 = vmatpush.bf16.msrb.mxu2 %v16561_v6  ;;  %v10672_v6 = vpop.f32.mrf.mxu1  ;;  %v16254_v0 = vld [vmem:[%s20977_s27 + $0x1b30] sm:$0xf0]  ;;  %v16657_v4 = vor.u32 %v20024_v20, %v16654_v55  ;;  %v19988_v63 = vld [vmem:[%s20977_s27 + $0x1d24] sm:$0xf]  ;;  %v10685_v55 = vpop.f32.mrf.mxu2 }
 0x2bb   : > { %10950 = vmatpush.bf16.msrb.mxu3 %v16689_v50  ;;  %v19924_v50 = vld [vmem:[%s20977_s27 + $0x1b24] sm:$0xf]  ;;  %v16382_v48 = vld [vmem:[%s20977_s27 + $0x1c30] sm:$0xf0] }
 0x2bc   : > { %10912 = vmatpush.bf16.msrb.mxu0 %v16289_v59  ;;  %v16510_v9 = vld [vmem:[%s20977_s27 + $0x1d30] sm:$0xf0]  ;;  %v20020_v59 = vld [vmem:[%s20977_s27 + $0x1e24] sm:$0xf]  ;;  %v16385_v52 = vor.u32 %v19956_v1, %v16382_v48 }
 0x2bd   : > { %10925 = vmatpush.bf16.msrb.mxu1 %v16417_v18  ;;  %v16638_v18 = vld [vmem:[%s20977_s27 + $0x1e30] sm:$0xf0]  ;;  %v19920_v24 = vld [vmem:[%s20977_s27 + $0x1b04] sm:$0xf] }
 0x2be   : > { %10938 = vmatpush.bf16.msrb.mxu2 %v16545_v25  ;;  %v16257_v25 = vor.u32 %v19924_v50, %v16254_v0  ;;  %v16238_v43 = vld [vmem:[%s20977_s27 + $0x1b10] sm:$0xf0]  ;;  %v19952_v60 = vld [vmem:[%s20977_s27 + $0x1c04] sm:$0xf]  ;;  %v16641_v22 = vor.u32 %v20020_v59, %v16638_v18 }
 0x2bf   : > { %10951 = vmatpush.bf16.msrb.mxu3 %v16673_v11  ;;  %v16513_v11 = vor.u32 %v19988_v63, %v16510_v9  ;;  %v16366_v61 = vld [vmem:[%s20977_s27 + $0x1c10] sm:$0xf0]  ;;  %v19984_v56 = vld [vmem:[%s20977_s27 + $0x1d04] sm:$0xf] }
 0x2c0   : > { %10913 = vmatpush.bf16.msrb.mxu0 %v16273_v51  ;;  %v16494_v2 = vld [vmem:[%s20977_s27 + $0x1d10] sm:$0xf0]  ;;  %v20016_v10 = vld [vmem:[%s20977_s27 + $0x1e04] sm:$0xf] }
 0x2c1   : > { %10926 = vmatpush.bf16.msrb.mxu1 %v16401_v57  ;;  %v16622_v20 = vld [vmem:[%s20977_s27 + $0x1e10] sm:$0xf0]  ;;  %v20076_v29 = vld [vmem:[%s20977_s27 + $0x1fe4] sm:$0xf]  ;;  %v10698_v57 = vpop.f32.mrf.mxu3  ;;  %v16497_v48 = vor.u32 %v19984_v56, %v16494_v2 }
 0x2c2   : > { %10939 = vmatpush.bf16.msrb.mxu2 %v16529_v58  ;;  %v16862_v51 = vld [vmem:[%s20977_s27 + $0x1ff0] sm:$0xf0]  ;;  %v20108_v6 = vld [vmem:[%s20977_s27 + $0x20e4] sm:$0xf]  ;;  %v16241_v58 = vor.u32 %v19920_v24, %v16238_v43  ;;  %v16625_v59 = vor.u32 %v20016_v10, %v16622_v20 }
 0x2c3   : > { %10952 = vmatpush.bf16.msrb.mxu3 %v16657_v4  ;;  %v16990_v50 = vld [vmem:[%s20977_s27 + $0x20f0] sm:$0xf0]  ;;  %v20140_v0 = vld [vmem:[%s20977_s27 + $0x21e4] sm:$0xf]  ;;  %v16369_v4 = vor.u32 %v19952_v60, %v16366_v61  ;;  %v16865_v18 = vor.u32 %v20076_v29, %v16862_v51 }
 0x2c4   : > { %10914 = vmatpush.bf16.msrb.mxu0 %v16257_v25  ;;  %v17118_v1 = vld [vmem:[%s20977_s27 + $0x21f0] sm:$0xf0]  ;;  %v20172_v63 = vld [vmem:[%s20977_s27 + $0x22e4] sm:$0xf]  ;;  %v16993_v25 = vor.u32 %v20108_v6, %v16990_v50 }
 0x2c5   : > { %10927 = vmatpush.bf16.msrb.mxu1 %v16385_v52  ;;  %v17246_v9 = vld [vmem:[%s20977_s27 + $0x22f0] sm:$0xf0]  ;;  %v17121_v24 = vor.u32 %v20140_v0, %v17118_v1  ;;  %v20072_v43 = vld [vmem:[%s20977_s27 + $0x1fc4] sm:$0xf] }
 0x2c6   : > { %10940 = vmatpush.bf16.msrb.mxu2 %v16513_v11  ;;  %v16846_v55 = vld [vmem:[%s20977_s27 + $0x1fd0] sm:$0xf0]  ;;  %v20104_v57 = vld [vmem:[%s20977_s27 + $0x20c4] sm:$0xf]  ;;  %v17249_v52 = vor.u32 %v20172_v63, %v17246_v9 }
 0x2c7   : > { %10953 = vmatpush.bf16.msrb.mxu3 %v16641_v22  ;;  %v16974_v11 = vld [vmem:[%s20977_s27 + $0x20d0] sm:$0xf0]  ;;  %v20136_v60 = vld [vmem:[%s20977_s27 + $0x21c4] sm:$0xf]  ;;  %v16849_v2 = vor.u32 %v20072_v43, %v16846_v55 }
 0x2c8   : > { %10915 = vmatpush.bf16.msrb.mxu0 %v16241_v58  ;;  %v17102_v61 = vld [vmem:[%s20977_s27 + $0x21d0] sm:$0xf0]  ;;  %v20168_v56 = vld [vmem:[%s20977_s27 + $0x22c4] sm:$0xf]  ;;  %v16977_v10 = vor.u32 %v20104_v57, %v16974_v11  ;;  %v10709_v11 = vpop.f32.mrf.mxu0 }
 0x2c9   : > { %10928 = vmatpush.bf16.msrb.mxu1 %v16369_v4  ;;  %v17230_v22 = vld [vmem:[%s20977_s27 + $0x22d0] sm:$0xf0]  ;;  %v17105_v20 = vor.u32 %v20136_v60, %v17102_v61  ;;  %v20068_v29 = vld [vmem:[%s20977_s27 + $0x1fa4] sm:$0xf] }
 0x2ca   : > { %10941 = vmatpush.bf16.msrb.mxu2 %v16497_v48  ;;  %v16830_v51 = vld [vmem:[%s20977_s27 + $0x1fb0] sm:$0xf0]  ;;  %v20100_v6 = vld [vmem:[%s20977_s27 + $0x20a4] sm:$0xf]  ;;  %v17233_v58 = vor.u32 %v20168_v56, %v17230_v22  ;;  %v10710_v56 = vadd.f32 %v10709_v11, %v22518_v62 }
 0x2cb   : > { %10954 = vmatpush.bf16.msrb.mxu3 %v16625_v59  ;;  %10916 = vmatmul.bf16.vlgmr.msrb.gmra.mxu0 %v21578_v21  ;;  %v16958_v50 = vld [vmem:[%s20977_s27 + $0x20b0] sm:$0xf0]  ;;  %v20132_v0 = vld [vmem:[%s20977_s27 + $0x21a4] sm:$0xf]  ;;  %v16833_v63 = vor.u32 %v20068_v29, %v16830_v51 }
 0x2cc   : > { %10960 = vmatpush.bf16.msra.mxu0 %v16865_v18  ;;  %v17086_v1 = vld [vmem:[%s20977_s27 + $0x21b0] sm:$0xf0]  ;;  %10929 = vmatmul.bf16.vlgmr.msrb.gmra.mxu1 %v21647_v12  ;;  %v20164_v4 = vld [vmem:[%s20977_s27 + $0x22a4] sm:$0xf]  ;;  %v16961_v9 = vor.u32 %v20100_v6, %v16958_v50 }
 0x2cd   : > { %10973 = vmatpush.bf16.msra.mxu1 %v16993_v25  ;;  %10942 = vmatmul.bf16.vlgmr.msrb.gmra.mxu2 %v21654_v38  ;;  %v17214_v48 = vld [vmem:[%s20977_s27 + $0x22b0] sm:$0xf0]  ;;  %v17089_v59 = vor.u32 %v20132_v0, %v17086_v1  ;;  %v20064_v18 = vld [vmem:[%s20977_s27 + $0x1f84] sm:$0xf] }
 0x2ce   : > { %10986 = vmatpush.bf16.msra.mxu2 %v17121_v24  ;;  %10955 = vmatmul.bf16.vlgmr.msrb.gmra.mxu3 %v21652_v30  ;;  %v16814_v25 = vld [vmem:[%s20977_s27 + $0x1f90] sm:$0xf0]  ;;  %v20096_v24 = vld [vmem:[%s20977_s27 + $0x2084] sm:$0xf]  ;;  %v17217_v43 = vor.u32 %v20164_v4, %v17214_v48 }
 0x2cf   : > { %10999 = vmatpush.bf16.msra.mxu3 %v17249_v52  ;;  %v16942_v55 = vld [vmem:[%s20977_s27 + $0x2090] sm:$0xf0]  ;;  %v20128_v57 = vld [vmem:[%s20977_s27 + $0x2184] sm:$0xf]  ;;  %v16817_v22 = vor.u32 %v20064_v18, %v16814_v25 }
 0x2d0   : > { %10961 = vmatpush.bf16.msra.mxu0 %v16849_v2  ;;  %v17070_v52 = vld [vmem:[%s20977_s27 + $0x2190] sm:$0xf0]  ;;  %v20160_v60 = vld [vmem:[%s20977_s27 + $0x2284] sm:$0xf]  ;;  %v10722_v2 = vpop.f32.mrf.mxu1 }
 0x2d1   : > { %10974 = vmatpush.bf16.msra.mxu1 %v16977_v10  ;;  %v17198_v61 = vld [vmem:[%s20977_s27 + $0x2290] sm:$0xf0]  ;;  %v16945_v10 = vor.u32 %v20096_v24, %v16942_v55  ;;  %v20060_v29 = vld [vmem:[%s20977_s27 + $0x1f64] sm:$0xf]  ;;  %v10723_v50 = vadd.f32 %v10722_v2, %v10710_v56  ;;  %v10735_v55 = vpop.f32.mrf.mxu2  ;;  %v10711_v2 = vpop.f32.mrf.mxu0 }
 0x2d2   : > { %10987 = vmatpush.bf16.msra.mxu2 %v17105_v20  ;;  %v17073_v20 = vor.u32 %v20128_v57, %v17070_v52  ;;  %v16798_v51 = vld [vmem:[%s20977_s27 + $0x1f70] sm:$0xf0]  ;;  %v20092_v6 = vld [vmem:[%s20977_s27 + $0x2064] sm:$0xf] }
 0x2d3   : > { %11000 = vmatpush.bf16.msra.mxu3 %v17233_v58  ;;  %v17201_v58 = vor.u32 %v20160_v60, %v17198_v61  ;;  %v16926_v0 = vld [vmem:[%s20977_s27 + $0x2070] sm:$0xf0]  ;;  %v20124_v1 = vld [vmem:[%s20977_s27 + $0x2164] sm:$0xf]  ;;  %v10736_v60 = vadd.f32 %v10735_v55, %v10723_v50  ;;  %v10748_v61 = vpop.f32.mrf.mxu3 }
 0x2d4   : > { %10962 = vmatpush.bf16.msra.mxu0 %v16833_v63  ;;  %v17054_v62 = vld [vmem:[%s20977_s27 + $0x2170] sm:$0xf0]  ;;  %v20156_v4 = vld [vmem:[%s20977_s27 + $0x2264] sm:$0xf]  ;;  %v16801_v63 = vor.u32 %v20060_v29, %v16798_v51 }
 0x2d5   : > { %10975 = vmatpush.bf16.msra.mxu1 %v16961_v9  ;;  %v17182_v48 = vld [vmem:[%s20977_s27 + $0x2270] sm:$0xf0]  ;;  %v16929_v9 = vor.u32 %v20092_v6, %v16926_v0  ;;  %v20056_v18 = vld [vmem:[%s20977_s27 + $0x1f44] sm:$0xf]  ;;  %v22589_v29 = vadd.f32 %v10748_v61, %v10736_v60 }
 0x2d6   : > { %10988 = vmatpush.bf16.msra.mxu2 %v17089_v59  ;;  %v17057_v59 = vor.u32 %v20124_v1, %v17054_v62  ;;  %v16782_v25 = vld [vmem:[%s20977_s27 + $0x1f50] sm:$0xf0]  ;;  %v20088_v24 = vld [vmem:[%s20977_s27 + $0x2044] sm:$0xf] }
 0x2d7   : > { %11001 = vmatpush.bf16.msra.mxu3 %v17217_v43  ;;  %v17185_v43 = vor.u32 %v20156_v4, %v17182_v48  ;;  %v16910_v57 = vld [vmem:[%s20977_s27 + $0x2050] sm:$0xf0]  ;;  %v20120_v52 = vld [vmem:[%s20977_s27 + $0x2144] sm:$0xf] }
 0x2d8   : > { %10963 = vmatpush.bf16.msra.mxu0 %v16817_v22  ;;  %v17038_v11 = vld [vmem:[%s20977_s27 + $0x2150] sm:$0xf0]  ;;  %v20152_v56 = vld [vmem:[%s20977_s27 + $0x2244] sm:$0xf]  ;;  %v16913_v51 = vor.u32 %v20088_v24, %v16910_v57 }
 0x2d9   : > { %10976 = vmatpush.bf16.msra.mxu1 %v16945_v10  ;;  %v17166_v22 = vld [vmem:[%s20977_s27 + $0x2250] sm:$0xf0]  ;;  %v16785_v10 = vor.u32 %v20056_v18, %v16782_v25  ;;  %v17041_v6 = vor.u32 %v20120_v52, %v17038_v11  ;;  %v20084_v0 = vld [vmem:[%s20977_s27 + $0x2024] sm:$0xf] }
 0x2da   : > { %10989 = vmatpush.bf16.msra.mxu2 %v17073_v20  ;;  %v10724_v20 = vpop.f32.mrf.mxu1  ;;  %v16766_v50 = vld [vmem:[%s20977_s27 + $0x1f30] sm:$0xf0]  ;;  %v17169_v1 = vor.u32 %v20152_v56, %v17166_v22  ;;  %v20116_v4 = vld [vmem:[%s20977_s27 + $0x2124] sm:$0xf]  ;;  %v10737_v22 = vpop.f32.mrf.mxu2 }
 0x2db   : > { %11002 = vmatpush.bf16.msra.mxu3 %v17201_v58  ;;  %v20052_v58 = vld [vmem:[%s20977_s27 + $0x1f24] sm:$0xf]  ;;  %v16894_v62 = vld [vmem:[%s20977_s27 + $0x2030] sm:$0xf0] }
 0x2dc   : > { %10964 = vmatpush.bf16.msra.mxu0 %v16801_v63  ;;  %v17022_v48 = vld [vmem:[%s20977_s27 + $0x2130] sm:$0xf0]  ;;  %v20148_v63 = vld [vmem:[%s20977_s27 + $0x2224] sm:$0xf]  ;;  %v16897_v24 = vor.u32 %v20084_v0, %v16894_v62 }
 0x2dd   : > { %10977 = vmatpush.bf16.msra.mxu1 %v16929_v9  ;;  %v17150_v9 = vld [vmem:[%s20977_s27 + $0x2230] sm:$0xf0]  ;;  %v20048_v18 = vld [vmem:[%s20977_s27 + $0x1f04] sm:$0xf] }
 0x2de   : > { %10990 = vmatpush.bf16.msra.mxu2 %v17057_v59  ;;  %v16769_v59 = vor.u32 %v20052_v58, %v16766_v50  ;;  %v16750_v25 = vld [vmem:[%s20977_s27 + $0x1f10] sm:$0xf0]  ;;  %v20080_v55 = vld [vmem:[%s20977_s27 + $0x2004] sm:$0xf]  ;;  %v17153_v11 = vor.u32 %v20148_v63, %v17150_v9 }
 0x2df   : > { %11003 = vmatpush.bf16.msra.mxu3 %v17185_v43  ;;  %v17025_v43 = vor.u32 %v20116_v4, %v17022_v48  ;;  %v16878_v57 = vld [vmem:[%s20977_s27 + $0x2010] sm:$0xf0]  ;;  %v20112_v52 = vld [vmem:[%s20977_s27 + $0x2104] sm:$0xf] }
 0x2e0   : > { %10965 = vmatpush.bf16.msra.mxu0 %v16785_v10  ;;  %v17006_v60 = vld [vmem:[%s20977_s27 + $0x2110] sm:$0xf0]  ;;  %v20144_v61 = vld [vmem:[%s20977_s27 + $0x2204] sm:$0xf] }
 0x2e1   : > { %10978 = vmatpush.bf16.msra.mxu1 %v16913_v51  ;;  %v17134_v56 = vld [vmem:[%s20977_s27 + $0x2210] sm:$0xf0]  ;;  %v20204_v2 = vld [vmem:[%s20977_s27 + $0x23e4] sm:$0xf]  ;;  %v10750_v51 = vpop.f32.mrf.mxu3  ;;  %v17009_v62 = vor.u32 %v20112_v52, %v17006_v60 }
 0x2e2   : > { %10991 = vmatpush.bf16.msra.mxu2 %v17041_v6  ;;  %v17374_v10 = vld [vmem:[%s20977_s27 + $0x23f0] sm:$0xf0]  ;;  %v20236_v20 = vld [vmem:[%s20977_s27 + $0x24e4] sm:$0xf]  ;;  %v16753_v6 = vor.u32 %v20048_v18, %v16750_v25  ;;  %v17137_v63 = vor.u32 %v20144_v61, %v17134_v56 }
 0x2e3   : > { %11004 = vmatpush.bf16.msra.mxu3 %v17169_v1  ;;  %v17502_v58 = vld [vmem:[%s20977_s27 + $0x24f0] sm:$0xf0]  ;;  %v20268_v50 = vld [vmem:[%s20977_s27 + $0x25e4] sm:$0xf]  ;;  %v16881_v1 = vor.u32 %v20080_v55, %v16878_v57  ;;  %v17377_v9 = vor.u32 %v20204_v2, %v17374_v10 }
 0x2e4   : > { %10966 = vmatpush.bf16.msra.mxu0 %v16769_v59  ;;  %v17630_v0 = vld [vmem:[%s20977_s27 + $0x25f0] sm:$0xf0]  ;;  %v20300_v4 = vld [vmem:[%s20977_s27 + $0x26e4] sm:$0xf]  ;;  %v17505_v59 = vor.u32 %v20236_v20, %v17502_v58 }
 0x2e5   : > { %10979 = vmatpush.bf16.msra.mxu1 %v16897_v24  ;;  %v17758_v48 = vld [vmem:[%s20977_s27 + $0x26f0] sm:$0xf0]  ;;  %v17633_v18 = vor.u32 %v20268_v50, %v17630_v0  ;;  %v20200_v25 = vld [vmem:[%s20977_s27 + $0x23c4] sm:$0xf] }
 0x2e6   : > { %10992 = vmatpush.bf16.msra.mxu2 %v17025_v43  ;;  %v17358_v22 = vld [vmem:[%s20977_s27 + $0x23d0] sm:$0xf0]  ;;  %v20232_v51 = vld [vmem:[%s20977_s27 + $0x24c4] sm:$0xf]  ;;  %v17761_v24 = vor.u32 %v20300_v4, %v17758_v48  ;;  %v24695_v48 = vld [vmem:[#allocation13_spill] sm:$0xff] }
 0x2e7   : > { %11005 = vmatpush.bf16.msra.mxu3 %v17153_v11  ;;  %v17486_v43 = vld [vmem:[%s20977_s27 + $0x24d0] sm:$0xf0]  ;;  %v20264_v55 = vld [vmem:[%s20977_s27 + $0x25c4] sm:$0xf]  ;;  %v17361_v60 = vor.u32 %v20200_v25, %v17358_v22 }
 0x2e8   : > { %10967 = vmatpush.bf16.msra.mxu0 %v16753_v6  ;;  %v17614_v57 = vld [vmem:[%s20977_s27 + $0x25d0] sm:$0xf0]  ;;  %v20296_v52 = vld [vmem:[%s20977_s27 + $0x26c4] sm:$0xf]  ;;  %v17489_v61 = vor.u32 %v20232_v51, %v17486_v43 }
 0x2e9   : > { %10980 = vmatpush.bf16.msra.mxu1 %v16881_v1  ;;  %v17742_v11 = vld [vmem:[%s20977_s27 + $0x26d0] sm:$0xf0]  ;;  %v17617_v56 = vor.u32 %v20264_v55, %v17614_v57  ;;  %v20196_v2 = vld [vmem:[%s20977_s27 + $0x23a4] sm:$0xf]  ;;  %v10761_v57 = vpop.f32.mrf.mxu0 }
 0x2ea   : > { %10993 = vmatpush.bf16.msra.mxu2 %v17009_v62  ;;  %v17342_v10 = vld [vmem:[%s20977_s27 + $0x23b0] sm:$0xf0]  ;;  %v20228_v20 = vld [vmem:[%s20977_s27 + $0x24a4] sm:$0xf]  ;;  %v17745_v6 = vor.u32 %v20296_v52, %v17742_v11 }
 0x2eb   : > { %11006 = vmatpush.bf16.msra.mxu3 %v17137_v63  ;;  %10968 = vmatmul.bf16.vlgmr.msra.gmra.mxu0 %v21658_v44  ;;  %v17470_v58 = vld [vmem:[%s20977_s27 + $0x24b0] sm:$0xf0]  ;;  %v20260_v50 = vld [vmem:[%s20977_s27 + $0x25a4] sm:$0xf]  ;;  %v17345_v63 = vor.u32 %v20196_v2, %v17342_v10 }
 0x2ec   : > { %11012 = vmatpush.bf16.msrb.mxu0 %v17377_v9  ;;  %v17598_v0 = vld [vmem:[%s20977_s27 + $0x25b0] sm:$0xf0]  ;;  %v20292_v62 = vld [vmem:[%s20977_s27 + $0x26a4] sm:$0xf]  ;;  %v17473_v9 = vor.u32 %v20228_v20, %v17470_v58 }
 0x2ed   : > { %11025 = vmatpush.bf16.msrb.mxu1 %v17505_v59  ;;  %10994 = vmatmul.bf16.vlgmr.msra.gmra.mxu2 %v21734_v8  ;;  %v24694_v1 = vld [vmem:[#allocation12_spill] sm:$0xff]  ;;  %v17601_v59 = vor.u32 %v20260_v50, %v17598_v0  ;;  %v20224_v22 = vld [vmem:[%s20977_s27 + $0x2484] sm:$0xf] }
 0x2ee   : > { %11038 = vmatpush.bf16.msrb.mxu2 %v17633_v18  ;;  %10981 = vmatmul.bf16.vlgmr.msra.gmra.mxu1 %v24694_v1  ;;  %v17726_v4 = vld [vmem:[%s20977_s27 + $0x26b0] sm:$0xf0]  ;;  %v20192_v18 = vld [vmem:[%s20977_s27 + $0x2384] sm:$0xf] }
 0x2ef   : > { %11051 = vmatpush.bf16.msrb.mxu3 %v17761_v24  ;;  %v17326_v25 = vld [vmem:[%s20977_s27 + $0x2390] sm:$0xf0]  ;;  %v17729_v51 = vor.u32 %v20292_v62, %v17726_v4  ;;  %v20256_v43 = vld [vmem:[%s20977_s27 + $0x2584] sm:$0xf] }
 0x2f0   : > { %11007 = vmatmul.bf16.vlgmr.msra.gmra.mxu3 %v24695_v48  ;;  %11013 = vmatpush.bf16.msrb.mxu0 %v17361_v60  ;;  %v17454_v24 = vld [vmem:[%s20977_s27 + $0x2490] sm:$0xf0]  ;;  %v20288_v52 = vld [vmem:[%s20977_s27 + $0x2684] sm:$0xf]  ;;  %v10762_v60 = vadd.f32 %v10761_v57, %v22589_v29 }
 0x2f1   : > { %11026 = vmatpush.bf16.msrb.mxu1 %v17489_v61  ;;  %v17582_v55 = vld [vmem:[%s20977_s27 + $0x2590] sm:$0xf0]  ;;  %v17329_v61 = vor.u32 %v20192_v18, %v17326_v25  ;;  %v17457_v2 = vor.u32 %v20224_v22, %v17454_v24  ;;  %v20188_v20 = vld [vmem:[%s20977_s27 + $0x2364] sm:$0xf] }
 0x2f2   : > { %11039 = vmatpush.bf16.msrb.mxu2 %v17617_v56  ;;  %v17710_v11 = vld [vmem:[%s20977_s27 + $0x2690] sm:$0xf0]  ;;  %v10774_v56 = vpop.f32.mrf.mxu1  ;;  %v17585_v10 = vor.u32 %v20256_v43, %v17582_v55  ;;  %v20220_v58 = vld [vmem:[%s20977_s27 + $0x2464] sm:$0xf]  ;;  %v10787_v55 = vpop.f32.mrf.mxu2 }
 0x2f3   : > { %11052 = vmatpush.bf16.msrb.mxu3 %v17745_v6  ;;  %v17310_v6 = vld [vmem:[%s20977_s27 + $0x2370] sm:$0xf0]  ;;  %v17713_v50 = vor.u32 %v20288_v52, %v17710_v11  ;;  %v10775_v0 = vadd.f32 %v10774_v56, %v10762_v60  ;;  %v20252_v4 = vld [vmem:[%s20977_s27 + $0x2564] sm:$0xf] }
 0x2f4   : > { %11014 = vmatpush.bf16.msrb.mxu0 %v17345_v63  ;;  %v17438_v62 = vld [vmem:[%s20977_s27 + $0x2470] sm:$0xf0]  ;;  %v20284_v63 = vld [vmem:[%s20977_s27 + $0x2664] sm:$0xf] }
 0x2f5   : > { %11027 = vmatpush.bf16.msrb.mxu1 %v17473_v9  ;;  %v17566_v29 = vld [vmem:[%s20977_s27 + $0x2570] sm:$0xf0]  ;;  %v17441_v18 = vor.u32 %v20220_v58, %v17438_v62  ;;  %v20184_v22 = vld [vmem:[%s20977_s27 + $0x2344] sm:$0xf]  ;;  %v10788_v60 = vadd.f32 %v10787_v55, %v10775_v0 }
 0x2f6   : > { %11040 = vmatpush.bf16.msrb.mxu2 %v17601_v59  ;;  %v17694_v9 = vld [vmem:[%s20977_s27 + $0x2670] sm:$0xf0]  ;;  %v17313_v59 = vor.u32 %v20188_v20, %v17310_v6  ;;  %v17569_v25 = vor.u32 %v20252_v4, %v17566_v29  ;;  %v20216_v24 = vld [vmem:[%s20977_s27 + $0x2444] sm:$0xf] }
 0x2f7   : > { %11053 = vmatpush.bf16.msrb.mxu3 %v17729_v51  ;;  %v17294_v51 = vld [vmem:[%s20977_s27 + $0x2350] sm:$0xf0]  ;;  %v17697_v43 = vor.u32 %v20284_v63, %v17694_v9  ;;  %v20248_v52 = vld [vmem:[%s20977_s27 + $0x2544] sm:$0xf] }
 0x2f8   : > { %11015 = vmatpush.bf16.msrb.mxu0 %v17329_v61  ;;  %v17422_v57 = vld [vmem:[%s20977_s27 + $0x2450] sm:$0xf0]  ;;  %v10800_v61 = vpop.f32.mrf.mxu3  ;;  %v20280_v56 = vld [vmem:[%s20977_s27 + $0x2644] sm:$0xf]  ;;  %v17297_v20 = vor.u32 %v20184_v22, %v17294_v51 }
 0x2f9   : > { %11028 = vmatpush.bf16.msrb.mxu1 %v17457_v2  ;;  %v17550_v11 = vld [vmem:[%s20977_s27 + $0x2550] sm:$0xf0]  ;;  %v22660_v58 = vadd.f32 %v10800_v61, %v10788_v60  ;;  %v20180_v62 = vld [vmem:[%s20977_s27 + $0x2324] sm:$0xf] }
 0x2fa   : > { %11041 = vmatpush.bf16.msrb.mxu2 %v17585_v10  ;;  %v17678_v2 = vld [vmem:[%s20977_s27 + $0x2650] sm:$0xf0]  ;;  %v10763_v10 = vpop.f32.mrf.mxu0  ;;  %v10776_v6 = vpop.f32.mrf.mxu1  ;;  %v17553_v0 = vor.u32 %v20248_v52, %v17550_v11  ;;  %v20212_v29 = vld [vmem:[%s20977_s27 + $0x2424] sm:$0xf] }
 0x2fb   : > { %11054 = vmatpush.bf16.msrb.mxu3 %v17713_v50  ;;  %v17425_v50 = vor.u32 %v20216_v24, %v17422_v57  ;;  %v17278_v4 = vld [vmem:[%s20977_s27 + $0x2330] sm:$0xf0]  ;;  %v17681_v63 = vor.u32 %v20280_v56, %v17678_v2  ;;  %v20176_v24 = vld [vmem:[%s20977_s27 + $0x2304] sm:$0xf] }
 0x2fc   : > { %11016 = vmatpush.bf16.msrb.mxu0 %v17313_v59  ;;  %v17406_v9 = vld [vmem:[%s20977_s27 + $0x2430] sm:$0xf0]  ;;  %v20244_v59 = vld [vmem:[%s20977_s27 + $0x2524] sm:$0xf]  ;;  %v17281_v51 = vor.u32 %v20180_v62, %v17278_v4 }
 0x2fd   : > { %11029 = vmatpush.bf16.msrb.mxu1 %v17441_v18  ;;  %v17534_v22 = vld [vmem:[%s20977_s27 + $0x2530] sm:$0xf0]  ;;  %v20276_v18 = vld [vmem:[%s20977_s27 + $0x2624] sm:$0xf] }
 0x2fe   : > { %11042 = vmatpush.bf16.msrb.mxu2 %v17569_v25  ;;  %v17662_v25 = vld [vmem:[%s20977_s27 + $0x2630] sm:$0xf0]  ;;  %v17537_v57 = vor.u32 %v20244_v59, %v17534_v22  ;;  %v20208_v52 = vld [vmem:[%s20977_s27 + $0x2404] sm:$0xf] }
 0x2ff   : > { %11055 = vmatpush.bf16.msrb.mxu3 %v17697_v43  ;;  %v17262_v55 = vld [vmem:[%s20977_s27 + $0x2310] sm:$0xf0]  ;;  %v17409_v43 = vor.u32 %v20212_v29, %v17406_v9  ;;  %v20240_v60 = vld [vmem:[%s20977_s27 + $0x2504] sm:$0xf]  ;;  %v17665_v61 = vor.u32 %v20276_v18, %v17662_v25 }
 0x300   : > { %11017 = vmatpush.bf16.msrb.mxu0 %v17297_v20  ;;  %v17390_v11 = vld [vmem:[%s20977_s27 + $0x2410] sm:$0xf0]  ;;  %v20272_v2 = vld [vmem:[%s20977_s27 + $0x2604] sm:$0xf]  ;;  %v10789_v20 = vpop.f32.mrf.mxu2  ;;  %v17265_v4 = vor.u32 %v20176_v24, %v17262_v55 }
 0x301   : > { %11030 = vmatpush.bf16.msrb.mxu1 %v17425_v50  ;;  %v17518_v56 = vld [vmem:[%s20977_s27 + $0x2510] sm:$0xf0]  ;;  %v20332_v6 = vld [vmem:[%s20977_s27 + $0x27e4] sm:$0xf] }
 0x302   : > { %11043 = vmatpush.bf16.msrb.mxu2 %v17553_v0  ;;  %v17646_v10 = vld [vmem:[%s20977_s27 + $0x2610] sm:$0xf0]  ;;  %v20364_v50 = vld [vmem:[%s20977_s27 + $0x28e4] sm:$0xf]  ;;  %v10802_v0 = vpop.f32.mrf.mxu3  ;;  %v17521_v22 = vor.u32 %v20240_v60, %v17518_v56 }
 0x303   : > { %11056 = vmatpush.bf16.msrb.mxu3 %v17681_v63  ;;  %v17886_v62 = vld [vmem:[%s20977_s27 + $0x27f0] sm:$0xf0]  ;;  %v20396_v9 = vld [vmem:[%s20977_s27 + $0x29e4] sm:$0xf]  ;;  %v17393_v63 = vor.u32 %v20208_v52, %v17390_v11 }
 0x304   : > { %11018 = vmatpush.bf16.msrb.mxu0 %v17281_v51  ;;  %v18014_v29 = vld [vmem:[%s20977_s27 + $0x28f0] sm:$0xf0]  ;;  %v20428_v18 = vld [vmem:[%s20977_s27 + $0x2ae4] sm:$0xf]  ;;  %v17649_v51 = vor.u32 %v20272_v2, %v17646_v10  ;;  %v17889_v20 = vor.u32 %v20332_v6, %v17886_v62 }
 0x305   : > { %v18142_v59 = vld [vmem:[%s20977_s27 + $0x29f0] sm:$0xf0]  ;;  %11031 = vmatpush.bf16.msrb.mxu1 %v17409_v43  ;;  %v18017_v24 = vor.u32 %v20364_v50, %v18014_v29  ;;  %v20328_v0 = vld [vmem:[%s20977_s27 + $0x27c4] sm:$0xf] }
 0x306   : > { %11044 = vmatpush.bf16.msrb.mxu2 %v17537_v57  ;;  %v18270_v25 = vld [vmem:[%s20977_s27 + $0x2af0] sm:$0xf0]  ;;  %v18145_v55 = vor.u32 %v20396_v9, %v18142_v59  ;;  %v20360_v8 = vld [vmem:[%s20977_s27 + $0x28c4] sm:$0xf] }
 0x307   : > { %11057 = vmatpush.bf16.msrb.mxu3 %v17665_v61  ;;  %v17870_v48 = vld [vmem:[%s20977_s27 + $0x27d0] sm:$0xf0]  ;;  %v18273_v43 = vor.u32 %v20428_v18, %v18270_v25  ;;  %v20392_v52 = vld [vmem:[%s20977_s27 + $0x29c4] sm:$0xf]  ;;  %v24699_v25 = vld [vmem:[#allocation17_spill] sm:$0xff] }
 0x308   : > { %11019 = vmatpush.bf16.msrb.mxu0 %v17265_v4  ;;  %v17998_v57 = vld [vmem:[%s20977_s27 + $0x28d0] sm:$0xf0]  ;;  %v20424_v60 = vld [vmem:[%s20977_s27 + $0x2ac4] sm:$0xf]  ;;  %v17873_v56 = vor.u32 %v20328_v0, %v17870_v48  ;;  %v24696_v4 = vld [vmem:[#allocation15_spill] sm:$0xff] }
 0x309   : > { %v18126_v11 = vld [vmem:[%s20977_s27 + $0x29d0] sm:$0xf0]  ;;  %11032 = vmatpush.bf16.msrb.mxu1 %v17393_v63  ;;  %v18001_v2 = vor.u32 %v20360_v8, %v17998_v57  ;;  %v20324_v6 = vld [vmem:[%s20977_s27 + $0x27a4] sm:$0xf] }
 0x30a   : > { %11045 = vmatpush.bf16.msrb.mxu2 %v17521_v22  ;;  %v18254_v61 = vld [vmem:[%s20977_s27 + $0x2ad0] sm:$0xf0]  ;;  %v18129_v10 = vor.u32 %v20392_v52, %v18126_v11  ;;  %v20356_v50 = vld [vmem:[%s20977_s27 + $0x28a4] sm:$0xf] }
 0x30b   : > { %11058 = vmatpush.bf16.msrb.mxu3 %v17649_v51  ;;  %v17854_v62 = vld [vmem:[%s20977_s27 + $0x27b0] sm:$0xf0]  ;;  %11020 = vmatmul.bf16.vlgmr.msrb.gmra.mxu0 %v24696_v4  ;;  %v18257_v29 = vor.u32 %v20424_v60, %v18254_v61  ;;  %v20388_v59 = vld [vmem:[%s20977_s27 + $0x29a4] sm:$0xf]  ;;  %v10813_v61 = vpop.f32.mrf.mxu0 }
 0x30c   : > { %11064 = vmatpush.bf16.msra.mxu0 %v17889_v20  ;;  %v17982_v9 = vld [vmem:[%s20977_s27 + $0x28b0] sm:$0xf0]  ;;  %v24697_v48 = vld [vmem:[#allocation18_spill] sm:$0xff]  ;;  %v17857_v51 = vor.u32 %v20324_v6, %v17854_v62  ;;  %v10826_v6 = vpop.f32.mrf.mxu1 }
 0x30d   : > { %11077 = vmatpush.bf16.msra.mxu1 %v18017_v24  ;;  %v18110_v63 = vld [vmem:[%s20977_s27 + $0x29b0] sm:$0xf0]  ;;  %11046 = vmatmul.bf16.vlgmr.msrb.gmra.mxu2 %v24697_v48  ;;  %v20420_v8 = vld [vmem:[%s20977_s27 + $0x2aa4] sm:$0xf]  ;;  %v17985_v20 = vor.u32 %v20356_v50, %v17982_v9 }
 0x30e   : > { %11090 = vmatpush.bf16.msra.mxu2 %v18145_v55  ;;  %v24698_v22 = vld [vmem:[#allocation16_spill] sm:$0xff]  ;;  %11059 = vmatmul.bf16.vlgmr.msrb.gmra.mxu3 %v24699_v25  ;;  %v18113_v24 = vor.u32 %v20388_v59, %v18110_v63  ;;  %v20320_v55 = vld [vmem:[%s20977_s27 + $0x2784] sm:$0xf] }
 0x30f   : > { %11103 = vmatpush.bf16.msra.mxu3 %v18273_v43  ;;  %11033 = vmatmul.bf16.vlgmr.msrb.gmra.mxu1 %v24698_v22  ;;  %v18238_v18 = vld [vmem:[%s20977_s27 + $0x2ab0] sm:$0xf0]  ;;  %v20352_v43 = vld [vmem:[%s20977_s27 + $0x2884] sm:$0xf] }
 0x310   : > { %11065 = vmatpush.bf16.msra.mxu0 %v17873_v56  ;;  %v17838_v0 = vld [vmem:[%s20977_s27 + $0x2790] sm:$0xf0]  ;;  %v18241_v57 = vor.u32 %v20420_v8, %v18238_v18  ;;  %v20384_v11 = vld [vmem:[%s20977_s27 + $0x2984] sm:$0xf] }
 0x311   : > { %11078 = vmatpush.bf16.msra.mxu1 %v18001_v2  ;;  %v17966_v52 = vld [vmem:[%s20977_s27 + $0x2890] sm:$0xf0]  ;;  %v20416_v25 = vld [vmem:[%s20977_s27 + $0x2a84] sm:$0xf]  ;;  %v10814_v2 = vadd.f32 %v10813_v61, %v22660_v58 }
 0x312   : > { %11091 = vmatpush.bf16.msra.mxu2 %v18129_v10  ;;  %v18094_v60 = vld [vmem:[%s20977_s27 + $0x2990] sm:$0xf0]  ;;  %v17841_v10 = vor.u32 %v20320_v55, %v17838_v0  ;;  %v17969_v62 = vor.u32 %v20352_v43, %v17966_v52  ;;  %v20348_v59 = vld [vmem:[%s20977_s27 + $0x2864] sm:$0xf] }
 0x313   : > { %11104 = vmatpush.bf16.msra.mxu3 %v18257_v29  ;;  %v18222_v56 = vld [vmem:[%s20977_s27 + $0x2a90] sm:$0xf0]  ;;  %v18097_v50 = vor.u32 %v20384_v11, %v18094_v60  ;;  %v20316_v29 = vld [vmem:[%s20977_s27 + $0x2764] sm:$0xf]  ;;  %v10827_v8 = vadd.f32 %v10826_v6, %v10814_v2  ;;  %v10839_v60 = vpop.f32.mrf.mxu2  ;;  %v10852_v6 = vpop.f32.mrf.mxu3 }
 0x314   : > { %11066 = vmatpush.bf16.msra.mxu0 %v17857_v51  ;;  %v17822_v9 = vld [vmem:[%s20977_s27 + $0x2770] sm:$0xf0]  ;;  %v18225_v63 = vor.u32 %v20416_v25, %v18222_v56  ;;  %v20380_v51 = vld [vmem:[%s20977_s27 + $0x2964] sm:$0xf] }
 0x315   : > { %11079 = vmatpush.bf16.msra.mxu1 %v17985_v20  ;;  %v17950_v18 = vld [vmem:[%s20977_s27 + $0x2870] sm:$0xf0]  ;;  %v20412_v55 = vld [vmem:[%s20977_s27 + $0x2a64] sm:$0xf] }
 0x316   : > { %11092 = vmatpush.bf16.msra.mxu2 %v18113_v24  ;;  %v18078_v58 = vld [vmem:[%s20977_s27 + $0x2970] sm:$0xf0]  ;;  %v17825_v24 = vor.u32 %v20316_v29, %v17822_v9  ;;  %v17953_v0 = vor.u32 %v20348_v59, %v17950_v18  ;;  %v20344_v25 = vld [vmem:[%s20977_s27 + $0x2844] sm:$0xf]  ;;  %v10828_v59 = vpop.f32.mrf.mxu1 }
 0x317   : > { %11105 = vmatpush.bf16.msra.mxu3 %v18241_v57  ;;  %v18206_v20 = vld [vmem:[%s20977_s27 + $0x2a70] sm:$0xf0]  ;;  %v18081_v43 = vor.u32 %v20380_v51, %v18078_v58  ;;  %v20312_v57 = vld [vmem:[%s20977_s27 + $0x2744] sm:$0xf] }
 0x318   : > { %11067 = vmatpush.bf16.msra.mxu0 %v17841_v10  ;;  %v17806_v52 = vld [vmem:[%s20977_s27 + $0x2750] sm:$0xf0]  ;;  %v18209_v11 = vor.u32 %v20412_v55, %v18206_v20  ;;  %v20376_v56 = vld [vmem:[%s20977_s27 + $0x2944] sm:$0xf]  ;;  %v10840_v10 = vadd.f32 %v10839_v60, %v10827_v8 }
 0x319   : > { %11080 = vmatpush.bf16.msra.mxu1 %v17969_v62  ;;  %v17934_v61 = vld [vmem:[%s20977_s27 + $0x2850] sm:$0xf0]  ;;  %v20408_v29 = vld [vmem:[%s20977_s27 + $0x2a44] sm:$0xf]  ;;  %v17809_v9 = vor.u32 %v20312_v57, %v17806_v52 }
 0x31a   : > { %11093 = vmatpush.bf16.msra.mxu2 %v18097_v50  ;;  %v18062_v2 = vld [vmem:[%s20977_s27 + $0x2950] sm:$0xf0]  ;;  %v10815_v50 = vpop.f32.mrf.mxu0  ;;  %v17937_v18 = vor.u32 %v20344_v25, %v17934_v61  ;;  %v20308_v51 = vld [vmem:[%s20977_s27 + $0x2724] sm:$0xf] }
 0x31b   : > { %11106 = vmatpush.bf16.msra.mxu3 %v18225_v63  ;;  %v18190_v62 = vld [vmem:[%s20977_s27 + $0x2a50] sm:$0xf0]  ;;  %v22731_v63 = vadd.f32 %v10852_v6, %v10840_v10  ;;  %v18065_v8 = vor.u32 %v20376_v56, %v18062_v2  ;;  %v20340_v55 = vld [vmem:[%s20977_s27 + $0x2824] sm:$0xf]  ;;  %v10841_v59 = vpop.f32.mrf.mxu2 }
 0x31c   : > { %11068 = vmatpush.bf16.msra.mxu0 %v17825_v24  ;;  %v17790_v58 = vld [vmem:[%s20977_s27 + $0x2730] sm:$0xf0]  ;;  %v18193_v20 = vor.u32 %v20408_v29, %v18190_v62  ;;  %v20372_v57 = vld [vmem:[%s20977_s27 + $0x2924] sm:$0xf] }
 0x31d   : > { %11081 = vmatpush.bf16.msra.mxu1 %v17953_v0  ;;  %v17918_v24 = vld [vmem:[%s20977_s27 + $0x2830] sm:$0xf0]  ;;  %v20404_v0 = vld [vmem:[%s20977_s27 + $0x2a24] sm:$0xf]  ;;  %v17793_v60 = vor.u32 %v20308_v51, %v17790_v58 }
 0x31e   : > { %11094 = vmatpush.bf16.msra.mxu2 %v18081_v43  ;;  %v18046_v52 = vld [vmem:[%s20977_s27 + $0x2930] sm:$0xf0]  ;;  %v20304_v25 = vld [vmem:[%s20977_s27 + $0x2704] sm:$0xf] }
 0x31f   : > { %11107 = vmatpush.bf16.msra.mxu3 %v18209_v11  ;;  %v18174_v43 = vld [vmem:[%s20977_s27 + $0x2a30] sm:$0xf0]  ;;  %v17921_v11 = vor.u32 %v20340_v55, %v17918_v24  ;;  %v18049_v56 = vor.u32 %v20372_v57, %v18046_v52  ;;  %v20336_v2 = vld [vmem:[%s20977_s27 + $0x2804] sm:$0xf] }
 0x320   : > { %11069 = vmatpush.bf16.msra.mxu0 %v17809_v9  ;;  %v17774_v61 = vld [vmem:[%s20977_s27 + $0x2710] sm:$0xf0]  ;;  %v20368_v6 = vld [vmem:[%s20977_s27 + $0x2904] sm:$0xf]  ;;  %v18177_v29 = vor.u32 %v20404_v0, %v18174_v43 }
 0x321   : > { %11082 = vmatpush.bf16.msra.mxu1 %v17937_v18  ;;  %v17902_v10 = vld [vmem:[%s20977_s27 + $0x2810] sm:$0xf0]  ;;  %v20400_v50 = vld [vmem:[%s20977_s27 + $0x2a04] sm:$0xf]  ;;  %v17777_v55 = vor.u32 %v20304_v25, %v17774_v61 }
 0x322   : > { %11095 = vmatpush.bf16.msra.mxu2 %v18065_v8  ;;  %v18030_v62 = vld [vmem:[%s20977_s27 + $0x2910] sm:$0xf0]  ;;  %v20460_v51 = vld [vmem:[%s20977_s27 + $0x2be4] sm:$0xf]  ;;  %v10854_v8 = vpop.f32.mrf.mxu3 }
 0x323   : > { %11108 = vmatpush.bf16.msra.mxu3 %v18193_v20  ;;  %v18158_v9 = vld [vmem:[%s20977_s27 + $0x2a10] sm:$0xf0]  ;;  %v20492_v18 = vld [vmem:[%s20977_s27 + $0x2ce4] sm:$0xf]  ;;  %v17905_v20 = vor.u32 %v20336_v2, %v17902_v10  ;;  %v18033_v0 = vor.u32 %v20368_v6, %v18030_v62 }
 0x324   : > { %v18398_v58 = vld [vmem:[%s20977_s27 + $0x2bf0] sm:$0xf0]  ;;  %11070 = vmatpush.bf16.msra.mxu0 %v17793_v60  ;;  %v20524_v57 = vld [vmem:[%s20977_s27 + $0x2de4] sm:$0xf]  ;;  %v18161_v60 = vor.u32 %v20400_v50, %v18158_v9 }
 0x325   : > { %v18526_v24 = vld [vmem:[%s20977_s27 + $0x2cf0] sm:$0xf0]  ;;  %11083 = vmatpush.bf16.msra.mxu1 %v17921_v11  ;;  %v20556_v43 = vld [vmem:[%s20977_s27 + $0x2ee4] sm:$0xf]  ;;  %v18401_v8 = vor.u32 %v20460_v51, %v18398_v58 }
 0x326   : > { %v18654_v52 = vld [vmem:[%s20977_s27 + $0x2df0] sm:$0xf0]  ;;  %11096 = vmatpush.bf16.msra.mxu2 %v18049_v56  ;;  %v18529_v25 = vor.u32 %v20492_v18, %v18526_v24  ;;  %v20456_v48 = vld [vmem:[%s20977_s27 + $0x2bc4] sm:$0xf] }
 0x327   : > { %v18782_v59 = vld [vmem:[%s20977_s27 + $0x2ef0] sm:$0xf0]  ;;  %11109 = vmatpush.bf16.msra.mxu3 %v18177_v29  ;;  %v18657_v61 = vor.u32 %v20524_v57, %v18654_v52  ;;  %v20488_v22 = vld [vmem:[%s20977_s27 + $0x2cc4] sm:$0xf] }
 0x328   : > { %v18382_v4 = vld [vmem:[%s20977_s27 + $0x2bd0] sm:$0xf0]  ;;  %11071 = vmatpush.bf16.msra.mxu0 %v17777_v55  ;;  %v18785_v11 = vor.u32 %v20556_v43, %v18782_v59  ;;  %v20520_v2 = vld [vmem:[%s20977_s27 + $0x2dc4] sm:$0xf]  ;;  %v24700_v55 = vld [vmem:[#allocation19_spill] sm:$0xff] }
 0x329   : > { %v18510_v56 = vld [vmem:[%s20977_s27 + $0x2cd0] sm:$0xf0]  ;;  %11084 = vmatpush.bf16.msra.mxu1 %v17905_v20  ;;  %v20552_v6 = vld [vmem:[%s20977_s27 + $0x2ec4] sm:$0xf]  ;;  %v18385_v62 = vor.u32 %v20456_v48, %v18382_v4  ;;  %v24703_v43 = vld [vmem:[#allocation21_spill] sm:$0xff] }
 0x32a   : > { %v18638_v10 = vld [vmem:[%s20977_s27 + $0x2dd0] sm:$0xf0]  ;;  %11097 = vmatpush.bf16.msra.mxu2 %v18033_v0  ;;  %v18513_v50 = vor.u32 %v20488_v22, %v18510_v56  ;;  %v20452_v51 = vld [vmem:[%s20977_s27 + $0x2ba4] sm:$0xf] }
 0x32b   : > { %v18766_v29 = vld [vmem:[%s20977_s27 + $0x2ed0] sm:$0xf0]  ;;  %11110 = vmatpush.bf16.msra.mxu3 %v18161_v60  ;;  %v18641_v9 = vor.u32 %v20520_v2, %v18638_v10  ;;  %v20484_v18 = vld [vmem:[%s20977_s27 + $0x2ca4] sm:$0xf]  ;;  %11072 = vmatmul.bf16.vlgmr.msra.gmra.mxu0 %v24700_v55 }
 0x32c   : > { %11116 = vmatpush.bf16.msrb.mxu0 %v18401_v8  ;;  %v18366_v58 = vld [vmem:[%s20977_s27 + $0x2bb0] sm:$0xf0]  ;;  %v18769_v24 = vor.u32 %v20552_v6, %v18766_v29  ;;  %v20516_v52 = vld [vmem:[%s20977_s27 + $0x2da4] sm:$0xf]  ;;  %v10865_v29 = vpop.f32.mrf.mxu0 }
 0x32d   : > { %11129 = vmatpush.bf16.msrb.mxu1 %v18529_v25  ;;  %v18494_v57 = vld [vmem:[%s20977_s27 + $0x2cb0] sm:$0xf0]  ;;  %v24701_v4 = vld [vmem:[#allocation22_spill] sm:$0xff]  ;;  %v18369_v59 = vor.u32 %v20452_v51, %v18366_v58  ;;  %v10878_v51 = vpop.f32.mrf.mxu1 }
 0x32e   : > { %11142 = vmatpush.bf16.msrb.mxu2 %v18657_v61  ;;  %v18622_v20 = vld [vmem:[%s20977_s27 + $0x2db0] sm:$0xf0]  ;;  %v20548_v22 = vld [vmem:[%s20977_s27 + $0x2ea4] sm:$0xf]  ;;  %11111 = vmatmul.bf16.vlgmr.msra.gmra.mxu3 %v24703_v43  ;;  %v18497_v60 = vor.u32 %v20484_v18, %v18494_v57 }
 0x32f   : > { %11155 = vmatpush.bf16.msrb.mxu3 %v18785_v11  ;;  %11098 = vmatmul.bf16.vlgmr.msra.gmra.mxu2 %v24701_v4  ;;  %v24702_v48 = vld [vmem:[#allocation20_spill] sm:$0xff]  ;;  %v18625_v8 = vor.u32 %v20516_v52, %v18622_v20  ;;  %v20448_v25 = vld [vmem:[%s20977_s27 + $0x2b84] sm:$0xf] }
 0x330   : > { %11085 = vmatmul.bf16.vlgmr.msra.gmra.mxu1 %v24702_v48  ;;  %v18750_v0 = vld [vmem:[%s20977_s27 + $0x2eb0] sm:$0xf0]  ;;  %11117 = vmatpush.bf16.msrb.mxu0 %v18385_v62  ;;  %v20480_v11 = vld [vmem:[%s20977_s27 + $0x2c84] sm:$0xf] }
 0x331   : > { %11130 = vmatpush.bf16.msrb.mxu1 %v18513_v50  ;;  %v18350_v61 = vld [vmem:[%s20977_s27 + $0x2b90] sm:$0xf0]  ;;  %v18753_v56 = vor.u32 %v20548_v22, %v18750_v0  ;;  %v20512_v10 = vld [vmem:[%s20977_s27 + $0x2d84] sm:$0xf]  ;;  %v10866_v50 = vadd.f32 %v10865_v29, %v22731_v63 }
 0x332   : > { %11143 = vmatpush.bf16.msrb.mxu2 %v18641_v9  ;;  %v18478_v2 = vld [vmem:[%s20977_s27 + $0x2c90] sm:$0xf0]  ;;  %v20544_v43 = vld [vmem:[%s20977_s27 + $0x2e84] sm:$0xf]  ;;  %v18353_v9 = vor.u32 %v20448_v25, %v18350_v61 }
 0x333   : > { %11156 = vmatpush.bf16.msrb.mxu3 %v18769_v24  ;;  %v18606_v6 = vld [vmem:[%s20977_s27 + $0x2d90] sm:$0xf0]  ;;  %v18481_v58 = vor.u32 %v20480_v11, %v18478_v2  ;;  %v20444_v24 = vld [vmem:[%s20977_s27 + $0x2b64] sm:$0xf]  ;;  %v10879_v22 = vadd.f32 %v10878_v51, %v10866_v50  ;;  %v10904_v51 = vpop.f32.mrf.mxu3 }
 0x334   : > { %v18734_v62 = vld [vmem:[%s20977_s27 + $0x2e90] sm:$0xf0]  ;;  %11118 = vmatpush.bf16.msrb.mxu0 %v18369_v59  ;;  %v18609_v18 = vor.u32 %v20512_v10, %v18606_v6  ;;  %v20476_v52 = vld [vmem:[%s20977_s27 + $0x2c64] sm:$0xf]  ;;  %v10891_v6 = vpop.f32.mrf.mxu2 }
 0x335   : > { %11131 = vmatpush.bf16.msrb.mxu1 %v18497_v60  ;;  %v18334_v57 = vld [vmem:[%s20977_s27 + $0x2b70] sm:$0xf0]  ;;  %v18737_v20 = vor.u32 %v20544_v43, %v18734_v62  ;;  %v20508_v59 = vld [vmem:[%s20977_s27 + $0x2d64] sm:$0xf] }
 0x336   : > { %11144 = vmatpush.bf16.msrb.mxu2 %v18625_v8  ;;  %v18462_v0 = vld [vmem:[%s20977_s27 + $0x2c70] sm:$0xf0]  ;;  %v20540_v25 = vld [vmem:[%s20977_s27 + $0x2e64] sm:$0xf]  ;;  %v18337_v8 = vor.u32 %v20444_v24, %v18334_v57 }
 0x337   : > { %11157 = vmatpush.bf16.msrb.mxu3 %v18753_v56  ;;  %v18590_v63 = vld [vmem:[%s20977_s27 + $0x2d70] sm:$0xf0]  ;;  %v18465_v61 = vor.u32 %v20476_v52, %v18462_v0  ;;  %v20440_v56 = vld [vmem:[%s20977_s27 + $0x2b44] sm:$0xf]  ;;  %v10880_v52 = vpop.f32.mrf.mxu1 }
 0x338   : > { %v18718_v60 = vld [vmem:[%s20977_s27 + $0x2e70] sm:$0xf0]  ;;  %11119 = vmatpush.bf16.msrb.mxu0 %v18353_v9  ;;  %v18593_v11 = vor.u32 %v20508_v59, %v18590_v63  ;;  %v20472_v43 = vld [vmem:[%s20977_s27 + $0x2c44] sm:$0xf]  ;;  %v10892_v9 = vadd.f32 %v10891_v6, %v10879_v22 }
 0x339   : > { %11132 = vmatpush.bf16.msrb.mxu1 %v18481_v58  ;;  %v18318_v2 = vld [vmem:[%s20977_s27 + $0x2b50] sm:$0xf0]  ;;  %v18721_v10 = vor.u32 %v20540_v25, %v18718_v60  ;;  %v20504_v62 = vld [vmem:[%s20977_s27 + $0x2d44] sm:$0xf] }
 0x33a   : > { %11145 = vmatpush.bf16.msrb.mxu2 %v18609_v18  ;;  %v18446_v29 = vld [vmem:[%s20977_s27 + $0x2c50] sm:$0xf0]  ;;  %v20536_v24 = vld [vmem:[%s20977_s27 + $0x2e44] sm:$0xf]  ;;  %v10867_v18 = vpop.f32.mrf.mxu0  ;;  %v18321_v57 = vor.u32 %v20440_v56, %v18318_v2 }
 0x33b   : > { %11158 = vmatpush.bf16.msrb.mxu3 %v18737_v20  ;;  %v18574_v50 = vld [vmem:[%s20977_s27 + $0x2d50] sm:$0xf0]  ;;  %v22802_v20 = vadd.f32 %v10904_v51, %v10892_v9  ;;  %v18449_v0 = vor.u32 %v20472_v43, %v18446_v29  ;;  %v20436_v59 = vld [vmem:[%s20977_s27 + $0x2b24] sm:$0xf] }
 0x33c   : > { %v18702_v58 = vld [vmem:[%s20977_s27 + $0x2e50] sm:$0xf0]  ;;  %11120 = vmatpush.bf16.msrb.mxu0 %v18337_v8  ;;  %v18577_v22 = vor.u32 %v20504_v62, %v18574_v50  ;;  %v20468_v25 = vld [vmem:[%s20977_s27 + $0x2c24] sm:$0xf]  ;;  %v10893_v52 = vpop.f32.mrf.mxu2 }
 0x33d   : > { %11133 = vmatpush.bf16.msrb.mxu1 %v18465_v61  ;;  %v18302_v63 = vld [vmem:[%s20977_s27 + $0x2b30] sm:$0xf0]  ;;  %v18705_v60 = vor.u32 %v20536_v24, %v18702_v58  ;;  %v20500_v56 = vld [vmem:[%s20977_s27 + $0x2d24] sm:$0xf]  ;;  %v19119_v52 = vld [vmem:[%s20977_s27 + $0x1f4] sm:$0xf0] }
 0x33e   : > { %11146 = vmatpush.bf16.msrb.mxu2 %v18593_v11  ;;  %v18430_v8 = vld [vmem:[%s20977_s27 + $0x2c30] sm:$0xf0]  ;;  %v20532_v61 = vld [vmem:[%s20977_s27 + $0x2e24] sm:$0xf]  ;;  %v18305_v6 = vor.u32 %v20436_v59, %v18302_v63 }
 0x33f   : > { %11159 = vmatpush.bf16.msrb.mxu3 %v18721_v10  ;;  %v18558_v2 = vld [vmem:[%s20977_s27 + $0x2d30] sm:$0xf0]  ;;  %v20432_v43 = vld [vmem:[%s20977_s27 + $0x2b04] sm:$0xf]  ;;  %v18433_v10 = vor.u32 %v20468_v25, %v18430_v8 }
 0x340   : > { %v18686_v11 = vld [vmem:[%s20977_s27 + $0x2e30] sm:$0xf0]  ;;  %11121 = vmatpush.bf16.msrb.mxu0 %v18321_v57  ;;  %v18561_v62 = vor.u32 %v20500_v56, %v18558_v2  ;;  %v20464_v50 = vld [vmem:[%s20977_s27 + $0x2c04] sm:$0xf]  ;;  %v12900_v56 = vld [vmem:[%s20977_s27 + $0xe8] sm:$0xf] }
 0x341   : > { %v18286_v29 = vld [vmem:[%s20977_s27 + $0x2b10] sm:$0xf0]  ;;  %11134 = vmatpush.bf16.msrb.mxu1 %v18449_v0  ;;  %v20496_v51 = vld [vmem:[%s20977_s27 + $0x2d04] sm:$0xf]  ;;  %v18689_v24 = vor.u32 %v20532_v61, %v18686_v11  ;;  %v19087_v2 = vld [vmem:[%s20977_s27 + $0xf4] sm:$0xf0] }
 0x342   : > { %11147 = vmatpush.bf16.msrb.mxu2 %v18577_v22  ;;  %v18414_v9 = vld [vmem:[%s20977_s27 + $0x2c10] sm:$0xf0]  ;;  %v20528_v18 = vld [vmem:[%s20977_s27 + $0x2e04] sm:$0xf]  ;;  %v10906_v22 = vpop.f32.mrf.mxu3  ;;  %v18289_v25 = vor.u32 %v20432_v43, %v18286_v29  ;;  %v13028_v11 = vld [vmem:[%s20977_s27 + $0x1e8] sm:$0xf]  ;;  %v12901_v29 = vor.u32 %v19087_v2, %v12900_v56 }
 0x343   : > { %11160 = vmatpush.bf16.msrb.mxu3 %v18705_v60  ;;  %v18542_v58 = vld [vmem:[%s20977_s27 + $0x2d10] sm:$0xf0]  ;;  %v20588_v59 = vld [vmem:[%s20977_s27 + $0x2fe4] sm:$0xf]  ;;  %v18417_v60 = vor.u32 %v20464_v50, %v18414_v9  ;;  %v12884_v50 = vld [vmem:[%s20977_s27 + $0xc8] sm:$0xf] }
 0x344   : > { %v18670_v57 = vld [vmem:[%s20977_s27 + $0x2e10] sm:$0xf0]  ;;  %v20620_v0 = vld [vmem:[%s20977_s27 + $0x30e4] sm:$0xf]  ;;  %11122 = vmatpush.bf16.msrb.mxu0 %v18305_v6  ;;  %v18545_v61 = vor.u32 %v20496_v51, %v18542_v58  ;;  %v19083_v9 = vld [vmem:[%s20977_s27 + $0xd4] sm:$0xf0] }
 0x345   : > { %v18910_v63 = vld [vmem:[%s20977_s27 + $0x2ff0] sm:$0xf0]  ;;  %11135 = vmatpush.bf16.msrb.mxu1 %v18433_v10  ;;  %v18673_v6 = vor.u32 %v20528_v18, %v18670_v57  ;;  %v20584_v4 = vld [vmem:[%s20977_s27 + $0x2fc4] sm:$0xf]  ;;  %v13029_v10 = vor.u32 %v19119_v52, %v13028_v11  ;;  %v13012_v51 = vld [vmem:[%s20977_s27 + $0x1c8] sm:$0xf]  ;;  %v12885_v57 = vor.u32 %v19083_v9, %v12884_v50 }
 0x346   : > { %v19038_v8 = vld [vmem:[%s20977_s27 + $0x30f0] sm:$0xf0]  ;;  %11148 = vmatpush.bf16.msrb.mxu2 %v18561_v62  ;;  %v18913_v22 = vor.u32 %v20588_v59, %v18910_v63  ;;  %v20616_v48 = vld [vmem:[%s20977_s27 + $0x30c4] sm:$0xf]  ;;  %v12868_v2 = vld [vmem:[%s20977_s27 + $0xa8] sm:$0xf] }
 0x347   : > { %11161 = vmatpush.bf16.msrb.mxu3 %v18689_v24  ;;  %v19041_v43 = vor.u32 %v20620_v0, %v19038_v8  ;;  %v18894_v55 = vld [vmem:[%s20977_s27 + $0x2fd0] sm:$0xf0]  ;;  %v19115_v24 = vld [vmem:[%s20977_s27 + $0x1d4] sm:$0xf0]  ;;  %v20580_v59 = vld [vmem:[%s20977_s27 + $0x2fa4] sm:$0xf] }
 0x348   : > { %11123 = vmatpush.bf16.msrb.mxu0 %v18289_v25  ;;  %v19022_v62 = vld [vmem:[%s20977_s27 + $0x30d0] sm:$0xf0]  ;;  %v18897_v58 = vor.u32 %v20584_v4, %v18894_v55  ;;  %v20612_v0 = vld [vmem:[%s20977_s27 + $0x30a4] sm:$0xf]  ;;  %v24704_v25 = vld [vmem:[#allocation23_spill] sm:$0xff]  ;;  %v13013_v8 = vor.u32 %v19115_v24, %v13012_v51  ;;  %v10917_v9 = vpop.f32.mrf.mxu0 }
 0x349   : > { %11136 = vmatpush.bf16.msrb.mxu1 %v18417_v60  ;;  %v19025_v18 = vor.u32 %v20616_v48, %v19022_v62  ;;  %v18878_v63 = vld [vmem:[%s20977_s27 + $0x2fb0] sm:$0xf0]  ;;  %v19079_v60 = vld [vmem:[%s20977_s27 + $0xb4] sm:$0xf0]  ;;  %v12996_v55 = vld [vmem:[%s20977_s27 + $0x1a8] sm:$0xf] }
 0x34a   : > { %11149 = vmatpush.bf16.msrb.mxu2 %v18545_v61  ;;  %v19006_v56 = vld [vmem:[%s20977_s27 + $0x30b0] sm:$0xf0]  ;;  %v19111_v4 = vld [vmem:[%s20977_s27 + $0x1b4] sm:$0xf0]  ;;  %v24705_v48 = vld [vmem:[#allocation25_spill] sm:$0xff]  ;;  %v18881_v61 = vor.u32 %v20580_v59, %v18878_v63  ;;  %v12869_v52 = vor.u32 %v19079_v60, %v12868_v2 }
 0x34b   : > { %11162 = vmatpush.bf16.msrb.mxu3 %v18673_v6  ;;  %11124 = vmatmul.bf16.vlgmr.msrb.gmra.mxu0 %v24704_v25  ;;  %v19009_v11 = vor.u32 %v20612_v0, %v19006_v56  ;;  %v20576_v6 = vld [vmem:[%s20977_s27 + $0x2f84] sm:$0xf]  ;;  %v12852_v62 = vld [vmem:[%s20977_s27 + $0x88] sm:$0xf]  ;;  %v19075_v50 = vld [vmem:[%s20977_s27 + $0x94] sm:$0xf0] }
 0x34c   : > { %11168 = vmatpush.bf16.msra.mxu0 %v18913_v22  ;;  %11137 = vmatmul.bf16.vlgmr.msrb.gmra.mxu1 %v21967_v13  ;;  %v18862_v22 = vld [vmem:[%s20977_s27 + $0x2f90] sm:$0xf0]  ;;  %v12980_v51 = vld [vmem:[%s20977_s27 + $0x188] sm:$0xf]  ;;  %v19107_v24 = vld [vmem:[%s20977_s27 + $0x194] sm:$0xf0]  ;;  %v12853_v63 = vor.u32 %v19075_v50, %v12852_v62 }
 0x34d   : > { %11181 = vmatpush.bf16.msra.mxu1 %v19041_v43  ;;  %11150 = vmatmul.bf16.vlgmr.msrb.gmra.mxu2 %v21974_v54  ;;  %v20608_v43 = vld [vmem:[%s20977_s27 + $0x3084] sm:$0xf]  ;;  %v12981_v2 = vor.u32 %v19107_v24, %v12980_v51  ;;  %v12820_v51 = vld [vmem:[%s20977_s27 + $0x48] sm:$0xf]  ;;  %v19067_v24 = vld [vmem:[%s20977_s27 + $0x54] sm:$0xf0] }
 0x34e   : > { %11194 = vmatpush.bf16.msra.mxu2 %v12901_v29  ;;  %11163 = vmatmul.bf16.vlgmr.msrb.gmra.mxu3 %v24705_v48  ;;  %v12997_v29 = vor.u32 %v19111_v4, %v12996_v55  ;;  %v20572_v0 = vld [vmem:[%s20977_s27 + $0x2f64] sm:$0xf]  ;;  %v18974_v55 = vld [vmem:[%s20977_s27 + $0x3070] sm:$0xf0]  ;;  %v12836_v4 = vld [vmem:[%s20977_s27 + $0x68] sm:$0xf] }
 0x34f   : > { %11207 = vmatpush.bf16.msra.mxu3 %v13029_v10  ;;  %v18990_v10 = vld [vmem:[%s20977_s27 + $0x3090] sm:$0xf0]  ;;  %v20604_v56 = vld [vmem:[%s20977_s27 + $0x3064] sm:$0xf]  ;;  %v19147_v48 = vld [vmem:[%s20977_s27 + $0x2d4] sm:$0xf0] }
 0x350   : > { %11169 = vmatpush.bf16.msra.mxu0 %v18897_v58  ;;  %v10918_v58 = vadd.f32 %v10917_v9, %v22802_v20  ;;  %v18993_v59 = vor.u32 %v20608_v43, %v18990_v10  ;;  %v19071_v20 = vld [vmem:[%s20977_s27 + $0x74] sm:$0xf0]  ;;  %v20568_v43 = vld [vmem:[%s20977_s27 + $0x2f44] sm:$0xf]  ;;  %v10943_v50 = vpop.f32.mrf.mxu2  ;;  %v18958_v9 = vld [vmem:[%s20977_s27 + $0x3050] sm:$0xf0] }
 0x351   : > { %11182 = vmatpush.bf16.msra.mxu1 %v19025_v18  ;;  %v18865_v18 = vor.u32 %v20576_v6, %v18862_v22  ;;  %v18977_v6 = vor.u32 %v20604_v56, %v18974_v55  ;;  %v12837_v22 = vor.u32 %v19071_v20, %v12836_v4  ;;  %v20600_v10 = vld [vmem:[%s20977_s27 + $0x3044] sm:$0xf]  ;;  %v18814_v4 = vld [vmem:[%s20977_s27 + $0x2f30] sm:$0xf0]  ;;  %v13268_v54 = vld [vmem:[%s20977_s27 + $0x3c8] sm:$0xf] }
 0x352   : > { %11195 = vmatpush.bf16.msra.mxu2 %v12885_v57  ;;  %v10930_v57 = vpop.f32.mrf.mxu1  ;;  %v20564_v55 = vld [vmem:[%s20977_s27 + $0x2f24] sm:$0xf] }
 0x353   : > { %11208 = vmatpush.bf16.msra.mxu3 %v13013_v8  ;;  %v18846_v8 = vld [vmem:[%s20977_s27 + $0x2f70] sm:$0xf0]  ;;  %v10931_v60 = vadd.f32 %v10930_v57, %v10918_v58  ;;  %v12948_v57 = vld [vmem:[%s20977_s27 + $0x148] sm:$0xf]  ;;  %v20596_v20 = vld [vmem:[%s20977_s27 + $0x3024] sm:$0xf] }
 0x354   : > { %11170 = vmatpush.bf16.msra.mxu0 %v18881_v61  ;;  %v12964_v61 = vld [vmem:[%s20977_s27 + $0x168] sm:$0xf] }
 0x355   : > { %11183 = vmatpush.bf16.msra.mxu1 %v19009_v11  ;;  %v19103_v11 = vld [vmem:[%s20977_s27 + $0x174] sm:$0xf0]  ;;  %v10944_v58 = vadd.f32 %v10943_v50, %v10931_v60  ;;  %v12821_v60 = vor.u32 %v19067_v24, %v12820_v51  ;;  %v18798_v50 = vld [vmem:[%s20977_s27 + $0x2f10] sm:$0xf0]  ;;  %v20592_v51 = vld [vmem:[%s20977_s27 + $0x3004] sm:$0xf] }
 0x356   : > { %11196 = vmatpush.bf16.msra.mxu2 %v12869_v52  ;;  %v18849_v52 = vor.u32 %v20572_v0, %v18846_v8  ;;  %v12965_v62 = vor.u32 %v19103_v11, %v12964_v61  ;;  %v18942_v11 = vld [vmem:[%s20977_s27 + $0x3030] sm:$0xf0] }
 0x357   : > { %11209 = vmatpush.bf16.msra.mxu3 %v12997_v29  ;;  %v18830_v29 = vld [vmem:[%s20977_s27 + $0x2f50] sm:$0xf0] }
 0x358   : > { %11171 = vmatpush.bf16.msra.mxu0 %v18865_v18  ;;  %v10956_v18 = vpop.f32.mrf.mxu3  ;;  %v18833_v0 = vor.u32 %v20568_v43, %v18830_v29  ;;  %v19063_v43 = vld [vmem:[%s20977_s27 + $0x34] sm:$0xf0]  ;;  %v18817_v29 = vor.u32 %v20564_v55, %v18814_v4  ;;  %v18926_v24 = vld [vmem:[%s20977_s27 + $0x3010] sm:$0xf0] }
 0x359   : > { %11184 = vmatpush.bf16.msra.mxu1 %v18993_v59  ;;  %v19099_v59 = vld [vmem:[%s20977_s27 + $0x154] sm:$0xf0]  ;;  %v22873_v56 = vadd.f32 %v10956_v18, %v10944_v58  ;;  %v12788_v58 = vld [vmem:[%s20977_s27 + $0x8] sm:$0xf] }
 0x35a   : > { %11197 = vmatpush.bf16.msra.mxu2 %v12853_v63  ;;  %v10919_v63 = vpop.f32.mrf.mxu0  ;;  %v10932_v8 = vpop.f32.mrf.mxu1  ;;  %v12949_v61 = vor.u32 %v19099_v59, %v12948_v57  ;;  %v19059_v57 = vld [vmem:[%s20977_s27 + $0x14] sm:$0xf0]  ;;  %v12916_v59 = vld [vmem:[%s20977_s27 + $0x108] sm:$0xf] }
 0x35b   : > { %11210 = vmatpush.bf16.msra.mxu3 %v12981_v2  ;;  %v18961_v2 = vor.u32 %v20600_v10, %v18958_v9  ;;  %v20560_v10 = vld [vmem:[%s20977_s27 + $0x2f04] sm:$0xf]  ;;  %v19091_v63 = vld [vmem:[%s20977_s27 + $0x114] sm:$0xf0]  ;;  %v13156_v8 = vld [vmem:[%s20977_s27 + $0x2e8] sm:$0xf] }
 0x35c   : > { %11172 = vmatpush.bf16.msra.mxu0 %v18849_v52  ;;  %v12804_v52 = vld [vmem:[%s20977_s27 + $0x28] sm:$0xf]  ;;  %v19151_v55 = vld [vmem:[%s20977_s27 + $0x2f4] sm:$0xf0]  ;;  %v18801_v4 = vor.u32 %v20560_v10, %v18798_v50 }
 0x35d   : > { %11185 = vmatpush.bf16.msra.mxu1 %v18977_v6  ;;  %v12932_v6 = vld [vmem:[%s20977_s27 + $0x128] sm:$0xf]  ;;  %v12805_v9 = vor.u32 %v19063_v43, %v12804_v52  ;;  %v19215_v52 = vld [vmem:[%s20977_s27 + $0x4f4] sm:$0xf0]  ;;  %v12789_v43 = vor.u32 %v19059_v57, %v12788_v58 }
 0x35e   : > { %11198 = vmatpush.bf16.msra.mxu2 %v12837_v22  ;;  %v19095_v22 = vld [vmem:[%s20977_s27 + $0x134] sm:$0xf0]  ;;  %v13524_v58 = vld [vmem:[%s20977_s27 + $0x5c8] sm:$0xf] }
 0x35f   : > { %11211 = vmatpush.bf16.msra.mxu3 %v12965_v62  ;;  %v18945_v62 = vor.u32 %v20596_v20, %v18942_v11  ;;  %v12933_v18 = vor.u32 %v19095_v22, %v12932_v6  ;;  %v19183_v20 = vld [vmem:[%s20977_s27 + $0x3f4] sm:$0xf0]  ;;  %v13412_v11 = vld [vmem:[%s20977_s27 + $0x4e8] sm:$0xf] }
 0x360   : > { %11173 = vmatpush.bf16.msra.mxu0 %v18833_v0  ;;  %v10945_v0 = vpop.f32.mrf.mxu2  ;;  %v13540_v6 = vld [vmem:[%s20977_s27 + $0x5e8] sm:$0xf]  ;;  %v19247_v22 = vld [vmem:[%s20977_s27 + $0x5f4] sm:$0xf0]  ;;  %v13413_v50 = vor.u32 %v19215_v52, %v13412_v11 }
 0x361   : > { %11186 = vmatpush.bf16.msra.mxu1 %v18961_v2  ;;  %v13284_v2 = vld [vmem:[%s20977_s27 + $0x3e8] sm:$0xf]  ;;  %v13157_v0 = vor.u32 %v19151_v55, %v13156_v8  ;;  %v19143_v55 = vld [vmem:[%s20977_s27 + $0x2b4] sm:$0xf0] }
 0x362   : > { %11199 = vmatpush.bf16.msra.mxu2 %v12821_v60  ;;  %v10958_v60 = vpop.f32.mrf.mxu3  ;;  %v13285_v10 = vor.u32 %v19183_v20, %v13284_v2  ;;  %v13124_v8 = vld [vmem:[%s20977_s27 + $0x2a8] sm:$0xf]  ;;  %v19175_v11 = vld [vmem:[%s20977_s27 + $0x3b4] sm:$0xf0] }
 0x363   : > { %11212 = vmatpush.bf16.msra.mxu3 %v12949_v61  ;;  %v18929_v61 = vor.u32 %v20592_v51, %v18926_v24  ;;  %v13140_v60 = vld [vmem:[%s20977_s27 + $0x2c8] sm:$0xf]  ;;  %v19211_v24 = vld [vmem:[%s20977_s27 + $0x4d4] sm:$0xf0] }
 0x364   : > { %11174 = vmatpush.bf16.msra.mxu0 %v18817_v29  ;;  %v12917_v29 = vor.u32 %v19091_v63, %v12916_v59  ;;  %v13396_v51 = vld [vmem:[%s20977_s27 + $0x4c8] sm:$0xf]  ;;  %v13141_v57 = vor.u32 %v19147_v48, %v13140_v60  ;;  %v19171_v60 = vld [vmem:[%s20977_s27 + $0x394] sm:$0xf0] }
 0x365   : > { %11187 = vmatpush.bf16.msra.mxu1 %v18945_v62  ;;  %v13541_v62 = vor.u32 %v19247_v22, %v13540_v6  ;;  %v13397_v63 = vor.u32 %v19211_v24, %v13396_v51  ;;  %v13252_v2 = vld [vmem:[%s20977_s27 + $0x3a8] sm:$0xf] }
 0x366   : > { %11200 = vmatpush.bf16.msra.mxu2 %v12805_v9  ;;  %v19179_v9 = vld [vmem:[%s20977_s27 + $0x3d4] sm:$0xf0]  ;;  %v13380_v52 = vld [vmem:[%s20977_s27 + $0x4a8] sm:$0xf]  ;;  %v13253_v6 = vor.u32 %v19175_v11, %v13252_v2 }
 0x367   : > { %11213 = vmatpush.bf16.msra.mxu3 %v12933_v18  ;;  %v19243_v18 = vld [vmem:[%s20977_s27 + $0x5d4] sm:$0xf0]  ;;  %v13269_v59 = vor.u32 %v19179_v9, %v13268_v54  ;;  %v13508_v48 = vld [vmem:[%s20977_s27 + $0x5a8] sm:$0xf] }
 0x368   : > { %11175 = vmatpush.bf16.msra.mxu0 %v18801_v4  ;;  %v24706_v4 = vld [vmem:[#allocation27_spill] sm:$0xff]  ;;  %v13525_v20 = vor.u32 %v19243_v18, %v13524_v58  ;;  %v19239_v54 = vld [vmem:[%s20977_s27 + $0x5b4] sm:$0xf0]  ;;  %v10969_v51 = vpop.f32.mrf.mxu0  ;;  %v13492_v24 = vld [vmem:[%s20977_s27 + $0x588] sm:$0xf] }
 0x369   : > { %11188 = vmatpush.bf16.msra.mxu1 %v18929_v61  ;;  %v19207_v61 = vld [vmem:[%s20977_s27 + $0x4b4] sm:$0xf0]  ;;  %v10970_v18 = vadd.f32 %v10969_v51, %v22873_v56  ;;  %v13332_v51 = vld [vmem:[%s20977_s27 + $0x448] sm:$0xf] }
 0x36a   : > { %11201 = vmatpush.bf16.msra.mxu2 %v12789_v43  ;;  %v13125_v43 = vor.u32 %v19143_v55, %v13124_v8  ;;  %v13381_v22 = vor.u32 %v19207_v61, %v13380_v52  ;;  %v19203_v9 = vld [vmem:[%s20977_s27 + $0x494] sm:$0xf0]  ;;  %v13092_v55 = vld [vmem:[%s20977_s27 + $0x268] sm:$0xf] }
 0x36b   : > { %11214 = vmatpush.bf16.msra.mxu3 %v12917_v29  ;;  %11176 = vmatmul.bf16.vlgmr.msra.gmra.mxu0 %v24706_v4  ;;  %v13108_v29 = vld [vmem:[%s20977_s27 + $0x288] sm:$0xf]  ;;  %v19235_v58 = vld [vmem:[%s20977_s27 + $0x594] sm:$0xf0] }
 0x36c   : > { %11220 = vmatpush.bf16.msrb.mxu0 %v13157_v0  ;;  %11189 = vmatmul.bf16.vlgmr.msra.gmra.mxu1 %v22046_v23  ;;  %v19139_v0 = vld [vmem:[%s20977_s27 + $0x294] sm:$0xf0]  ;;  %v13493_v11 = vor.u32 %v19235_v58, %v13492_v24 }
 0x36d   : > { %11233 = vmatpush.bf16.msrb.mxu1 %v13285_v10  ;;  %11202 = vmatmul.bf16.vlgmr.msra.gmra.mxu2 %v21103_v35  ;;  %v13236_v10 = vld [vmem:[%s20977_s27 + $0x388] sm:$0xf]  ;;  %v19135_v2 = vld [vmem:[%s20977_s27 + $0x274] sm:$0xf0] }
 0x36e   : > { %11246 = vmatpush.bf16.msrb.mxu2 %v13413_v50  ;;  %11215 = vmatmul.bf16.vlgmr.msra.gmra.mxu3 %v21109_v42  ;;  %v13509_v50 = vor.u32 %v19239_v54, %v13508_v48  ;;  %v19167_v61 = vld [vmem:[%s20977_s27 + $0x374] sm:$0xf0]  ;;  %v13348_v48 = vld [vmem:[%s20977_s27 + $0x468] sm:$0xf] }
 0x36f   : > { %11259 = vmatpush.bf16.msrb.mxu3 %v13541_v62  ;;  %v13364_v62 = vld [vmem:[%s20977_s27 + $0x488] sm:$0xf]  ;;  %v19199_v56 = vld [vmem:[%s20977_s27 + $0x474] sm:$0xf0] }
 0x370   : > { %11221 = vmatpush.bf16.msrb.mxu0 %v13141_v57  ;;  %v13109_v57 = vor.u32 %v19139_v0, %v13108_v29  ;;  %v13365_v8 = vor.u32 %v19203_v9, %v13364_v62  ;;  %v13476_v54 = vld [vmem:[%s20977_s27 + $0x568] sm:$0xf]  ;;  %v13349_v29 = vor.u32 %v19199_v56, %v13348_v48  ;;  %v10995_v62 = vpop.f32.mrf.mxu2  ;;  %v19163_v9 = vld [vmem:[%s20977_s27 + $0x354] sm:$0xf0] }
 0x371   : > { %11234 = vmatpush.bf16.msrb.mxu1 %v13269_v59  ;;  %v10982_v59 = vpop.f32.mrf.mxu1  ;;  %v13076_v0 = vld [vmem:[%s20977_s27 + $0x248] sm:$0xf]  ;;  %v19195_v24 = vld [vmem:[%s20977_s27 + $0x454] sm:$0xf0] }
 0x372   : > { %11247 = vmatpush.bf16.msrb.mxu2 %v13397_v63  ;;  %v13237_v63 = vor.u32 %v19171_v60, %v13236_v10  ;;  %v10983_v52 = vadd.f32 %v10982_v59, %v10970_v18  ;;  %v19131_v10 = vld [vmem:[%s20977_s27 + $0x254] sm:$0xf0]  ;;  %v13188_v48 = vld [vmem:[%s20977_s27 + $0x328] sm:$0xf] }
 0x373   : > { %11260 = vmatpush.bf16.msrb.mxu3 %v13525_v20  ;;  %v13220_v20 = vld [vmem:[%s20977_s27 + $0x368] sm:$0xf]  ;;  %v11008_v18 = vpop.f32.mrf.mxu3  ;;  %v19227_v59 = vld [vmem:[%s20977_s27 + $0x554] sm:$0xf0] }
 0x374   : > { %11222 = vmatpush.bf16.msrb.mxu0 %v13125_v43  ;;  %v19231_v43 = vld [vmem:[%s20977_s27 + $0x574] sm:$0xf0]  ;;  %v10996_v58 = vadd.f32 %v10995_v62, %v10983_v52  ;;  %v13060_v52 = vld [vmem:[%s20977_s27 + $0x228] sm:$0xf] }
 0x375   : > { %11235 = vmatpush.bf16.msrb.mxu1 %v13253_v6  ;;  %v13093_v6 = vor.u32 %v19135_v2, %v13092_v55  ;;  %v13477_v60 = vor.u32 %v19231_v43, %v13476_v54  ;;  %v19159_v54 = vld [vmem:[%s20977_s27 + $0x334] sm:$0xf0]  ;;  %v13316_v43 = vld [vmem:[%s20977_s27 + $0x428] sm:$0xf] }
 0x376   : > { %11248 = vmatpush.bf16.msrb.mxu2 %v13381_v22  ;;  %v13221_v22 = vor.u32 %v19167_v61, %v13220_v20  ;;  %v22944_v2 = vadd.f32 %v11008_v18, %v10996_v58  ;;  %v19127_v61 = vld [vmem:[%s20977_s27 + $0x234] sm:$0xf0]  ;;  %v13780_v42 = vld [vmem:[%s20977_s27 + $0x7c8] sm:$0xf] }
 0x377   : > { %11261 = vmatpush.bf16.msrb.mxu3 %v13509_v50  ;;  %v13204_v50 = vld [vmem:[%s20977_s27 + $0x348] sm:$0xf]  ;;  %v19187_v18 = vld [vmem:[%s20977_s27 + $0x414] sm:$0xf0] }
 0x378   : > { %11223 = vmatpush.bf16.msrb.mxu0 %v13109_v57  ;;  %v13460_v57 = vld [vmem:[%s20977_s27 + $0x548] sm:$0xf]  ;;  %v13205_v20 = vor.u32 %v19163_v9, %v13204_v50  ;;  %v19123_v50 = vld [vmem:[%s20977_s27 + $0x214] sm:$0xf0] }
 0x379   : > { %11236 = vmatpush.bf16.msrb.mxu1 %v13237_v63  ;;  %v10971_v63 = vpop.f32.mrf.mxu0  ;;  %v10984_v55 = vpop.f32.mrf.mxu1  ;;  %v13461_v56 = vor.u32 %v19227_v59, %v13460_v57  ;;  %v13172_v9 = vld [vmem:[%s20977_s27 + $0x308] sm:$0xf]  ;;  %v19219_v59 = vld [vmem:[%s20977_s27 + $0x514] sm:$0xf0] }
 0x37a   : > { %11249 = vmatpush.bf16.msrb.mxu2 %v13365_v8  ;;  %v13077_v8 = vor.u32 %v19131_v10, %v13076_v0  ;;  %v13061_v0 = vor.u32 %v19127_v61, %v13060_v52  ;;  %v13044_v10 = vld [vmem:[%s20977_s27 + $0x208] sm:$0xf]  ;;  %v10997_v63 = vpop.f32.mrf.mxu2  ;;  %v19279_v55 = vld [vmem:[%s20977_s27 + $0x6f4] sm:$0xf0] }
 0x37b   : > { %11262 = vmatpush.bf16.msrb.mxu3 %v13493_v11  ;;  %v13333_v11 = vor.u32 %v19195_v24, %v13332_v51  ;;  %v19155_v51 = vld [vmem:[%s20977_s27 + $0x314] sm:$0xf0]  ;;  %v13300_v24 = vld [vmem:[%s20977_s27 + $0x408] sm:$0xf]  ;;  %v13045_v52 = vor.u32 %v19123_v50, %v13044_v10 }
 0x37c   : > { %11224 = vmatpush.bf16.msrb.mxu0 %v13093_v6  ;;  %v19191_v6 = vld [vmem:[%s20977_s27 + $0x434] sm:$0xf0]  ;;  %v13428_v57 = vld [vmem:[%s20977_s27 + $0x508] sm:$0xf] }
 0x37d   : > { %11237 = vmatpush.bf16.msrb.mxu1 %v13221_v22  ;;  %v13444_v22 = vld [vmem:[%s20977_s27 + $0x528] sm:$0xf]  ;;  %v13317_v62 = vor.u32 %v19191_v6, %v13316_v43  ;;  %v19311_v61 = vld [vmem:[%s20977_s27 + $0x7f4] sm:$0xf0]  ;;  %v13301_v43 = vor.u32 %v19187_v18, %v13300_v24 }
 0x37e   : > { %11250 = vmatpush.bf16.msrb.mxu2 %v13349_v29  ;;  %v19223_v29 = vld [vmem:[%s20977_s27 + $0x534] sm:$0xf0]  ;;  %v14052_v6 = vld [vmem:[%s20977_s27 + $0x9e8] sm:$0xf] }
 0x37f   : > { %11263 = vmatpush.bf16.msrb.mxu3 %v13477_v60  ;;  %v13189_v60 = vor.u32 %v19159_v54, %v13188_v48  ;;  %v13445_v58 = vor.u32 %v19223_v29, %v13444_v22  ;;  %v13924_v48 = vld [vmem:[%s20977_s27 + $0x8e8] sm:$0xf]  ;;  %v19343_v54 = vld [vmem:[%s20977_s27 + $0x8f4] sm:$0xf0]  ;;  %v13429_v29 = vor.u32 %v19219_v59, %v13428_v57 }
 0x380   : > { %11225 = vmatpush.bf16.msrb.mxu0 %v13077_v8  ;;  %v13668_v8 = vld [vmem:[%s20977_s27 + $0x6e8] sm:$0xf]  ;;  %v19375_v22 = vld [vmem:[%s20977_s27 + $0x9f4] sm:$0xf0]  ;;  %v13925_v50 = vor.u32 %v19343_v54, %v13924_v48 }
 0x381   : > { %11238 = vmatpush.bf16.msrb.mxu1 %v13205_v20  ;;  %v13796_v20 = vld [vmem:[%s20977_s27 + $0x7e8] sm:$0xf]  ;;  %v19335_v54 = vld [vmem:[%s20977_s27 + $0x8b4] sm:$0xf0] }
 0x382   : > { %11251 = vmatpush.bf16.msrb.mxu2 %v13333_v11  ;;  %v11010_v11 = vpop.f32.mrf.mxu3  ;;  %v13797_v10 = vor.u32 %v19311_v61, %v13796_v20  ;;  %v13652_v63 = vld [vmem:[%s20977_s27 + $0x6c8] sm:$0xf]  ;;  %v19303_v61 = vld [vmem:[%s20977_s27 + $0x7b4] sm:$0xf0] }
 0x383   : > { %11264 = vmatpush.bf16.msrb.mxu3 %v13461_v56  ;;  %v13173_v56 = vor.u32 %v19155_v51, %v13172_v9  ;;  %v19275_v11 = vld [vmem:[%s20977_s27 + $0x6d4] sm:$0xf0]  ;;  %v13908_v9 = vld [vmem:[%s20977_s27 + $0x8c8] sm:$0xf] }
 0x384   : > { %11226 = vmatpush.bf16.msrb.mxu0 %v13061_v0  ;;  %v13669_v0 = vor.u32 %v19279_v55, %v13668_v8  ;;  %v19339_v51 = vld [vmem:[%s20977_s27 + $0x8d4] sm:$0xf0]  ;;  %v14036_v24 = vld [vmem:[%s20977_s27 + $0x9c8] sm:$0xf]  ;;  %v13653_v18 = vor.u32 %v19275_v11, %v13652_v63 }
 0x385   : > { %11239 = vmatpush.bf16.msrb.mxu1 %v13189_v60  ;;  %v14053_v60 = vor.u32 %v19375_v22, %v14052_v6  ;;  %v13909_v59 = vor.u32 %v19339_v51, %v13908_v9  ;;  %v13636_v8 = vld [vmem:[%s20977_s27 + $0x6a8] sm:$0xf]  ;;  %v19271_v55 = vld [vmem:[%s20977_s27 + $0x6b4] sm:$0xf0] }
 0x386   : > { %11252 = vmatpush.bf16.msrb.mxu2 %v13317_v62  ;;  %v19307_v62 = vld [vmem:[%s20977_s27 + $0x7d4] sm:$0xf0]  ;;  %v13764_v20 = vld [vmem:[%s20977_s27 + $0x7a8] sm:$0xf] }
 0x387   : > { %11265 = vmatpush.bf16.msrb.mxu3 %v13445_v58  ;;  %v19371_v58 = vld [vmem:[%s20977_s27 + $0x9d4] sm:$0xf0]  ;;  %v13781_v57 = vor.u32 %v19307_v62, %v13780_v42  ;;  %v13892_v48 = vld [vmem:[%s20977_s27 + $0x8a8] sm:$0xf]  ;;  %v13765_v6 = vor.u32 %v19303_v61, %v13764_v20 }
 0x388   : > { %11227 = vmatpush.bf16.msrb.mxu0 %v13045_v52  ;;  %v14037_v52 = vor.u32 %v19371_v58, %v14036_v24  ;;  %v14020_v42 = vld [vmem:[%s20977_s27 + $0x9a8] sm:$0xf]  ;;  %v13893_v22 = vor.u32 %v19335_v54, %v13892_v48  ;;  %v19299_v63 = vld [vmem:[%s20977_s27 + $0x794] sm:$0xf0]  ;;  %v11021_v62 = vpop.f32.mrf.mxu0 }
 0x389   : > { %11240 = vmatpush.bf16.msrb.mxu1 %v13173_v56  ;;  %v19367_v56 = vld [vmem:[%s20977_s27 + $0x9b4] sm:$0xf0]  ;;  %v13876_v11 = vld [vmem:[%s20977_s27 + $0x888] sm:$0xf]  ;;  %v11022_v24 = vadd.f32 %v11021_v62, %v22944_v2 }
 0x38a   : > { %11253 = vmatpush.bf16.msrb.mxu2 %v13301_v43  ;;  %v13637_v43 = vor.u32 %v19271_v55, %v13636_v8  ;;  %v14004_v9 = vld [vmem:[%s20977_s27 + $0x988] sm:$0xf]  ;;  %v19363_v51 = vld [vmem:[%s20977_s27 + $0x994] sm:$0xf0] }
 0x38b   : > { %11266 = vmatpush.bf16.msrb.mxu3 %v13429_v29  ;;  %11228 = vmatmul.bf16.vlgmr.msrb.gmra.mxu0 %v21101_v34  ;;  %v13620_v29 = vld [vmem:[%s20977_s27 + $0x688] sm:$0xf]  ;;  %v19263_v55 = vld [vmem:[%s20977_s27 + $0x674] sm:$0xf0] }
 0x38c   : > { %11272 = vmatpush.bf16.msra.mxu0 %v13669_v0  ;;  %11241 = vmatmul.bf16.vlgmr.msrb.gmra.mxu1 %v21107_v41  ;;  %v19267_v0 = vld [vmem:[%s20977_s27 + $0x694] sm:$0xf0]  ;;  %v13604_v8 = vld [vmem:[%s20977_s27 + $0x668] sm:$0xf] }
 0x38d   : > { %11285 = vmatpush.bf16.msra.mxu1 %v13797_v10  ;;  %11254 = vmatmul.bf16.vlgmr.msrb.gmra.mxu2 %v21156_v46  ;;  %v13748_v10 = vld [vmem:[%s20977_s27 + $0x788] sm:$0xf]  ;;  %v13621_v58 = vor.u32 %v19267_v0, %v13620_v29  ;;  %v19295_v48 = vld [vmem:[%s20977_s27 + $0x774] sm:$0xf0] }
 0x38e   : > { %11298 = vmatpush.bf16.msra.mxu2 %v13925_v50  ;;  %11267 = vmatmul.bf16.vlgmr.msrb.gmra.mxu3 %v21160_v49  ;;  %v14021_v50 = vor.u32 %v19367_v56, %v14020_v42  ;;  %v13732_v20 = vld [vmem:[%s20977_s27 + $0x768] sm:$0xf]  ;;  %v19327_v2 = vld [vmem:[%s20977_s27 + $0x874] sm:$0xf0] }
 0x38f   : > { %11311 = vmatpush.bf16.msra.mxu3 %v14053_v60  ;;  %v19331_v60 = vld [vmem:[%s20977_s27 + $0x894] sm:$0xf0]  ;;  %v13860_v54 = vld [vmem:[%s20977_s27 + $0x868] sm:$0xf] }
 0x390   : > { %11273 = vmatpush.bf16.msra.mxu0 %v13653_v18  ;;  %v11034_v18 = vpop.f32.mrf.mxu1  ;;  %v13988_v42 = vld [vmem:[%s20977_s27 + $0x968] sm:$0xf]  ;;  %v19359_v56 = vld [vmem:[%s20977_s27 + $0x974] sm:$0xf0] }
 0x391   : > { %11286 = vmatpush.bf16.msra.mxu1 %v13781_v57  ;;  %v13749_v57 = vor.u32 %v19299_v63, %v13748_v10  ;;  %v11035_v61 = vadd.f32 %v11034_v18, %v11022_v24  ;;  %v13588_v29 = vld [vmem:[%s20977_s27 + $0x648] sm:$0xf]  ;;  %v19259_v0 = vld [vmem:[%s20977_s27 + $0x654] sm:$0xf0]  ;;  %v11047_v63 = vpop.f32.mrf.mxu2  ;;  %v11023_v18 = vpop.f32.mrf.mxu0 }
 0x392   : > { %11299 = vmatpush.bf16.msra.mxu2 %v13909_v59  ;;  %v13877_v59 = vor.u32 %v19331_v60, %v13876_v11  ;;  %v13716_v10 = vld [vmem:[%s20977_s27 + $0x748] sm:$0xf]  ;;  %v19291_v11 = vld [vmem:[%s20977_s27 + $0x754] sm:$0xf0] }
 0x393   : > { %11312 = vmatpush.bf16.msra.mxu3 %v14037_v52  ;;  %v14005_v52 = vor.u32 %v19363_v51, %v14004_v9  ;;  %v13844_v60 = vld [vmem:[%s20977_s27 + $0x848] sm:$0xf]  ;;  %v19323_v62 = vld [vmem:[%s20977_s27 + $0x854] sm:$0xf0]  ;;  %v11048_v9 = vadd.f32 %v11047_v63, %v11035_v61  ;;  %v11060_v51 = vpop.f32.mrf.mxu3 }
 0x394   : > { %11274 = vmatpush.bf16.msra.mxu0 %v13637_v43  ;;  %v13605_v43 = vor.u32 %v19263_v55, %v13604_v8  ;;  %v13972_v24 = vld [vmem:[%s20977_s27 + $0x948] sm:$0xf]  ;;  %v13717_v55 = vor.u32 %v19291_v11, %v13716_v10  ;;  %v19255_v61 = vld [vmem:[%s20977_s27 + $0x634] sm:$0xf0] }
 0x395   : > { %11287 = vmatpush.bf16.msra.mxu1 %v13765_v6  ;;  %v13733_v6 = vor.u32 %v19295_v48, %v13732_v20  ;;  %v23015_v8 = vadd.f32 %v11060_v51, %v11048_v9  ;;  %v13845_v20 = vor.u32 %v19323_v62, %v13844_v60  ;;  %v13700_v48 = vld [vmem:[%s20977_s27 + $0x728] sm:$0xf]  ;;  %v19283_v11 = vld [vmem:[%s20977_s27 + $0x714] sm:$0xf0] }
 0x396   : > { %11300 = vmatpush.bf16.msra.mxu2 %v13893_v22  ;;  %v13861_v22 = vor.u32 %v19327_v2, %v13860_v54  ;;  %v19287_v2 = vld [vmem:[%s20977_s27 + $0x734] sm:$0xf0]  ;;  %v13684_v63 = vld [vmem:[%s20977_s27 + $0x708] sm:$0xf] }
 0x397   : > { %11313 = vmatpush.bf16.msra.mxu3 %v14021_v50  ;;  %v13989_v50 = vor.u32 %v19359_v56, %v13988_v42  ;;  %v13828_v42 = vld [vmem:[%s20977_s27 + $0x828] sm:$0xf]  ;;  %v19319_v56 = vld [vmem:[%s20977_s27 + $0x834] sm:$0xf0]  ;;  %v13701_v10 = vor.u32 %v19287_v2, %v13700_v48 }
 0x398   : > { %11275 = vmatpush.bf16.msra.mxu0 %v13621_v58  ;;  %v19355_v58 = vld [vmem:[%s20977_s27 + $0x954] sm:$0xf0]  ;;  %v13812_v60 = vld [vmem:[%s20977_s27 + $0x808] sm:$0xf] }
 0x399   : > { %11288 = vmatpush.bf16.msra.mxu1 %v13749_v57  ;;  %v13589_v57 = vor.u32 %v19259_v0, %v13588_v29  ;;  %v13973_v54 = vor.u32 %v19355_v58, %v13972_v24  ;;  %v13556_v29 = vld [vmem:[%s20977_s27 + $0x608] sm:$0xf]  ;;  %v19251_v0 = vld [vmem:[%s20977_s27 + $0x614] sm:$0xf0]  ;;  %v11049_v58 = vpop.f32.mrf.mxu2 }
 0x39a   : > { %11301 = vmatpush.bf16.msra.mxu2 %v13877_v59  ;;  %v11036_v59 = vpop.f32.mrf.mxu1  ;;  %v19315_v9 = vld [vmem:[%s20977_s27 + $0x814] sm:$0xf0]  ;;  %v13940_v51 = vld [vmem:[%s20977_s27 + $0x908] sm:$0xf] }
 0x39b   : > { %11314 = vmatpush.bf16.msra.mxu3 %v14005_v52  ;;  %v13572_v52 = vld [vmem:[%s20977_s27 + $0x628] sm:$0xf]  ;;  %v19347_v24 = vld [vmem:[%s20977_s27 + $0x914] sm:$0xf0]  ;;  %v13813_v2 = vor.u32 %v19315_v9, %v13812_v60 }
 0x39c   : > { %11276 = vmatpush.bf16.msra.mxu0 %v13605_v43  ;;  %v13956_v43 = vld [vmem:[%s20977_s27 + $0x928] sm:$0xf]  ;;  %v19471_v48 = vld [vmem:[%s20977_s27 + $0xcf4] sm:$0xf0] }
 0x39d   : > { %11289 = vmatpush.bf16.msra.mxu1 %v13733_v6  ;;  %v19351_v6 = vld [vmem:[%s20977_s27 + $0x934] sm:$0xf0]  ;;  %v14180_v18 = vld [vmem:[%s20977_s27 + $0xae8] sm:$0xf] }
 0x39e   : > { %11302 = vmatpush.bf16.msra.mxu2 %v13861_v22  ;;  %v13573_v22 = vor.u32 %v19255_v61, %v13572_v52  ;;  %v13957_v62 = vor.u32 %v19351_v6, %v13956_v43  ;;  %v14308_v59 = vld [vmem:[%s20977_s27 + $0xbe8] sm:$0xf]  ;;  %v19439_v52 = vld [vmem:[%s20977_s27 + $0xbf4] sm:$0xf0]  ;;  %v13941_v43 = vor.u32 %v19347_v24, %v13940_v51 }
 0x39f   : > { %11315 = vmatpush.bf16.msra.mxu3 %v13989_v50  ;;  %v13829_v50 = vor.u32 %v19319_v56, %v13828_v42  ;;  %v14436_v61 = vld [vmem:[%s20977_s27 + $0xce8] sm:$0xf]  ;;  %v19503_v56 = vld [vmem:[%s20977_s27 + $0xdf4] sm:$0xf0] }
 0x3a0   : > { %11277 = vmatpush.bf16.msra.mxu0 %v13589_v57  ;;  %v19407_v57 = vld [vmem:[%s20977_s27 + $0xaf4] sm:$0xf0]  ;;  %v14564_v42 = vld [vmem:[%s20977_s27 + $0xde8] sm:$0xf] }
 0x3a1   : > { %11290 = vmatpush.bf16.msra.mxu1 %v13717_v55  ;;  %v11062_v55 = vpop.f32.mrf.mxu3  ;;  %v14181_v6 = vor.u32 %v19407_v57, %v14180_v18  ;;  %v19403_v58 = vld [vmem:[%s20977_s27 + $0xad4] sm:$0xf0]  ;;  %v14548_v60 = vld [vmem:[%s20977_s27 + $0xdc8] sm:$0xf] }
 0x3a2   : > { %11303 = vmatpush.bf16.msra.mxu2 %v13845_v20  ;;  %v13557_v20 = vor.u32 %v19251_v0, %v13556_v29  ;;  %v14437_v29 = vor.u32 %v19471_v48, %v14436_v61  ;;  %v14164_v0 = vld [vmem:[%s20977_s27 + $0xac8] sm:$0xf]  ;;  %v19399_v57 = vld [vmem:[%s20977_s27 + $0xab4] sm:$0xf0] }
 0x3a3   : > { %11316 = vmatpush.bf16.msra.mxu3 %v13973_v54  ;;  %v13685_v54 = vor.u32 %v19283_v11, %v13684_v63  ;;  %v14292_v55 = vld [vmem:[%s20977_s27 + $0xbc8] sm:$0xf]  ;;  %v19467_v11 = vld [vmem:[%s20977_s27 + $0xcd4] sm:$0xf0]  ;;  %v14165_v9 = vor.u32 %v19403_v58, %v14164_v0 }
 0x3a4   : > { %11278 = vmatpush.bf16.msra.mxu0 %v13573_v22  ;;  %v14309_v22 = vor.u32 %v19439_v52, %v14308_v59  ;;  %v14420_v63 = vld [vmem:[%s20977_s27 + $0xcc8] sm:$0xf]  ;;  %v19431_v52 = vld [vmem:[%s20977_s27 + $0xbb4] sm:$0xf0] }
 0x3a5   : > { %11291 = vmatpush.bf16.msra.mxu1 %v13701_v10  ;;  %v14565_v10 = vor.u32 %v19503_v56, %v14564_v42  ;;  %v14421_v24 = vor.u32 %v19467_v11, %v14420_v63  ;;  %v14148_v18 = vld [vmem:[%s20977_s27 + $0xaa8] sm:$0xf]  ;;  %v19463_v48 = vld [vmem:[%s20977_s27 + $0xcb4] sm:$0xf0] }
 0x3a6   : > { %11304 = vmatpush.bf16.msra.mxu2 %v13829_v50  ;;  %v19435_v50 = vld [vmem:[%s20977_s27 + $0xbd4] sm:$0xf0]  ;;  %v14276_v59 = vld [vmem:[%s20977_s27 + $0xba8] sm:$0xf]  ;;  %v14149_v42 = vor.u32 %v19399_v57, %v14148_v18 }
 0x3a7   : > { %11317 = vmatpush.bf16.msra.mxu3 %v13957_v62  ;;  %v19499_v62 = vld [vmem:[%s20977_s27 + $0xdd4] sm:$0xf0]  ;;  %v14293_v51 = vor.u32 %v19435_v50, %v14292_v55  ;;  %v14404_v61 = vld [vmem:[%s20977_s27 + $0xca8] sm:$0xf]  ;;  %v14277_v56 = vor.u32 %v19431_v52, %v14276_v59 }
 0x3a8   : > { %11279 = vmatpush.bf16.msra.mxu0 %v13557_v20  ;;  %v14549_v20 = vor.u32 %v19499_v62, %v14548_v60  ;;  %v19427_v58 = vld [vmem:[%s20977_s27 + $0xb94] sm:$0xf0]  ;;  %v14388_v55 = vld [vmem:[%s20977_s27 + $0xc88] sm:$0xf]  ;;  %v11073_v50 = vpop.f32.mrf.mxu0 }
 0x3a9   : > { %11292 = vmatpush.bf16.msra.mxu1 %v13685_v54  ;;  %v14532_v54 = vld [vmem:[%s20977_s27 + $0xda8] sm:$0xf]  ;;  %v19491_v11 = vld [vmem:[%s20977_s27 + $0xd94] sm:$0xf0]  ;;  %v11074_v60 = vadd.f32 %v11073_v50, %v23015_v8 }
 0x3aa   : > { %11305 = vmatpush.bf16.msra.mxu2 %v13813_v2  ;;  %v19495_v2 = vld [vmem:[%s20977_s27 + $0xdb4] sm:$0xf0]  ;;  %v14516_v63 = vld [vmem:[%s20977_s27 + $0xd88] sm:$0xf] }
 0x3ab   : > { %11318 = vmatpush.bf16.msra.mxu3 %v13941_v43  ;;  %11280 = vmatmul.bf16.vlgmr.msra.gmra.mxu0 %v21152_v39  ;;  %v14405_v43 = vor.u32 %v19463_v48, %v14404_v61  ;;  %v14533_v0 = vor.u32 %v19495_v2, %v14532_v54  ;;  %v14116_v18 = vld [vmem:[%s20977_s27 + $0xa68] sm:$0xf]  ;;  %v19391_v57 = vld [vmem:[%s20977_s27 + $0xa74] sm:$0xf0] }
 0x3ac   : > { %11324 = vmatpush.bf16.msrb.mxu0 %v14181_v6  ;;  %11293 = vmatmul.bf16.vlgmr.msra.gmra.mxu1 %v21158_v47  ;;  %v14132_v6 = vld [vmem:[%s20977_s27 + $0xa88] sm:$0xf]  ;;  %v19423_v61 = vld [vmem:[%s20977_s27 + $0xb74] sm:$0xf0] }
 0x3ad   : > { %11337 = vmatpush.bf16.msrb.mxu1 %v14309_v22  ;;  %11306 = vmatmul.bf16.vlgmr.msra.gmra.mxu2 %v21236_v27  ;;  %v19395_v22 = vld [vmem:[%s20977_s27 + $0xa94] sm:$0xf0]  ;;  %v14244_v59 = vld [vmem:[%s20977_s27 + $0xb68] sm:$0xf] }
 0x3ae   : > { %11350 = vmatpush.bf16.msrb.mxu2 %v14437_v29  ;;  %11319 = vmatmul.bf16.vlgmr.msra.gmra.mxu3 %v21247_v37  ;;  %v14260_v29 = vld [vmem:[%s20977_s27 + $0xb88] sm:$0xf]  ;;  %v14133_v62 = vor.u32 %v19395_v22, %v14132_v6  ;;  %v19455_v8 = vld [vmem:[%s20977_s27 + $0xc74] sm:$0xf0] }
 0x3af   : > { %11363 = vmatpush.bf16.msrb.mxu3 %v14565_v10  ;;  %v19459_v10 = vld [vmem:[%s20977_s27 + $0xc94] sm:$0xf0]  ;;  %v14372_v48 = vld [vmem:[%s20977_s27 + $0xc68] sm:$0xf] }
 0x3b0   : > { %11325 = vmatpush.bf16.msrb.mxu0 %v14165_v9  ;;  %v11086_v9 = vpop.f32.mrf.mxu1  ;;  %v14500_v54 = vld [vmem:[%s20977_s27 + $0xd68] sm:$0xf]  ;;  %v19487_v2 = vld [vmem:[%s20977_s27 + $0xd74] sm:$0xf0] }
 0x3b1   : > { %11338 = vmatpush.bf16.msrb.mxu1 %v14293_v51  ;;  %v14261_v51 = vor.u32 %v19427_v58, %v14260_v29  ;;  %v11087_v52 = vadd.f32 %v11086_v9, %v11074_v60  ;;  %v14100_v6 = vld [vmem:[%s20977_s27 + $0xa48] sm:$0xf]  ;;  %v19387_v22 = vld [vmem:[%s20977_s27 + $0xa54] sm:$0xf0]  ;;  %v11075_v9 = vpop.f32.mrf.mxu0 }
 0x3b2   : > { %11351 = vmatpush.bf16.msrb.mxu2 %v14421_v24  ;;  %v14389_v24 = vor.u32 %v19459_v10, %v14388_v55  ;;  %v14228_v29 = vld [vmem:[%s20977_s27 + $0xb48] sm:$0xf]  ;;  %v11099_v58 = vpop.f32.mrf.mxu2  ;;  %v19419_v55 = vld [vmem:[%s20977_s27 + $0xb54] sm:$0xf0] }
 0x3b3   : > { %11364 = vmatpush.bf16.msrb.mxu3 %v14549_v20  ;;  %v14517_v20 = vor.u32 %v19491_v11, %v14516_v63  ;;  %v14356_v10 = vld [vmem:[%s20977_s27 + $0xc48] sm:$0xf]  ;;  %v19451_v50 = vld [vmem:[%s20977_s27 + $0xc54] sm:$0xf0]  ;;  %v11100_v63 = vadd.f32 %v11099_v58, %v11087_v52  ;;  %v11112_v11 = vpop.f32.mrf.mxu3 }
 0x3b4   : > { %11326 = vmatpush.bf16.msrb.mxu0 %v14149_v42  ;;  %v14117_v42 = vor.u32 %v19391_v57, %v14116_v18  ;;  %v14484_v60 = vld [vmem:[%s20977_s27 + $0xd48] sm:$0xf]  ;;  %v14229_v57 = vor.u32 %v19419_v55, %v14228_v29  ;;  %v19383_v52 = vld [vmem:[%s20977_s27 + $0xa34] sm:$0xf0] }
 0x3b5   : > { %11339 = vmatpush.bf16.msrb.mxu1 %v14277_v56  ;;  %v14245_v56 = vor.u32 %v19423_v61, %v14244_v59  ;;  %v23086_v18 = vadd.f32 %v11112_v11, %v11100_v63  ;;  %v14357_v59 = vor.u32 %v19451_v50, %v14356_v10  ;;  %v14212_v61 = vld [vmem:[%s20977_s27 + $0xb28] sm:$0xf]  ;;  %v19411_v55 = vld [vmem:[%s20977_s27 + $0xb14] sm:$0xf0] }
 0x3b6   : > { %11352 = vmatpush.bf16.msrb.mxu2 %v14405_v43  ;;  %v14373_v43 = vor.u32 %v19455_v8, %v14372_v48  ;;  %v19415_v8 = vld [vmem:[%s20977_s27 + $0xb34] sm:$0xf0]  ;;  %v14196_v58 = vld [vmem:[%s20977_s27 + $0xb08] sm:$0xf] }
 0x3b7   : > { %11365 = vmatpush.bf16.msrb.mxu3 %v14533_v0  ;;  %v14501_v0 = vor.u32 %v19487_v2, %v14500_v54  ;;  %v14340_v54 = vld [vmem:[%s20977_s27 + $0xc28] sm:$0xf]  ;;  %v19447_v2 = vld [vmem:[%s20977_s27 + $0xc34] sm:$0xf0]  ;;  %v14213_v29 = vor.u32 %v19415_v8, %v14212_v61 }
 0x3b8   : > { %11327 = vmatpush.bf16.msrb.mxu0 %v14133_v62  ;;  %v19483_v62 = vld [vmem:[%s20977_s27 + $0xd54] sm:$0xf0]  ;;  %v14324_v10 = vld [vmem:[%s20977_s27 + $0xc08] sm:$0xf] }
 0x3b9   : > { %11340 = vmatpush.bf16.msrb.mxu1 %v14261_v51  ;;  %v14101_v51 = vor.u32 %v19387_v22, %v14100_v6  ;;  %v14485_v48 = vor.u32 %v19483_v62, %v14484_v60  ;;  %v14068_v6 = vld [vmem:[%s20977_s27 + $0xa08] sm:$0xf]  ;;  %v19379_v22 = vld [vmem:[%s20977_s27 + $0xa14] sm:$0xf0] }
 0x3ba   : > { %11353 = vmatpush.bf16.msrb.mxu2 %v14389_v24  ;;  %v11088_v24 = vpop.f32.mrf.mxu1  ;;  %v19443_v63 = vld [vmem:[%s20977_s27 + $0xc14] sm:$0xf0]  ;;  %v14452_v11 = vld [vmem:[%s20977_s27 + $0xd08] sm:$0xf]  ;;  %v11101_v62 = vpop.f32.mrf.mxu2 }
 0x3bb   : > { %11366 = vmatpush.bf16.msrb.mxu3 %v14517_v20  ;;  %v14084_v20 = vld [vmem:[%s20977_s27 + $0xa28] sm:$0xf]  ;;  %v19475_v60 = vld [vmem:[%s20977_s27 + $0xd14] sm:$0xf0]  ;;  %v14325_v8 = vor.u32 %v19443_v63, %v14324_v10 }
 0x3bc   : > { %11328 = vmatpush.bf16.msrb.mxu0 %v14117_v42  ;;  %v14468_v42 = vld [vmem:[%s20977_s27 + $0xd28] sm:$0xf]  ;;  %v19599_v61 = vld [vmem:[%s20977_s27 + $0x10f4] sm:$0xf0] }
 0x3bd   : > { %11341 = vmatpush.bf16.msrb.mxu1 %v14245_v56  ;;  %v19479_v56 = vld [vmem:[%s20977_s27 + $0xd34] sm:$0xf0]  ;;  %v14692_v9 = vld [vmem:[%s20977_s27 + $0xee8] sm:$0xf] }
 0x3be   : > { %11354 = vmatpush.bf16.msrb.mxu2 %v14373_v43  ;;  %v14085_v43 = vor.u32 %v19383_v52, %v14084_v20  ;;  %v14469_v50 = vor.u32 %v19479_v56, %v14468_v42  ;;  %v14820_v24 = vld [vmem:[%s20977_s27 + $0xfe8] sm:$0xf]  ;;  %v19567_v20 = vld [vmem:[%s20977_s27 + $0xff4] sm:$0xf0]  ;;  %v14453_v42 = vor.u32 %v19475_v60, %v14452_v11 }
 0x3bf   : > { %11367 = vmatpush.bf16.msrb.mxu3 %v14501_v0  ;;  %v14341_v0 = vor.u32 %v19447_v2, %v14340_v54  ;;  %v14948_v52 = vld [vmem:[%s20977_s27 + $0x10e8] sm:$0xf]  ;;  %v19631_v2 = vld [vmem:[%s20977_s27 + $0x11f4] sm:$0xf0] }
 0x3c0   : > { %11329 = vmatpush.bf16.msrb.mxu0 %v14101_v51  ;;  %v19535_v51 = vld [vmem:[%s20977_s27 + $0xef4] sm:$0xf0]  ;;  %v15076_v54 = vld [vmem:[%s20977_s27 + $0x11e8] sm:$0xf] }
 0x3c1   : > { %11342 = vmatpush.bf16.msrb.mxu1 %v14229_v57  ;;  %v11114_v57 = vpop.f32.mrf.mxu3  ;;  %v14693_v56 = vor.u32 %v19535_v51, %v14692_v9  ;;  %v19531_v62 = vld [vmem:[%s20977_s27 + $0xed4] sm:$0xf0]  ;;  %v15060_v10 = vld [vmem:[%s20977_s27 + $0x11c8] sm:$0xf] }
 0x3c2   : > { %11355 = vmatpush.bf16.msrb.mxu2 %v14357_v59  ;;  %v14069_v59 = vor.u32 %v19379_v22, %v14068_v6  ;;  %v14949_v6 = vor.u32 %v19599_v61, %v14948_v52  ;;  %v14676_v22 = vld [vmem:[%s20977_s27 + $0xec8] sm:$0xf]  ;;  %v19527_v51 = vld [vmem:[%s20977_s27 + $0xeb4] sm:$0xf0] }
 0x3c3   : > { %11368 = vmatpush.bf16.msrb.mxu3 %v14485_v48  ;;  %v14197_v48 = vor.u32 %v19411_v55, %v14196_v58  ;;  %v14804_v57 = vld [vmem:[%s20977_s27 + $0xfc8] sm:$0xf]  ;;  %v19595_v55 = vld [vmem:[%s20977_s27 + $0x10d4] sm:$0xf0]  ;;  %v14677_v63 = vor.u32 %v19531_v62, %v14676_v22 }
 0x3c4   : > { %11330 = vmatpush.bf16.msrb.mxu0 %v14085_v43  ;;  %v14821_v43 = vor.u32 %v19567_v20, %v14820_v24  ;;  %v14932_v58 = vld [vmem:[%s20977_s27 + $0x10c8] sm:$0xf]  ;;  %v19559_v20 = vld [vmem:[%s20977_s27 + $0xfb4] sm:$0xf0] }
 0x3c5   : > { %11343 = vmatpush.bf16.msrb.mxu1 %v14213_v29  ;;  %v15077_v29 = vor.u32 %v19631_v2, %v15076_v54  ;;  %v14933_v60 = vor.u32 %v19595_v55, %v14932_v58  ;;  %v14660_v9 = vld [vmem:[%s20977_s27 + $0xea8] sm:$0xf]  ;;  %v19591_v61 = vld [vmem:[%s20977_s27 + $0x10b4] sm:$0xf0] }
 0x3c6   : > { %11356 = vmatpush.bf16.msrb.mxu2 %v14341_v0  ;;  %v19563_v0 = vld [vmem:[%s20977_s27 + $0xfd4] sm:$0xf0]  ;;  %v14788_v24 = vld [vmem:[%s20977_s27 + $0xfa8] sm:$0xf]  ;;  %v14661_v54 = vor.u32 %v19527_v51, %v14660_v9 }
 0x3c7   : > { %11369 = vmatpush.bf16.msrb.mxu3 %v14469_v50  ;;  %v19627_v50 = vld [vmem:[%s20977_s27 + $0x11d4] sm:$0xf0]  ;;  %v14805_v11 = vor.u32 %v19563_v0, %v14804_v57  ;;  %v14916_v52 = vld [vmem:[%s20977_s27 + $0x10a8] sm:$0xf]  ;;  %v14789_v2 = vor.u32 %v19559_v20, %v14788_v24 }
 0x3c8   : > { %11331 = vmatpush.bf16.msrb.mxu0 %v14069_v59  ;;  %v15061_v59 = vor.u32 %v19627_v50, %v15060_v10  ;;  %v19555_v62 = vld [vmem:[%s20977_s27 + $0xf94] sm:$0xf0]  ;;  %v14900_v57 = vld [vmem:[%s20977_s27 + $0x1088] sm:$0xf]  ;;  %v11125_v0 = vpop.f32.mrf.mxu0 }
 0x3c9   : > { %11344 = vmatpush.bf16.msrb.mxu1 %v14197_v48  ;;  %v15044_v48 = vld [vmem:[%s20977_s27 + $0x11a8] sm:$0xf]  ;;  %v19619_v55 = vld [vmem:[%s20977_s27 + $0x1194] sm:$0xf0]  ;;  %v11126_v10 = vadd.f32 %v11125_v0, %v23086_v18 }
 0x3ca   : > { %11357 = vmatpush.bf16.msrb.mxu2 %v14325_v8  ;;  %v19623_v8 = vld [vmem:[%s20977_s27 + $0x11b4] sm:$0xf0]  ;;  %v15028_v58 = vld [vmem:[%s20977_s27 + $0x1188] sm:$0xf] }
 0x3cb   : > { %11370 = vmatpush.bf16.msrb.mxu3 %v14453_v42  ;;  %11332 = vmatmul.bf16.vlgmr.msrb.gmra.mxu0 %v21243_v36  ;;  %v14917_v42 = vor.u32 %v19591_v61, %v14916_v52  ;;  %v15045_v22 = vor.u32 %v19623_v8, %v15044_v48  ;;  %v14628_v9 = vld [vmem:[%s20977_s27 + $0xe68] sm:$0xf]  ;;  %v19519_v51 = vld [vmem:[%s20977_s27 + $0xe74] sm:$0xf0] }
 0x3cc   : > { %11376 = vmatpush.bf16.msra.mxu0 %v14693_v56  ;;  %11345 = vmatmul.bf16.vlgmr.msrb.gmra.mxu1 %v21253_v40  ;;  %v14644_v56 = vld [vmem:[%s20977_s27 + $0xe88] sm:$0xf]  ;;  %v19551_v52 = vld [vmem:[%s20977_s27 + $0xf74] sm:$0xf0] }
 0x3cd   : > { %11389 = vmatpush.bf16.msra.mxu1 %v14821_v43  ;;  %11358 = vmatmul.bf16.vlgmr.msrb.gmra.mxu2 %v21329_v31  ;;  %v19523_v43 = vld [vmem:[%s20977_s27 + $0xe94] sm:$0xf0]  ;;  %v14756_v24 = vld [vmem:[%s20977_s27 + $0xf68] sm:$0xf] }
 0x3ce   : > { %11402 = vmatpush.bf16.msra.mxu2 %v14949_v6  ;;  %11371 = vmatmul.bf16.vlgmr.msrb.gmra.mxu3 %v21340_v32  ;;  %v14772_v6 = vld [vmem:[%s20977_s27 + $0xf88] sm:$0xf]  ;;  %v14645_v50 = vor.u32 %v19523_v43, %v14644_v56  ;;  %v19583_v18 = vld [vmem:[%s20977_s27 + $0x1074] sm:$0xf0] }
 0x3cf   : > { %11415 = vmatpush.bf16.msra.mxu3 %v15077_v29  ;;  %v19587_v29 = vld [vmem:[%s20977_s27 + $0x1094] sm:$0xf0]  ;;  %v14884_v61 = vld [vmem:[%s20977_s27 + $0x1068] sm:$0xf] }
 0x3d0   : > { %11377 = vmatpush.bf16.msra.mxu0 %v14677_v63  ;;  %v11138_v63 = vpop.f32.mrf.mxu1  ;;  %v15012_v48 = vld [vmem:[%s20977_s27 + $0x1168] sm:$0xf]  ;;  %v19615_v8 = vld [vmem:[%s20977_s27 + $0x1174] sm:$0xf0] }
 0x3d1   : > { %11390 = vmatpush.bf16.msra.mxu1 %v14805_v11  ;;  %v14773_v11 = vor.u32 %v19555_v62, %v14772_v6  ;;  %v11139_v20 = vadd.f32 %v11138_v63, %v11126_v10  ;;  %v14612_v56 = vld [vmem:[%s20977_s27 + $0xe48] sm:$0xf]  ;;  %v19515_v43 = vld [vmem:[%s20977_s27 + $0xe54] sm:$0xf0]  ;;  %v11151_v62 = vpop.f32.mrf.mxu2  ;;  %v11127_v63 = vpop.f32.mrf.mxu0 }
 0x3d2   : > { %11403 = vmatpush.bf16.msra.mxu2 %v14933_v60  ;;  %v14901_v60 = vor.u32 %v19587_v29, %v14900_v57  ;;  %v14740_v6 = vld [vmem:[%s20977_s27 + $0xf48] sm:$0xf]  ;;  %v19547_v57 = vld [vmem:[%s20977_s27 + $0xf54] sm:$0xf0] }
 0x3d3   : > { %11416 = vmatpush.bf16.msra.mxu3 %v15061_v59  ;;  %v15029_v59 = vor.u32 %v19619_v55, %v15028_v58  ;;  %v14868_v29 = vld [vmem:[%s20977_s27 + $0x1048] sm:$0xf]  ;;  %v19579_v0 = vld [vmem:[%s20977_s27 + $0x1054] sm:$0xf0]  ;;  %v11152_v58 = vadd.f32 %v11151_v62, %v11139_v20  ;;  %v11164_v55 = vpop.f32.mrf.mxu3 }
 0x3d4   : > { %11378 = vmatpush.bf16.msra.mxu0 %v14661_v54  ;;  %v14629_v54 = vor.u32 %v19519_v51, %v14628_v9  ;;  %v14996_v10 = vld [vmem:[%s20977_s27 + $0x1148] sm:$0xf]  ;;  %v14741_v51 = vor.u32 %v19547_v57, %v14740_v6  ;;  %v19511_v20 = vld [vmem:[%s20977_s27 + $0xe34] sm:$0xf0] }
 0x3d5   : > { %11391 = vmatpush.bf16.msra.mxu1 %v14789_v2  ;;  %v14757_v2 = vor.u32 %v19551_v52, %v14756_v24  ;;  %v23157_v9 = vadd.f32 %v11164_v55, %v11152_v58  ;;  %v14869_v24 = vor.u32 %v19579_v0, %v14868_v29  ;;  %v14724_v52 = vld [vmem:[%s20977_s27 + $0xf28] sm:$0xf]  ;;  %v19539_v57 = vld [vmem:[%s20977_s27 + $0xf14] sm:$0xf0] }
 0x3d6   : > { %11404 = vmatpush.bf16.msra.mxu2 %v14917_v42  ;;  %v14885_v42 = vor.u32 %v19583_v18, %v14884_v61  ;;  %v19543_v18 = vld [vmem:[%s20977_s27 + $0xf34] sm:$0xf0]  ;;  %v14708_v62 = vld [vmem:[%s20977_s27 + $0xf08] sm:$0xf] }
 0x3d7   : > { %11417 = vmatpush.bf16.msra.mxu3 %v15045_v22  ;;  %v15013_v22 = vor.u32 %v19615_v8, %v15012_v48  ;;  %v14852_v48 = vld [vmem:[%s20977_s27 + $0x1028] sm:$0xf]  ;;  %v19575_v8 = vld [vmem:[%s20977_s27 + $0x1034] sm:$0xf0]  ;;  %v14725_v6 = vor.u32 %v19543_v18, %v14724_v52 }
 0x3d8   : > { %11379 = vmatpush.bf16.msra.mxu0 %v14645_v50  ;;  %v19611_v50 = vld [vmem:[%s20977_s27 + $0x1154] sm:$0xf0]  ;;  %v14836_v29 = vld [vmem:[%s20977_s27 + $0x1008] sm:$0xf] }
 0x3d9   : > { %11392 = vmatpush.bf16.msra.mxu1 %v14773_v11  ;;  %v14613_v11 = vor.u32 %v19515_v43, %v14612_v56  ;;  %v14997_v61 = vor.u32 %v19611_v50, %v14996_v10  ;;  %v14580_v56 = vld [vmem:[%s20977_s27 + $0xe08] sm:$0xf]  ;;  %v19507_v43 = vld [vmem:[%s20977_s27 + $0xe14] sm:$0xf0]  ;;  %v11153_v50 = vpop.f32.mrf.mxu2 }
 0x3da   : > { %11405 = vmatpush.bf16.msra.mxu2 %v14901_v60  ;;  %v11140_v60 = vpop.f32.mrf.mxu1  ;;  %v19571_v58 = vld [vmem:[%s20977_s27 + $0x1014] sm:$0xf0]  ;;  %v14964_v55 = vld [vmem:[%s20977_s27 + $0x1108] sm:$0xf] }
 0x3db   : > { %11418 = vmatpush.bf16.msra.mxu3 %v15029_v59  ;;  %v14596_v59 = vld [vmem:[%s20977_s27 + $0xe28] sm:$0xf]  ;;  %v19603_v10 = vld [vmem:[%s20977_s27 + $0x1114] sm:$0xf0]  ;;  %v14837_v18 = vor.u32 %v19571_v58, %v14836_v29 }
 0x3dc   : > { %11380 = vmatpush.bf16.msra.mxu0 %v14629_v54  ;;  %v14980_v54 = vld [vmem:[%s20977_s27 + $0x1128] sm:$0xf]  ;;  %v19727_v52 = vld [vmem:[%s20977_s27 + $0x14f4] sm:$0xf0] }
 0x3dd   : > { %11393 = vmatpush.bf16.msra.mxu1 %v14757_v2  ;;  %v19607_v2 = vld [vmem:[%s20977_s27 + $0x1134] sm:$0xf0]  ;;  %v15204_v63 = vld [vmem:[%s20977_s27 + $0x12e8] sm:$0xf] }
 0x3de   : > { %11406 = vmatpush.bf16.msra.mxu2 %v14885_v42  ;;  %v14597_v42 = vor.u32 %v19511_v20, %v14596_v59  ;;  %v14981_v0 = vor.u32 %v19607_v2, %v14980_v54  ;;  %v15332_v60 = vld [vmem:[%s20977_s27 + $0x13e8] sm:$0xf]  ;;  %v19695_v59 = vld [vmem:[%s20977_s27 + $0x13f4] sm:$0xf0]  ;;  %v14965_v54 = vor.u32 %v19603_v10, %v14964_v55 }
 0x3df   : > { %11419 = vmatpush.bf16.msra.mxu3 %v15013_v22  ;;  %v14853_v22 = vor.u32 %v19575_v8, %v14852_v48  ;;  %v15460_v20 = vld [vmem:[%s20977_s27 + $0x14e8] sm:$0xf]  ;;  %v19759_v8 = vld [vmem:[%s20977_s27 + $0x15f4] sm:$0xf0] }
 0x3e0   : > { %11381 = vmatpush.bf16.msra.mxu0 %v14613_v11  ;;  %v19663_v11 = vld [vmem:[%s20977_s27 + $0x12f4] sm:$0xf0]  ;;  %v15588_v48 = vld [vmem:[%s20977_s27 + $0x15e8] sm:$0xf] }
 0x3e1   : > { %11394 = vmatpush.bf16.msra.mxu1 %v14741_v51  ;;  %v11166_v51 = vpop.f32.mrf.mxu3  ;;  %v15205_v2 = vor.u32 %v19663_v11, %v15204_v63  ;;  %v19659_v50 = vld [vmem:[%s20977_s27 + $0x12d4] sm:$0xf0]  ;;  %v15572_v29 = vld [vmem:[%s20977_s27 + $0x15c8] sm:$0xf] }
 0x3e2   : > { %11407 = vmatpush.bf16.msra.mxu2 %v14869_v24  ;;  %v14581_v24 = vor.u32 %v19507_v43, %v14580_v56  ;;  %v15461_v56 = vor.u32 %v19727_v52, %v15460_v20  ;;  %v15188_v43 = vld [vmem:[%s20977_s27 + $0x12c8] sm:$0xf]  ;;  %v19655_v11 = vld [vmem:[%s20977_s27 + $0x12b4] sm:$0xf0] }
 0x3e3   : > { %11420 = vmatpush.bf16.msra.mxu3 %v14997_v61  ;;  %v14709_v61 = vor.u32 %v19539_v57, %v14708_v62  ;;  %v15316_v51 = vld [vmem:[%s20977_s27 + $0x13c8] sm:$0xf]  ;;  %v19723_v57 = vld [vmem:[%s20977_s27 + $0x14d4] sm:$0xf0]  ;;  %v15189_v58 = vor.u32 %v19659_v50, %v15188_v43 }
 0x3e4   : > { %11382 = vmatpush.bf16.msra.mxu0 %v14597_v42  ;;  %v15333_v42 = vor.u32 %v19695_v59, %v15332_v60  ;;  %v15444_v62 = vld [vmem:[%s20977_s27 + $0x14c8] sm:$0xf]  ;;  %v19687_v59 = vld [vmem:[%s20977_s27 + $0x13b4] sm:$0xf0] }
 0x3e5   : > { %11395 = vmatpush.bf16.msra.mxu1 %v14725_v6  ;;  %v15589_v6 = vor.u32 %v19759_v8, %v15588_v48  ;;  %v15445_v10 = vor.u32 %v19723_v57, %v15444_v62  ;;  %v15172_v63 = vld [vmem:[%s20977_s27 + $0x12a8] sm:$0xf]  ;;  %v19719_v52 = vld [vmem:[%s20977_s27 + $0x14b4] sm:$0xf0] }
 0x3e6   : > { %11408 = vmatpush.bf16.msra.mxu2 %v14853_v22  ;;  %v19691_v22 = vld [vmem:[%s20977_s27 + $0x13d4] sm:$0xf0]  ;;  %v15300_v60 = vld [vmem:[%s20977_s27 + $0x13a8] sm:$0xf]  ;;  %v15173_v48 = vor.u32 %v19655_v11, %v15172_v63 }
 0x3e7   : > { %11421 = vmatpush.bf16.msra.mxu3 %v14981_v0  ;;  %v19755_v0 = vld [vmem:[%s20977_s27 + $0x15d4] sm:$0xf0]  ;;  %v15317_v55 = vor.u32 %v19691_v22, %v15316_v51  ;;  %v15428_v20 = vld [vmem:[%s20977_s27 + $0x14a8] sm:$0xf]  ;;  %v15301_v8 = vor.u32 %v19687_v59, %v15300_v60 }
 0x3e8   : > { %11383 = vmatpush.bf16.msra.mxu0 %v14581_v24  ;;  %v15573_v24 = vor.u32 %v19755_v0, %v15572_v29  ;;  %v19683_v50 = vld [vmem:[%s20977_s27 + $0x1394] sm:$0xf0]  ;;  %v15412_v51 = vld [vmem:[%s20977_s27 + $0x1488] sm:$0xf]  ;;  %v11177_v22 = vpop.f32.mrf.mxu0 }
 0x3e9   : > { %11396 = vmatpush.bf16.msra.mxu1 %v14709_v61  ;;  %v15556_v61 = vld [vmem:[%s20977_s27 + $0x15a8] sm:$0xf]  ;;  %v19747_v57 = vld [vmem:[%s20977_s27 + $0x1594] sm:$0xf0]  ;;  %v11178_v29 = vadd.f32 %v11177_v22, %v23157_v9 }
 0x3ea   : > { %11409 = vmatpush.bf16.msra.mxu2 %v14837_v18  ;;  %v19751_v18 = vld [vmem:[%s20977_s27 + $0x15b4] sm:$0xf0]  ;;  %v15540_v62 = vld [vmem:[%s20977_s27 + $0x1588] sm:$0xf] }
 0x3eb   : > { %11422 = vmatpush.bf16.msra.mxu3 %v14965_v54  ;;  %11384 = vmatmul.bf16.vlgmr.msra.gmra.mxu0 %v21336_v28  ;;  %v15429_v54 = vor.u32 %v19719_v52, %v15428_v20  ;;  %v15557_v43 = vor.u32 %v19751_v18, %v15556_v61  ;;  %v15140_v63 = vld [vmem:[%s20977_s27 + $0x1268] sm:$0xf]  ;;  %v19647_v11 = vld [vmem:[%s20977_s27 + $0x1274] sm:$0xf0] }
 0x3ec   : > { %11428 = vmatpush.bf16.msrb.mxu0 %v15205_v2  ;;  %11397 = vmatmul.bf16.vlgmr.msra.gmra.mxu1 %v21346_v45  ;;  %v15156_v2 = vld [vmem:[%s20977_s27 + $0x1288] sm:$0xf]  ;;  %v19679_v20 = vld [vmem:[%s20977_s27 + $0x1374] sm:$0xf0] }
 0x3ed   : > { %11441 = vmatpush.bf16.msrb.mxu1 %v15333_v42  ;;  %11410 = vmatmul.bf16.vlgmr.msra.gmra.mxu2 %v21411_v3  ;;  %v19651_v42 = vld [vmem:[%s20977_s27 + $0x1294] sm:$0xf0]  ;;  %v15268_v60 = vld [vmem:[%s20977_s27 + $0x1368] sm:$0xf] }
 0x3ee   : > { %11454 = vmatpush.bf16.msrb.mxu2 %v15461_v56  ;;  %11423 = vmatmul.bf16.vlgmr.msra.gmra.mxu3 %v21418_v33  ;;  %v15284_v56 = vld [vmem:[%s20977_s27 + $0x1388] sm:$0xf]  ;;  %v15157_v0 = vor.u32 %v19651_v42, %v15156_v2  ;;  %v19711_v9 = vld [vmem:[%s20977_s27 + $0x1474] sm:$0xf0] }
 0x3ef   : > { %11467 = vmatpush.bf16.msrb.mxu3 %v15589_v6  ;;  %v19715_v6 = vld [vmem:[%s20977_s27 + $0x1494] sm:$0xf0]  ;;  %v15396_v52 = vld [vmem:[%s20977_s27 + $0x1468] sm:$0xf] }
 0x3f0   : > { %11429 = vmatpush.bf16.msrb.mxu0 %v15189_v58  ;;  %v11190_v58 = vpop.f32.mrf.mxu1  ;;  %v15524_v61 = vld [vmem:[%s20977_s27 + $0x1568] sm:$0xf]  ;;  %v19743_v18 = vld [vmem:[%s20977_s27 + $0x1574] sm:$0xf0]  ;;  %v15397_v2 = vor.u32 %v19711_v9, %v15396_v52 }
 0x3f1   : > { %11442 = vmatpush.bf16.msrb.mxu1 %v15317_v55  ;;  %v15285_v55 = vor.u32 %v19683_v50, %v15284_v56  ;;  %v11191_v59 = vadd.f32 %v11190_v58, %v11178_v29  ;;  %v15124_v42 = vld [vmem:[%s20977_s27 + $0x1248] sm:$0xf]  ;;  %v19643_v56 = vld [vmem:[%s20977_s27 + $0x1254] sm:$0xf0]  ;;  %v11216_v58 = vpop.f32.mrf.mxu3 }
 0x3f2   : > { %11455 = vmatpush.bf16.msrb.mxu2 %v15445_v10  ;;  %v15413_v10 = vor.u32 %v19715_v6, %v15412_v51  ;;  %v15525_v51 = vor.u32 %v19743_v18, %v15524_v61  ;;  %v19675_v6 = vld [vmem:[%s20977_s27 + $0x1354] sm:$0xf0]  ;;  %v15380_v22 = vld [vmem:[%s20977_s27 + $0x1448] sm:$0xf] }
 0x3f3   : > { %11468 = vmatpush.bf16.msrb.mxu3 %v15573_v24  ;;  %v15541_v24 = vor.u32 %v19747_v57, %v15540_v62  ;;  %v19707_v62 = vld [vmem:[%s20977_s27 + $0x1454] sm:$0xf0]  ;;  %v11203_v57 = vpop.f32.mrf.mxu2  ;;  %v15508_v29 = vld [vmem:[%s20977_s27 + $0x1548] sm:$0xf] }
 0x3f4   : > { %11430 = vmatpush.bf16.msrb.mxu0 %v15173_v48  ;;  %v12472_v48 = vrot.slane %v11191_v59, 6  ;;  %v19639_v59 = vld [vmem:[%s20977_s27 + $0x1234] sm:$0xf0]  ;;  %v15364_v61 = vld [vmem:[%s20977_s27 + $0x1428] sm:$0xf] }
 0x3f5   : > { %11443 = vmatpush.bf16.msrb.mxu1 %v15301_v8  ;;  %v15141_v8 = vor.u32 %v19647_v11, %v15140_v63  ;;  %v19671_v9 = vld [vmem:[%s20977_s27 + $0x1334] sm:$0xf0] }
 0x3f6   : > { %11456 = vmatpush.bf16.msrb.mxu2 %v15429_v54  ;;  %v15269_v54 = vor.u32 %v19679_v20, %v15268_v60  ;;  %v23225_v50 = vsel %vm12475_vm0, %v22358_v26, %v12472_v48  ;;  %v23232_v26 = vadd.f32 %v11216_v58, %v11203_v57  ;;  %v15381_v60 = vor.u32 %v19707_v62, %v15380_v22  ;;  %v15236_v20 = vld [vmem:[%s20977_s27 + $0x1328] sm:$0xf]  ;;  %v19703_v18 = vld [vmem:[%s20977_s27 + $0x1434] sm:$0xf0] }
 0x3f7   : > { %11469 = vmatpush.bf16.msrb.mxu3 %v15557_v43  ;;  %v15252_v43 = vld [vmem:[%s20977_s27 + $0x1348] sm:$0xf]  ;;  %24707 = vst [vmem:[#allocation12_spill] sm:$0xff] %v23225_v50  ;;  %v19699_v57 = vld [vmem:[%s20977_s27 + $0x1414] sm:$0xf0] }
 0x3f8   : > { %11431 = vmatpush.bf16.msrb.mxu0 %v15157_v0  ;;  %v19739_v0 = vld [vmem:[%s20977_s27 + $0x1554] sm:$0xf0]  ;;  %v11192_v63 = vpop.f32.mrf.mxu1  ;;  %v15253_v11 = vor.u32 %v19675_v6, %v15252_v43  ;;  %v15492_v48 = vld [vmem:[%s20977_s27 + $0x1528] sm:$0xf]  ;;  %v15365_v43 = vor.u32 %v19703_v18, %v15364_v61 }
 0x3f9   : > { %11444 = vmatpush.bf16.msrb.mxu1 %v15285_v55  ;;  %v11179_v55 = vpop.f32.mrf.mxu0  ;;  %v15509_v52 = vor.u32 %v19739_v0, %v15508_v29  ;;  %v19667_v6 = vld [vmem:[%s20977_s27 + $0x1314] sm:$0xf0]  ;;  %v15348_v22 = vld [vmem:[%s20977_s27 + $0x1408] sm:$0xf] }
 0x3fa   : > { %11457 = vmatpush.bf16.msrb.mxu2 %v15413_v10  ;;  %v15125_v10 = vor.u32 %v19643_v56, %v15124_v42  ;;  %v19635_v42 = vld [vmem:[%s20977_s27 + $0x1214] sm:$0xf0]  ;;  %v15237_v56 = vor.u32 %v19671_v9, %v15236_v20  ;;  %v15476_v29 = vld [vmem:[%s20977_s27 + $0x1508] sm:$0xf]  ;;  %v15349_v9 = vor.u32 %v19699_v57, %v15348_v22 }
 0x3fb   : > { %11470 = vmatpush.bf16.msrb.mxu3 %v15541_v24  ;;  %v15108_v24 = vld [vmem:[%s20977_s27 + $0x1228] sm:$0xf]  ;;  %v19731_v0 = vld [vmem:[%s20977_s27 + $0x1514] sm:$0xf0]  ;;  %v11205_v58 = vpop.f32.mrf.mxu2 }
 0x3fc   : > { %11432 = vmatpush.bf16.msrb.mxu0 %v15141_v8  ;;  %v19735_v8 = vld [vmem:[%s20977_s27 + $0x1534] sm:$0xf0]  ;;  %v15716_v55 = vld [vmem:[%s20977_s27 + $0x16e8] sm:$0xf] }
 0x3fd   : > { %11445 = vmatpush.bf16.msrb.mxu1 %v15269_v54  ;;  %v15109_v54 = vor.u32 %v19639_v59, %v15108_v24  ;;  %v15493_v62 = vor.u32 %v19735_v8, %v15492_v48  ;;  %v15844_v63 = vld [vmem:[%s20977_s27 + $0x17e8] sm:$0xf]  ;;  %v19823_v24 = vld [vmem:[%s20977_s27 + $0x17f4] sm:$0xf0]  ;;  %v15477_v48 = vor.u32 %v19731_v0, %v15476_v29 }
 0x3fe   : > { %11458 = vmatpush.bf16.msrb.mxu2 %v15397_v2  ;;  %v15092_v2 = vld [vmem:[%s20977_s27 + $0x1208] sm:$0xf]  ;;  %v19855_v20 = vld [vmem:[%s20977_s27 + $0x18f4] sm:$0xf0] }
 0x3ff   : > { %11471 = vmatpush.bf16.msrb.mxu3 %v15525_v51  ;;  %v15220_v51 = vld [vmem:[%s20977_s27 + $0x1308] sm:$0xf]  ;;  %v19887_v18 = vld [vmem:[%s20977_s27 + $0x19f4] sm:$0xf0] }
 0x400   : > { %11433 = vmatpush.bf16.msrb.mxu0 %v15125_v10  ;;  %v19791_v10 = vld [vmem:[%s20977_s27 + $0x16f4] sm:$0xf0]  ;;  %v15972_v59 = vld [vmem:[%s20977_s27 + $0x18e8] sm:$0xf] }
 0x401   : > { %11446 = vmatpush.bf16.msrb.mxu1 %v15253_v11  ;;  %v11218_v11 = vpop.f32.mrf.mxu3  ;;  %v16100_v61 = vld [vmem:[%s20977_s27 + $0x19e8] sm:$0xf]  ;;  %v15717_v8 = vor.u32 %v19791_v10, %v15716_v55  ;;  %v19787_v58 = vld [vmem:[%s20977_s27 + $0x16d4] sm:$0xf0] }
 0x402   : > { %11459 = vmatpush.bf16.msrb.mxu2 %v15381_v60  ;;  %v15093_v60 = vor.u32 %v19635_v42, %v15092_v2  ;;  %v15973_v2 = vor.u32 %v19855_v20, %v15972_v59  ;;  %v15700_v42 = vld [vmem:[%s20977_s27 + $0x16c8] sm:$0xf]  ;;  %v19783_v10 = vld [vmem:[%s20977_s27 + $0x16b4] sm:$0xf0] }
 0x403   : > { %11472 = vmatpush.bf16.msrb.mxu3 %v15509_v52  ;;  %v15221_v52 = vor.u32 %v19667_v6, %v15220_v51  ;;  %v15828_v11 = vld [vmem:[%s20977_s27 + $0x17c8] sm:$0xf]  ;;  %v19851_v6 = vld [vmem:[%s20977_s27 + $0x18d4] sm:$0xf0]  ;;  %v15701_v57 = vor.u32 %v19787_v58, %v15700_v42 }
 0x404   : > { %11434 = vmatpush.bf16.msrb.mxu0 %v15109_v54  ;;  %v15845_v54 = vor.u32 %v19823_v24, %v15844_v63  ;;  %v15956_v51 = vld [vmem:[%s20977_s27 + $0x18c8] sm:$0xf]  ;;  %v19815_v59 = vld [vmem:[%s20977_s27 + $0x17b4] sm:$0xf0] }
 0x405   : > { %11447 = vmatpush.bf16.msrb.mxu1 %v15237_v56  ;;  %v16101_v56 = vor.u32 %v19887_v18, %v16100_v61  ;;  %v16084_v22 = vld [vmem:[%s20977_s27 + $0x19c8] sm:$0xf]  ;;  %v15957_v0 = vor.u32 %v19851_v6, %v15956_v51  ;;  %v19879_v61 = vld [vmem:[%s20977_s27 + $0x19b4] sm:$0xf0] }
 0x406   : > { %11460 = vmatpush.bf16.msrb.mxu2 %v15365_v43  ;;  %v19819_v43 = vld [vmem:[%s20977_s27 + $0x17d4] sm:$0xf0]  ;;  %v15684_v55 = vld [vmem:[%s20977_s27 + $0x16a8] sm:$0xf] }
 0x407   : > { %11473 = vmatpush.bf16.msrb.mxu3 %v15493_v62  ;;  %v19883_v62 = vld [vmem:[%s20977_s27 + $0x19d4] sm:$0xf0]  ;;  %v15829_v29 = vor.u32 %v19819_v43, %v15828_v11  ;;  %v15812_v63 = vld [vmem:[%s20977_s27 + $0x17a8] sm:$0xf]  ;;  %v15685_v18 = vor.u32 %v19783_v10, %v15684_v55 }
 0x408   : > { %11435 = vmatpush.bf16.msrb.mxu0 %v15093_v60  ;;  %v24708_v60 = vld [vmem:[#allocation11_spill] sm:$0xff]  ;;  %v16085_v24 = vor.u32 %v19883_v62, %v16084_v22  ;;  %v15940_v20 = vld [vmem:[%s20977_s27 + $0x18a8] sm:$0xf]  ;;  %v19811_v11 = vld [vmem:[%s20977_s27 + $0x1794] sm:$0xf0]  ;;  %v11229_v62 = vpop.f32.mrf.mxu0 }
 0x409   : > { %11448 = vmatpush.bf16.msrb.mxu1 %v15221_v52  ;;  %v19847_v52 = vld [vmem:[%s20977_s27 + $0x18b4] sm:$0xf0]  ;;  %v15796_v42 = vld [vmem:[%s20977_s27 + $0x1788] sm:$0xf] }
 0x40a   : > { %11461 = vmatpush.bf16.msrb.mxu2 %v15349_v9  ;;  %v16068_v9 = vld [vmem:[%s20977_s27 + $0x19a8] sm:$0xf]  ;;  %v19843_v43 = vld [vmem:[%s20977_s27 + $0x1894] sm:$0xf0] }
 0x40b   : > { %11474 = vmatpush.bf16.msrb.mxu3 %v15477_v48  ;;  %11436 = vmatmul.bf16.vlgmr.msrb.gmra.mxu0 %v24708_v60  ;;  %v15813_v48 = vor.u32 %v19815_v59, %v15812_v63  ;;  %v16069_v58 = vor.u32 %v19879_v61, %v16068_v9  ;;  %v16052_v51 = vld [vmem:[%s20977_s27 + $0x1988] sm:$0xf]  ;;  %v19875_v6 = vld [vmem:[%s20977_s27 + $0x1994] sm:$0xf0]  ;;  %v11230_v63 = vadd.f32 %v11229_v62, %v23232_v26 }
 0x40c   : > { %11480 = vmatpush.bf16.msra.mxu0 %v15717_v8  ;;  %11449 = vmatmul.bf16.vlgmr.msrb.gmra.mxu1 %v21422_v53  ;;  %v15941_v8 = vor.u32 %v19847_v52, %v15940_v20  ;;  %v19775_v55 = vld [vmem:[%s20977_s27 + $0x1674] sm:$0xf0]  ;;  %v15780_v10 = vld [vmem:[%s20977_s27 + $0x1768] sm:$0xf]  ;;  %v16053_v59 = vor.u32 %v19875_v6, %v16052_v51 }
 0x40d   : > { %11493 = vmatpush.bf16.msra.mxu1 %v15845_v54  ;;  %11462 = vmatmul.bf16.vlgmr.msrb.gmra.mxu2 %v21488_v5  ;;  %v15668_v54 = vld [vmem:[%s20977_s27 + $0x1688] sm:$0xf]  ;;  %v19807_v20 = vld [vmem:[%s20977_s27 + $0x1774] sm:$0xf0] }
 0x40e   : > { %11506 = vmatpush.bf16.msra.mxu2 %v15973_v2  ;;  %11475 = vmatmul.bf16.vlgmr.msrb.gmra.mxu3 %v21495_v15  ;;  %v19779_v2 = vld [vmem:[%s20977_s27 + $0x1694] sm:$0xf0]  ;;  %v15908_v52 = vld [vmem:[%s20977_s27 + $0x1868] sm:$0xf]  ;;  %v15781_v26 = vor.u32 %v19807_v20, %v15780_v10 }
 0x40f   : > { %11519 = vmatpush.bf16.msra.mxu3 %v16101_v56  ;;  %v15924_v56 = vld [vmem:[%s20977_s27 + $0x1888] sm:$0xf]  ;;  %v15669_v22 = vor.u32 %v19779_v2, %v15668_v54  ;;  %v19839_v9 = vld [vmem:[%s20977_s27 + $0x1874] sm:$0xf0] }
 0x410   : > { %11481 = vmatpush.bf16.msra.mxu0 %v15701_v57  ;;  %v15797_v57 = vor.u32 %v19811_v11, %v15796_v42  ;;  %v16036_v61 = vld [vmem:[%s20977_s27 + $0x1968] sm:$0xf]  ;;  %v15909_v54 = vor.u32 %v19839_v9, %v15908_v52  ;;  %v19771_v42 = vld [vmem:[%s20977_s27 + $0x1654] sm:$0xf0]  ;;  %v11255_v11 = vpop.f32.mrf.mxu2  ;;  %v11231_v10 = vpop.f32.mrf.mxu0 }
 0x411   : > { %11494 = vmatpush.bf16.msra.mxu1 %v15829_v29  ;;  %v15925_v29 = vor.u32 %v19843_v43, %v15924_v56  ;;  %v15636_v2 = vld [vmem:[%s20977_s27 + $0x1648] sm:$0xf]  ;;  %v19803_v43 = vld [vmem:[%s20977_s27 + $0x1754] sm:$0xf0]  ;;  %v11268_v62 = vpop.f32.mrf.mxu3 }
 0x412   : > { %11507 = vmatpush.bf16.msra.mxu2 %v15957_v0  ;;  %v15652_v0 = vld [vmem:[%s20977_s27 + $0x1668] sm:$0xf]  ;;  %v19835_v6 = vld [vmem:[%s20977_s27 + $0x1854] sm:$0xf0] }
 0x413   : > { %11520 = vmatpush.bf16.msra.mxu3 %v16085_v24  ;;  %v11242_v24 = vpop.f32.mrf.mxu1  ;;  %v15892_v51 = vld [vmem:[%s20977_s27 + $0x1848] sm:$0xf]  ;;  %v19767_v20 = vld [vmem:[%s20977_s27 + $0x1634] sm:$0xf0] }
 0x414   : > { %11482 = vmatpush.bf16.msra.mxu0 %v15685_v18  ;;  %v19871_v18 = vld [vmem:[%s20977_s27 + $0x1974] sm:$0xf0]  ;;  %v15748_v52 = vld [vmem:[%s20977_s27 + $0x1728] sm:$0xf] }
 0x415   : > { %11495 = vmatpush.bf16.msra.mxu1 %v15813_v48  ;;  %v11243_v48 = vadd.f32 %v11242_v24, %v11230_v63  ;;  %v16037_v56 = vor.u32 %v19871_v18, %v16036_v61  ;;  %v15893_v24 = vor.u32 %v19835_v6, %v15892_v51  ;;  %v19799_v18 = vld [vmem:[%s20977_s27 + $0x1734] sm:$0xf0]  ;;  %v15860_v6 = vld [vmem:[%s20977_s27 + $0x1808] sm:$0xf] }
 0x416   : > { %11508 = vmatpush.bf16.msra.mxu2 %v15941_v8  ;;  %v15653_v8 = vor.u32 %v19775_v55, %v15652_v0  ;;  %v16020_v0 = vld [vmem:[%s20977_s27 + $0x1948] sm:$0xf]  ;;  %v19795_v51 = vld [vmem:[%s20977_s27 + $0x1714] sm:$0xf0] }
 0x417   : > { %11521 = vmatpush.bf16.msra.mxu3 %v16069_v58  ;;  %v15764_v58 = vld [vmem:[%s20977_s27 + $0x1748] sm:$0xf] }
 0x418   : > { %11483 = vmatpush.bf16.msra.mxu0 %v15669_v22  ;;  %v11256_v22 = vadd.f32 %v11255_v11, %v11243_v48  ;;  %v15765_v63 = vor.u32 %v19803_v43, %v15764_v58  ;;  %v15876_v48 = vld [vmem:[%s20977_s27 + $0x1828] sm:$0xf]  ;;  %v19763_v58 = vld [vmem:[%s20977_s27 + $0x1614] sm:$0xf0]  ;;  %v15749_v11 = vor.u32 %v19799_v18, %v15748_v52 }
 0x419   : > { %11496 = vmatpush.bf16.msra.mxu1 %v15797_v57  ;;  %v19867_v57 = vld [vmem:[%s20977_s27 + $0x1954] sm:$0xf0]  ;;  %v15732_v43 = vld [vmem:[%s20977_s27 + $0x1708] sm:$0xf]  ;;  %v11270_v10 = vpop.f32.mrf.mxu3 }
 0x41a   : > { %11509 = vmatpush.bf16.msra.mxu2 %v15925_v29  ;;  %v15637_v29 = vor.u32 %v19771_v42, %v15636_v2  ;;  %v23303_v55 = vadd.f32 %v11268_v62, %v11256_v22  ;;  %v16021_v61 = vor.u32 %v19867_v57, %v16020_v0  ;;  %v16004_v2 = vld [vmem:[%s20977_s27 + $0x1928] sm:$0xf]  ;;  %v11257_v22 = vpop.f32.mrf.mxu2  ;;  %v19827_v0 = vld [vmem:[%s20977_s27 + $0x1814] sm:$0xf0] }
 0x41b   : > { %11522 = vmatpush.bf16.msra.mxu3 %v16053_v59  ;;  %v15620_v59 = vld [vmem:[%s20977_s27 + $0x1628] sm:$0xf]  ;;  %v11244_v9 = vpop.f32.mrf.mxu1  ;;  %v19951_v52 = vld [vmem:[%s20977_s27 + $0x1bf4] sm:$0xf0] }
 0x41c   : > { %11484 = vmatpush.bf16.msra.mxu0 %v15653_v8  ;;  %v19831_v8 = vld [vmem:[%s20977_s27 + $0x1834] sm:$0xf0]  ;;  %v15604_v42 = vld [vmem:[%s20977_s27 + $0x1608] sm:$0xf] }
 0x41d   : > { %11497 = vmatpush.bf16.msra.mxu1 %v15781_v26  ;;  %v19863_v26 = vld [vmem:[%s20977_s27 + $0x1934] sm:$0xf0]  ;;  %v15988_v57 = vld [vmem:[%s20977_s27 + $0x1908] sm:$0xf] }
 0x41e   : > { %11510 = vmatpush.bf16.msra.mxu2 %v15909_v54  ;;  %v15621_v54 = vor.u32 %v19767_v20, %v15620_v59  ;;  %v16005_v62 = vor.u32 %v19863_v26, %v16004_v2  ;;  %v19919_v59 = vld [vmem:[%s20977_s27 + $0x1af4] sm:$0xf0]  ;;  %v15605_v20 = vor.u32 %v19763_v58, %v15604_v42  ;;  %v16484_v9 = vld [vmem:[%s20977_s27 + $0x1ce8] sm:$0xf] }
 0x41f   : > { %11523 = vmatpush.bf16.msra.mxu3 %v16037_v56  ;;  %v15877_v56 = vor.u32 %v19831_v8, %v15876_v48  ;;  %v19983_v18 = vld [vmem:[%s20977_s27 + $0x1cf4] sm:$0xf0]  ;;  %v15861_v48 = vor.u32 %v19827_v0, %v15860_v6  ;;  %v16612_v8 = vld [vmem:[%s20977_s27 + $0x1de8] sm:$0xf] }
 0x420   : > { %11485 = vmatpush.bf16.msra.mxu0 %v15637_v29  ;;  %v19859_v29 = vld [vmem:[%s20977_s27 + $0x1914] sm:$0xf0]  ;;  %v16485_v58 = vor.u32 %v19983_v18, %v16484_v9  ;;  %v16212_v22 = vld [vmem:[%s20977_s27 + $0x1ac8] sm:$0xf] }
 0x421   : > { %11498 = vmatpush.bf16.msra.mxu1 %v15765_v63  ;;  %v16228_v63 = vld [vmem:[%s20977_s27 + $0x1ae8] sm:$0xf]  ;;  %v20015_v2 = vld [vmem:[%s20977_s27 + $0x1df4] sm:$0xf0]  ;;  %v15989_v26 = vor.u32 %v19859_v29, %v15988_v57 }
 0x422   : > { %11511 = vmatpush.bf16.msra.mxu2 %v15893_v24  ;;  %v16356_v24 = vld [vmem:[%s20977_s27 + $0x1be8] sm:$0xf]  ;;  %v19915_v10 = vld [vmem:[%s20977_s27 + $0x1ad4] sm:$0xf0] }
 0x423   : > { %11524 = vmatpush.bf16.msra.mxu3 %v16021_v61  ;;  %v15733_v61 = vor.u32 %v19795_v51, %v15732_v43  ;;  %v16357_v42 = vor.u32 %v19951_v52, %v16356_v24  ;;  %v16340_v50 = vld [vmem:[%s20977_s27 + $0x1bc8] sm:$0xf]  ;;  %v19979_v51 = vld [vmem:[%s20977_s27 + $0x1cd4] sm:$0xf0]  ;;  %v16213_v0 = vor.u32 %v19915_v10, %v16212_v22 }
 0x424   : > { %11486 = vmatpush.bf16.msra.mxu0 %v15621_v54  ;;  %v16229_v54 = vor.u32 %v19919_v59, %v16228_v63  ;;  %v16468_v43 = vld [vmem:[%s20977_s27 + $0x1cc8] sm:$0xf]  ;;  %v19911_v59 = vld [vmem:[%s20977_s27 + $0x1ab4] sm:$0xf0] }
 0x425   : > { %11499 = vmatpush.bf16.msra.mxu1 %v15749_v11  ;;  %v16613_v11 = vor.u32 %v20015_v2, %v16612_v8  ;;  %v16596_v6 = vld [vmem:[%s20977_s27 + $0x1dc8] sm:$0xf]  ;;  %v16469_v29 = vor.u32 %v19979_v51, %v16468_v43  ;;  %v19943_v52 = vld [vmem:[%s20977_s27 + $0x1bb4] sm:$0xf0] }
 0x426   : > { %11512 = vmatpush.bf16.msra.mxu2 %v15877_v56  ;;  %v19947_v56 = vld [vmem:[%s20977_s27 + $0x1bd4] sm:$0xf0]  ;;  %v16196_v63 = vld [vmem:[%s20977_s27 + $0x1aa8] sm:$0xf] }
 0x427   : > { %11525 = vmatpush.bf16.msra.mxu3 %v16005_v62  ;;  %v20011_v62 = vld [vmem:[%s20977_s27 + $0x1dd4] sm:$0xf0]  ;;  %v16341_v57 = vor.u32 %v19947_v56, %v16340_v50  ;;  %v16324_v24 = vld [vmem:[%s20977_s27 + $0x1ba8] sm:$0xf] }
 0x428   : > { %11487 = vmatpush.bf16.msra.mxu0 %v15605_v20  ;;  %v16597_v20 = vor.u32 %v20011_v62, %v16596_v6  ;;  %v16452_v9 = vld [vmem:[%s20977_s27 + $0x1ca8] sm:$0xf]  ;;  %v19975_v18 = vld [vmem:[%s20977_s27 + $0x1cb4] sm:$0xf0]  ;;  %v16325_v8 = vor.u32 %v19943_v52, %v16324_v24  ;;  %v11281_v56 = vpop.f32.mrf.mxu0 }
 0x429   : > { %11500 = vmatpush.bf16.msra.mxu1 %v15733_v61  ;;  %v16580_v50 = vld [vmem:[%s20977_s27 + $0x1da8] sm:$0xf]  ;;  %v20007_v61 = vld [vmem:[%s20977_s27 + $0x1db4] sm:$0xf0]  ;;  %v16453_v2 = vor.u32 %v19975_v18, %v16452_v9  ;;  %v11282_v6 = vadd.f32 %v11281_v56, %v23303_v55 }
 0x42a   : > { %11513 = vmatpush.bf16.msra.mxu2 %v15861_v48  ;;  %v16197_v48 = vor.u32 %v19911_v59, %v16196_v63  ;;  %v19939_v22 = vld [vmem:[%s20977_s27 + $0x1b94] sm:$0xf0]  ;;  %v16436_v10 = vld [vmem:[%s20977_s27 + $0x1c88] sm:$0xf] }
 0x42b   : > { %11526 = vmatpush.bf16.msra.mxu3 %v15989_v26  ;;  %11488 = vmatmul.bf16.vlgmr.msra.gmra.mxu0 %v21493_v14  ;;  %v16180_v26 = vld [vmem:[%s20977_s27 + $0x1a88] sm:$0xf]  ;;  %v20003_v51 = vld [vmem:[%s20977_s27 + $0x1d94] sm:$0xf0] }
 0x42c   : > { %11532 = vmatpush.bf16.msrb.mxu0 %v16229_v54  ;;  %11501 = vmatmul.bf16.vlgmr.msra.gmra.mxu1 %v21499_v19  ;;  %v19907_v54 = vld [vmem:[%s20977_s27 + $0x1a94] sm:$0xf0]  ;;  %v16564_v43 = vld [vmem:[%s20977_s27 + $0x1d88] sm:$0xf] }
 0x42d   : > { %11545 = vmatpush.bf16.msrb.mxu1 %v16357_v42  ;;  %11514 = vmatmul.bf16.vlgmr.msra.gmra.mxu2 %v21567_v7  ;;  %v16308_v42 = vld [vmem:[%s20977_s27 + $0x1b88] sm:$0xf]  ;;  %v16181_v62 = vor.u32 %v19907_v54, %v16180_v26  ;;  %v19903_v59 = vld [vmem:[%s20977_s27 + $0x1a74] sm:$0xf0] }
 0x42e   : > { %11558 = vmatpush.bf16.msrb.mxu2 %v16485_v58  ;;  %11527 = vmatmul.bf16.vlgmr.msra.gmra.mxu3 %v21574_v17  ;;  %v16581_v58 = vor.u32 %v20007_v61, %v16580_v50  ;;  %v16164_v63 = vld [vmem:[%s20977_s27 + $0x1a68] sm:$0xf]  ;;  %v19935_v9 = vld [vmem:[%s20977_s27 + $0x1b74] sm:$0xf0] }
 0x42f   : > { %11571 = vmatpush.bf16.msrb.mxu3 %v16613_v11  ;;  %v19971_v11 = vld [vmem:[%s20977_s27 + $0x1c94] sm:$0xf0]  ;;  %v16292_v24 = vld [vmem:[%s20977_s27 + $0x1b68] sm:$0xf] }
 0x430   : > { %11533 = vmatpush.bf16.msrb.mxu0 %v16213_v0  ;;  %v11294_v0 = vpop.f32.mrf.mxu1  ;;  %v16420_v18 = vld [vmem:[%s20977_s27 + $0x1c68] sm:$0xf]  ;;  %v19967_v55 = vld [vmem:[%s20977_s27 + $0x1c74] sm:$0xf0] }
 0x431   : > { %11546 = vmatpush.bf16.msrb.mxu1 %v16341_v57  ;;  %v16309_v57 = vor.u32 %v19939_v22, %v16308_v42  ;;  %v11295_v52 = vadd.f32 %v11294_v0, %v11282_v6  ;;  %v16548_v50 = vld [vmem:[%s20977_s27 + $0x1d68] sm:$0xf]  ;;  %v19999_v61 = vld [vmem:[%s20977_s27 + $0x1d74] sm:$0xf0]  ;;  %v11307_v22 = vpop.f32.mrf.mxu2  ;;  %v11283_v0 = vpop.f32.mrf.mxu0 }
 0x432   : > { %11559 = vmatpush.bf16.msrb.mxu2 %v16469_v29  ;;  %v16437_v29 = vor.u32 %v19971_v11, %v16436_v10  ;;  %v16148_v26 = vld [vmem:[%s20977_s27 + $0x1a48] sm:$0xf]  ;;  %v19899_v54 = vld [vmem:[%s20977_s27 + $0x1a54] sm:$0xf0] }
 0x433   : > { %11572 = vmatpush.bf16.msrb.mxu3 %v16597_v20  ;;  %v16565_v20 = vor.u32 %v20003_v51, %v16564_v43  ;;  %v16276_v42 = vld [vmem:[%s20977_s27 + $0x1b48] sm:$0xf]  ;;  %v19931_v10 = vld [vmem:[%s20977_s27 + $0x1b54] sm:$0xf0]  ;;  %v11308_v43 = vadd.f32 %v11307_v22, %v11295_v52  ;;  %v11320_v51 = vpop.f32.mrf.mxu3 }
 0x434   : > { %11534 = vmatpush.bf16.msrb.mxu0 %v16197_v48  ;;  %v16165_v48 = vor.u32 %v19903_v59, %v16164_v63  ;;  %v16404_v11 = vld [vmem:[%s20977_s27 + $0x1c48] sm:$0xf]  ;;  %v19963_v56 = vld [vmem:[%s20977_s27 + $0x1c54] sm:$0xf0]  ;;  %v16277_v59 = vor.u32 %v19931_v10, %v16276_v42 }
 0x435   : > { %11547 = vmatpush.bf16.msrb.mxu1 %v16325_v8  ;;  %v16293_v8 = vor.u32 %v19935_v9, %v16292_v24  ;;  %v16532_v6 = vld [vmem:[%s20977_s27 + $0x1d48] sm:$0xf]  ;;  %v23374_v63 = vadd.f32 %v11320_v51, %v11308_v43  ;;  %v16405_v24 = vor.u32 %v19963_v56, %v16404_v11  ;;  %v19895_v52 = vld [vmem:[%s20977_s27 + $0x1a34] sm:$0xf0] }
 0x436   : > { %11560 = vmatpush.bf16.msrb.mxu2 %v16453_v2  ;;  %v16421_v2 = vor.u32 %v19967_v55, %v16420_v18  ;;  %v16260_v9 = vld [vmem:[%s20977_s27 + $0x1b28] sm:$0xf]  ;;  %v19927_v55 = vld [vmem:[%s20977_s27 + $0x1b34] sm:$0xf0] }
 0x437   : > { %11573 = vmatpush.bf16.msrb.mxu3 %v16581_v58  ;;  %v16549_v58 = vor.u32 %v19999_v61, %v16548_v50  ;;  %v16388_v50 = vld [vmem:[%s20977_s27 + $0x1c28] sm:$0xf]  ;;  %v19959_v61 = vld [vmem:[%s20977_s27 + $0x1c34] sm:$0xf0]  ;;  %v16261_v42 = vor.u32 %v19927_v55, %v16260_v9 }
 0x438   : > { %11535 = vmatpush.bf16.msrb.mxu0 %v16181_v62  ;;  %v19995_v62 = vld [vmem:[%s20977_s27 + $0x1d54] sm:$0xf0]  ;;  %v16244_v22 = vld [vmem:[%s20977_s27 + $0x1b08] sm:$0xf] }
 0x439   : > { %11548 = vmatpush.bf16.msrb.mxu1 %v16309_v57  ;;  %v16149_v57 = vor.u32 %v19899_v54, %v16148_v26  ;;  %v16533_v18 = vor.u32 %v19995_v62, %v16532_v6  ;;  %v16116_v26 = vld [vmem:[%s20977_s27 + $0x1a08] sm:$0xf]  ;;  %v19891_v54 = vld [vmem:[%s20977_s27 + $0x1a14] sm:$0xf0]  ;;  %v11309_v62 = vpop.f32.mrf.mxu2 }
 0x43a   : > { %11561 = vmatpush.bf16.msrb.mxu2 %v16437_v29  ;;  %v11296_v29 = vpop.f32.mrf.mxu1  ;;  %v19923_v10 = vld [vmem:[%s20977_s27 + $0x1b14] sm:$0xf0]  ;;  %v16372_v11 = vld [vmem:[%s20977_s27 + $0x1c08] sm:$0xf] }
 0x43b   : > { %11574 = vmatpush.bf16.msrb.mxu3 %v16565_v20  ;;  %v16132_v20 = vld [vmem:[%s20977_s27 + $0x1a28] sm:$0xf]  ;;  %v19955_v43 = vld [vmem:[%s20977_s27 + $0x1c14] sm:$0xf0] }
 0x43c   : > { %11536 = vmatpush.bf16.msrb.mxu0 %v16165_v48  ;;  %v16516_v48 = vld [vmem:[%s20977_s27 + $0x1d28] sm:$0xf]  ;;  %v19987_v6 = vld [vmem:[%s20977_s27 + $0x1d14] sm:$0xf0]  ;;  %v16373_v55 = vor.u32 %v19955_v43, %v16372_v11 }
 0x43d   : > { %11549 = vmatpush.bf16.msrb.mxu1 %v16293_v8  ;;  %v19991_v8 = vld [vmem:[%s20977_s27 + $0x1d34] sm:$0xf0]  ;;  %v16500_v51 = vld [vmem:[%s20977_s27 + $0x1d08] sm:$0xf] }
 0x43e   : > { %11562 = vmatpush.bf16.msrb.mxu2 %v16421_v2  ;;  %v16133_v2 = vor.u32 %v19895_v52, %v16132_v20  ;;  %v16517_v56 = vor.u32 %v19991_v8, %v16516_v48  ;;  %v16740_v0 = vld [vmem:[%s20977_s27 + $0x1ee8] sm:$0xf]  ;;  %v20079_v20 = vld [vmem:[%s20977_s27 + $0x1ff4] sm:$0xf0]  ;;  %v16501_v48 = vor.u32 %v19987_v6, %v16500_v51 }
 0x43f   : > { %11575 = vmatpush.bf16.msrb.mxu3 %v16549_v58  ;;  %v16389_v58 = vor.u32 %v19959_v61, %v16388_v50  ;;  %v16868_v29 = vld [vmem:[%s20977_s27 + $0x1fe8] sm:$0xf]  ;;  %v20111_v9 = vld [vmem:[%s20977_s27 + $0x20f4] sm:$0xf0] }
 0x440   : > { %11537 = vmatpush.bf16.msrb.mxu0 %v16149_v57  ;;  %v20047_v57 = vld [vmem:[%s20977_s27 + $0x1ef4] sm:$0xf0]  ;;  %v16996_v52 = vld [vmem:[%s20977_s27 + $0x20e8] sm:$0xf] }
 0x441   : > { %11550 = vmatpush.bf16.msrb.mxu1 %v16277_v59  ;;  %v11322_v59 = vpop.f32.mrf.mxu3  ;;  %v17124_v50 = vld [vmem:[%s20977_s27 + $0x21e8] sm:$0xf]  ;;  %v20143_v61 = vld [vmem:[%s20977_s27 + $0x21f4] sm:$0xf0]  ;;  %v16741_v8 = vor.u32 %v20047_v57, %v16740_v0 }
 0x442   : > { %11563 = vmatpush.bf16.msrb.mxu2 %v16405_v24  ;;  %v16117_v24 = vor.u32 %v19891_v54, %v16116_v26  ;;  %v16997_v26 = vor.u32 %v20111_v9, %v16996_v52  ;;  %v16724_v54 = vld [vmem:[%s20977_s27 + $0x1ec8] sm:$0xf]  ;;  %v20043_v62 = vld [vmem:[%s20977_s27 + $0x1ed4] sm:$0xf0] }
 0x443   : > { %11576 = vmatpush.bf16.msrb.mxu3 %v16533_v18  ;;  %v16245_v18 = vor.u32 %v19923_v10, %v16244_v22  ;;  %v16852_v59 = vld [vmem:[%s20977_s27 + $0x1fc8] sm:$0xf]  ;;  %v20107_v10 = vld [vmem:[%s20977_s27 + $0x20d4] sm:$0xf0]  ;;  %v16725_v43 = vor.u32 %v20043_v62, %v16724_v54 }
 0x444   : > { %11538 = vmatpush.bf16.msrb.mxu0 %v16133_v2  ;;  %v16869_v2 = vor.u32 %v20079_v20, %v16868_v29  ;;  %v16980_v22 = vld [vmem:[%s20977_s27 + $0x20c8] sm:$0xf]  ;;  %v20039_v57 = vld [vmem:[%s20977_s27 + $0x1eb4] sm:$0xf0] }
 0x445   : > { %11551 = vmatpush.bf16.msrb.mxu1 %v16261_v42  ;;  %v17125_v42 = vor.u32 %v20143_v61, %v17124_v50  ;;  %v17108_v11 = vld [vmem:[%s20977_s27 + $0x21c8] sm:$0xf]  ;;  %v16981_v6 = vor.u32 %v20107_v10, %v16980_v22  ;;  %v20071_v20 = vld [vmem:[%s20977_s27 + $0x1fb4] sm:$0xf0] }
 0x446   : > { %11564 = vmatpush.bf16.msrb.mxu2 %v16389_v58  ;;  %v20075_v58 = vld [vmem:[%s20977_s27 + $0x1fd4] sm:$0xf0]  ;;  %v16708_v0 = vld [vmem:[%s20977_s27 + $0x1ea8] sm:$0xf] }
 0x447   : > { %11577 = vmatpush.bf16.msrb.mxu3 %v16517_v56  ;;  %v20139_v56 = vld [vmem:[%s20977_s27 + $0x21d4] sm:$0xf0]  ;;  %v16853_v51 = vor.u32 %v20075_v58, %v16852_v59  ;;  %v16836_v29 = vld [vmem:[%s20977_s27 + $0x1fa8] sm:$0xf]  ;;  %v16709_v50 = vor.u32 %v20039_v57, %v16708_v0 }
 0x448   : > { %11539 = vmatpush.bf16.msrb.mxu0 %v16117_v24  ;;  %v17109_v24 = vor.u32 %v20139_v56, %v17108_v11  ;;  %v16964_v52 = vld [vmem:[%s20977_s27 + $0x20a8] sm:$0xf]  ;;  %v20103_v9 = vld [vmem:[%s20977_s27 + $0x20b4] sm:$0xf0]  ;;  %v16837_v61 = vor.u32 %v20071_v20, %v16836_v29  ;;  %v11333_v58 = vpop.f32.mrf.mxu0 }
 0x449   : > { %11552 = vmatpush.bf16.msrb.mxu1 %v16245_v18  ;;  %v17092_v18 = vld [vmem:[%s20977_s27 + $0x21a8] sm:$0xf]  ;;  %v20067_v62 = vld [vmem:[%s20977_s27 + $0x1f94] sm:$0xf0]  ;;  %v11334_v11 = vadd.f32 %v11333_v58, %v23374_v63 }
 0x44a   : > { %11565 = vmatpush.bf16.msrb.mxu2 %v16373_v55  ;;  %v20135_v55 = vld [vmem:[%s20977_s27 + $0x21b4] sm:$0xf0]  ;;  %v16948_v59 = vld [vmem:[%s20977_s27 + $0x2088] sm:$0xf] }
 0x44b   : > { %11578 = vmatpush.bf16.msrb.mxu3 %v16501_v48  ;;  %11540 = vmatmul.bf16.vlgmr.msrb.gmra.mxu0 %v21572_v16  ;;  %v16965_v48 = vor.u32 %v20103_v9, %v16964_v52  ;;  %v17093_v54 = vor.u32 %v20135_v55, %v17092_v18  ;;  %v17076_v22 = vld [vmem:[%s20977_s27 + $0x2188] sm:$0xf]  ;;  %v20131_v10 = vld [vmem:[%s20977_s27 + $0x2194] sm:$0xf0] }
 0x44c   : > { %11584 = vmatpush.bf16.msra.mxu0 %v16741_v8  ;;  %11553 = vmatmul.bf16.vlgmr.msrb.gmra.mxu1 %v21578_v21  ;;  %v16692_v8 = vld [vmem:[%s20977_s27 + $0x1e88] sm:$0xf]  ;;  %v20031_v57 = vld [vmem:[%s20977_s27 + $0x1e74] sm:$0xf0] }
 0x44d   : > { %11597 = vmatpush.bf16.msra.mxu1 %v16869_v2  ;;  %11566 = vmatmul.bf16.vlgmr.msrb.gmra.mxu2 %v21647_v12  ;;  %v20035_v2 = vld [vmem:[%s20977_s27 + $0x1e94] sm:$0xf0]  ;;  %v16676_v0 = vld [vmem:[%s20977_s27 + $0x1e68] sm:$0xf] }
 0x44e   : > { %11610 = vmatpush.bf16.msra.mxu2 %v16997_v26  ;;  %11579 = vmatmul.bf16.vlgmr.msrb.gmra.mxu3 %v21654_v38  ;;  %v16820_v26 = vld [vmem:[%s20977_s27 + $0x1f88] sm:$0xf]  ;;  %v16693_v56 = vor.u32 %v20035_v2, %v16692_v8  ;;  %v20063_v52 = vld [vmem:[%s20977_s27 + $0x1f74] sm:$0xf0] }
 0x44f   : > { %11623 = vmatpush.bf16.msra.mxu3 %v17125_v42  ;;  %v20099_v42 = vld [vmem:[%s20977_s27 + $0x2094] sm:$0xf0]  ;;  %v16804_v29 = vld [vmem:[%s20977_s27 + $0x1f68] sm:$0xf] }
 0x450   : > { %11585 = vmatpush.bf16.msra.mxu0 %v16725_v43  ;;  %v11346_v43 = vpop.f32.mrf.mxu1  ;;  %v16932_v9 = vld [vmem:[%s20977_s27 + $0x2068] sm:$0xf]  ;;  %v20095_v63 = vld [vmem:[%s20977_s27 + $0x2074] sm:$0xf0] }
 0x451   : > { %11598 = vmatpush.bf16.msra.mxu1 %v16853_v51  ;;  %v16821_v51 = vor.u32 %v20067_v62, %v16820_v26  ;;  %v11347_v20 = vadd.f32 %v11346_v43, %v11334_v11  ;;  %v17060_v18 = vld [vmem:[%s20977_s27 + $0x2168] sm:$0xf]  ;;  %v20127_v55 = vld [vmem:[%s20977_s27 + $0x2174] sm:$0xf0]  ;;  %v11359_v62 = vpop.f32.mrf.mxu2  ;;  %v11335_v43 = vpop.f32.mrf.mxu0 }
 0x452   : > { %11611 = vmatpush.bf16.msra.mxu2 %v16981_v6  ;;  %v16949_v6 = vor.u32 %v20099_v42, %v16948_v59  ;;  %v16660_v8 = vld [vmem:[%s20977_s27 + $0x1e48] sm:$0xf]  ;;  %v20027_v2 = vld [vmem:[%s20977_s27 + $0x1e54] sm:$0xf0] }
 0x453   : > { %11624 = vmatpush.bf16.msra.mxu3 %v17109_v24  ;;  %v17077_v24 = vor.u32 %v20131_v10, %v17076_v22  ;;  %v16788_v26 = vld [vmem:[%s20977_s27 + $0x1f48] sm:$0xf]  ;;  %v20059_v59 = vld [vmem:[%s20977_s27 + $0x1f54] sm:$0xf0]  ;;  %v11360_v22 = vadd.f32 %v11359_v62, %v11347_v20  ;;  %v11372_v10 = vpop.f32.mrf.mxu3 }
 0x454   : > { %11586 = vmatpush.bf16.msra.mxu0 %v16709_v50  ;;  %v16677_v50 = vor.u32 %v20031_v57, %v16676_v0  ;;  %v16916_v42 = vld [vmem:[%s20977_s27 + $0x2048] sm:$0xf]  ;;  %v20091_v58 = vld [vmem:[%s20977_s27 + $0x2054] sm:$0xf0]  ;;  %v16789_v57 = vor.u32 %v20059_v59, %v16788_v26 }
 0x455   : > { %11599 = vmatpush.bf16.msra.mxu1 %v16837_v61  ;;  %v16805_v61 = vor.u32 %v20063_v52, %v16804_v29  ;;  %v17044_v11 = vld [vmem:[%s20977_s27 + $0x2148] sm:$0xf]  ;;  %v23445_v0 = vadd.f32 %v11372_v10, %v11360_v22  ;;  %v16917_v29 = vor.u32 %v20091_v58, %v16916_v42  ;;  %v20023_v20 = vld [vmem:[%s20977_s27 + $0x1e34] sm:$0xf0] }
 0x456   : > { %11612 = vmatpush.bf16.msra.mxu2 %v16965_v48  ;;  %v16933_v48 = vor.u32 %v20095_v63, %v16932_v9  ;;  %v16772_v52 = vld [vmem:[%s20977_s27 + $0x1f28] sm:$0xf]  ;;  %v20055_v63 = vld [vmem:[%s20977_s27 + $0x1f34] sm:$0xf0] }
 0x457   : > { %11625 = vmatpush.bf16.msra.mxu3 %v17093_v54  ;;  %v17061_v54 = vor.u32 %v20127_v55, %v17060_v18  ;;  %v16900_v18 = vld [vmem:[%s20977_s27 + $0x2028] sm:$0xf]  ;;  %v20087_v55 = vld [vmem:[%s20977_s27 + $0x2034] sm:$0xf0]  ;;  %v16773_v26 = vor.u32 %v20055_v63, %v16772_v52 }
 0x458   : > { %11587 = vmatpush.bf16.msra.mxu0 %v16693_v56  ;;  %v20123_v56 = vld [vmem:[%s20977_s27 + $0x2154] sm:$0xf0]  ;;  %v16756_v62 = vld [vmem:[%s20977_s27 + $0x1f08] sm:$0xf] }
 0x459   : > { %11600 = vmatpush.bf16.msra.mxu1 %v16821_v51  ;;  %v16661_v51 = vor.u32 %v20027_v2, %v16660_v8  ;;  %v17045_v9 = vor.u32 %v20123_v56, %v17044_v11  ;;  %v16628_v8 = vld [vmem:[%s20977_s27 + $0x1e08] sm:$0xf]  ;;  %v20019_v2 = vld [vmem:[%s20977_s27 + $0x1e14] sm:$0xf0]  ;;  %v11361_v56 = vpop.f32.mrf.mxu2 }
 0x45a   : > { %11613 = vmatpush.bf16.msra.mxu2 %v16949_v6  ;;  %v11348_v6 = vpop.f32.mrf.mxu1  ;;  %v20051_v59 = vld [vmem:[%s20977_s27 + $0x1f14] sm:$0xf0]  ;;  %v16884_v42 = vld [vmem:[%s20977_s27 + $0x2008] sm:$0xf] }
 0x45b   : > { %11626 = vmatpush.bf16.msra.mxu3 %v17077_v24  ;;  %v16644_v24 = vld [vmem:[%s20977_s27 + $0x1e28] sm:$0xf]  ;;  %v20083_v22 = vld [vmem:[%s20977_s27 + $0x2014] sm:$0xf0] }
 0x45c   : > { %11588 = vmatpush.bf16.msra.mxu0 %v16677_v50  ;;  %v17028_v50 = vld [vmem:[%s20977_s27 + $0x2128] sm:$0xf]  ;;  %v20115_v11 = vld [vmem:[%s20977_s27 + $0x2114] sm:$0xf0]  ;;  %v16885_v63 = vor.u32 %v20083_v22, %v16884_v42 }
 0x45d   : > { %11601 = vmatpush.bf16.msra.mxu1 %v16805_v61  ;;  %v20119_v61 = vld [vmem:[%s20977_s27 + $0x2134] sm:$0xf0]  ;;  %v17012_v10 = vld [vmem:[%s20977_s27 + $0x2108] sm:$0xf] }
 0x45e   : > { %11614 = vmatpush.bf16.msra.mxu2 %v16933_v48  ;;  %v16645_v48 = vor.u32 %v20023_v20, %v16644_v24  ;;  %v17029_v58 = vor.u32 %v20119_v61, %v17028_v50  ;;  %v17252_v43 = vld [vmem:[%s20977_s27 + $0x22e8] sm:$0xf]  ;;  %v20207_v24 = vld [vmem:[%s20977_s27 + $0x23f4] sm:$0xf0]  ;;  %v17013_v50 = vor.u32 %v20115_v11, %v17012_v10 }
 0x45f   : > { %11627 = vmatpush.bf16.msra.mxu3 %v17061_v54  ;;  %v16901_v54 = vor.u32 %v20087_v55, %v16900_v18  ;;  %v17380_v6 = vld [vmem:[%s20977_s27 + $0x23e8] sm:$0xf]  ;;  %v20239_v52 = vld [vmem:[%s20977_s27 + $0x24f4] sm:$0xf0] }
 0x460   : > { %11589 = vmatpush.bf16.msra.mxu0 %v16661_v51  ;;  %v20175_v51 = vld [vmem:[%s20977_s27 + $0x22f4] sm:$0xf0]  ;;  %v17508_v20 = vld [vmem:[%s20977_s27 + $0x24e8] sm:$0xf] }
 0x461   : > { %11602 = vmatpush.bf16.msra.mxu1 %v16789_v57  ;;  %v11374_v57 = vpop.f32.mrf.mxu3  ;;  %v17636_v18 = vld [vmem:[%s20977_s27 + $0x25e8] sm:$0xf]  ;;  %v20271_v55 = vld [vmem:[%s20977_s27 + $0x25f4] sm:$0xf0]  ;;  %v17253_v61 = vor.u32 %v20175_v51, %v17252_v43 }
 0x462   : > { %11615 = vmatpush.bf16.msra.mxu2 %v16917_v29  ;;  %v16629_v29 = vor.u32 %v20019_v2, %v16628_v8  ;;  %v17509_v8 = vor.u32 %v20239_v52, %v17508_v20  ;;  %v17236_v2 = vld [vmem:[%s20977_s27 + $0x22c8] sm:$0xf]  ;;  %v20171_v56 = vld [vmem:[%s20977_s27 + $0x22d4] sm:$0xf0] }
 0x463   : > { %11628 = vmatpush.bf16.msra.mxu3 %v17045_v9  ;;  %v16757_v9 = vor.u32 %v20051_v59, %v16756_v62  ;;  %v17364_v57 = vld [vmem:[%s20977_s27 + $0x23c8] sm:$0xf]  ;;  %v20235_v59 = vld [vmem:[%s20977_s27 + $0x24d4] sm:$0xf0]  ;;  %v17237_v22 = vor.u32 %v20171_v56, %v17236_v2 }
 0x464   : > { %11590 = vmatpush.bf16.msra.mxu0 %v16645_v48  ;;  %v17381_v48 = vor.u32 %v20207_v24, %v17380_v6  ;;  %v17492_v62 = vld [vmem:[%s20977_s27 + $0x24c8] sm:$0xf]  ;;  %v20167_v51 = vld [vmem:[%s20977_s27 + $0x22b4] sm:$0xf0] }
 0x465   : > { %11603 = vmatpush.bf16.msra.mxu1 %v16773_v26  ;;  %v17637_v26 = vor.u32 %v20271_v55, %v17636_v18  ;;  %v17620_v42 = vld [vmem:[%s20977_s27 + $0x25c8] sm:$0xf]  ;;  %v17493_v11 = vor.u32 %v20235_v59, %v17492_v62  ;;  %v20199_v24 = vld [vmem:[%s20977_s27 + $0x23b4] sm:$0xf0] }
 0x466   : > { %11616 = vmatpush.bf16.msra.mxu2 %v16901_v54  ;;  %v20203_v54 = vld [vmem:[%s20977_s27 + $0x23d4] sm:$0xf0]  ;;  %v17220_v43 = vld [vmem:[%s20977_s27 + $0x22a8] sm:$0xf] }
 0x467   : > { %11629 = vmatpush.bf16.msra.mxu3 %v17029_v58  ;;  %v20267_v58 = vld [vmem:[%s20977_s27 + $0x25d4] sm:$0xf0]  ;;  %v17365_v10 = vor.u32 %v20203_v54, %v17364_v57  ;;  %v17348_v6 = vld [vmem:[%s20977_s27 + $0x23a8] sm:$0xf]  ;;  %v17221_v55 = vor.u32 %v20167_v51, %v17220_v43 }
 0x468   : > { %11591 = vmatpush.bf16.msra.mxu0 %v16629_v29  ;;  %v17621_v29 = vor.u32 %v20267_v58, %v17620_v42  ;;  %v17476_v20 = vld [vmem:[%s20977_s27 + $0x24a8] sm:$0xf]  ;;  %v20231_v52 = vld [vmem:[%s20977_s27 + $0x24b4] sm:$0xf0]  ;;  %v11385_v62 = vpop.f32.mrf.mxu0 }
 0x469   : > { %11604 = vmatpush.bf16.msra.mxu1 %v16757_v9  ;;  %v17604_v9 = vld [vmem:[%s20977_s27 + $0x25a8] sm:$0xf]  ;;  %v20195_v57 = vld [vmem:[%s20977_s27 + $0x2394] sm:$0xf0]  ;;  %v11386_v58 = vadd.f32 %v11385_v62, %v23445_v0 }
 0x46a   : > { %11617 = vmatpush.bf16.msra.mxu2 %v16885_v63  ;;  %v20263_v63 = vld [vmem:[%s20977_s27 + $0x25b4] sm:$0xf0]  ;;  %v24709_v18 = vld [vmem:[#allocation14_spill] sm:$0xff] }
 0x46b   : > { %11630 = vmatpush.bf16.msra.mxu3 %v17013_v50  ;;  %11592 = vmatmul.bf16.vlgmr.msra.gmra.mxu0 %v21652_v30  ;;  %v17349_v50 = vor.u32 %v20199_v24, %v17348_v6  ;;  %v17332_v2 = vld [vmem:[%s20977_s27 + $0x2388] sm:$0xf]  ;;  %v17605_v56 = vor.u32 %v20263_v63, %v17604_v9  ;;  %v20227_v54 = vld [vmem:[%s20977_s27 + $0x2494] sm:$0xf0] }
 0x46c   : > { %11636 = vmatpush.bf16.msrb.mxu0 %v17253_v61  ;;  %11605 = vmatmul.bf16.vlgmr.msra.gmra.mxu1 %v21658_v44  ;;  %v17477_v61 = vor.u32 %v20231_v52, %v17476_v20  ;;  %v17588_v59 = vld [vmem:[%s20977_s27 + $0x2588] sm:$0xf]  ;;  %v20259_v42 = vld [vmem:[%s20977_s27 + $0x2594] sm:$0xf0] }
 0x46d   : > { %11649 = vmatpush.bf16.msrb.mxu1 %v17381_v48  ;;  %11618 = vmatmul.bf16.vlgmr.msra.gmra.mxu2 %v24694_v1  ;;  %v17204_v48 = vld [vmem:[%s20977_s27 + $0x2288] sm:$0xf]  ;;  %v20159_v6 = vld [vmem:[%s20977_s27 + $0x2274] sm:$0xf0]  ;;  %v17589_v24 = vor.u32 %v20259_v42, %v17588_v59 }
 0x46e   : > { %11662 = vmatpush.bf16.msrb.mxu2 %v17509_v8  ;;  %11631 = vmatmul.bf16.vlgmr.msra.gmra.mxu3 %v24709_v18  ;;  %v20163_v8 = vld [vmem:[%s20977_s27 + $0x2294] sm:$0xf0]  ;;  %v17188_v51 = vld [vmem:[%s20977_s27 + $0x2268] sm:$0xf] }
 0x46f   : > { %11675 = vmatpush.bf16.msrb.mxu3 %v17637_v26  ;;  %v17460_v26 = vld [vmem:[%s20977_s27 + $0x2488] sm:$0xf]  ;;  %v20191_v52 = vld [vmem:[%s20977_s27 + $0x2374] sm:$0xf0] }
 0x470   : > { %11637 = vmatpush.bf16.msrb.mxu0 %v17237_v22  ;;  %v17205_v22 = vor.u32 %v20163_v8, %v17204_v48  ;;  %v17461_v43 = vor.u32 %v20227_v54, %v17460_v26  ;;  %v17444_v9 = vld [vmem:[%s20977_s27 + $0x2468] sm:$0xf]  ;;  %v20223_v0 = vld [vmem:[%s20977_s27 + $0x2474] sm:$0xf0]  ;;  %v11411_v26 = vpop.f32.mrf.mxu2 }
 0x471   : > { %11650 = vmatpush.bf16.msrb.mxu1 %v17365_v10  ;;  %v11398_v10 = vpop.f32.mrf.mxu1  ;;  %v17572_v63 = vld [vmem:[%s20977_s27 + $0x2568] sm:$0xf]  ;;  %v17445_v48 = vor.u32 %v20223_v0, %v17444_v9  ;;  %v20187_v54 = vld [vmem:[%s20977_s27 + $0x2354] sm:$0xf0] }
 0x472   : > { %11663 = vmatpush.bf16.msrb.mxu2 %v17493_v11  ;;  %v17333_v11 = vor.u32 %v20195_v57, %v17332_v2  ;;  %v11399_v20 = vadd.f32 %v11398_v10, %v11386_v58  ;;  %v17172_v8 = vld [vmem:[%s20977_s27 + $0x2248] sm:$0xf]  ;;  %v20155_v2 = vld [vmem:[%s20977_s27 + $0x2254] sm:$0xf0]  ;;  %v11424_v58 = vpop.f32.mrf.mxu3 }
 0x473   : > { %11676 = vmatpush.bf16.msrb.mxu3 %v17621_v29  ;;  %v17316_v29 = vld [vmem:[%s20977_s27 + $0x2368] sm:$0xf]  ;;  %v20219_v59 = vld [vmem:[%s20977_s27 + $0x2454] sm:$0xf0] }
 0x474   : > { %11638 = vmatpush.bf16.msrb.mxu0 %v17221_v55  ;;  %v20255_v55 = vld [vmem:[%s20977_s27 + $0x2574] sm:$0xf0]  ;;  %v17428_v62 = vld [vmem:[%s20977_s27 + $0x2448] sm:$0xf]  ;;  %v11412_v42 = vadd.f32 %v11411_v26, %v11399_v20 }
 0x475   : > { %11651 = vmatpush.bf16.msrb.mxu1 %v17349_v50  ;;  %v17189_v50 = vor.u32 %v20159_v6, %v17188_v51  ;;  %v17573_v57 = vor.u32 %v20255_v55, %v17572_v63  ;;  %v20251_v10 = vld [vmem:[%s20977_s27 + $0x2554] sm:$0xf0]  ;;  %v17156_v20 = vld [vmem:[%s20977_s27 + $0x2228] sm:$0xf] }
 0x476   : > { %11664 = vmatpush.bf16.msrb.mxu2 %v17477_v61  ;;  %v17317_v61 = vor.u32 %v20191_v52, %v17316_v29  ;;  %v23516_v6 = vadd.f32 %v11424_v58, %v11412_v42  ;;  %v20151_v52 = vld [vmem:[%s20977_s27 + $0x2234] sm:$0xf0]  ;;  %v17284_v9 = vld [vmem:[%s20977_s27 + $0x2328] sm:$0xf] }
 0x477   : > { %11677 = vmatpush.bf16.msrb.mxu3 %v17605_v56  ;;  %v17300_v56 = vld [vmem:[%s20977_s27 + $0x2348] sm:$0xf]  ;;  %v20183_v63 = vld [vmem:[%s20977_s27 + $0x2334] sm:$0xf0] }
 0x478   : > { %11639 = vmatpush.bf16.msrb.mxu0 %v17205_v22  ;;  %v17556_v22 = vld [vmem:[%s20977_s27 + $0x2548] sm:$0xf]  ;;  %v17301_v29 = vor.u32 %v20187_v54, %v17300_v56  ;;  %v20147_v56 = vld [vmem:[%s20977_s27 + $0x2214] sm:$0xf0] }
 0x479   : > { %11652 = vmatpush.bf16.msrb.mxu1 %v17333_v11  ;;  %v11387_v11 = vpop.f32.mrf.mxu0  ;;  %v11400_v51 = vpop.f32.mrf.mxu1  ;;  %v17557_v0 = vor.u32 %v20251_v10, %v17556_v22  ;;  %v17412_v55 = vld [vmem:[%s20977_s27 + $0x2428] sm:$0xf]  ;;  %v20211_v58 = vld [vmem:[%s20977_s27 + $0x2414] sm:$0xf0] }
 0x47a   : > { %11665 = vmatpush.bf16.msrb.mxu2 %v17461_v43  ;;  %v17173_v43 = vor.u32 %v20155_v2, %v17172_v8  ;;  %v17157_v8 = vor.u32 %v20151_v52, %v17156_v20  ;;  %v17140_v2 = vld [vmem:[%s20977_s27 + $0x2208] sm:$0xf]  ;;  %v20243_v10 = vld [vmem:[%s20977_s27 + $0x2514] sm:$0xf0]  ;;  %v11413_v11 = vpop.f32.mrf.mxu2 }
 0x47b   : > { %11678 = vmatpush.bf16.msrb.mxu3 %v17589_v24  ;;  %v17429_v24 = vor.u32 %v20219_v59, %v17428_v62  ;;  %v17268_v54 = vld [vmem:[%s20977_s27 + $0x2308] sm:$0xf]  ;;  %v20179_v62 = vld [vmem:[%s20977_s27 + $0x2314] sm:$0xf0]  ;;  %v17141_v20 = vor.u32 %v20147_v56, %v17140_v2 }
 0x47c   : > { %11640 = vmatpush.bf16.msrb.mxu0 %v17189_v50  ;;  %v20215_v50 = vld [vmem:[%s20977_s27 + $0x2434] sm:$0xf0]  ;;  %v17396_v59 = vld [vmem:[%s20977_s27 + $0x2408] sm:$0xf] }
 0x47d   : > { %11653 = vmatpush.bf16.msrb.mxu1 %v17317_v61  ;;  %v17540_v61 = vld [vmem:[%s20977_s27 + $0x2528] sm:$0xf]  ;;  %v17413_v26 = vor.u32 %v20215_v50, %v17412_v55  ;;  %v20303_v51 = vld [vmem:[%s20977_s27 + $0x26f4] sm:$0xf0]  ;;  %v17397_v55 = vor.u32 %v20211_v58, %v17396_v59 }
 0x47e   : > { %11666 = vmatpush.bf16.msrb.mxu2 %v17445_v48  ;;  %v20247_v48 = vld [vmem:[%s20977_s27 + $0x2534] sm:$0xf0]  ;;  %v17524_v22 = vld [vmem:[%s20977_s27 + $0x2508] sm:$0xf] }
 0x47f   : > { %11679 = vmatpush.bf16.msrb.mxu3 %v17573_v57  ;;  %v17285_v57 = vor.u32 %v20183_v63, %v17284_v9  ;;  %v17541_v42 = vor.u32 %v20247_v48, %v17540_v61  ;;  %v20335_v52 = vld [vmem:[%s20977_s27 + $0x27f4] sm:$0xf0]  ;;  %v18020_v9 = vld [vmem:[%s20977_s27 + $0x28e8] sm:$0xf]  ;;  %v17525_v48 = vor.u32 %v20243_v10, %v17524_v22 }
 0x480   : > { %11641 = vmatpush.bf16.msrb.mxu0 %v17173_v43  ;;  %v17764_v43 = vld [vmem:[%s20977_s27 + $0x26e8] sm:$0xf]  ;;  %v20367_v63 = vld [vmem:[%s20977_s27 + $0x28f4] sm:$0xf0] }
 0x481   : > { %11654 = vmatpush.bf16.msrb.mxu1 %v17301_v29  ;;  %v17892_v29 = vld [vmem:[%s20977_s27 + $0x27e8] sm:$0xf]  ;;  %v20399_v61 = vld [vmem:[%s20977_s27 + $0x29f4] sm:$0xf0]  ;;  %v18021_v56 = vor.u32 %v20367_v63, %v18020_v9 }
 0x482   : > { %11667 = vmatpush.bf16.msrb.mxu2 %v17429_v24  ;;  %v11426_v24 = vpop.f32.mrf.mxu3  ;;  %v18148_v50 = vld [vmem:[%s20977_s27 + $0x29e8] sm:$0xf]  ;;  %v17893_v2 = vor.u32 %v20335_v52, %v17892_v29  ;;  %v20327_v9 = vld [vmem:[%s20977_s27 + $0x27b4] sm:$0xf0] }
 0x483   : > { %11680 = vmatpush.bf16.msrb.mxu3 %v17557_v0  ;;  %v17269_v0 = vor.u32 %v20179_v62, %v17268_v54  ;;  %v17748_v11 = vld [vmem:[%s20977_s27 + $0x26c8] sm:$0xf]  ;;  %v20299_v24 = vld [vmem:[%s20977_s27 + $0x26d4] sm:$0xf0] }
 0x484   : > { %11642 = vmatpush.bf16.msrb.mxu0 %v17157_v8  ;;  %v17765_v8 = vor.u32 %v20303_v51, %v17764_v43  ;;  %v17876_v18 = vld [vmem:[%s20977_s27 + $0x27c8] sm:$0xf]  ;;  %v20363_v62 = vld [vmem:[%s20977_s27 + $0x28d4] sm:$0xf0]  ;;  %v17749_v58 = vor.u32 %v20299_v24, %v17748_v11 }
 0x485   : > { %11655 = vmatpush.bf16.msrb.mxu1 %v17285_v57  ;;  %v18149_v57 = vor.u32 %v20399_v61, %v18148_v50  ;;  %v18004_v54 = vld [vmem:[%s20977_s27 + $0x28c8] sm:$0xf]  ;;  %v20295_v51 = vld [vmem:[%s20977_s27 + $0x26b4] sm:$0xf0]  ;;  %v24712_v50 = vld [vmem:[#allocation15_spill] sm:$0xff] }
 0x486   : > { %11668 = vmatpush.bf16.msrb.mxu2 %v17413_v26  ;;  %v20331_v26 = vld [vmem:[%s20977_s27 + $0x27d4] sm:$0xf0]  ;;  %v18132_v59 = vld [vmem:[%s20977_s27 + $0x29c8] sm:$0xf]  ;;  %v18005_v10 = vor.u32 %v20363_v62, %v18004_v54 }
 0x487   : > { %11681 = vmatpush.bf16.msrb.mxu3 %v17541_v42  ;;  %v20395_v42 = vld [vmem:[%s20977_s27 + $0x29d4] sm:$0xf0]  ;;  %v17877_v22 = vor.u32 %v20331_v26, %v17876_v18  ;;  %v17732_v43 = vld [vmem:[%s20977_s27 + $0x26a8] sm:$0xf] }
 0x488   : > { %11643 = vmatpush.bf16.msrb.mxu0 %v17141_v20  ;;  %v17860_v29 = vld [vmem:[%s20977_s27 + $0x27a8] sm:$0xf]  ;;  %v24710_v20 = vld [vmem:[#allocation13_spill] sm:$0xff]  ;;  %v18133_v52 = vor.u32 %v20395_v42, %v18132_v59  ;;  %v20391_v61 = vld [vmem:[%s20977_s27 + $0x29b4] sm:$0xf0]  ;;  %v11437_v42 = vpop.f32.mrf.mxu0 }
 0x489   : > { %11656 = vmatpush.bf16.msrb.mxu1 %v17269_v0  ;;  %v17988_v63 = vld [vmem:[%s20977_s27 + $0x28a8] sm:$0xf]  ;;  %v20359_v0 = vld [vmem:[%s20977_s27 + $0x28b4] sm:$0xf0] }
 0x48a   : > { %11669 = vmatpush.bf16.msrb.mxu2 %v17397_v55  ;;  %v24711_v55 = vld [vmem:[#allocation16_spill] sm:$0xff]  ;;  %v18116_v18 = vld [vmem:[%s20977_s27 + $0x29a8] sm:$0xf] }
 0x48b   : > { %11682 = vmatpush.bf16.msrb.mxu3 %v17525_v48  ;;  %11644 = vmatmul.bf16.vlgmr.msrb.gmra.mxu0 %v24710_v20  ;;  %v24713_v48 = vld [vmem:[#allocation18_spill] sm:$0xff]  ;;  %v20291_v24 = vld [vmem:[%s20977_s27 + $0x2694] sm:$0xf0]  ;;  %v18117_v26 = vor.u32 %v20391_v61, %v18116_v18 }
 0x48c   : > { %11688 = vmatpush.bf16.msra.mxu0 %v17765_v8  ;;  %11657 = vmatmul.bf16.vlgmr.msrb.gmra.mxu1 %v24712_v50  ;;  %v17733_v8 = vor.u32 %v20295_v51, %v17732_v43  ;;  %v17716_v11 = vld [vmem:[%s20977_s27 + $0x2688] sm:$0xf]  ;;  %v20323_v54 = vld [vmem:[%s20977_s27 + $0x2794] sm:$0xf0]  ;;  %v11450_v43 = vpop.f32.mrf.mxu1 }
 0x48d   : > { %11701 = vmatpush.bf16.msra.mxu1 %v17893_v2  ;;  %11670 = vmatmul.bf16.vlgmr.msrb.gmra.mxu2 %v24711_v55  ;;  %v17861_v2 = vor.u32 %v20327_v9, %v17860_v29  ;;  %v17972_v62 = vld [vmem:[%s20977_s27 + $0x2888] sm:$0xf]  ;;  %v20355_v59 = vld [vmem:[%s20977_s27 + $0x2894] sm:$0xf0] }
 0x48e   : > { %11714 = vmatpush.bf16.msra.mxu2 %v18021_v56  ;;  %11683 = vmatmul.bf16.vlgmr.msrb.gmra.mxu3 %v24713_v48  ;;  %v17989_v56 = vor.u32 %v20359_v0, %v17988_v63  ;;  %v18100_v48 = vld [vmem:[%s20977_s27 + $0x2988] sm:$0xf]  ;;  %v17973_v29 = vor.u32 %v20355_v59, %v17972_v62  ;;  %v20287_v9 = vld [vmem:[%s20977_s27 + $0x2674] sm:$0xf0] }
 0x48f   : > { %11727 = vmatpush.bf16.msra.mxu3 %v18149_v57  ;;  %v17844_v57 = vld [vmem:[%s20977_s27 + $0x2788] sm:$0xf]  ;;  %v20319_v61 = vld [vmem:[%s20977_s27 + $0x2774] sm:$0xf0] }
 0x490   : > { %11689 = vmatpush.bf16.msra.mxu0 %v17749_v58  ;;  %v20387_v58 = vld [vmem:[%s20977_s27 + $0x2994] sm:$0xf0]  ;;  %v17845_v51 = vor.u32 %v20323_v54, %v17844_v57  ;;  %v17828_v63 = vld [vmem:[%s20977_s27 + $0x2768] sm:$0xf]  ;;  %v11463_v59 = vpop.f32.mrf.mxu2 }
 0x491   : > { %11702 = vmatpush.bf16.msra.mxu1 %v17877_v22  ;;  %v11438_v22 = vadd.f32 %v11437_v42, %v23516_v6  ;;  %v18101_v0 = vor.u32 %v20387_v58, %v18100_v48  ;;  %v20351_v6 = vld [vmem:[%s20977_s27 + $0x2874] sm:$0xf0]  ;;  %v17812_v48 = vld [vmem:[%s20977_s27 + $0x2748] sm:$0xf] }
 0x492   : > { %11715 = vmatpush.bf16.msra.mxu2 %v18005_v10  ;;  %v17717_v10 = vor.u32 %v20291_v24, %v17716_v11  ;;  %v18084_v11 = vld [vmem:[%s20977_s27 + $0x2968] sm:$0xf]  ;;  %v17829_v24 = vor.u32 %v20319_v61, %v17828_v63  ;;  %v20283_v54 = vld [vmem:[%s20977_s27 + $0x2654] sm:$0xf0] }
 0x493   : > { %11728 = vmatpush.bf16.msra.mxu3 %v18133_v52  ;;  %v17700_v52 = vld [vmem:[%s20977_s27 + $0x2668] sm:$0xf]  ;;  %v11451_v18 = vadd.f32 %v11450_v43, %v11438_v22  ;;  %v20315_v42 = vld [vmem:[%s20977_s27 + $0x2754] sm:$0xf0]  ;;  %v11476_v43 = vpop.f32.mrf.mxu3 }
 0x494   : > { %11690 = vmatpush.bf16.msra.mxu0 %v17733_v8  ;;  %v17956_v8 = vld [vmem:[%s20977_s27 + $0x2868] sm:$0xf]  ;;  %v20347_v22 = vld [vmem:[%s20977_s27 + $0x2854] sm:$0xf0]  ;;  %v11452_v63 = vpop.f32.mrf.mxu1  ;;  %v17813_v61 = vor.u32 %v20315_v42, %v17812_v48 }
 0x495   : > { %11703 = vmatpush.bf16.msra.mxu1 %v17861_v2  ;;  %v20383_v2 = vld [vmem:[%s20977_s27 + $0x2974] sm:$0xf0]  ;;  %v17957_v57 = vor.u32 %v20351_v6, %v17956_v8  ;;  %v17940_v58 = vld [vmem:[%s20977_s27 + $0x2848] sm:$0xf] }
 0x496   : > { %11716 = vmatpush.bf16.msra.mxu2 %v17989_v56  ;;  %v17701_v56 = vor.u32 %v20287_v9, %v17700_v52  ;;  %v18085_v62 = vor.u32 %v20383_v2, %v18084_v11  ;;  %v18068_v52 = vld [vmem:[%s20977_s27 + $0x2948] sm:$0xf]  ;;  %v20279_v6 = vld [vmem:[%s20977_s27 + $0x2634] sm:$0xf0] }
 0x497   : > { %11729 = vmatpush.bf16.msra.mxu3 %v18117_v26  ;;  %v17684_v26 = vld [vmem:[%s20977_s27 + $0x2648] sm:$0xf]  ;;  %v20275_v42 = vld [vmem:[%s20977_s27 + $0x2614] sm:$0xf0] }
 0x498   : > { %11691 = vmatpush.bf16.msra.mxu0 %v17717_v10  ;;  %v11464_v10 = vadd.f32 %v11463_v59, %v11451_v18  ;;  %v17685_v9 = vor.u32 %v20283_v54, %v17684_v26  ;;  %v17941_v18 = vor.u32 %v20347_v22, %v17940_v58  ;;  %v17668_v8 = vld [vmem:[%s20977_s27 + $0x2628] sm:$0xf]  ;;  %v20343_v54 = vld [vmem:[%s20977_s27 + $0x2834] sm:$0xf0]  ;;  %v11465_v63 = vpop.f32.mrf.mxu2 }
 0x499   : > { %11704 = vmatpush.bf16.msra.mxu1 %v17845_v51  ;;  %v20379_v51 = vld [vmem:[%s20977_s27 + $0x2954] sm:$0xf0]  ;;  %v17796_v11 = vld [vmem:[%s20977_s27 + $0x2728] sm:$0xf]  ;;  %v17669_v59 = vor.u32 %v20279_v6, %v17668_v8 }
 0x49a   : > { %11717 = vmatpush.bf16.msra.mxu2 %v17973_v29  ;;  %v11439_v29 = vpop.f32.mrf.mxu0  ;;  %v18069_v2 = vor.u32 %v20379_v51, %v18068_v52  ;;  %v17924_v26 = vld [vmem:[%s20977_s27 + $0x2828] sm:$0xf]  ;;  %v20339_v51 = vld [vmem:[%s20977_s27 + $0x2814] sm:$0xf0] }
 0x49b   : > { %11730 = vmatpush.bf16.msra.mxu3 %v18101_v0  ;;  %v23587_v0 = vadd.f32 %v11476_v43, %v11464_v10  ;;  %v17652_v48 = vld [vmem:[%s20977_s27 + $0x2608] sm:$0xf]  ;;  %v17925_v58 = vor.u32 %v20343_v54, %v17924_v26  ;;  %v20307_v10 = vld [vmem:[%s20977_s27 + $0x2714] sm:$0xf0] }
 0x49c   : > { %11692 = vmatpush.bf16.msra.mxu0 %v17701_v56  ;;  %v20311_v56 = vld [vmem:[%s20977_s27 + $0x2734] sm:$0xf0]  ;;  %v17780_v22 = vld [vmem:[%s20977_s27 + $0x2708] sm:$0xf] }
 0x49d   : > { %11705 = vmatpush.bf16.msra.mxu1 %v17829_v24  ;;  %v18052_v24 = vld [vmem:[%s20977_s27 + $0x2928] sm:$0xf]  ;;  %v20431_v6 = vld [vmem:[%s20977_s27 + $0x2af4] sm:$0xf0] }
 0x49e   : > { %11718 = vmatpush.bf16.msra.mxu2 %v17957_v57  ;;  %v20375_v57 = vld [vmem:[%s20977_s27 + $0x2934] sm:$0xf0]  ;;  %v17908_v43 = vld [vmem:[%s20977_s27 + $0x2808] sm:$0xf] }
 0x49f   : > { %11731 = vmatpush.bf16.msra.mxu3 %v18085_v62  ;;  %v17797_v62 = vor.u32 %v20311_v56, %v17796_v11  ;;  %v18053_v52 = vor.u32 %v20375_v57, %v18052_v24  ;;  %v18036_v29 = vld [vmem:[%s20977_s27 + $0x2908] sm:$0xf]  ;;  %v17653_v11 = vor.u32 %v20275_v42, %v17652_v48  ;;  %v20463_v56 = vld [vmem:[%s20977_s27 + $0x2bf4] sm:$0xf0]  ;;  %v17909_v24 = vor.u32 %v20339_v51, %v17908_v43 }
 0x4a0   : > { %11693 = vmatpush.bf16.msra.mxu0 %v17685_v9  ;;  %v20371_v9 = vld [vmem:[%s20977_s27 + $0x2914] sm:$0xf0]  ;;  %v18276_v8 = vld [vmem:[%s20977_s27 + $0x2ae8] sm:$0xf] }
 0x4a1   : > { %11706 = vmatpush.bf16.msra.mxu1 %v17813_v61  ;;  %v18404_v61 = vld [vmem:[%s20977_s27 + $0x2be8] sm:$0xf]  ;;  %v20495_v54 = vld [vmem:[%s20977_s27 + $0x2cf4] sm:$0xf0] }
 0x4a2   : > { %11719 = vmatpush.bf16.msra.mxu2 %v17941_v18  ;;  %v11478_v18 = vpop.f32.mrf.mxu3  ;;  %v18532_v26 = vld [vmem:[%s20977_s27 + $0x2ce8] sm:$0xf]  ;;  %v20527_v63 = vld [vmem:[%s20977_s27 + $0x2df4] sm:$0xf0]  ;;  %v18405_v48 = vor.u32 %v20463_v56, %v18404_v61 }
 0x4a3   : > { %11732 = vmatpush.bf16.msra.mxu3 %v18069_v2  ;;  %v17781_v2 = vor.u32 %v20307_v10, %v17780_v22  ;;  %v18660_v57 = vld [vmem:[%s20977_s27 + $0x2de8] sm:$0xf]  ;;  %v18277_v18 = vor.u32 %v20431_v6, %v18276_v8  ;;  %v18533_v42 = vor.u32 %v20495_v54, %v18532_v26  ;;  %v20427_v20 = vld [vmem:[%s20977_s27 + $0x2ad4] sm:$0xf0] }
 0x4a4   : > { %11694 = vmatpush.bf16.msra.mxu0 %v17669_v59  ;;  %v18037_v59 = vor.u32 %v20371_v9, %v18036_v29  ;;  %v18260_v55 = vld [vmem:[%s20977_s27 + $0x2ac8] sm:$0xf]  ;;  %v20491_v10 = vld [vmem:[%s20977_s27 + $0x2cd4] sm:$0xf0] }
 0x4a5   : > { %11707 = vmatpush.bf16.msra.mxu1 %v17797_v62  ;;  %v18388_v50 = vld [vmem:[%s20977_s27 + $0x2bc8] sm:$0xf]  ;;  %v18661_v62 = vor.u32 %v20527_v63, %v18660_v57  ;;  %v18261_v51 = vor.u32 %v20427_v20, %v18260_v55  ;;  %v20423_v6 = vld [vmem:[%s20977_s27 + $0x2ab4] sm:$0xf0]  ;;  %v24716_v55 = vld [vmem:[#allocation19_spill] sm:$0xff] }
 0x4a6   : > { %11720 = vmatpush.bf16.msra.mxu2 %v17925_v58  ;;  %v20459_v58 = vld [vmem:[%s20977_s27 + $0x2bd4] sm:$0xf0]  ;;  %v18516_v22 = vld [vmem:[%s20977_s27 + $0x2cc8] sm:$0xf] }
 0x4a7   : > { %11733 = vmatpush.bf16.msra.mxu3 %v18053_v52  ;;  %v18644_v43 = vld [vmem:[%s20977_s27 + $0x2dc8] sm:$0xf]  ;;  %v20523_v52 = vld [vmem:[%s20977_s27 + $0x2dd4] sm:$0xf0]  ;;  %v18389_v29 = vor.u32 %v20459_v58, %v18388_v50  ;;  %v18517_v9 = vor.u32 %v20491_v10, %v18516_v22 }
 0x4a8   : > { %11695 = vmatpush.bf16.msra.mxu0 %v17653_v11  ;;  %v18244_v8 = vld [vmem:[%s20977_s27 + $0x2aa8] sm:$0xf]  ;;  %v24714_v11 = vld [vmem:[#allocation17_spill] sm:$0xff]  ;;  %v18645_v56 = vor.u32 %v20523_v52, %v18644_v43  ;;  %v20455_v26 = vld [vmem:[%s20977_s27 + $0x2bb4] sm:$0xf0]  ;;  %v11489_v52 = vpop.f32.mrf.mxu0 }
 0x4a9   : > { %11708 = vmatpush.bf16.msra.mxu1 %v17781_v2  ;;  %v18372_v61 = vld [vmem:[%s20977_s27 + $0x2ba8] sm:$0xf]  ;;  %v20487_v2 = vld [vmem:[%s20977_s27 + $0x2cb4] sm:$0xf0]  ;;  %v18245_v63 = vor.u32 %v20423_v6, %v18244_v8  ;;  %v11502_v8 = vpop.f32.mrf.mxu1 }
 0x4aa   : > { %11721 = vmatpush.bf16.msra.mxu2 %v17909_v24  ;;  %v18500_v54 = vld [vmem:[%s20977_s27 + $0x2ca8] sm:$0xf]  ;;  %v24715_v20 = vld [vmem:[#allocation20_spill] sm:$0xff] }
 0x4ab   : > { %11734 = vmatpush.bf16.msra.mxu3 %v18037_v59  ;;  %11696 = vmatmul.bf16.vlgmr.msra.gmra.mxu0 %v24714_v11  ;;  %v18628_v50 = vld [vmem:[%s20977_s27 + $0x2da8] sm:$0xf]  ;;  %v20519_v24 = vld [vmem:[%s20977_s27 + $0x2db4] sm:$0xf0]  ;;  %v18373_v59 = vor.u32 %v20455_v26, %v18372_v61 }
 0x4ac   : > { %11740 = vmatpush.bf16.msrb.mxu0 %v18277_v18  ;;  %11709 = vmatmul.bf16.vlgmr.msra.gmra.mxu1 %v24716_v55  ;;  %v24717_v57 = vld [vmem:[#allocation22_spill] sm:$0xff]  ;;  %v18501_v18 = vor.u32 %v20487_v2, %v18500_v54  ;;  %v18629_v58 = vor.u32 %v20519_v24, %v18628_v50  ;;  %v20451_v22 = vld [vmem:[%s20977_s27 + $0x2b94] sm:$0xf0] }
 0x4ad   : > { %11753 = vmatpush.bf16.msrb.mxu1 %v18405_v48  ;;  %11722 = vmatmul.bf16.vlgmr.msra.gmra.mxu2 %v24715_v20  ;;  %v18228_v48 = vld [vmem:[%s20977_s27 + $0x2a88] sm:$0xf]  ;;  %v20483_v43 = vld [vmem:[%s20977_s27 + $0x2c94] sm:$0xf0] }
 0x4ae   : > { %11766 = vmatpush.bf16.msrb.mxu2 %v18533_v42  ;;  %11735 = vmatmul.bf16.vlgmr.msra.gmra.mxu3 %v24717_v57  ;;  %v20419_v42 = vld [vmem:[%s20977_s27 + $0x2a94] sm:$0xf0]  ;;  %v18484_v10 = vld [vmem:[%s20977_s27 + $0x2c88] sm:$0xf] }
 0x4af   : > { %11779 = vmatpush.bf16.msrb.mxu3 %v18661_v62  ;;  %v18356_v62 = vld [vmem:[%s20977_s27 + $0x2b88] sm:$0xf]  ;;  %v18485_v61 = vor.u32 %v20483_v43, %v18484_v10  ;;  %v20415_v26 = vld [vmem:[%s20977_s27 + $0x2a74] sm:$0xf0] }
 0x4b0   : > { %11741 = vmatpush.bf16.msrb.mxu0 %v18261_v51  ;;  %v18612_v57 = vld [vmem:[%s20977_s27 + $0x2d88] sm:$0xf]  ;;  %v20515_v51 = vld [vmem:[%s20977_s27 + $0x2d94] sm:$0xf0]  ;;  %v18357_v6 = vor.u32 %v20451_v22, %v18356_v62  ;;  %v11515_v43 = vpop.f32.mrf.mxu2 }
 0x4b1   : > { %11754 = vmatpush.bf16.msrb.mxu1 %v18389_v29  ;;  %v11490_v29 = vadd.f32 %v11489_v52, %v23587_v0  ;;  %v18340_v54 = vld [vmem:[%s20977_s27 + $0x2b68] sm:$0xf]  ;;  %v18613_v2 = vor.u32 %v20515_v51, %v18612_v57  ;;  %v20447_v24 = vld [vmem:[%s20977_s27 + $0x2b74] sm:$0xf0] }
 0x4b2   : > { %11767 = vmatpush.bf16.msrb.mxu2 %v18517_v9  ;;  %v18229_v9 = vor.u32 %v20419_v42, %v18228_v48  ;;  %v20479_v0 = vld [vmem:[%s20977_s27 + $0x2c74] sm:$0xf0]  ;;  %v18596_v48 = vld [vmem:[%s20977_s27 + $0x2d68] sm:$0xf]  ;;  %v18341_v42 = vor.u32 %v20447_v24, %v18340_v54  ;;  %v11504_v54 = vpop.f32.mrf.mxu1 }
 0x4b3   : > { %11780 = vmatpush.bf16.msrb.mxu3 %v18645_v56  ;;  %v18212_v56 = vld [vmem:[%s20977_s27 + $0x2a68] sm:$0xf]  ;;  %v11503_v50 = vadd.f32 %v11502_v8, %v11490_v29  ;;  %v20411_v22 = vld [vmem:[%s20977_s27 + $0x2a54] sm:$0xf0]  ;;  %v11528_v8 = vpop.f32.mrf.mxu3 }
 0x4b4   : > { %11742 = vmatpush.bf16.msrb.mxu0 %v18245_v63  ;;  %v18468_v63 = vld [vmem:[%s20977_s27 + $0x2c68] sm:$0xf]  ;;  %v20443_v52 = vld [vmem:[%s20977_s27 + $0x2b54] sm:$0xf0] }
 0x4b5   : > { %11755 = vmatpush.bf16.msrb.mxu1 %v18373_v59  ;;  %v20511_v59 = vld [vmem:[%s20977_s27 + $0x2d74] sm:$0xf0]  ;;  %v18469_v62 = vor.u32 %v20479_v0, %v18468_v63  ;;  %v18324_v57 = vld [vmem:[%s20977_s27 + $0x2b48] sm:$0xf] }
 0x4b6   : > { %11768 = vmatpush.bf16.msrb.mxu2 %v18501_v18  ;;  %v18213_v18 = vor.u32 %v20415_v26, %v18212_v56  ;;  %v18597_v10 = vor.u32 %v20511_v59, %v18596_v48  ;;  %v18452_v51 = vld [vmem:[%s20977_s27 + $0x2c48] sm:$0xf]  ;;  %v20475_v29 = vld [vmem:[%s20977_s27 + $0x2c54] sm:$0xf0]  ;;  %v18325_v24 = vor.u32 %v20443_v52, %v18324_v57 }
 0x4b7   : > { %11781 = vmatpush.bf16.msrb.mxu3 %v18629_v58  ;;  %v18196_v58 = vld [vmem:[%s20977_s27 + $0x2a48] sm:$0xf]  ;;  %v20407_v0 = vld [vmem:[%s20977_s27 + $0x2a34] sm:$0xf0] }
 0x4b8   : > { %11743 = vmatpush.bf16.msrb.mxu0 %v18229_v9  ;;  %v11516_v9 = vadd.f32 %v11515_v43, %v11503_v50  ;;  %v18580_v56 = vld [vmem:[%s20977_s27 + $0x2d48] sm:$0xf]  ;;  %v18197_v26 = vor.u32 %v20411_v22, %v18196_v58  ;;  %v18453_v50 = vor.u32 %v20475_v29, %v18452_v51  ;;  %v20471_v22 = vld [vmem:[%s20977_s27 + $0x2c34] sm:$0xf0]  ;;  %v11517_v54 = vpop.f32.mrf.mxu2 }
 0x4b9   : > { %11756 = vmatpush.bf16.msrb.mxu1 %v18357_v6  ;;  %v20507_v6 = vld [vmem:[%s20977_s27 + $0x2d54] sm:$0xf0]  ;;  %v18180_v63 = vld [vmem:[%s20977_s27 + $0x2a28] sm:$0xf]  ;;  %v12902_v54 = vld [vmem:[%s20977_s27 + $0xf8] sm:$0xf0] }
 0x4ba   : > { %11769 = vmatpush.bf16.msrb.mxu2 %v18485_v61  ;;  %v11491_v61 = vpop.f32.mrf.mxu0  ;;  %v18308_v48 = vld [vmem:[%s20977_s27 + $0x2b28] sm:$0xf]  ;;  %v18581_v59 = vor.u32 %v20507_v6, %v18580_v56  ;;  %v18181_v43 = vor.u32 %v20407_v0, %v18180_v63  ;;  %v20403_v52 = vld [vmem:[%s20977_s27 + $0x2a14] sm:$0xf0] }
 0x4bb   : > { %11782 = vmatpush.bf16.msrb.mxu3 %v18613_v2  ;;  %v23658_v2 = vadd.f32 %v11528_v8, %v11516_v9  ;;  %v18436_v58 = vld [vmem:[%s20977_s27 + $0x2c28] sm:$0xf]  ;;  %v20435_v9 = vld [vmem:[%s20977_s27 + $0x2b14] sm:$0xf0] }
 0x4bc   : > { %11744 = vmatpush.bf16.msrb.mxu0 %v18213_v18  ;;  %v20439_v18 = vld [vmem:[%s20977_s27 + $0x2b34] sm:$0xf0]  ;;  %v18164_v57 = vld [vmem:[%s20977_s27 + $0x2a08] sm:$0xf]  ;;  %v18437_v51 = vor.u32 %v20471_v22, %v18436_v58 }
 0x4bd   : > { %11757 = vmatpush.bf16.msrb.mxu1 %v18341_v42  ;;  %v18564_v42 = vld [vmem:[%s20977_s27 + $0x2d28] sm:$0xf]  ;;  %v20467_v6 = vld [vmem:[%s20977_s27 + $0x2c14] sm:$0xf0] }
 0x4be   : > { %11770 = vmatpush.bf16.msrb.mxu2 %v18469_v62  ;;  %v20503_v62 = vld [vmem:[%s20977_s27 + $0x2d34] sm:$0xf0]  ;;  %v18292_v29 = vld [vmem:[%s20977_s27 + $0x2b08] sm:$0xf] }
 0x4bf   : > { %11783 = vmatpush.bf16.msrb.mxu3 %v18597_v10  ;;  %v18309_v10 = vor.u32 %v20439_v18, %v18308_v48  ;;  %v18420_v8 = vld [vmem:[%s20977_s27 + $0x2c08] sm:$0xf]  ;;  %v18565_v56 = vor.u32 %v20503_v62, %v18564_v42  ;;  %v20559_v0 = vld [vmem:[%s20977_s27 + $0x2ef4] sm:$0xf0]  ;;  %v18165_v48 = vor.u32 %v20403_v52, %v18164_v57  ;;  %v19085_v62 = vld [vmem:[%s20977_s27 + $0xec] sm:$0xf] }
 0x4c0   : > { %11745 = vmatpush.bf16.msrb.mxu0 %v18197_v26  ;;  %v18548_v61 = vld [vmem:[%s20977_s27 + $0x2d08] sm:$0xf]  ;;  %v20499_v26 = vld [vmem:[%s20977_s27 + $0x2d14] sm:$0xf0]  ;;  %v18421_v42 = vor.u32 %v20467_v6, %v18420_v8  ;;  %v19081_v8 = vld [vmem:[%s20977_s27 + $0xcc] sm:$0xf] }
 0x4c1   : > { %11758 = vmatpush.bf16.msrb.mxu1 %v18325_v24  ;;  %v18788_v63 = vld [vmem:[%s20977_s27 + $0x2ee8] sm:$0xf]  ;;  %v20591_v18 = vld [vmem:[%s20977_s27 + $0x2ff4] sm:$0xf0] }
 0x4c2   : > { %11771 = vmatpush.bf16.msrb.mxu2 %v18453_v50  ;;  %v18916_v24 = vld [vmem:[%s20977_s27 + $0x2fe8] sm:$0xf]  ;;  %v11530_v50 = vpop.f32.mrf.mxu3  ;;  %v20623_v22 = vld [vmem:[%s20977_s27 + $0x30f4] sm:$0xf0] }
 0x4c3   : > { %11784 = vmatpush.bf16.msrb.mxu3 %v18581_v59  ;;  %v19044_v58 = vld [vmem:[%s20977_s27 + $0x30e8] sm:$0xf]  ;;  %v18293_v59 = vor.u32 %v20435_v9, %v18292_v29  ;;  %v18789_v50 = vor.u32 %v20559_v0, %v18788_v63  ;;  %v18917_v57 = vor.u32 %v20591_v18, %v18916_v24  ;;  %v20555_v11 = vld [vmem:[%s20977_s27 + $0x2ed4] sm:$0xf0] }
 0x4c4   : > { %11746 = vmatpush.bf16.msrb.mxu0 %v18181_v43  ;;  %v18549_v43 = vor.u32 %v20499_v26, %v18548_v61  ;;  %v19045_v52 = vor.u32 %v20623_v22, %v19044_v58  ;;  %v18772_v20 = vld [vmem:[%s20977_s27 + $0x2ec8] sm:$0xf]  ;;  %v20619_v9 = vld [vmem:[%s20977_s27 + $0x30d4] sm:$0xf0] }
 0x4c5   : > { %11759 = vmatpush.bf16.msrb.mxu1 %v18309_v10  ;;  %v18900_v55 = vld [vmem:[%s20977_s27 + $0x2fc8] sm:$0xf]  ;;  %v12905_v10 = vor.u32 %v19085_v62, %v12902_v54  ;;  %v18773_v6 = vor.u32 %v20555_v11, %v18772_v20  ;;  %v20551_v0 = vld [vmem:[%s20977_s27 + $0x2eb4] sm:$0xf0]  ;;  %v19077_v11 = vld [vmem:[%s20977_s27 + $0xac] sm:$0xf] }
 0x4c6   : > { %11772 = vmatpush.bf16.msrb.mxu2 %v18437_v51  ;;  %v20587_v51 = vld [vmem:[%s20977_s27 + $0x2fd4] sm:$0xf0]  ;;  %v19028_v29 = vld [vmem:[%s20977_s27 + $0x30c8] sm:$0xf]  ;;  %v12870_v20 = vld [vmem:[%s20977_s27 + $0xb8] sm:$0xf0] }
 0x4c7   : > { %11785 = vmatpush.bf16.msrb.mxu3 %v18565_v56  ;;  %v12886_v56 = vld [vmem:[%s20977_s27 + $0xd8] sm:$0xf0]  ;;  %v18901_v61 = vor.u32 %v20587_v51, %v18900_v55  ;;  %v19029_v26 = vor.u32 %v20619_v9, %v19028_v29  ;;  %v18756_v63 = vld [vmem:[%s20977_s27 + $0x2ea8] sm:$0xf]  ;;  %v20583_v58 = vld [vmem:[%s20977_s27 + $0x2fb4] sm:$0xf0] }
 0x4c8   : > { %11747 = vmatpush.bf16.msrb.mxu0 %v18165_v48  ;;  %v18884_v24 = vld [vmem:[%s20977_s27 + $0x2fa8] sm:$0xf]  ;;  %v24718_v48 = vld [vmem:[#allocation21_spill] sm:$0xff]  ;;  %v12889_v18 = vor.u32 %v19081_v8, %v12886_v56  ;;  %v20611_v29 = vld [vmem:[%s20977_s27 + $0x3094] sm:$0xf0]  ;;  %v11541_v9 = vpop.f32.mrf.mxu0 }
 0x4c9   : > { %11760 = vmatpush.bf16.msrb.mxu1 %v18293_v59  ;;  %v19012_v22 = vld [vmem:[%s20977_s27 + $0x30a8] sm:$0xf]  ;;  %v20615_v59 = vld [vmem:[%s20977_s27 + $0x30b4] sm:$0xf0]  ;;  %v18885_v62 = vor.u32 %v20583_v58, %v18884_v24  ;;  %v19073_v8 = vld [vmem:[%s20977_s27 + $0x8c] sm:$0xf] }
 0x4ca   : > { %11773 = vmatpush.bf16.msrb.mxu2 %v18421_v42  ;;  %v24719_v55 = vld [vmem:[#allocation26_spill] sm:$0xff]  ;;  %v18757_v42 = vor.u32 %v20551_v0, %v18756_v63  ;;  %v19013_v54 = vor.u32 %v20615_v59, %v19012_v22  ;;  %v12854_v56 = vld [vmem:[%s20977_s27 + $0x98] sm:$0xf0] }
 0x4cb   : > { %11786 = vmatpush.bf16.msrb.mxu3 %v18549_v43  ;;  %11748 = vmatmul.bf16.vlgmr.msrb.gmra.mxu0 %v24718_v48  ;;  %v18740_v43 = vld [vmem:[%s20977_s27 + $0x2e88] sm:$0xf]  ;;  %v12857_v22 = vor.u32 %v19073_v8, %v12854_v56  ;;  %v20603_v56 = vld [vmem:[%s20977_s27 + $0x3054] sm:$0xf0] }
 0x4cc   : > { %11792 = vmatpush.bf16.msra.mxu0 %v18789_v50  ;;  %11761 = vmatmul.bf16.vlgmr.msrb.gmra.mxu1 %v24704_v25  ;;  %v20547_v50 = vld [vmem:[%s20977_s27 + $0x2e94] sm:$0xf0]  ;;  %v18996_v51 = vld [vmem:[%s20977_s27 + $0x3088] sm:$0xf] }
 0x4cd   : > { %11805 = vmatpush.bf16.msra.mxu1 %v18917_v57  ;;  %11774 = vmatmul.bf16.vlgmr.msrb.gmra.mxu2 %v21967_v13  ;;  %v18868_v57 = vld [vmem:[%s20977_s27 + $0x2f88] sm:$0xf]  ;;  %v18997_v0 = vor.u32 %v20611_v29, %v18996_v51  ;;  %v19145_v13 = vld [vmem:[%s20977_s27 + $0x2cc] sm:$0xf] }
 0x4ce   : > { %11818 = vmatpush.bf16.msra.mxu2 %v19045_v52  ;;  %11787 = vmatmul.bf16.vlgmr.msrb.gmra.mxu3 %v24719_v55  ;;  %v12873_v52 = vor.u32 %v19077_v11, %v12870_v20  ;;  %v18724_v24 = vld [vmem:[%s20977_s27 + $0x2e68] sm:$0xf]  ;;  %v20575_v11 = vld [vmem:[%s20977_s27 + $0x2f74] sm:$0xf0]  ;;  %v13014_v55 = vld [vmem:[%s20977_s27 + $0x1d8] sm:$0xf0] }
 0x4cf   : > { %11831 = vmatpush.bf16.msra.mxu3 %v12905_v10  ;;  %v20579_v10 = vld [vmem:[%s20977_s27 + $0x2f94] sm:$0xf0]  ;;  %v18852_v58 = vld [vmem:[%s20977_s27 + $0x2f68] sm:$0xf] }
 0x4d0   : > { %11793 = vmatpush.bf16.msra.mxu0 %v18773_v6  ;;  %v11542_v6 = vadd.f32 %v11541_v9, %v23658_v2  ;;  %v18869_v63 = vor.u32 %v20579_v10, %v18868_v57  ;;  %v18980_v20 = vld [vmem:[%s20977_s27 + $0x3068] sm:$0xf]  ;;  %v20607_v2 = vld [vmem:[%s20977_s27 + $0x3074] sm:$0xf0]  ;;  %v11567_v29 = vpop.f32.mrf.mxu2 }
 0x4d1   : > { %11806 = vmatpush.bf16.msra.mxu1 %v18901_v61  ;;  %v18741_v61 = vor.u32 %v20547_v50, %v18740_v43  ;;  %v18853_v43 = vor.u32 %v20575_v11, %v18852_v58  ;;  %v18981_v50 = vor.u32 %v20607_v2, %v18980_v20  ;;  %v18708_v57 = vld [vmem:[%s20977_s27 + $0x2e48] sm:$0xf]  ;;  %v20571_v9 = vld [vmem:[%s20977_s27 + $0x2f54] sm:$0xf0] }
 0x4d2   : > { %11819 = vmatpush.bf16.msra.mxu2 %v19029_v26  ;;  %v11554_v26 = vpop.f32.mrf.mxu1  ;;  %v18836_v10 = vld [vmem:[%s20977_s27 + $0x2f48] sm:$0xf]  ;;  %v20535_v20 = vld [vmem:[%s20977_s27 + $0x2e34] sm:$0xf0] }
 0x4d3   : > { %11832 = vmatpush.bf16.msra.mxu3 %v12889_v18  ;;  %v20543_v18 = vld [vmem:[%s20977_s27 + $0x2e74] sm:$0xf0]  ;;  %v11555_v59 = vadd.f32 %v11554_v26, %v11542_v6  ;;  %v18964_v8 = vld [vmem:[%s20977_s27 + $0x3048] sm:$0xf]  ;;  %v19065_v26 = vld [vmem:[%s20977_s27 + $0x4c] sm:$0xf] }
 0x4d4   : > { %11794 = vmatpush.bf16.msra.mxu0 %v18757_v42  ;;  %v19069_v42 = vld [vmem:[%s20977_s27 + $0x6c] sm:$0xf]  ;;  %v18692_v11 = vld [vmem:[%s20977_s27 + $0x2e28] sm:$0xf] }
 0x4d5   : > { %11807 = vmatpush.bf16.msra.mxu1 %v18885_v62  ;;  %v12838_v62 = vld [vmem:[%s20977_s27 + $0x78] sm:$0xf0]  ;;  %v11568_v6 = vadd.f32 %v11567_v29, %v11555_v59  ;;  %v18965_v59 = vor.u32 %v20603_v56, %v18964_v8  ;;  %v18820_v2 = vld [vmem:[%s20977_s27 + $0x2f28] sm:$0xf]  ;;  %v20531_v29 = vld [vmem:[%s20977_s27 + $0x2e14] sm:$0xf0] }
 0x4d6   : > { %11820 = vmatpush.bf16.msra.mxu2 %v19013_v54  ;;  %v18725_v54 = vor.u32 %v20543_v18, %v18724_v24  ;;  %v12841_v51 = vor.u32 %v19069_v42, %v12838_v62  ;;  %v20567_v62 = vld [vmem:[%s20977_s27 + $0x2f34] sm:$0xf0]  ;;  %v18804_v8 = vld [vmem:[%s20977_s27 + $0x2f08] sm:$0xf] }
 0x4d7   : > { %11833 = vmatpush.bf16.msra.mxu3 %v12873_v52  ;;  %v20539_v52 = vld [vmem:[%s20977_s27 + $0x2e54] sm:$0xf0] }
 0x4d8   : > { %11795 = vmatpush.bf16.msra.mxu0 %v18741_v61  ;;  %v11580_v61 = vpop.f32.mrf.mxu3  ;;  %v18709_v24 = vor.u32 %v20539_v52, %v18708_v57  ;;  %v20599_v57 = vld [vmem:[%s20977_s27 + $0x3034] sm:$0xf0]  ;;  %v18693_v52 = vor.u32 %v20535_v20, %v18692_v11  ;;  %v13030_v11 = vld [vmem:[%s20977_s27 + $0x1f8] sm:$0xf0] }
 0x4d9   : > { %11808 = vmatpush.bf16.msra.mxu1 %v18869_v63  ;;  %v12822_v63 = vld [vmem:[%s20977_s27 + $0x58] sm:$0xf0]  ;;  %v23729_v58 = vadd.f32 %v11580_v61, %v11568_v6  ;;  %v20563_v56 = vld [vmem:[%s20977_s27 + $0x2f14] sm:$0xf0]  ;;  %v18932_v6 = vld [vmem:[%s20977_s27 + $0x3008] sm:$0xf] }
 0x4da   : > { %11821 = vmatpush.bf16.msra.mxu2 %v18997_v0  ;;  %v11543_v0 = vpop.f32.mrf.mxu0  ;;  %v11556_v18 = vpop.f32.mrf.mxu1  ;;  %v12825_v42 = vor.u32 %v19065_v26, %v12822_v63  ;;  %v20595_v26 = vld [vmem:[%s20977_s27 + $0x3014] sm:$0xf0]  ;;  %v19057_v63 = vld [vmem:[%s20977_s27 + $0xc] sm:$0xf] }
 0x4db   : > { %11834 = vmatpush.bf16.msra.mxu3 %v12857_v22  ;;  %v18837_v22 = vor.u32 %v20571_v9, %v18836_v10  ;;  %v18676_v10 = vld [vmem:[%s20977_s27 + $0x2e08] sm:$0xf]  ;;  %v12790_v0 = vld [vmem:[%s20977_s27 + $0x18] sm:$0xf0]  ;;  %v19117_v18 = vld [vmem:[%s20977_s27 + $0x1ec] sm:$0xf] }
 0x4dc   : > { %11796 = vmatpush.bf16.msra.mxu0 %v18725_v54  ;;  %v18948_v54 = vld [vmem:[%s20977_s27 + $0x3028] sm:$0xf]  ;;  %v18677_v20 = vor.u32 %v20531_v29, %v18676_v10 }
 0x4dd   : > { %11809 = vmatpush.bf16.msra.mxu1 %v18853_v43  ;;  %v19061_v43 = vld [vmem:[%s20977_s27 + $0x2c] sm:$0xf]  ;;  %v18949_v9 = vor.u32 %v20599_v57, %v18948_v54  ;;  %v13286_v54 = vld [vmem:[%s20977_s27 + $0x3f8] sm:$0xf0]  ;;  %v18933_v57 = vor.u32 %v20595_v26, %v18932_v6 }
 0x4de   : > { %11822 = vmatpush.bf16.msra.mxu2 %v18981_v50  ;;  %v12806_v50 = vld [vmem:[%s20977_s27 + $0x38] sm:$0xf0]  ;;  %v19209_v6 = vld [vmem:[%s20977_s27 + $0x4cc] sm:$0xf] }
 0x4df   : > { %11835 = vmatpush.bf16.msra.mxu3 %v12841_v51  ;;  %v18821_v51 = vor.u32 %v20567_v62, %v18820_v2  ;;  %v12809_v61 = vor.u32 %v19061_v43, %v12806_v50  ;;  %v13158_v2 = vld [vmem:[%s20977_s27 + $0x2f8] sm:$0xf0]  ;;  %v19181_v62 = vld [vmem:[%s20977_s27 + $0x3ec] sm:$0xf] }
 0x4e0   : > { %11797 = vmatpush.bf16.msra.mxu0 %v18709_v24  ;;  %v11569_v24 = vpop.f32.mrf.mxu2  ;;  %v19213_v43 = vld [vmem:[%s20977_s27 + $0x4ec] sm:$0xf]  ;;  %v13414_v50 = vld [vmem:[%s20977_s27 + $0x4f8] sm:$0xf0]  ;;  %v13289_v29 = vor.u32 %v19181_v62, %v13286_v54 }
 0x4e1   : > { %11810 = vmatpush.bf16.msra.mxu1 %v18837_v22  ;;  %v19149_v22 = vld [vmem:[%s20977_s27 + $0x2ec] sm:$0xf]  ;;  %v13033_v24 = vor.u32 %v19117_v18, %v13030_v11  ;;  %v12998_v11 = vld [vmem:[%s20977_s27 + $0x1b8] sm:$0xf0] }
 0x4e2   : > { %11823 = vmatpush.bf16.msra.mxu2 %v18965_v59  ;;  %v11582_v59 = vpop.f32.mrf.mxu3  ;;  %v13161_v10 = vor.u32 %v19149_v22, %v13158_v2  ;;  %v19109_v18 = vld [vmem:[%s20977_s27 + $0x1ac] sm:$0xf]  ;;  %v13126_v62 = vld [vmem:[%s20977_s27 + $0x2b8] sm:$0xf0] }
 0x4e3   : > { %11836 = vmatpush.bf16.msra.mxu3 %v12825_v42  ;;  %v18805_v42 = vor.u32 %v20563_v56, %v18804_v8  ;;  %v19113_v59 = vld [vmem:[%s20977_s27 + $0x1cc] sm:$0xf]  ;;  %v13270_v56 = vld [vmem:[%s20977_s27 + $0x3d8] sm:$0xf0] }
 0x4e4   : > { %11798 = vmatpush.bf16.msra.mxu0 %v18693_v52  ;;  %v12793_v52 = vor.u32 %v19057_v63, %v12790_v0  ;;  %v19177_v8 = vld [vmem:[%s20977_s27 + $0x3cc] sm:$0xf]  ;;  %v13017_v26 = vor.u32 %v19113_v59, %v13014_v55  ;;  %v13382_v55 = vld [vmem:[%s20977_s27 + $0x4b8] sm:$0xf0] }
 0x4e5   : > { %11811 = vmatpush.bf16.msra.mxu1 %v18821_v51  ;;  %v13417_v51 = vor.u32 %v19213_v43, %v13414_v50  ;;  %v13273_v0 = vor.u32 %v19177_v8, %v13270_v56  ;;  %v19141_v22 = vld [vmem:[%s20977_s27 + $0x2ac] sm:$0xf]  ;;  %v13110_v59 = vld [vmem:[%s20977_s27 + $0x298] sm:$0xf0] }
 0x4e6   : > { %11824 = vmatpush.bf16.msra.mxu2 %v18949_v9  ;;  %v13142_v9 = vld [vmem:[%s20977_s27 + $0x2d8] sm:$0xf0]  ;;  %v19173_v54 = vld [vmem:[%s20977_s27 + $0x3ac] sm:$0xf]  ;;  %v13129_v43 = vor.u32 %v19141_v22, %v13126_v62 }
 0x4e7   : > { %11837 = vmatpush.bf16.msra.mxu3 %v12809_v61  ;;  %v13398_v61 = vld [vmem:[%s20977_s27 + $0x4d8] sm:$0xf0]  ;;  %v13145_v63 = vor.u32 %v19145_v13, %v13142_v9  ;;  %v19205_v13 = vld [vmem:[%s20977_s27 + $0x4ac] sm:$0xf] }
 0x4e8   : > { %11799 = vmatpush.bf16.msra.mxu0 %v18677_v20  ;;  %v24720_v20 = vld [vmem:[#allocation25_spill] sm:$0xff]  ;;  %v13401_v2 = vor.u32 %v19209_v6, %v13398_v61  ;;  %v11593_v8 = vpop.f32.mrf.mxu0  ;;  %v19201_v56 = vld [vmem:[%s20977_s27 + $0x48c] sm:$0xf] }
 0x4e9   : > { %11812 = vmatpush.bf16.msra.mxu1 %v18805_v42  ;;  %v13254_v42 = vld [vmem:[%s20977_s27 + $0x3b8] sm:$0xf0]  ;;  %v19133_v22 = vld [vmem:[%s20977_s27 + $0x26c] sm:$0xf] }
 0x4ea   : > { %11825 = vmatpush.bf16.msra.mxu2 %v18933_v57  ;;  %v13001_v57 = vor.u32 %v19109_v18, %v12998_v11  ;;  %v13257_v50 = vor.u32 %v19173_v54, %v13254_v42  ;;  %v13238_v9 = vld [vmem:[%s20977_s27 + $0x398] sm:$0xf0]  ;;  %v19101_v18 = vld [vmem:[%s20977_s27 + $0x16c] sm:$0xf] }
 0x4eb   : > { %11838 = vmatpush.bf16.msra.mxu3 %v12793_v52  ;;  %11800 = vmatmul.bf16.vlgmr.msra.gmra.mxu0 %v24720_v20  ;;  %v19105_v52 = vld [vmem:[%s20977_s27 + $0x18c] sm:$0xf]  ;;  %v13366_v6 = vld [vmem:[%s20977_s27 + $0x498] sm:$0xf0] }
 0x4ec   : > { %11844 = vmatpush.bf16.msrb.mxu0 %v13033_v24  ;;  %11813 = vmatmul.bf16.vlgmr.msra.gmra.mxu1 %v24706_v4  ;;  %v12982_v24 = vld [vmem:[%s20977_s27 + $0x198] sm:$0xf0]  ;;  %v19165_v42 = vld [vmem:[%s20977_s27 + $0x36c] sm:$0xf] }
 0x4ed   : > { %11857 = vmatpush.bf16.msrb.mxu1 %v13161_v10  ;;  %11826 = vmatmul.bf16.vlgmr.msra.gmra.mxu2 %v22046_v23  ;;  %v19137_v10 = vld [vmem:[%s20977_s27 + $0x28c] sm:$0xf]  ;;  %v12985_v61 = vor.u32 %v19105_v52, %v12982_v24  ;;  %v12966_v11 = vld [vmem:[%s20977_s27 + $0x178] sm:$0xf0] }
 0x4ee   : > { %11870 = vmatpush.bf16.msrb.mxu2 %v13289_v29  ;;  %11839 = vmatmul.bf16.vlgmr.msra.gmra.mxu3 %v21103_v35  ;;  %v13385_v29 = vor.u32 %v19205_v13, %v13382_v55  ;;  %v11594_v35 = vadd.f32 %v11593_v8, %v23729_v58  ;;  %v13094_v54 = vld [vmem:[%s20977_s27 + $0x278] sm:$0xf0]  ;;  %v19197_v13 = vld [vmem:[%s20977_s27 + $0x46c] sm:$0xf] }
 0x4ef   : > { %11883 = vmatpush.bf16.msrb.mxu3 %v13417_v51  ;;  %v19169_v51 = vld [vmem:[%s20977_s27 + $0x38c] sm:$0xf]  ;;  %v13222_v58 = vld [vmem:[%s20977_s27 + $0x378] sm:$0xf0] }
 0x4f0   : > { %11845 = vmatpush.bf16.msrb.mxu0 %v13017_v26  ;;  %v11606_v26 = vpop.f32.mrf.mxu1  ;;  %v13350_v55 = vld [vmem:[%s20977_s27 + $0x478] sm:$0xf0]  ;;  %v19097_v52 = vld [vmem:[%s20977_s27 + $0x14c] sm:$0xf] }
 0x4f1   : > { %11858 = vmatpush.bf16.msrb.mxu1 %v13145_v63  ;;  %v13113_v63 = vor.u32 %v19137_v10, %v13110_v59  ;;  %v11607_v62 = vadd.f32 %v11606_v26, %v11594_v35  ;;  %v12950_v24 = vld [vmem:[%s20977_s27 + $0x158] sm:$0xf0]  ;;  %v19129_v10 = vld [vmem:[%s20977_s27 + $0x24c] sm:$0xf]  ;;  %v11619_v59 = vpop.f32.mrf.mxu2  ;;  %v11595_v26 = vpop.f32.mrf.mxu0 }
 0x4f2   : > { %11871 = vmatpush.bf16.msrb.mxu2 %v13273_v0  ;;  %v13241_v0 = vor.u32 %v19169_v51, %v13238_v9  ;;  %v13078_v51 = vld [vmem:[%s20977_s27 + $0x258] sm:$0xf0]  ;;  %v19161_v9 = vld [vmem:[%s20977_s27 + $0x34c] sm:$0xf] }
 0x4f3   : > { %11884 = vmatpush.bf16.msrb.mxu3 %v13401_v2  ;;  %v13369_v2 = vor.u32 %v19201_v56, %v13366_v6  ;;  %v13206_v8 = vld [vmem:[%s20977_s27 + $0x358] sm:$0xf0]  ;;  %v11620_v56 = vadd.f32 %v11619_v59, %v11607_v62  ;;  %v11632_v6 = vpop.f32.mrf.mxu3  ;;  %v19193_v35 = vld [vmem:[%s20977_s27 + $0x44c] sm:$0xf] }
 0x4f4   : > { %11846 = vmatpush.bf16.msrb.mxu0 %v13001_v57  ;;  %v12969_v57 = vor.u32 %v19101_v18, %v12966_v11  ;;  %v13081_v11 = vor.u32 %v19129_v10, %v13078_v51  ;;  %v12934_v62 = vld [vmem:[%s20977_s27 + $0x138] sm:$0xf0]  ;;  %v19121_v59 = vld [vmem:[%s20977_s27 + $0x20c] sm:$0xf] }
 0x4f5   : > { %11859 = vmatpush.bf16.msrb.mxu1 %v13129_v43  ;;  %v13097_v43 = vor.u32 %v19133_v22, %v13094_v54  ;;  %v23800_v18 = vadd.f32 %v11632_v6, %v11620_v56  ;;  %v13209_v22 = vor.u32 %v19161_v9, %v13206_v8  ;;  %v19125_v54 = vld [vmem:[%s20977_s27 + $0x22c] sm:$0xf]  ;;  %v13046_v51 = vld [vmem:[%s20977_s27 + $0x218] sm:$0xf0] }
 0x4f6   : > { %11872 = vmatpush.bf16.msrb.mxu2 %v13257_v50  ;;  %v13225_v50 = vor.u32 %v19165_v42, %v13222_v58  ;;  %v13062_v58 = vld [vmem:[%s20977_s27 + $0x238] sm:$0xf0]  ;;  %v19153_v9 = vld [vmem:[%s20977_s27 + $0x30c] sm:$0xf] }
 0x4f7   : > { %11885 = vmatpush.bf16.msrb.mxu3 %v13385_v29  ;;  %v13353_v29 = vor.u32 %v19197_v13, %v13350_v55  ;;  %v19157_v13 = vld [vmem:[%s20977_s27 + $0x32c] sm:$0xf]  ;;  %v13190_v55 = vld [vmem:[%s20977_s27 + $0x338] sm:$0xf0]  ;;  %v13065_v10 = vor.u32 %v19125_v54, %v13062_v58 }
 0x4f8   : > { %11847 = vmatpush.bf16.msrb.mxu0 %v12985_v61  ;;  %v13334_v61 = vld [vmem:[%s20977_s27 + $0x458] sm:$0xf0]  ;;  %v19185_v6 = vld [vmem:[%s20977_s27 + $0x40c] sm:$0xf] }
 0x4f9   : > { %11860 = vmatpush.bf16.msrb.mxu1 %v13113_v63  ;;  %v12953_v63 = vor.u32 %v19097_v52, %v12950_v24  ;;  %v13337_v42 = vor.u32 %v19193_v35, %v13334_v61  ;;  %v19089_v52 = vld [vmem:[%s20977_s27 + $0x10c] sm:$0xf]  ;;  %v12918_v24 = vld [vmem:[%s20977_s27 + $0x118] sm:$0xf0]  ;;  %v11621_v61 = vpop.f32.mrf.mxu2 }
 0x4fa   : > { %11873 = vmatpush.bf16.msrb.mxu2 %v13241_v0  ;;  %v11608_v0 = vpop.f32.mrf.mxu1  ;;  %v13174_v56 = vld [vmem:[%s20977_s27 + $0x318] sm:$0xf0]  ;;  %v19245_v26 = vld [vmem:[%s20977_s27 + $0x5ec] sm:$0xf] }
 0x4fb   : > { %11886 = vmatpush.bf16.msrb.mxu3 %v13369_v2  ;;  %v19093_v2 = vld [vmem:[%s20977_s27 + $0x12c] sm:$0xf]  ;;  %v13302_v35 = vld [vmem:[%s20977_s27 + $0x418] sm:$0xf0]  ;;  %v13177_v58 = vor.u32 %v19153_v9, %v13174_v56 }
 0x4fc   : > { %11848 = vmatpush.bf16.msrb.mxu0 %v12969_v57  ;;  %v19189_v57 = vld [vmem:[%s20977_s27 + $0x42c] sm:$0xf]  ;;  %v13798_v54 = vld [vmem:[%s20977_s27 + $0x7f8] sm:$0xf0] }
 0x4fd   : > { %11861 = vmatpush.bf16.msrb.mxu1 %v13097_v43  ;;  %v13318_v43 = vld [vmem:[%s20977_s27 + $0x438] sm:$0xf0]  ;;  %v19277_v0 = vld [vmem:[%s20977_s27 + $0x6ec] sm:$0xf] }
 0x4fe   : > { %11874 = vmatpush.bf16.msrb.mxu2 %v13225_v50  ;;  %v12937_v50 = vor.u32 %v19093_v2, %v12934_v62  ;;  %v13321_v8 = vor.u32 %v19189_v57, %v13318_v43  ;;  %v13670_v2 = vld [vmem:[%s20977_s27 + $0x6f8] sm:$0xf0]  ;;  %v19309_v62 = vld [vmem:[%s20977_s27 + $0x7ec] sm:$0xf]  ;;  %v13305_v57 = vor.u32 %v19185_v6, %v13302_v35 }
 0x4ff   : > { %11887 = vmatpush.bf16.msrb.mxu3 %v13353_v29  ;;  %v13193_v29 = vor.u32 %v19157_v13, %v13190_v55  ;;  %v19341_v13 = vld [vmem:[%s20977_s27 + $0x8ec] sm:$0xf]  ;;  %v13926_v55 = vld [vmem:[%s20977_s27 + $0x8f8] sm:$0xf0] }
 0x500   : > { %11849 = vmatpush.bf16.msrb.mxu0 %v12953_v63  ;;  %v13542_v63 = vld [vmem:[%s20977_s27 + $0x5f8] sm:$0xf0]  ;;  %v19337_v9 = vld [vmem:[%s20977_s27 + $0x8cc] sm:$0xf] }
 0x501   : > { %11862 = vmatpush.bf16.msrb.mxu1 %v13081_v11  ;;  %v11634_v11 = vpop.f32.mrf.mxu3  ;;  %v13545_v43 = vor.u32 %v19245_v26, %v13542_v63  ;;  %v13526_v61 = vld [vmem:[%s20977_s27 + $0x5d8] sm:$0xf0]  ;;  %v19237_v26 = vld [vmem:[%s20977_s27 + $0x5ac] sm:$0xf] }
 0x502   : > { %11875 = vmatpush.bf16.msrb.mxu2 %v13209_v22  ;;  %v12921_v22 = vor.u32 %v19089_v52, %v12918_v24  ;;  %v13801_v52 = vor.u32 %v19309_v62, %v13798_v54  ;;  %v19241_v24 = vld [vmem:[%s20977_s27 + $0x5cc] sm:$0xf]  ;;  %v13510_v63 = vld [vmem:[%s20977_s27 + $0x5b8] sm:$0xf0] }
 0x503   : > { %11888 = vmatpush.bf16.msrb.mxu3 %v13337_v42  ;;  %v13049_v42 = vor.u32 %v19121_v59, %v13046_v51  ;;  %v19273_v11 = vld [vmem:[%s20977_s27 + $0x6cc] sm:$0xf]  ;;  %v13782_v51 = vld [vmem:[%s20977_s27 + $0x7d8] sm:$0xf0]  ;;  %v13529_v56 = vor.u32 %v19241_v24, %v13526_v61 }
 0x504   : > { %11850 = vmatpush.bf16.msrb.mxu0 %v12937_v50  ;;  %v13673_v50 = vor.u32 %v19277_v0, %v13670_v2  ;;  %v19305_v59 = vld [vmem:[%s20977_s27 + $0x7cc] sm:$0xf]  ;;  %v13638_v2 = vld [vmem:[%s20977_s27 + $0x6b8] sm:$0xf0] }
 0x505   : > { %11863 = vmatpush.bf16.msrb.mxu1 %v13065_v10  ;;  %v13929_v10 = vor.u32 %v19341_v13, %v13926_v55  ;;  %v13785_v35 = vor.u32 %v19305_v59, %v13782_v51  ;;  %v19269_v0 = vld [vmem:[%s20977_s27 + $0x6ac] sm:$0xf]  ;;  %v13766_v54 = vld [vmem:[%s20977_s27 + $0x7b8] sm:$0xf0]  ;;  %v13513_v55 = vor.u32 %v19237_v26, %v13510_v63 }
 0x506   : > { %11876 = vmatpush.bf16.msrb.mxu2 %v13193_v29  ;;  %v13654_v29 = vld [vmem:[%s20977_s27 + $0x6d8] sm:$0xf0]  ;;  %v19301_v62 = vld [vmem:[%s20977_s27 + $0x7ac] sm:$0xf] }
 0x507   : > { %11889 = vmatpush.bf16.msrb.mxu3 %v13321_v8  ;;  %v13910_v8 = vld [vmem:[%s20977_s27 + $0x8d8] sm:$0xf0]  ;;  %v13657_v6 = vor.u32 %v19273_v11, %v13654_v29  ;;  %v19297_v61 = vld [vmem:[%s20977_s27 + $0x78c] sm:$0xf] }
 0x508   : > { %11851 = vmatpush.bf16.msrb.mxu0 %v12921_v22  ;;  %v13913_v22 = vor.u32 %v19337_v9, %v13910_v8  ;;  %v13894_v13 = vld [vmem:[%s20977_s27 + $0x8b8] sm:$0xf0]  ;;  %v19329_v29 = vld [vmem:[%s20977_s27 + $0x88c] sm:$0xf] }
 0x509   : > { %11864 = vmatpush.bf16.msrb.mxu1 %v13049_v42  ;;  %v24721_v42 = vld [vmem:[#allocation10_spill] sm:$0xff]  ;;  %v13622_v24 = vld [vmem:[%s20977_s27 + $0x698] sm:$0xf0]  ;;  %v11658_v9 = vpop.f32.mrf.mxu1  ;;  %v19261_v26 = vld [vmem:[%s20977_s27 + $0x66c] sm:$0xf] }
 0x50a   : > { %11877 = vmatpush.bf16.msrb.mxu2 %v13177_v58  ;;  %v19333_v58 = vld [vmem:[%s20977_s27 + $0x8ac] sm:$0xf]  ;;  %v13750_v11 = vld [vmem:[%s20977_s27 + $0x798] sm:$0xf0] }
 0x50b   : > { %11890 = vmatpush.bf16.msrb.mxu3 %v13305_v57  ;;  %11852 = vmatmul.bf16.vlgmr.msrb.gmra.mxu0 %v24721_v42  ;;  %v13769_v57 = vor.u32 %v19301_v62, %v13766_v54  ;;  %v13878_v59 = vld [vmem:[%s20977_s27 + $0x898] sm:$0xf0]  ;;  %v19325_v62 = vld [vmem:[%s20977_s27 + $0x86c] sm:$0xf] }
 0x50c   : > { %11896 = vmatpush.bf16.msra.mxu0 %v13545_v43  ;;  %11865 = vmatmul.bf16.vlgmr.msrb.gmra.mxu1 %v21101_v34  ;;  %v19233_v43 = vld [vmem:[%s20977_s27 + $0x58c] sm:$0xf]  ;;  %v13881_v63 = vor.u32 %v19329_v29, %v13878_v59  ;;  %v13862_v54 = vld [vmem:[%s20977_s27 + $0x878] sm:$0xf0] }
 0x50d   : > { %11909 = vmatpush.bf16.msra.mxu1 %v13673_v50  ;;  %11878 = vmatmul.bf16.vlgmr.msrb.gmra.mxu2 %v21107_v41  ;;  %v13641_v41 = vor.u32 %v19269_v0, %v13638_v2  ;;  %v13494_v50 = vld [vmem:[%s20977_s27 + $0x598] sm:$0xf0]  ;;  %v19293_v2 = vld [vmem:[%s20977_s27 + $0x76c] sm:$0xf] }
 0x50e   : > { %11922 = vmatpush.bf16.msra.mxu2 %v13801_v52  ;;  %11891 = vmatmul.bf16.vlgmr.msrb.gmra.mxu3 %v21156_v46  ;;  %v19265_v52 = vld [vmem:[%s20977_s27 + $0x68c] sm:$0xf]  ;;  %v13897_v46 = vor.u32 %v19333_v58, %v13894_v13  ;;  %v13497_v51 = vor.u32 %v19233_v43, %v13494_v50  ;;  %v13865_v43 = vor.u32 %v19325_v62, %v13862_v54  ;;  %v13846_v29 = vld [vmem:[%s20977_s27 + $0x858] sm:$0xf0] }
 0x50f   : > { %11935 = vmatpush.bf16.msra.mxu3 %v13929_v10  ;;  %v11645_v10 = vpop.f32.mrf.mxu0  ;;  %v13625_v8 = vor.u32 %v19265_v52, %v13622_v24  ;;  %v13590_v52 = vld [vmem:[%s20977_s27 + $0x658] sm:$0xf0] }
 0x510   : > { %11897 = vmatpush.bf16.msra.mxu0 %v13529_v56  ;;  %v11646_v34 = vadd.f32 %v11645_v10, %v23800_v18  ;;  %v13753_v56 = vor.u32 %v19297_v61, %v13750_v11  ;;  %v13734_v18 = vld [vmem:[%s20977_s27 + $0x778] sm:$0xf0]  ;;  %v11671_v50 = vpop.f32.mrf.mxu2  ;;  %v19321_v10 = vld [vmem:[%s20977_s27 + $0x84c] sm:$0xf] }
 0x511   : > { %11910 = vmatpush.bf16.msra.mxu1 %v13657_v6  ;;  %v19229_v6 = vld [vmem:[%s20977_s27 + $0x56c] sm:$0xf]  ;;  %v13737_v13 = vor.u32 %v19293_v2, %v13734_v18  ;;  %v13718_v24 = vld [vmem:[%s20977_s27 + $0x758] sm:$0xf0]  ;;  %v11684_v11 = vpop.f32.mrf.mxu3 }
 0x512   : > { %11923 = vmatpush.bf16.msra.mxu2 %v13785_v35  ;;  %v13478_v35 = vld [vmem:[%s20977_s27 + $0x578] sm:$0xf0]  ;;  %v11659_v0 = vadd.f32 %v11658_v9, %v11646_v34  ;;  %v19317_v18 = vld [vmem:[%s20977_s27 + $0x82c] sm:$0xf] }
 0x513   : > { %11936 = vmatpush.bf16.msra.mxu3 %v13913_v22  ;;  %v13606_v22 = vld [vmem:[%s20977_s27 + $0x678] sm:$0xf0]  ;;  %v13481_v42 = vor.u32 %v19229_v6, %v13478_v35  ;;  %v19221_v6 = vld [vmem:[%s20977_s27 + $0x52c] sm:$0xf] }
 0x514   : > { %11898 = vmatpush.bf16.msra.mxu0 %v13513_v55  ;;  %v13609_v58 = vor.u32 %v19261_v26, %v13606_v22  ;;  %v19225_v55 = vld [vmem:[%s20977_s27 + $0x54c] sm:$0xf]  ;;  %v11672_v61 = vadd.f32 %v11671_v50, %v11659_v0  ;;  %v13446_v35 = vld [vmem:[%s20977_s27 + $0x538] sm:$0xf0] }
 0x515   : > { %11911 = vmatpush.bf16.msra.mxu1 %v13641_v41  ;;  %v13462_v41 = vld [vmem:[%s20977_s27 + $0x558] sm:$0xf0]  ;;  %v19253_v26 = vld [vmem:[%s20977_s27 + $0x62c] sm:$0xf]  ;;  %v13449_v54 = vor.u32 %v19221_v6, %v13446_v35 }
 0x516   : > { %11924 = vmatpush.bf16.msra.mxu2 %v13769_v57  ;;  %v19257_v57 = vld [vmem:[%s20977_s27 + $0x64c] sm:$0xf]  ;;  %v13465_v34 = vor.u32 %v19225_v55, %v13462_v41  ;;  %v23871_v9 = vadd.f32 %v11684_v11, %v11672_v61  ;;  %v13574_v0 = vld [vmem:[%s20977_s27 + $0x638] sm:$0xf0] }
 0x517   : > { %11937 = vmatpush.bf16.msra.mxu3 %v13897_v46  ;;  %v19289_v46 = vld [vmem:[%s20977_s27 + $0x74c] sm:$0xf]  ;;  %v11647_v59 = vpop.f32.mrf.mxu0  ;;  %v13702_v2 = vld [vmem:[%s20977_s27 + $0x738] sm:$0xf0] }
 0x518   : > { %11899 = vmatpush.bf16.msra.mxu0 %v13497_v51  ;;  %v11660_v51 = vpop.f32.mrf.mxu1  ;;  %v19285_v22 = vld [vmem:[%s20977_s27 + $0x72c] sm:$0xf]  ;;  %v13830_v62 = vld [vmem:[%s20977_s27 + $0x838] sm:$0xf0]  ;;  %v11673_v61 = vpop.f32.mrf.mxu2 }
 0x519   : > { %11912 = vmatpush.bf16.msra.mxu1 %v13625_v8  ;;  %v13593_v8 = vor.u32 %v19257_v57, %v13590_v52  ;;  %v13705_v55 = vor.u32 %v19285_v22, %v13702_v2  ;;  %v19249_v41 = vld [vmem:[%s20977_s27 + $0x60c] sm:$0xf]  ;;  %v13558_v57 = vld [vmem:[%s20977_s27 + $0x618] sm:$0xf0]  ;;  %v13833_v50 = vor.u32 %v19317_v18, %v13830_v62  ;;  %v11686_v59 = vpop.f32.mrf.mxu3 }
 0x51a   : > { %11925 = vmatpush.bf16.msra.mxu2 %v13753_v56  ;;  %v13721_v56 = vor.u32 %v19289_v46, %v13718_v24  ;;  %v13686_v52 = vld [vmem:[%s20977_s27 + $0x718] sm:$0xf0]  ;;  %v19313_v46 = vld [vmem:[%s20977_s27 + $0x80c] sm:$0xf]  ;;  %v13561_v6 = vor.u32 %v19249_v41, %v13558_v57 }
 0x51b   : > { %11938 = vmatpush.bf16.msra.mxu3 %v13881_v63  ;;  %v13849_v63 = vor.u32 %v19321_v10, %v13846_v29  ;;  %v13814_v24 = vld [vmem:[%s20977_s27 + $0x818] sm:$0xf0]  ;;  %v19373_v11 = vld [vmem:[%s20977_s27 + $0x9ec] sm:$0xf] }
 0x51c   : > { %11900 = vmatpush.bf16.msra.mxu0 %v13481_v42  ;;  %v19217_v42 = vld [vmem:[%s20977_s27 + $0x50c] sm:$0xf]  ;;  %v14054_v10 = vld [vmem:[%s20977_s27 + $0x9f8] sm:$0xf0] }
 0x51d   : > { %11913 = vmatpush.bf16.msra.mxu1 %v13609_v58  ;;  %v13430_v58 = vld [vmem:[%s20977_s27 + $0x518] sm:$0xf0]  ;;  %v19405_v29 = vld [vmem:[%s20977_s27 + $0xaec] sm:$0xf]  ;;  %v14057_v22 = vor.u32 %v19373_v11, %v14054_v10 }
 0x51e   : > { %11926 = vmatpush.bf16.msra.mxu2 %v13737_v13  ;;  %v13577_v13 = vor.u32 %v19253_v26, %v13574_v0  ;;  %v14182_v51 = vld [vmem:[%s20977_s27 + $0xaf8] sm:$0xf0]  ;;  %v19469_v26 = vld [vmem:[%s20977_s27 + $0xcec] sm:$0xf]  ;;  %v13817_v0 = vor.u32 %v19313_v46, %v13814_v24 }
 0x51f   : > { %11939 = vmatpush.bf16.msra.mxu3 %v13865_v43  ;;  %v19281_v43 = vld [vmem:[%s20977_s27 + $0x70c] sm:$0xf]  ;;  %v14185_v2 = vor.u32 %v19405_v29, %v14182_v51  ;;  %v14294_v41 = vld [vmem:[%s20977_s27 + $0xbd8] sm:$0xf0] }
 0x520   : > { %11901 = vmatpush.bf16.msra.mxu0 %v13465_v34  ;;  %v13433_v34 = vor.u32 %v19217_v42, %v13430_v58  ;;  %v13689_v35 = vor.u32 %v19281_v43, %v13686_v52  ;;  %v19369_v62 = vld [vmem:[%s20977_s27 + $0x9cc] sm:$0xf]  ;;  %v14422_v43 = vld [vmem:[%s20977_s27 + $0xcd8] sm:$0xf0] }
 0x521   : > { %11914 = vmatpush.bf16.msra.mxu1 %v13593_v8  ;;  %v19437_v8 = vld [vmem:[%s20977_s27 + $0xbec] sm:$0xf]  ;;  %v14022_v61 = vld [vmem:[%s20977_s27 + $0x9b8] sm:$0xf0] }
 0x522   : > { %11927 = vmatpush.bf16.msra.mxu2 %v13721_v56  ;;  %v14310_v56 = vld [vmem:[%s20977_s27 + $0xbf8] sm:$0xf0]  ;;  %v19401_v42 = vld [vmem:[%s20977_s27 + $0xacc] sm:$0xf] }
 0x523   : > { %11940 = vmatpush.bf16.msra.mxu3 %v13849_v63  ;;  %v14438_v63 = vld [vmem:[%s20977_s27 + $0xcf8] sm:$0xf0]  ;;  %v14313_v18 = vor.u32 %v19437_v8, %v14310_v56  ;;  %v19465_v57 = vld [vmem:[%s20977_s27 + $0xccc] sm:$0xf] }
 0x524   : > { %11902 = vmatpush.bf16.msra.mxu0 %v13449_v54  ;;  %v14038_v54 = vld [vmem:[%s20977_s27 + $0x9d8] sm:$0xf0]  ;;  %v14441_v58 = vor.u32 %v19469_v26, %v14438_v63  ;;  %v19365_v24 = vld [vmem:[%s20977_s27 + $0x9ac] sm:$0xf]  ;;  %v14425_v10 = vor.u32 %v19465_v57, %v14422_v43 }
 0x525   : > { %11915 = vmatpush.bf16.msra.mxu1 %v13577_v13  ;;  %v14166_v13 = vld [vmem:[%s20977_s27 + $0xad8] sm:$0xf0]  ;;  %v19397_v11 = vld [vmem:[%s20977_s27 + $0xaac] sm:$0xf] }
 0x526   : > { %11928 = vmatpush.bf16.msra.mxu2 %v13705_v55  ;;  %v19433_v55 = vld [vmem:[%s20977_s27 + $0xbcc] sm:$0xf]  ;;  %v14169_v52 = vor.u32 %v19401_v42, %v14166_v13  ;;  %v14150_v29 = vld [vmem:[%s20977_s27 + $0xab8] sm:$0xf0] }
 0x527   : > { %11941 = vmatpush.bf16.msra.mxu3 %v13833_v50  ;;  %v14041_v50 = vor.u32 %v19369_v62, %v14038_v54  ;;  %v14297_v46 = vor.u32 %v19433_v55, %v14294_v41  ;;  %v19429_v59 = vld [vmem:[%s20977_s27 + $0xbac] sm:$0xf]  ;;  %v14406_v8 = vld [vmem:[%s20977_s27 + $0xcb8] sm:$0xf0]  ;;  %v14153_v56 = vor.u32 %v19397_v11, %v14150_v29 }
 0x528   : > { %11903 = vmatpush.bf16.msra.mxu0 %v13433_v34  ;;  %v14278_v34 = vld [vmem:[%s20977_s27 + $0xbb8] sm:$0xf0]  ;;  %v19461_v51 = vld [vmem:[%s20977_s27 + $0xcac] sm:$0xf] }
 0x529   : > { %11916 = vmatpush.bf16.msra.mxu1 %v13561_v6  ;;  %v14281_v6 = vor.u32 %v19429_v59, %v14278_v34  ;;  %v14006_v26 = vld [vmem:[%s20977_s27 + $0x998] sm:$0xf0]  ;;  %v11710_v42 = vpop.f32.mrf.mxu1  ;;  %v19357_v55 = vld [vmem:[%s20977_s27 + $0x96c] sm:$0xf] }
 0x52a   : > { %11929 = vmatpush.bf16.msra.mxu2 %v13689_v35  ;;  %v19361_v35 = vld [vmem:[%s20977_s27 + $0x98c] sm:$0xf]  ;;  %v14134_v63 = vld [vmem:[%s20977_s27 + $0xa98] sm:$0xf0] }
 0x52b   : > { %11942 = vmatpush.bf16.msra.mxu3 %v13817_v0  ;;  %11904 = vmatmul.bf16.vlgmr.msra.gmra.mxu0 %v21160_v49  ;;  %v14025_v49 = vor.u32 %v19365_v24, %v14022_v61  ;;  %v19425_v0 = vld [vmem:[%s20977_s27 + $0xb8c] sm:$0xf]  ;;  %v14009_v54 = vor.u32 %v19361_v35, %v14006_v26  ;;  %v13990_v41 = vld [vmem:[%s20977_s27 + $0x978] sm:$0xf0] }
 0x52c   : > { %11948 = vmatpush.bf16.msrb.mxu0 %v14057_v22  ;;  %11917 = vmatmul.bf16.vlgmr.msra.gmra.mxu1 %v21152_v39  ;;  %v14409_v39 = vor.u32 %v19461_v51, %v14406_v8  ;;  %v14262_v22 = vld [vmem:[%s20977_s27 + $0xb98] sm:$0xf0]  ;;  %v19389_v57 = vld [vmem:[%s20977_s27 + $0xa6c] sm:$0xf]  ;;  %v13993_v11 = vor.u32 %v19357_v55, %v13990_v41 }
 0x52d   : > { %11961 = vmatpush.bf16.msrb.mxu1 %v14185_v2  ;;  %11930 = vmatmul.bf16.vlgmr.msra.gmra.mxu2 %v21158_v47  ;;  %v19393_v47 = vld [vmem:[%s20977_s27 + $0xa8c] sm:$0xf]  ;;  %v14265_v13 = vor.u32 %v19425_v0, %v14262_v22  ;;  %v14374_v61 = vld [vmem:[%s20977_s27 + $0xc78] sm:$0xf0] }
 0x52e   : > { %11974 = vmatpush.bf16.msrb.mxu2 %v14313_v18  ;;  %11943 = vmatmul.bf16.vlgmr.msra.gmra.mxu3 %v21236_v27  ;;  %v11697_v27 = vpop.f32.mrf.mxu0  ;;  %v19457_v2 = vld [vmem:[%s20977_s27 + $0xc8c] sm:$0xf]  ;;  %v14390_v18 = vld [vmem:[%s20977_s27 + $0xc98] sm:$0xf0] }
 0x52f   : > { %11987 = vmatpush.bf16.msrb.mxu3 %v14441_v58  ;;  %v11698_v62 = vadd.f32 %v11697_v27, %v23871_v9  ;;  %v14137_v58 = vor.u32 %v19393_v47, %v14134_v63  ;;  %v14393_v43 = vor.u32 %v19457_v2, %v14390_v18  ;;  %v14246_v9 = vld [vmem:[%s20977_s27 + $0xb78] sm:$0xf0]  ;;  %v19453_v24 = vld [vmem:[%s20977_s27 + $0xc6c] sm:$0xf] }
 0x530   : > { %11949 = vmatpush.bf16.msrb.mxu0 %v14041_v50  ;;  %v19353_v59 = vld [vmem:[%s20977_s27 + $0x94c] sm:$0xf]  ;;  %v13974_v34 = vld [vmem:[%s20977_s27 + $0x958] sm:$0xf0]  ;;  %v14377_v8 = vor.u32 %v19453_v24, %v14374_v61 }
 0x531   : > { %11962 = vmatpush.bf16.msrb.mxu1 %v14169_v52  ;;  %v11711_v50 = vadd.f32 %v11710_v42, %v11698_v62  ;;  %v14118_v52 = vld [vmem:[%s20977_s27 + $0xa78] sm:$0xf0]  ;;  %v19385_v51 = vld [vmem:[%s20977_s27 + $0xa4c] sm:$0xf]  ;;  %v11736_v47 = vpop.f32.mrf.mxu3  ;;  %v13977_v22 = vor.u32 %v19353_v59, %v13974_v34  ;;  %v11712_v27 = vpop.f32.mrf.mxu1 }
 0x532   : > { %11975 = vmatpush.bf16.msrb.mxu2 %v14297_v46  ;;  %v19421_v46 = vld [vmem:[%s20977_s27 + $0xb6c] sm:$0xf]  ;;  %v14230_v35 = vld [vmem:[%s20977_s27 + $0xb58] sm:$0xf0] }
 0x533   : > { %11988 = vmatpush.bf16.msrb.mxu3 %v14425_v10  ;;  %v14121_v10 = vor.u32 %v19389_v57, %v14118_v52  ;;  %v14249_v29 = vor.u32 %v19421_v46, %v14246_v9  ;;  %v14358_v63 = vld [vmem:[%s20977_s27 + $0xc58] sm:$0xf0]  ;;  %v19413_v41 = vld [vmem:[%s20977_s27 + $0xb2c] sm:$0xf] }
 0x534   : > { %11950 = vmatpush.bf16.msrb.mxu0 %v14025_v49  ;;  %v11723_v49 = vpop.f32.mrf.mxu2  ;;  %v13958_v42 = vld [vmem:[%s20977_s27 + $0x938] sm:$0xf0]  ;;  %v19345_v46 = vld [vmem:[%s20977_s27 + $0x90c] sm:$0xf] }
 0x535   : > { %11963 = vmatpush.bf16.msrb.mxu1 %v14153_v56  ;;  %v14102_v56 = vld [vmem:[%s20977_s27 + $0xa58] sm:$0xf0]  ;;  %v11724_v26 = vadd.f32 %v11723_v49, %v11711_v50 }
 0x536   : > { %11976 = vmatpush.bf16.msrb.mxu2 %v14281_v6  ;;  %v19417_v6 = vld [vmem:[%s20977_s27 + $0xb4c] sm:$0xf]  ;;  %v11699_v0 = vpop.f32.mrf.mxu0  ;;  %v14105_v18 = vor.u32 %v19385_v51, %v14102_v56  ;;  %v14086_v55 = vld [vmem:[%s20977_s27 + $0xa38] sm:$0xf0] }
 0x537   : > { %11989 = vmatpush.bf16.msrb.mxu3 %v14409_v39  ;;  %v19449_v39 = vld [vmem:[%s20977_s27 + $0xc4c] sm:$0xf]  ;;  %v23942_v2 = vadd.f32 %v11736_v47, %v11724_v26  ;;  %v14233_v62 = vor.u32 %v19417_v6, %v14230_v35  ;;  %v14214_v57 = vld [vmem:[%s20977_s27 + $0xb38] sm:$0xf0] }
 0x538   : > { %11951 = vmatpush.bf16.msrb.mxu0 %v14009_v54  ;;  %v19349_v54 = vld [vmem:[%s20977_s27 + $0x92c] sm:$0xf]  ;;  %v14342_v50 = vld [vmem:[%s20977_s27 + $0xc38] sm:$0xf0]  ;;  %v14217_v61 = vor.u32 %v19413_v41, %v14214_v57 }
 0x539   : > { %11964 = vmatpush.bf16.msrb.mxu1 %v14137_v58  ;;  %v19381_v58 = vld [vmem:[%s20977_s27 + $0xa2c] sm:$0xf]  ;;  %v13961_v52 = vor.u32 %v19349_v54, %v13958_v42  ;;  %v13942_v9 = vld [vmem:[%s20977_s27 + $0x918] sm:$0xf0]  ;;  %v11738_v26 = vpop.f32.mrf.mxu3 }
 0x53a   : > { %11977 = vmatpush.bf16.msrb.mxu2 %v14265_v13  ;;  %v14361_v13 = vor.u32 %v19449_v39, %v14358_v63  ;;  %v14089_v24 = vor.u32 %v19381_v58, %v14086_v55  ;;  %v14198_v34 = vld [vmem:[%s20977_s27 + $0xb18] sm:$0xf0]  ;;  %v19441_v51 = vld [vmem:[%s20977_s27 + $0xc0c] sm:$0xf]  ;;  %v13945_v47 = vor.u32 %v19345_v46, %v13942_v9 }
 0x53b   : > { %11990 = vmatpush.bf16.msrb.mxu3 %v14393_v43  ;;  %v19445_v43 = vld [vmem:[%s20977_s27 + $0xc2c] sm:$0xf]  ;;  %v14566_v6 = vld [vmem:[%s20977_s27 + $0xdf8] sm:$0xf0] }
 0x53c   : > { %11952 = vmatpush.bf16.msrb.mxu0 %v13993_v11  ;;  %v19377_v11 = vld [vmem:[%s20977_s27 + $0xa0c] sm:$0xf]  ;;  %v14345_v59 = vor.u32 %v19445_v43, %v14342_v50  ;;  %v11725_v49 = vpop.f32.mrf.mxu2  ;;  %v14694_v39 = vld [vmem:[%s20977_s27 + $0xef8] sm:$0xf0] }
 0x53d   : > { %11965 = vmatpush.bf16.msrb.mxu1 %v14121_v10  ;;  %v14070_v10 = vld [vmem:[%s20977_s27 + $0xa18] sm:$0xf0]  ;;  %v19501_v56 = vld [vmem:[%s20977_s27 + $0xdec] sm:$0xf] }
 0x53e   : > { %11978 = vmatpush.bf16.msrb.mxu2 %v14249_v29  ;;  %v19409_v29 = vld [vmem:[%s20977_s27 + $0xb0c] sm:$0xf]  ;;  %v14822_v0 = vld [vmem:[%s20977_s27 + $0xff8] sm:$0xf0]  ;;  %v14569_v42 = vor.u32 %v19501_v56, %v14566_v6 }
 0x53f   : > { %11991 = vmatpush.bf16.msrb.mxu3 %v14377_v8  ;;  %v14326_v8 = vld [vmem:[%s20977_s27 + $0xc18] sm:$0xf0]  ;;  %v19533_v35 = vld [vmem:[%s20977_s27 + $0xeec] sm:$0xf]  ;;  %v14201_v27 = vor.u32 %v19409_v29, %v14198_v34 }
 0x540   : > { %11953 = vmatpush.bf16.msrb.mxu0 %v13977_v22  ;;  %v19565_v63 = vld [vmem:[%s20977_s27 + $0xfec] sm:$0xf]  ;;  %v14073_v22 = vor.u32 %v19377_v11, %v14070_v10  ;;  %v14329_v54 = vor.u32 %v19441_v51, %v14326_v8  ;;  %v14697_v58 = vor.u32 %v19533_v35, %v14694_v39  ;;  %v14550_v41 = vld [vmem:[%s20977_s27 + $0xdd8] sm:$0xf0] }
 0x541   : > { %11966 = vmatpush.bf16.msrb.mxu1 %v14105_v18  ;;  %v19597_v18 = vld [vmem:[%s20977_s27 + $0x10ec] sm:$0xf]  ;;  %v14678_v50 = vld [vmem:[%s20977_s27 + $0xed8] sm:$0xf0] }
 0x542   : > { %11979 = vmatpush.bf16.msrb.mxu2 %v14233_v62  ;;  %v14950_v62 = vld [vmem:[%s20977_s27 + $0x10f8] sm:$0xf0]  ;;  %v19497_v55 = vld [vmem:[%s20977_s27 + $0xdcc] sm:$0xf] }
 0x543   : > { %11992 = vmatpush.bf16.msrb.mxu3 %v14361_v13  ;;  %v14825_v13 = vor.u32 %v19565_v63, %v14822_v0  ;;  %v19529_v57 = vld [vmem:[%s20977_s27 + $0xecc] sm:$0xf]  ;;  %v14953_v43 = vor.u32 %v19597_v18, %v14950_v62  ;;  %v14806_v46 = vld [vmem:[%s20977_s27 + $0xfd8] sm:$0xf0] }
 0x544   : > { %11954 = vmatpush.bf16.msrb.mxu0 %v13961_v52  ;;  %v19561_v52 = vld [vmem:[%s20977_s27 + $0xfcc] sm:$0xf]  ;;  %v14681_v11 = vor.u32 %v19529_v57, %v14678_v50  ;;  %v14662_v8 = vld [vmem:[%s20977_s27 + $0xeb8] sm:$0xf0] }
 0x545   : > { %11967 = vmatpush.bf16.msrb.mxu1 %v14089_v24  ;;  %v19593_v9 = vld [vmem:[%s20977_s27 + $0x10cc] sm:$0xf]  ;;  %v14934_v24 = vld [vmem:[%s20977_s27 + $0x10d8] sm:$0xf0]  ;;  %v14809_v10 = vor.u32 %v19561_v52, %v14806_v46 }
 0x546   : > { %11980 = vmatpush.bf16.msrb.mxu2 %v14217_v61  ;;  %v14553_v61 = vor.u32 %v19497_v55, %v14550_v41  ;;  %v19493_v29 = vld [vmem:[%s20977_s27 + $0xdac] sm:$0xf]  ;;  %v14937_v51 = vor.u32 %v19593_v9, %v14934_v24  ;;  %v14790_v56 = vld [vmem:[%s20977_s27 + $0xfb8] sm:$0xf0] }
 0x547   : > { %11993 = vmatpush.bf16.msrb.mxu3 %v14345_v59  ;;  %v14534_v59 = vld [vmem:[%s20977_s27 + $0xdb8] sm:$0xf0]  ;;  %v19525_v34 = vld [vmem:[%s20977_s27 + $0xeac] sm:$0xf] }
 0x548   : > { %11955 = vmatpush.bf16.msrb.mxu0 %v13945_v47  ;;  %v19557_v49 = vld [vmem:[%s20977_s27 + $0xfac] sm:$0xf]  ;;  %v14918_v35 = vld [vmem:[%s20977_s27 + $0x10b8] sm:$0xf0]  ;;  %v14665_v26 = vor.u32 %v19525_v34, %v14662_v8 }
 0x549   : > { %11968 = vmatpush.bf16.msrb.mxu1 %v14073_v22  ;;  %v19589_v6 = vld [vmem:[%s20977_s27 + $0x10ac] sm:$0xf]  ;;  %v14793_v47 = vor.u32 %v19557_v49, %v14790_v56  ;;  %v14518_v63 = vld [vmem:[%s20977_s27 + $0xd98] sm:$0xf0] }
 0x54a   : > { %11981 = vmatpush.bf16.msrb.mxu2 %v14201_v27  ;;  %v19489_v39 = vld [vmem:[%s20977_s27 + $0xd8c] sm:$0xf]  ;;  %v14646_v0 = vld [vmem:[%s20977_s27 + $0xe98] sm:$0xf0] }
 0x54b   : > { %11994 = vmatpush.bf16.msrb.mxu3 %v14329_v54  ;;  %11956 = vmatmul.bf16.vlgmr.msrb.gmra.mxu0 %v21247_v37  ;;  %v14537_v37 = vor.u32 %v19493_v29, %v14534_v59  ;;  %v19553_v22 = vld [vmem:[%s20977_s27 + $0xf8c] sm:$0xf]  ;;  %v14774_v27 = vld [vmem:[%s20977_s27 + $0xf98] sm:$0xf0] }
 0x54c   : > { %12000 = vmatpush.bf16.msra.mxu0 %v14569_v42  ;;  %11969 = vmatmul.bf16.vlgmr.msrb.gmra.mxu1 %v21243_v36  ;;  %v14921_v36 = vor.u32 %v19589_v6, %v14918_v35  ;;  %v19585_v18 = vld [vmem:[%s20977_s27 + $0x108c] sm:$0xf]  ;;  %v14902_v62 = vld [vmem:[%s20977_s27 + $0x1098] sm:$0xf0]  ;;  %v14521_v42 = vor.u32 %v19489_v39, %v14518_v63  ;;  %v14777_v55 = vor.u32 %v19553_v22, %v14774_v27 }
 0x54d   : > { %12013 = vmatpush.bf16.msra.mxu1 %v14697_v58  ;;  %11982 = vmatmul.bf16.vlgmr.msrb.gmra.mxu2 %v21253_v40  ;;  %v19521_v40 = vld [vmem:[%s20977_s27 + $0xe8c] sm:$0xf]  ;;  %v11762_v58 = vpop.f32.mrf.mxu1  ;;  %v14502_v57 = vld [vmem:[%s20977_s27 + $0xd78] sm:$0xf0]  ;;  %v14905_v50 = vor.u32 %v19585_v18, %v14902_v62 }
 0x54e   : > { %12026 = vmatpush.bf16.msra.mxu2 %v14825_v13  ;;  %11995 = vmatmul.bf16.vlgmr.msrb.gmra.mxu3 %v21329_v31  ;;  %v11749_v31 = vpop.f32.mrf.mxu0  ;;  %v14649_v13 = vor.u32 %v19521_v40, %v14646_v0  ;;  %v19485_v41 = vld [vmem:[%s20977_s27 + $0xd6c] sm:$0xf]  ;;  %v14630_v46 = vld [vmem:[%s20977_s27 + $0xe78] sm:$0xf0] }
 0x54f   : > { %12039 = vmatpush.bf16.msra.mxu3 %v14953_v43  ;;  %v11750_v54 = vadd.f32 %v11749_v31, %v23942_v2  ;;  %v19517_v43 = vld [vmem:[%s20977_s27 + $0xe6c] sm:$0xf]  ;;  %v14758_v2 = vld [vmem:[%s20977_s27 + $0xf78] sm:$0xf0] }
 0x550   : > { %12001 = vmatpush.bf16.msra.mxu0 %v14553_v61  ;;  %v19549_v9 = vld [vmem:[%s20977_s27 + $0xf6c] sm:$0xf]  ;;  %v14886_v61 = vld [vmem:[%s20977_s27 + $0x1078] sm:$0xf0]  ;;  %v11775_v49 = vpop.f32.mrf.mxu2 }
 0x551   : > { %12014 = vmatpush.bf16.msra.mxu1 %v14681_v11  ;;  %v11763_v52 = vadd.f32 %v11762_v58, %v11750_v54  ;;  %v19581_v24 = vld [vmem:[%s20977_s27 + $0x106c] sm:$0xf]  ;;  %v14505_v11 = vor.u32 %v19485_v41, %v14502_v57  ;;  %v14761_v29 = vor.u32 %v19549_v9, %v14758_v2  ;;  %v14486_v34 = vld [vmem:[%s20977_s27 + $0xd58] sm:$0xf0] }
 0x552   : > { %12027 = vmatpush.bf16.msra.mxu2 %v14809_v10  ;;  %v14633_v10 = vor.u32 %v19517_v43, %v14630_v46  ;;  %v19481_v59 = vld [vmem:[%s20977_s27 + $0xd4c] sm:$0xf]  ;;  %v14889_v8 = vor.u32 %v19581_v24, %v14886_v61  ;;  %v14614_v56 = vld [vmem:[%s20977_s27 + $0xe58] sm:$0xf0] }
 0x553   : > { %12040 = vmatpush.bf16.msra.mxu3 %v14937_v51  ;;  %v19513_v51 = vld [vmem:[%s20977_s27 + $0xe4c] sm:$0xf]  ;;  %v14742_v35 = vld [vmem:[%s20977_s27 + $0xf58] sm:$0xf0]  ;;  %v14489_v40 = vor.u32 %v19481_v59, %v14486_v34 }
 0x554   : > { %12002 = vmatpush.bf16.msra.mxu0 %v14537_v37  ;;  %v19545_v6 = vld [vmem:[%s20977_s27 + $0xf4c] sm:$0xf]  ;;  %v11776_v37 = vadd.f32 %v11775_v49, %v11763_v52  ;;  %v14870_v39 = vld [vmem:[%s20977_s27 + $0x1058] sm:$0xf0]  ;;  %v14617_v22 = vor.u32 %v19513_v51, %v14614_v56 }
 0x555   : > { %12015 = vmatpush.bf16.msra.mxu1 %v14665_v26  ;;  %v11788_v26 = vpop.f32.mrf.mxu3  ;;  %v14745_v27 = vor.u32 %v19545_v6, %v14742_v35  ;;  %v19477_v31 = vld [vmem:[%s20977_s27 + $0xd2c] sm:$0xf]  ;;  %v14470_v18 = vld [vmem:[%s20977_s27 + $0xd38] sm:$0xf0] }
 0x556   : > { %12028 = vmatpush.bf16.msra.mxu2 %v14793_v47  ;;  %v19577_v47 = vld [vmem:[%s20977_s27 + $0x104c] sm:$0xf]  ;;  %v11751_v63 = vpop.f32.mrf.mxu0  ;;  %v24013_v0 = vadd.f32 %v11788_v26, %v11776_v37  ;;  %v14854_v41 = vld [vmem:[%s20977_s27 + $0x1038] sm:$0xf0]  ;;  %v14473_v57 = vor.u32 %v19477_v31, %v14470_v18 }
 0x557   : > { %12041 = vmatpush.bf16.msra.mxu3 %v14921_v36  ;;  %v11764_v36 = vpop.f32.mrf.mxu1  ;;  %v19509_v62 = vld [vmem:[%s20977_s27 + $0xe2c] sm:$0xf]  ;;  %v14873_v54 = vor.u32 %v19577_v47, %v14870_v39  ;;  %v14582_v2 = vld [vmem:[%s20977_s27 + $0xe18] sm:$0xf0] }
 0x558   : > { %12003 = vmatpush.bf16.msra.mxu0 %v14521_v42  ;;  %v14598_v42 = vld [vmem:[%s20977_s27 + $0xe38] sm:$0xf0]  ;;  %v19541_v58 = vld [vmem:[%s20977_s27 + $0xf2c] sm:$0xf]  ;;  %v11777_v59 = vpop.f32.mrf.mxu2 }
 0x559   : > { %12016 = vmatpush.bf16.msra.mxu1 %v14649_v13  ;;  %v14726_v13 = vld [vmem:[%s20977_s27 + $0xf38] sm:$0xf0]  ;;  %v19473_v43 = vld [vmem:[%s20977_s27 + $0xd0c] sm:$0xf]  ;;  %v14601_v52 = vor.u32 %v19509_v62, %v14598_v42 }
 0x55a   : > { %12029 = vmatpush.bf16.msra.mxu2 %v14777_v55  ;;  %v19573_v55 = vld [vmem:[%s20977_s27 + $0x102c] sm:$0xf]  ;;  %v14729_v46 = vor.u32 %v19541_v58, %v14726_v13  ;;  %v15078_v51 = vld [vmem:[%s20977_s27 + $0x11f8] sm:$0xf0] }
 0x55b   : > { %12042 = vmatpush.bf16.msra.mxu3 %v14905_v50  ;;  %v14454_v50 = vld [vmem:[%s20977_s27 + $0xd18] sm:$0xf0]  ;;  %v19505_v9 = vld [vmem:[%s20977_s27 + $0xe0c] sm:$0xf]  ;;  %v14857_v61 = vor.u32 %v19573_v55, %v14854_v41 }
 0x55c   : > { %12004 = vmatpush.bf16.msra.mxu0 %v14505_v11  ;;  %v19537_v24 = vld [vmem:[%s20977_s27 + $0xf0c] sm:$0xf]  ;;  %v14710_v11 = vld [vmem:[%s20977_s27 + $0xf18] sm:$0xf0]  ;;  %v14457_v56 = vor.u32 %v19473_v43, %v14454_v50  ;;  %v14585_v26 = vor.u32 %v19505_v9, %v14582_v2 }
 0x55d   : > { %12017 = vmatpush.bf16.msra.mxu1 %v14633_v10  ;;  %v19569_v10 = vld [vmem:[%s20977_s27 + $0x100c] sm:$0xf]  ;;  %v11790_v49 = vpop.f32.mrf.mxu3  ;;  %v15206_v6 = vld [vmem:[%s20977_s27 + $0x12f8] sm:$0xf0]  ;;  %v14713_v47 = vor.u32 %v19537_v24, %v14710_v11 }
 0x55e   : > { %12030 = vmatpush.bf16.msra.mxu2 %v14761_v29  ;;  %v14838_v29 = vld [vmem:[%s20977_s27 + $0x1018] sm:$0xf0]  ;;  %v19629_v34 = vld [vmem:[%s20977_s27 + $0x11ec] sm:$0xf] }
 0x55f   : > { %12043 = vmatpush.bf16.msra.mxu3 %v14889_v8  ;;  %v19661_v8 = vld [vmem:[%s20977_s27 + $0x12ec] sm:$0xf]  ;;  %v15334_v37 = vld [vmem:[%s20977_s27 + $0x13f8] sm:$0xf0]  ;;  %v15081_v36 = vor.u32 %v19629_v34, %v15078_v51 }
 0x560   : > { %12005 = vmatpush.bf16.msra.mxu0 %v14489_v40  ;;  %v19693_v35 = vld [vmem:[%s20977_s27 + $0x13ec] sm:$0xf]  ;;  %v15462_v63 = vld [vmem:[%s20977_s27 + $0x14f8] sm:$0xf0]  ;;  %v14841_v40 = vor.u32 %v19569_v10, %v14838_v29 }
 0x561   : > { %12018 = vmatpush.bf16.msra.mxu1 %v14617_v22  ;;  %v19725_v39 = vld [vmem:[%s20977_s27 + $0x14ec] sm:$0xf]  ;;  %v15209_v22 = vor.u32 %v19661_v8, %v15206_v6  ;;  %v15062_v18 = vld [vmem:[%s20977_s27 + $0x11d8] sm:$0xf0] }
 0x562   : > { %12031 = vmatpush.bf16.msra.mxu2 %v14745_v27  ;;  %v15337_v27 = vor.u32 %v19693_v35, %v15334_v37  ;;  %v19625_v31 = vld [vmem:[%s20977_s27 + $0x11cc] sm:$0xf]  ;;  %v15190_v42 = vld [vmem:[%s20977_s27 + $0x12d8] sm:$0xf0] }
 0x563   : > { %12044 = vmatpush.bf16.msra.mxu3 %v14873_v54  ;;  %v19657_v62 = vld [vmem:[%s20977_s27 + $0x12cc] sm:$0xf]  ;;  %v15465_v54 = vor.u32 %v19725_v39, %v15462_v63  ;;  %v15318_v13 = vld [vmem:[%s20977_s27 + $0x13d8] sm:$0xf0] }
 0x564   : > { %12006 = vmatpush.bf16.msra.mxu0 %v14473_v57  ;;  %v19689_v58 = vld [vmem:[%s20977_s27 + $0x13cc] sm:$0xf]  ;;  %v15446_v41 = vld [vmem:[%s20977_s27 + $0x14d8] sm:$0xf0]  ;;  %v15065_v57 = vor.u32 %v19625_v31, %v15062_v18  ;;  %v15193_v43 = vor.u32 %v19657_v62, %v15190_v42 }
 0x565   : > { %12019 = vmatpush.bf16.msra.mxu1 %v14601_v52  ;;  %v19721_v55 = vld [vmem:[%s20977_s27 + $0x14cc] sm:$0xf]  ;;  %v15321_v50 = vor.u32 %v19689_v58, %v15318_v13  ;;  %v15174_v24 = vld [vmem:[%s20977_s27 + $0x12b8] sm:$0xf0] }
 0x566   : > { %12032 = vmatpush.bf16.msra.mxu2 %v14729_v46  ;;  %v19621_v52 = vld [vmem:[%s20977_s27 + $0x11ac] sm:$0xf]  ;;  %v15046_v46 = vld [vmem:[%s20977_s27 + $0x11b8] sm:$0xf0]  ;;  %v15449_v2 = vor.u32 %v19721_v55, %v15446_v41 }
 0x567   : > { %12045 = vmatpush.bf16.msra.mxu3 %v14857_v61  ;;  %v19653_v9 = vld [vmem:[%s20977_s27 + $0x12ac] sm:$0xf]  ;;  %v15302_v11 = vld [vmem:[%s20977_s27 + $0x13b8] sm:$0xf0] }
 0x568   : > { %12007 = vmatpush.bf16.msra.mxu0 %v14457_v56  ;;  %v19685_v61 = vld [vmem:[%s20977_s27 + $0x13ac] sm:$0xf]  ;;  %v15430_v29 = vld [vmem:[%s20977_s27 + $0x14b8] sm:$0xf0]  ;;  %v15177_v59 = vor.u32 %v19653_v9, %v15174_v24 }
 0x569   : > { %12020 = vmatpush.bf16.msra.mxu1 %v14585_v26  ;;  %v19717_v10 = vld [vmem:[%s20977_s27 + $0x14ac] sm:$0xf]  ;;  %v15305_v34 = vor.u32 %v19685_v61, %v15302_v11  ;;  %v15030_v8 = vld [vmem:[%s20977_s27 + $0x1198] sm:$0xf0]  ;;  %v11814_v39 = vpop.f32.mrf.mxu1 }
 0x56a   : > { %12033 = vmatpush.bf16.msra.mxu2 %v14713_v47  ;;  %v19617_v51 = vld [vmem:[%s20977_s27 + $0x118c] sm:$0xf]  ;;  %v15158_v49 = vld [vmem:[%s20977_s27 + $0x1298] sm:$0xf0] }
 0x56b   : > { %12046 = vmatpush.bf16.msra.mxu3 %v14841_v40  ;;  %12008 = vmatmul.bf16.vlgmr.msra.gmra.mxu0 %v21340_v32  ;;  %v15049_v32 = vor.u32 %v19621_v52, %v15046_v46  ;;  %v19681_v56 = vld [vmem:[%s20977_s27 + $0x138c] sm:$0xf]  ;;  %v15286_v6 = vld [vmem:[%s20977_s27 + $0x1398] sm:$0xf0]  ;;  %v15033_v47 = vor.u32 %v19617_v51, %v15030_v8 }
 0x56c   : > { %12052 = vmatpush.bf16.msrb.mxu0 %v15081_v36  ;;  %12021 = vmatmul.bf16.vlgmr.msra.gmra.mxu1 %v21336_v28  ;;  %v15433_v28 = vor.u32 %v19717_v10, %v15430_v29  ;;  %v19713_v35 = vld [vmem:[%s20977_s27 + $0x148c] sm:$0xf]  ;;  %v15414_v37 = vld [vmem:[%s20977_s27 + $0x1498] sm:$0xf0]  ;;  %v15289_v40 = vor.u32 %v19681_v56, %v15286_v6 }
 0x56d   : > { %12065 = vmatpush.bf16.msrb.mxu1 %v15209_v22  ;;  %12034 = vmatmul.bf16.vlgmr.msra.gmra.mxu2 %v21346_v45  ;;  %v19649_v45 = vld [vmem:[%s20977_s27 + $0x128c] sm:$0xf]  ;;  %v15014_v22 = vld [vmem:[%s20977_s27 + $0x1178] sm:$0xf0]  ;;  %v15417_v31 = vor.u32 %v19713_v35, %v15414_v37 }
 0x56e   : > { %12078 = vmatpush.bf16.msrb.mxu2 %v15337_v27  ;;  %12047 = vmatmul.bf16.vlgmr.msra.gmra.mxu3 %v21411_v3  ;;  %v11801_v3 = vpop.f32.mrf.mxu0  ;;  %v15161_v63 = vor.u32 %v19649_v45, %v15158_v49  ;;  %v19613_v36 = vld [vmem:[%s20977_s27 + $0x116c] sm:$0xf]  ;;  %v15142_v62 = vld [vmem:[%s20977_s27 + $0x1278] sm:$0xf0] }
 0x56f   : > { %12091 = vmatpush.bf16.msrb.mxu3 %v15465_v54  ;;  %v11802_v26 = vadd.f32 %v11801_v3, %v24013_v0  ;;  %v19645_v27 = vld [vmem:[%s20977_s27 + $0x126c] sm:$0xf]  ;;  %v15270_v0 = vld [vmem:[%s20977_s27 + $0x1378] sm:$0xf0]  ;;  %v15017_v13 = vor.u32 %v19613_v36, %v15014_v22 }
 0x570   : > { %12053 = vmatpush.bf16.msrb.mxu0 %v15065_v57  ;;  %v19677_v54 = vld [vmem:[%s20977_s27 + $0x136c] sm:$0xf]  ;;  %v15398_v58 = vld [vmem:[%s20977_s27 + $0x1478] sm:$0xf0]  ;;  %v15145_v55 = vor.u32 %v19645_v27, %v15142_v62  ;;  %v11827_v46 = vpop.f32.mrf.mxu2 }
 0x571   : > { %12066 = vmatpush.bf16.msrb.mxu1 %v15193_v43  ;;  %v11815_v18 = vadd.f32 %v11814_v39, %v11802_v26  ;;  %v19709_v42 = vld [vmem:[%s20977_s27 + $0x146c] sm:$0xf]  ;;  %v15273_v41 = vor.u32 %v19677_v54, %v15270_v0  ;;  %v14998_v43 = vld [vmem:[%s20977_s27 + $0x1158] sm:$0xf0]  ;;  %v24086_v29 = vpop.f32.mrf.mxu3 }
 0x572   : > { %12079 = vmatpush.bf16.msrb.mxu2 %v15321_v50  ;;  %v19609_v57 = vld [vmem:[%s20977_s27 + $0x114c] sm:$0xf]  ;;  %v15401_v52 = vor.u32 %v19709_v42, %v15398_v58  ;;  %v15126_v9 = vld [vmem:[%s20977_s27 + $0x1258] sm:$0xf0] }
 0x573   : > { %12092 = vmatpush.bf16.msrb.mxu3 %v15449_v2  ;;  %v19641_v50 = vld [vmem:[%s20977_s27 + $0x124c] sm:$0xf]  ;;  %v15254_v24 = vld [vmem:[%s20977_s27 + $0x1358] sm:$0xf0]  ;;  %v24082_v61 = vadd.f32 %v11827_v46, %v11815_v18 }
 0x574   : > { %12054 = vmatpush.bf16.msrb.mxu0 %v15049_v32  ;;  %v19673_v2 = vld [vmem:[%s20977_s27 + $0x134c] sm:$0xf]  ;;  %v15382_v10 = vld [vmem:[%s20977_s27 + $0x1458] sm:$0xf0]  ;;  %v15129_v51 = vor.u32 %v19641_v50, %v15126_v9 }
 0x575   : > { %12067 = vmatpush.bf16.msrb.mxu1 %v15177_v59  ;;  %v19705_v11 = vld [vmem:[%s20977_s27 + $0x144c] sm:$0xf]  ;;  %v15001_v59 = vor.u32 %v19609_v57, %v14998_v43  ;;  %v15257_v8 = vor.u32 %v19673_v2, %v15254_v24  ;;  %v15110_v6 = vld [vmem:[%s20977_s27 + $0x1238] sm:$0xf0] }
 0x576   : > { %12080 = vmatpush.bf16.msrb.mxu2 %v15305_v34  ;;  %v11803_v32 = vpop.f32.mrf.mxu0  ;;  %v11816_v34 = vpop.f32.mrf.mxu1  ;;  %v19605_v45 = vld [vmem:[%s20977_s27 + $0x112c] sm:$0xf]  ;;  %v15385_v56 = vor.u32 %v19705_v11, %v15382_v10  ;;  %v15238_v35 = vld [vmem:[%s20977_s27 + $0x1338] sm:$0xf0] }
 0x577   : > { %12093 = vmatpush.bf16.msrb.mxu3 %v15433_v28  ;;  %v14982_v28 = vld [vmem:[%s20977_s27 + $0x1138] sm:$0xf0]  ;;  %v19637_v49 = vld [vmem:[%s20977_s27 + $0x122c] sm:$0xf] }
 0x578   : > { %12055 = vmatpush.bf16.msrb.mxu0 %v15033_v47  ;;  %v19669_v3 = vld [vmem:[%s20977_s27 + $0x132c] sm:$0xf]  ;;  %v15366_v26 = vld [vmem:[%s20977_s27 + $0x1438] sm:$0xf0]  ;;  %v14985_v47 = vor.u32 %v19605_v45, %v14982_v28  ;;  %v11829_v42 = vpop.f32.mrf.mxu2 }
 0x579   : > { %12068 = vmatpush.bf16.msrb.mxu1 %v15161_v63  ;;  %v19701_v37 = vld [vmem:[%s20977_s27 + $0x142c] sm:$0xf]  ;;  %v14966_v63 = vld [vmem:[%s20977_s27 + $0x1118] sm:$0xf0]  ;;  %v15241_v36 = vor.u32 %v19669_v3, %v15238_v35 }
 0x57a   : > { %12081 = vmatpush.bf16.msrb.mxu2 %v15289_v40  ;;  %v19601_v39 = vld [vmem:[%s20977_s27 + $0x110c] sm:$0xf]  ;;  %v15113_v40 = vor.u32 %v19637_v49, %v15110_v6  ;;  %v15094_v27 = vld [vmem:[%s20977_s27 + $0x1218] sm:$0xf0]  ;;  %v15369_v18 = vor.u32 %v19701_v37, %v15366_v26 }
 0x57b   : > { %12094 = vmatpush.bf16.msrb.mxu3 %v15417_v31  ;;  %v19633_v22 = vld [vmem:[%s20977_s27 + $0x120c] sm:$0xf]  ;;  %v15222_v62 = vld [vmem:[%s20977_s27 + $0x1318] sm:$0xf0]  ;;  %v14969_v57 = vor.u32 %v19601_v39, %v14966_v63 }
 0x57c   : > { %12056 = vmatpush.bf16.msrb.mxu0 %v15017_v13  ;;  %v19665_v31 = vld [vmem:[%s20977_s27 + $0x130c] sm:$0xf]  ;;  %v15350_v0 = vld [vmem:[%s20977_s27 + $0x1418] sm:$0xf0]  ;;  %v15097_v46 = vor.u32 %v19633_v22, %v15094_v27 }
 0x57d   : > { %12069 = vmatpush.bf16.msrb.mxu1 %v15145_v55  ;;  %v19697_v54 = vld [vmem:[%s20977_s27 + $0x140c] sm:$0xf]  ;;  %v15590_v13 = vld [vmem:[%s20977_s27 + $0x15f8] sm:$0xf0]  ;;  %v15225_v9 = vor.u32 %v19665_v31, %v15222_v62 }
 0x57e   : > { %12082 = vmatpush.bf16.msrb.mxu2 %v15273_v41  ;;  %v19757_v58 = vld [vmem:[%s20977_s27 + $0x15ec] sm:$0xf]  ;;  %v11842_v41 = vpop.f32.mrf.mxu3  ;;  %v15718_v43 = vld [vmem:[%s20977_s27 + $0x16f8] sm:$0xf0]  ;;  %v15353_v11 = vor.u32 %v19697_v54, %v15350_v0 }
 0x57f   : > { %12095 = vmatpush.bf16.msrb.mxu3 %v15401_v52  ;;  %v19789_v55 = vld [vmem:[%s20977_s27 + $0x16ec] sm:$0xf]  ;;  %v15846_v52 = vld [vmem:[%s20977_s27 + $0x17f8] sm:$0xf0]  ;;  %v15593_v10 = vor.u32 %v19757_v58, %v15590_v13 }
 0x580   : > { %12057 = vmatpush.bf16.msrb.mxu0 %v15001_v59  ;;  %v19821_v50 = vld [vmem:[%s20977_s27 + $0x17ec] sm:$0xf]  ;;  %v15974_v24 = vld [vmem:[%s20977_s27 + $0x18f8] sm:$0xf0]  ;;  %v15721_v32 = vor.u32 %v19789_v55, %v15718_v43 }
 0x581   : > { %12070 = vmatpush.bf16.msrb.mxu1 %v15129_v51  ;;  %v19853_v2 = vld [vmem:[%s20977_s27 + $0x18ec] sm:$0xf]  ;;  %v15849_v59 = vor.u32 %v19821_v50, %v15846_v52  ;;  %v15574_v51 = vld [vmem:[%s20977_s27 + $0x15d8] sm:$0xf0] }
 0x582   : > { %12083 = vmatpush.bf16.msrb.mxu2 %v15257_v8  ;;  %v19753_v34 = vld [vmem:[%s20977_s27 + $0x15cc] sm:$0xf]  ;;  %v15977_v45 = vor.u32 %v19853_v2, %v15974_v24  ;;  %v15702_v28 = vld [vmem:[%s20977_s27 + $0x16d8] sm:$0xf0] }
 0x583   : > { %12096 = vmatpush.bf16.msrb.mxu3 %v15385_v56  ;;  %v19785_v8 = vld [vmem:[%s20977_s27 + $0x16cc] sm:$0xf]  ;;  %v15830_v56 = vld [vmem:[%s20977_s27 + $0x17d8] sm:$0xf0]  ;;  %v15577_v35 = vor.u32 %v19753_v34, %v15574_v51 }
 0x584   : > { %12058 = vmatpush.bf16.msrb.mxu0 %v14985_v47  ;;  %v19817_v49 = vld [vmem:[%s20977_s27 + $0x17cc] sm:$0xf]  ;;  %v15958_v3 = vld [vmem:[%s20977_s27 + $0x18d8] sm:$0xf0]  ;;  %v15705_v37 = vor.u32 %v19785_v8, %v15702_v28 }
 0x585   : > { %12071 = vmatpush.bf16.msrb.mxu1 %v15113_v40  ;;  %v19849_v6 = vld [vmem:[%s20977_s27 + $0x18cc] sm:$0xf]  ;;  %v15833_v26 = vor.u32 %v19817_v49, %v15830_v56  ;;  %v15558_v39 = vld [vmem:[%s20977_s27 + $0x15b8] sm:$0xf0] }
 0x586   : > { %12084 = vmatpush.bf16.msrb.mxu2 %v15241_v36  ;;  %v19749_v47 = vld [vmem:[%s20977_s27 + $0x15ac] sm:$0xf]  ;;  %v15961_v40 = vor.u32 %v19849_v6, %v15958_v3  ;;  %v15686_v36 = vld [vmem:[%s20977_s27 + $0x16b8] sm:$0xf0] }
 0x587   : > { %12097 = vmatpush.bf16.msrb.mxu3 %v15369_v18  ;;  %v19781_v63 = vld [vmem:[%s20977_s27 + $0x16ac] sm:$0xf]  ;;  %v15814_v27 = vld [vmem:[%s20977_s27 + $0x17b8] sm:$0xf0] }
 0x588   : > { %12059 = vmatpush.bf16.msrb.mxu0 %v14969_v57  ;;  %v19813_v22 = vld [vmem:[%s20977_s27 + $0x17ac] sm:$0xf]  ;;  %v15942_v18 = vld [vmem:[%s20977_s27 + $0x18b8] sm:$0xf0]  ;;  %v15689_v62 = vor.u32 %v19781_v63, %v15686_v36  ;;  %v11853_v43 = vpop.f32.mrf.mxu0 }
 0x589   : > { %12072 = vmatpush.bf16.msrb.mxu1 %v15097_v46  ;;  %v19845_v31 = vld [vmem:[%s20977_s27 + $0x18ac] sm:$0xf]  ;;  %v15817_v54 = vor.u32 %v19813_v22, %v15814_v27  ;;  %v15542_v42 = vld [vmem:[%s20977_s27 + $0x1598] sm:$0xf0]  ;;  %v11854_v24 = vadd.f32 %v11853_v43, %v24086_v29 }
 0x58a   : > { %12085 = vmatpush.bf16.msrb.mxu2 %v15225_v9  ;;  %v19745_v0 = vld [vmem:[%s20977_s27 + $0x158c] sm:$0xf]  ;;  %v15670_v58 = vld [vmem:[%s20977_s27 + $0x1698] sm:$0xf0] }
 0x58b   : > { %12098 = vmatpush.bf16.msrb.mxu3 %v15353_v11  ;;  %12060 = vmatmul.bf16.vlgmr.msrb.gmra.mxu0 %v21418_v33  ;;  %v15561_v33 = vor.u32 %v19749_v47, %v15558_v39  ;;  %v19809_v13 = vld [vmem:[%s20977_s27 + $0x178c] sm:$0xf]  ;;  %v15798_v55 = vld [vmem:[%s20977_s27 + $0x1798] sm:$0xf0]  ;;  %v15545_v57 = vor.u32 %v19745_v0, %v15542_v42  ;;  %v11866_v11 = vpop.f32.mrf.mxu1 }
 0x58c   : > { %12104 = vmatpush.bf16.msra.mxu0 %v15593_v10  ;;  %12073 = vmatmul.bf16.vlgmr.msrb.gmra.mxu1 %v24708_v60  ;;  %v15945_v60 = vor.u32 %v19845_v31, %v15942_v18  ;;  %v19841_v41 = vld [vmem:[%s20977_s27 + $0x188c] sm:$0xf]  ;;  %v15801_v52 = vor.u32 %v19809_v13, %v15798_v55  ;;  %v15526_v9 = vld [vmem:[%s20977_s27 + $0x1578] sm:$0xf0] }
 0x58d   : > { %12117 = vmatpush.bf16.msra.mxu1 %v15721_v32  ;;  %12086 = vmatmul.bf16.vlgmr.msrb.gmra.mxu2 %v21422_v53  ;;  %v19777_v53 = vld [vmem:[%s20977_s27 + $0x168c] sm:$0xf]  ;;  %v15654_v32 = vld [vmem:[%s20977_s27 + $0x1678] sm:$0xf0] }
 0x58e   : > { %12130 = vmatpush.bf16.msra.mxu2 %v15849_v59  ;;  %12099 = vmatmul.bf16.vlgmr.msrb.gmra.mxu3 %v21488_v5  ;;  %v15926_v5 = vld [vmem:[%s20977_s27 + $0x1898] sm:$0xf0]  ;;  %v15673_v50 = vor.u32 %v19777_v53, %v15670_v58  ;;  %v19741_v46 = vld [vmem:[%s20977_s27 + $0x156c] sm:$0xf] }
 0x58f   : > { %12143 = vmatpush.bf16.msra.mxu3 %v15977_v45  ;;  %v19773_v2 = vld [vmem:[%s20977_s27 + $0x166c] sm:$0xf]  ;;  %v15929_v10 = vor.u32 %v19841_v41, %v15926_v5  ;;  %v15782_v34 = vld [vmem:[%s20977_s27 + $0x1778] sm:$0xf0]  ;;  %v11867_v45 = vadd.f32 %v11866_v11, %v11854_v24  ;;  %v15529_v28 = vor.u32 %v19741_v46, %v15526_v9 }
 0x590   : > { %12105 = vmatpush.bf16.msra.mxu0 %v15577_v35  ;;  %v19805_v59 = vld [vmem:[%s20977_s27 + $0x176c] sm:$0xf]  ;;  %v15910_v8 = vld [vmem:[%s20977_s27 + $0x1878] sm:$0xf0]  ;;  %v15657_v29 = vor.u32 %v19773_v2, %v15654_v32  ;;  %v11879_v35 = vpop.f32.mrf.mxu2  ;;  %v11855_v18 = vpop.f32.mrf.mxu0 }
 0x591   : > { %12118 = vmatpush.bf16.msra.mxu1 %v15705_v37  ;;  %v19837_v51 = vld [vmem:[%s20977_s27 + $0x186c] sm:$0xf]  ;;  %v15785_v49 = vor.u32 %v19805_v59, %v15782_v34  ;;  %v15510_v6 = vld [vmem:[%s20977_s27 + $0x1558] sm:$0xf0]  ;;  %v11880_v63 = vadd.f32 %v11879_v35, %v11867_v45 }
 0x592   : > { %12131 = vmatpush.bf16.msra.mxu2 %v15833_v26  ;;  %v19737_v56 = vld [vmem:[%s20977_s27 + $0x154c] sm:$0xf]  ;;  %v15913_v37 = vor.u32 %v19837_v51, %v15910_v8  ;;  %v15638_v26 = vld [vmem:[%s20977_s27 + $0x1658] sm:$0xf0] }
 0x593   : > { %12144 = vmatpush.bf16.msra.mxu3 %v15961_v40  ;;  %v19769_v3 = vld [vmem:[%s20977_s27 + $0x164c] sm:$0xf]  ;;  %v15766_v39 = vld [vmem:[%s20977_s27 + $0x1758] sm:$0xf0]  ;;  %v11892_v40 = vpop.f32.mrf.mxu3  ;;  %v15513_v27 = vor.u32 %v19737_v56, %v15510_v6  ;;  %v11868_v53 = vpop.f32.mrf.mxu1 }
 0x594   : > { %12106 = vmatpush.bf16.msra.mxu0 %v15561_v33  ;;  %v19801_v47 = vld [vmem:[%s20977_s27 + $0x174c] sm:$0xf]  ;;  %v15894_v22 = vld [vmem:[%s20977_s27 + $0x1858] sm:$0xf0]  ;;  %v24157_v31 = vadd.f32 %v11892_v40, %v11880_v63  ;;  %v15641_v33 = vor.u32 %v19769_v3, %v15638_v26 }
 0x595   : > { %12119 = vmatpush.bf16.msra.mxu1 %v15689_v62  ;;  %v19833_v36 = vld [vmem:[%s20977_s27 + $0x184c] sm:$0xf]  ;;  %v15769_v62 = vor.u32 %v19801_v47, %v15766_v39  ;;  %v15494_v0 = vld [vmem:[%s20977_s27 + $0x1538] sm:$0xf0] }
 0x596   : > { %12132 = vmatpush.bf16.msra.mxu2 %v15817_v54  ;;  %v19733_v54 = vld [vmem:[%s20977_s27 + $0x152c] sm:$0xf]  ;;  %v15622_v58 = vld [vmem:[%s20977_s27 + $0x1638] sm:$0xf0] }
 0x597   : > { %12145 = vmatpush.bf16.msra.mxu3 %v15945_v60  ;;  %v19765_v42 = vld [vmem:[%s20977_s27 + $0x162c] sm:$0xf]  ;;  %v15897_v60 = vor.u32 %v19833_v36, %v15894_v22  ;;  %v15750_v55 = vld [vmem:[%s20977_s27 + $0x1738] sm:$0xf0] }
 0x598   : > { %12107 = vmatpush.bf16.msra.mxu0 %v15545_v57  ;;  %v19797_v13 = vld [vmem:[%s20977_s27 + $0x172c] sm:$0xf]  ;;  %v15878_v5 = vld [vmem:[%s20977_s27 + $0x1838] sm:$0xf0]  ;;  %v15497_v57 = vor.u32 %v19733_v54, %v15494_v0  ;;  %v11881_v11 = vpop.f32.mrf.mxu2 }
 0x599   : > { %12120 = vmatpush.bf16.msra.mxu1 %v15673_v50  ;;  %v19829_v41 = vld [vmem:[%s20977_s27 + $0x182c] sm:$0xf]  ;;  %v15478_v50 = vld [vmem:[%s20977_s27 + $0x1518] sm:$0xf0]  ;;  %v15753_v46 = vor.u32 %v19797_v13, %v15750_v55 }
 0x59a   : > { %12133 = vmatpush.bf16.msra.mxu2 %v15801_v52  ;;  %v19729_v43 = vld [vmem:[%s20977_s27 + $0x150c] sm:$0xf]  ;;  %v15625_v52 = vor.u32 %v19765_v42, %v15622_v58  ;;  %v15606_v2 = vld [vmem:[%s20977_s27 + $0x1618] sm:$0xf0] }
 0x59b   : > { %12146 = vmatpush.bf16.msra.mxu3 %v15929_v10  ;;  %v19761_v9 = vld [vmem:[%s20977_s27 + $0x160c] sm:$0xf]  ;;  %v15881_v10 = vor.u32 %v19829_v41, %v15878_v5  ;;  %v15734_v32 = vld [vmem:[%s20977_s27 + $0x1718] sm:$0xf0]  ;;  %v11894_v51 = vpop.f32.mrf.mxu3 }
 0x59c   : > { %12108 = vmatpush.bf16.msra.mxu0 %v15529_v28  ;;  %v19793_v24 = vld [vmem:[%s20977_s27 + $0x170c] sm:$0xf]  ;;  %v15862_v34 = vld [vmem:[%s20977_s27 + $0x1818] sm:$0xf0]  ;;  %v15609_v3 = vor.u32 %v19761_v9, %v15606_v2 }
 0x59d   : > { %12121 = vmatpush.bf16.msra.mxu1 %v15657_v29  ;;  %v19825_v59 = vld [vmem:[%s20977_s27 + $0x180c] sm:$0xf]  ;;  %v16102_v45 = vld [vmem:[%s20977_s27 + $0x19f8] sm:$0xf0]  ;;  %v15481_v29 = vor.u32 %v19729_v43, %v15478_v50  ;;  %v15737_v35 = vor.u32 %v19793_v24, %v15734_v32 }
 0x59e   : > { %12134 = vmatpush.bf16.msra.mxu2 %v15785_v49  ;;  %v19885_v8 = vld [vmem:[%s20977_s27 + $0x19ec] sm:$0xf]  ;;  %v16230_v49 = vld [vmem:[%s20977_s27 + $0x1af8] sm:$0xf0]  ;;  %v15865_v47 = vor.u32 %v19825_v59, %v15862_v34 }
 0x59f   : > { %12147 = vmatpush.bf16.msra.mxu3 %v15913_v37  ;;  %v19917_v28 = vld [vmem:[%s20977_s27 + $0x1aec] sm:$0xf]  ;;  %v16358_v6 = vld [vmem:[%s20977_s27 + $0x1bf8] sm:$0xf0]  ;;  %v16105_v39 = vor.u32 %v19885_v8, %v16102_v45 }
 0x5a0   : > { %12109 = vmatpush.bf16.msra.mxu0 %v15513_v27  ;;  %v19949_v56 = vld [vmem:[%s20977_s27 + $0x1bec] sm:$0xf]  ;;  %v16486_v26 = vld [vmem:[%s20977_s27 + $0x1cf8] sm:$0xf0]  ;;  %v16233_v63 = vor.u32 %v19917_v28, %v16230_v49 }
 0x5a1   : > { %12122 = vmatpush.bf16.msra.mxu1 %v15641_v33  ;;  %v19981_v37 = vld [vmem:[%s20977_s27 + $0x1cec] sm:$0xf]  ;;  %v16361_v40 = vor.u32 %v19949_v56, %v16358_v6  ;;  %v16086_v22 = vld [vmem:[%s20977_s27 + $0x19d8] sm:$0xf0] }
 0x5a2   : > { %12135 = vmatpush.bf16.msra.mxu2 %v15769_v62  ;;  %v19881_v36 = vld [vmem:[%s20977_s27 + $0x19cc] sm:$0xf]  ;;  %v16489_v18 = vor.u32 %v19981_v37, %v16486_v26  ;;  %v16214_v33 = vld [vmem:[%s20977_s27 + $0x1ad8] sm:$0xf0] }
 0x5a3   : > { %12148 = vmatpush.bf16.msra.mxu3 %v15897_v60  ;;  %v19913_v27 = vld [vmem:[%s20977_s27 + $0x1acc] sm:$0xf]  ;;  %v16342_v54 = vld [vmem:[%s20977_s27 + $0x1bd8] sm:$0xf0]  ;;  %v16089_v53 = vor.u32 %v19881_v36, %v16086_v22 }
 0x5a4   : > { %12110 = vmatpush.bf16.msra.mxu0 %v15497_v57  ;;  %v19945_v62 = vld [vmem:[%s20977_s27 + $0x1bcc] sm:$0xf]  ;;  %v16470_v42 = vld [vmem:[%s20977_s27 + $0x1cd8] sm:$0xf0]  ;;  %v16217_v60 = vor.u32 %v19913_v27, %v16214_v33 }
 0x5a5   : > { %12123 = vmatpush.bf16.msra.mxu1 %v15625_v52  ;;  %v19977_v0 = vld [vmem:[%s20977_s27 + $0x1ccc] sm:$0xf]  ;;  %v16345_v58 = vor.u32 %v19945_v62, %v16342_v54  ;;  %v16070_v55 = vld [vmem:[%s20977_s27 + $0x19b8] sm:$0xf0] }
 0x5a6   : > { %12136 = vmatpush.bf16.msra.mxu2 %v15753_v46  ;;  %v19877_v13 = vld [vmem:[%s20977_s27 + $0x19ac] sm:$0xf]  ;;  %v16473_v5 = vor.u32 %v19977_v0, %v16470_v42  ;;  %v16198_v57 = vld [vmem:[%s20977_s27 + $0x1ab8] sm:$0xf0] }
 0x5a7   : > { %12149 = vmatpush.bf16.msra.mxu3 %v15881_v10  ;;  %v19909_v41 = vld [vmem:[%s20977_s27 + $0x1aac] sm:$0xf]  ;;  %v16326_v50 = vld [vmem:[%s20977_s27 + $0x1bb8] sm:$0xf0] }
 0x5a8   : > { %12111 = vmatpush.bf16.msra.mxu0 %v15481_v29  ;;  %v19941_v43 = vld [vmem:[%s20977_s27 + $0x1bac] sm:$0xf]  ;;  %v16454_v46 = vld [vmem:[%s20977_s27 + $0x1cb8] sm:$0xf0]  ;;  %v16201_v9 = vor.u32 %v19909_v41, %v16198_v57 }
 0x5a9   : > { %12124 = vmatpush.bf16.msra.mxu1 %v15609_v3  ;;  %v19973_v52 = vld [vmem:[%s20977_s27 + $0x1cac] sm:$0xf]  ;;  %v16329_v2 = vor.u32 %v19941_v43, %v16326_v50  ;;  %v16054_v11 = vld [vmem:[%s20977_s27 + $0x1998] sm:$0xf0]  ;;  %v11918_v28 = vpop.f32.mrf.mxu1 }
 0x5aa   : > { %12137 = vmatpush.bf16.msra.mxu2 %v15737_v35  ;;  %v19873_v24 = vld [vmem:[%s20977_s27 + $0x198c] sm:$0xf]  ;;  %v16182_v10 = vld [vmem:[%s20977_s27 + $0x1a98] sm:$0xf0] }
 0x5ab   : > { %12150 = vmatpush.bf16.msra.mxu3 %v15865_v47  ;;  %12112 = vmatmul.bf16.vlgmr.msra.gmra.mxu0 %v21495_v15  ;;  %v16073_v15 = vor.u32 %v19877_v13, %v16070_v55  ;;  %v19937_v32 = vld [vmem:[%s20977_s27 + $0x1b8c] sm:$0xf]  ;;  %v16310_v59 = vld [vmem:[%s20977_s27 + $0x1b98] sm:$0xf0]  ;;  %v16057_v45 = vor.u32 %v19873_v24, %v16054_v11 }
 0x5ac   : > { %12156 = vmatpush.bf16.msrb.mxu0 %v16105_v39  ;;  %12125 = vmatmul.bf16.vlgmr.msra.gmra.mxu1 %v21493_v14  ;;  %v16457_v14 = vor.u32 %v19973_v52, %v16454_v46  ;;  %v19969_v34 = vld [vmem:[%s20977_s27 + $0x1c8c] sm:$0xf]  ;;  %v16438_v51 = vld [vmem:[%s20977_s27 + $0x1c98] sm:$0xf0]  ;;  %v16313_v49 = vor.u32 %v19937_v32, %v16310_v59 }
 0x5ad   : > { %12169 = vmatpush.bf16.msrb.mxu1 %v16233_v63  ;;  %12138 = vmatmul.bf16.vlgmr.msra.gmra.mxu2 %v21499_v19  ;;  %v19905_v19 = vld [vmem:[%s20977_s27 + $0x1a8c] sm:$0xf]  ;;  %v16038_v6 = vld [vmem:[%s20977_s27 + $0x1978] sm:$0xf0]  ;;  %v16441_v35 = vor.u32 %v19969_v34, %v16438_v51 }
 0x5ae   : > { %12182 = vmatpush.bf16.msrb.mxu2 %v16361_v40  ;;  %12151 = vmatmul.bf16.vlgmr.msra.gmra.mxu3 %v21567_v7  ;;  %v11905_v7 = vpop.f32.mrf.mxu0  ;;  %v16185_v29 = vor.u32 %v19905_v19, %v16182_v10  ;;  %v19869_v56 = vld [vmem:[%s20977_s27 + $0x196c] sm:$0xf]  ;;  %v16166_v26 = vld [vmem:[%s20977_s27 + $0x1a78] sm:$0xf0] }
 0x5af   : > { %12195 = vmatpush.bf16.msrb.mxu3 %v16489_v18  ;;  %v11906_v8 = vadd.f32 %v11905_v7, %v24157_v31  ;;  %v19901_v3 = vld [vmem:[%s20977_s27 + $0x1a6c] sm:$0xf]  ;;  %v16294_v31 = vld [vmem:[%s20977_s27 + $0x1b78] sm:$0xf0]  ;;  %v16041_v40 = vor.u32 %v19869_v56, %v16038_v6 }
 0x5b0   : > { %12157 = vmatpush.bf16.msrb.mxu0 %v16089_v53  ;;  %v19933_v47 = vld [vmem:[%s20977_s27 + $0x1b6c] sm:$0xf]  ;;  %v16422_v63 = vld [vmem:[%s20977_s27 + $0x1c78] sm:$0xf0]  ;;  %v16169_v36 = vor.u32 %v19901_v3, %v16166_v26  ;;  %v11931_v54 = vpop.f32.mrf.mxu2 }
 0x5b1   : > { %12170 = vmatpush.bf16.msrb.mxu1 %v16217_v60  ;;  %v11919_v37 = vadd.f32 %v11918_v28, %v11906_v8  ;;  %v19965_v39 = vld [vmem:[%s20977_s27 + $0x1c6c] sm:$0xf]  ;;  %v16297_v22 = vor.u32 %v19933_v47, %v16294_v31  ;;  %v16022_v18 = vld [vmem:[%s20977_s27 + $0x1958] sm:$0xf0]  ;;  %v11920_v57 = vpop.f32.mrf.mxu1 }
 0x5b2   : > { %12183 = vmatpush.bf16.msrb.mxu2 %v16345_v58  ;;  %v19865_v27 = vld [vmem:[%s20977_s27 + $0x194c] sm:$0xf]  ;;  %v16425_v62 = vor.u32 %v19965_v39, %v16422_v63  ;;  %v16150_v0 = vld [vmem:[%s20977_s27 + $0x1a58] sm:$0xf0]  ;;  %v11944_v58 = vpop.f32.mrf.mxu3 }
 0x5b3   : > { %12196 = vmatpush.bf16.msrb.mxu3 %v16473_v5  ;;  %v19897_v33 = vld [vmem:[%s20977_s27 + $0x1a4c] sm:$0xf]  ;;  %v16278_v53 = vld [vmem:[%s20977_s27 + $0x1b58] sm:$0xf0]  ;;  %v11932_v60 = vadd.f32 %v11931_v54, %v11919_v37  ;;  %v16025_v5 = vor.u32 %v19865_v27, %v16022_v18 }
 0x5b4   : > { %12158 = vmatpush.bf16.msrb.mxu0 %v16073_v15  ;;  %v19929_v42 = vld [vmem:[%s20977_s27 + $0x1b4c] sm:$0xf]  ;;  %v16406_v55 = vld [vmem:[%s20977_s27 + $0x1c58] sm:$0xf0]  ;;  %v16153_v50 = vor.u32 %v19897_v33, %v16150_v0 }
 0x5b5   : > { %12171 = vmatpush.bf16.msrb.mxu1 %v16201_v9  ;;  %v19961_v13 = vld [vmem:[%s20977_s27 + $0x1c4c] sm:$0xf]  ;;  %v24228_v43 = vadd.f32 %v11944_v58, %v11932_v60  ;;  %v16281_v52 = vor.u32 %v19929_v42, %v16278_v53  ;;  %v16006_v15 = vld [vmem:[%s20977_s27 + $0x1938] sm:$0xf0] }
 0x5b6   : > { %12184 = vmatpush.bf16.msrb.mxu2 %v16329_v2  ;;  %v11907_v41 = vpop.f32.mrf.mxu0  ;;  %v19861_v46 = vld [vmem:[%s20977_s27 + $0x192c] sm:$0xf]  ;;  %v16409_v2 = vor.u32 %v19961_v13, %v16406_v55  ;;  %v16134_v24 = vld [vmem:[%s20977_s27 + $0x1a38] sm:$0xf0] }
 0x5b7   : > { %12197 = vmatpush.bf16.msrb.mxu3 %v16457_v14  ;;  %v19893_v9 = vld [vmem:[%s20977_s27 + $0x1a2c] sm:$0xf]  ;;  %v16262_v19 = vld [vmem:[%s20977_s27 + $0x1b38] sm:$0xf0]  ;;  %v16009_v32 = vor.u32 %v19861_v46, %v16006_v15 }
 0x5b8   : > { %12159 = vmatpush.bf16.msrb.mxu0 %v16057_v45  ;;  %v19925_v11 = vld [vmem:[%s20977_s27 + $0x1b2c] sm:$0xf]  ;;  %v16390_v10 = vld [vmem:[%s20977_s27 + $0x1c38] sm:$0xf0]  ;;  %v16137_v34 = vor.u32 %v19893_v9, %v16134_v24  ;;  %v11933_v3 = vpop.f32.mrf.mxu2 }
 0x5b9   : > { %12172 = vmatpush.bf16.msrb.mxu1 %v16185_v29  ;;  %v19957_v14 = vld [vmem:[%s20977_s27 + $0x1c2c] sm:$0xf]  ;;  %v15990_v7 = vld [vmem:[%s20977_s27 + $0x1918] sm:$0xf0]  ;;  %v16265_v51 = vor.u32 %v19925_v11, %v16262_v19 }
 0x5ba   : > { %12185 = vmatpush.bf16.msrb.mxu2 %v16313_v49  ;;  %v19857_v59 = vld [vmem:[%s20977_s27 + $0x190c] sm:$0xf]  ;;  %v16118_v45 = vld [vmem:[%s20977_s27 + $0x1a18] sm:$0xf0]  ;;  %v16393_v29 = vor.u32 %v19957_v14, %v16390_v10  ;;  %v11946_v47 = vpop.f32.mrf.mxu3 }
 0x5bb   : > { %12198 = vmatpush.bf16.msrb.mxu3 %v16441_v35  ;;  %v19889_v8 = vld [vmem:[%s20977_s27 + $0x1a0c] sm:$0xf]  ;;  %v16246_v49 = vld [vmem:[%s20977_s27 + $0x1b18] sm:$0xf0]  ;;  %v15993_v31 = vor.u32 %v19857_v59, %v15990_v7 }
 0x5bc   : > { %12160 = vmatpush.bf16.msrb.mxu0 %v16041_v40  ;;  %v19921_v28 = vld [vmem:[%s20977_s27 + $0x1b0c] sm:$0xf]  ;;  %v16374_v6 = vld [vmem:[%s20977_s27 + $0x1c18] sm:$0xf0] }
 0x5bd   : > { %12173 = vmatpush.bf16.msrb.mxu1 %v16169_v36  ;;  %v19953_v56 = vld [vmem:[%s20977_s27 + $0x1c0c] sm:$0xf]  ;;  %v16614_v37 = vld [vmem:[%s20977_s27 + $0x1df8] sm:$0xf0]  ;;  %v16121_v36 = vor.u32 %v19889_v8, %v16118_v45 }
 0x5be   : > { %12186 = vmatpush.bf16.msrb.mxu2 %v16297_v22  ;;  %v20013_v35 = vld [vmem:[%s20977_s27 + $0x1dec] sm:$0xf]  ;;  %v16742_v39 = vld [vmem:[%s20977_s27 + $0x1ef8] sm:$0xf0]  ;;  %v16249_v22 = vor.u32 %v19921_v28, %v16246_v49  ;;  %v16377_v33 = vor.u32 %v19953_v56, %v16374_v6 }
 0x5bf   : > { %12199 = vmatpush.bf16.msrb.mxu3 %v16425_v62  ;;  %v20045_v26 = vld [vmem:[%s20977_s27 + $0x1eec] sm:$0xf]  ;;  %v16870_v40 = vld [vmem:[%s20977_s27 + $0x1ff8] sm:$0xf0]  ;;  %v16617_v62 = vor.u32 %v20013_v35, %v16614_v37 }
 0x5c0   : > { %12161 = vmatpush.bf16.msrb.mxu0 %v16025_v5  ;;  %v20077_v63 = vld [vmem:[%s20977_s27 + $0x1fec] sm:$0xf]  ;;  %v16998_v18 = vld [vmem:[%s20977_s27 + $0x20f8] sm:$0xf0]  ;;  %v16745_v54 = vor.u32 %v20045_v26, %v16742_v39 }
 0x5c1   : > { %12174 = vmatpush.bf16.msrb.mxu1 %v16153_v50  ;;  %v20109_v27 = vld [vmem:[%s20977_s27 + $0x20ec] sm:$0xf]  ;;  %v16873_v0 = vor.u32 %v20077_v63, %v16870_v40  ;;  %v16598_v53 = vld [vmem:[%s20977_s27 + $0x1dd8] sm:$0xf0] }
 0x5c2   : > { %12187 = vmatpush.bf16.msrb.mxu2 %v16281_v52  ;;  %v20009_v42 = vld [vmem:[%s20977_s27 + $0x1dcc] sm:$0xf]  ;;  %v17001_v58 = vor.u32 %v20109_v27, %v16998_v18  ;;  %v16726_v13 = vld [vmem:[%s20977_s27 + $0x1ed8] sm:$0xf0] }
 0x5c3   : > { %12200 = vmatpush.bf16.msrb.mxu3 %v16409_v2  ;;  %v20041_v60 = vld [vmem:[%s20977_s27 + $0x1ecc] sm:$0xf]  ;;  %v16854_v41 = vld [vmem:[%s20977_s27 + $0x1fd8] sm:$0xf0]  ;;  %v16601_v50 = vor.u32 %v20009_v42, %v16598_v53 }
 0x5c4   : > { %12162 = vmatpush.bf16.msrb.mxu0 %v16009_v32  ;;  %v20073_v55 = vld [vmem:[%s20977_s27 + $0x1fcc] sm:$0xf]  ;;  %v16982_v57 = vld [vmem:[%s20977_s27 + $0x20d8] sm:$0xf0]  ;;  %v16729_v52 = vor.u32 %v20041_v60, %v16726_v13 }
 0x5c5   : > { %12175 = vmatpush.bf16.msrb.mxu1 %v16137_v34  ;;  %v20105_v5 = vld [vmem:[%s20977_s27 + $0x20cc] sm:$0xf]  ;;  %v16857_v46 = vor.u32 %v20073_v55, %v16854_v41  ;;  %v16582_v9 = vld [vmem:[%s20977_s27 + $0x1db8] sm:$0xf0] }
 0x5c6   : > { %12188 = vmatpush.bf16.msrb.mxu2 %v16265_v51  ;;  %v20005_v15 = vld [vmem:[%s20977_s27 + $0x1dac] sm:$0xf]  ;;  %v16985_v24 = vor.u32 %v20105_v5, %v16982_v57  ;;  %v16710_v11 = vld [vmem:[%s20977_s27 + $0x1eb8] sm:$0xf0] }
 0x5c7   : > { %12201 = vmatpush.bf16.msrb.mxu3 %v16393_v29  ;;  %v20037_v2 = vld [vmem:[%s20977_s27 + $0x1eac] sm:$0xf]  ;;  %v16838_v14 = vld [vmem:[%s20977_s27 + $0x1fb8] sm:$0xf0] }
 0x5c8   : > { %12163 = vmatpush.bf16.msrb.mxu0 %v15993_v31  ;;  %v20069_v19 = vld [vmem:[%s20977_s27 + $0x1fac] sm:$0xf]  ;;  %v16966_v32 = vld [vmem:[%s20977_s27 + $0x20b8] sm:$0xf0]  ;;  %v16713_v59 = vor.u32 %v20037_v2, %v16710_v11 }
 0x5c9   : > { %12176 = vmatpush.bf16.msrb.mxu1 %v16121_v36  ;;  %v20101_v10 = vld [vmem:[%s20977_s27 + $0x20ac] sm:$0xf]  ;;  %v16841_v7 = vor.u32 %v20069_v19, %v16838_v14  ;;  %v16566_v51 = vld [vmem:[%s20977_s27 + $0x1d98] sm:$0xf0]  ;;  %v11970_v3 = vpop.f32.mrf.mxu1 }
 0x5ca   : > { %12189 = vmatpush.bf16.msrb.mxu2 %v16249_v22  ;;  %v20001_v34 = vld [vmem:[%s20977_s27 + $0x1d8c] sm:$0xf]  ;;  %v16694_v8 = vld [vmem:[%s20977_s27 + $0x1e98] sm:$0xf0] }
 0x5cb   : > { %12202 = vmatpush.bf16.msrb.mxu3 %v16377_v33  ;;  %12164 = vmatmul.bf16.vlgmr.msrb.gmra.mxu0 %v21574_v17  ;;  %v16585_v17 = vor.u32 %v20005_v15, %v16582_v9  ;;  %v20065_v45 = vld [vmem:[%s20977_s27 + $0x1f8c] sm:$0xf]  ;;  %v16822_v28 = vld [vmem:[%s20977_s27 + $0x1f98] sm:$0xf0]  ;;  %v16569_v6 = vor.u32 %v20001_v34, %v16566_v51 }
 0x5cc   : > { %12208 = vmatpush.bf16.msra.mxu0 %v16617_v62  ;;  %12177 = vmatmul.bf16.vlgmr.msrb.gmra.mxu1 %v21572_v16  ;;  %v16969_v16 = vor.u32 %v20101_v10, %v16966_v32  ;;  %v20097_v29 = vld [vmem:[%s20977_s27 + $0x208c] sm:$0xf]  ;;  %v16950_v49 = vld [vmem:[%s20977_s27 + $0x2098] sm:$0xf0]  ;;  %v16825_v37 = vor.u32 %v20065_v45, %v16822_v28 }
 0x5cd   : > { %12221 = vmatpush.bf16.msra.mxu1 %v16745_v54  ;;  %12190 = vmatmul.bf16.vlgmr.msrb.gmra.mxu2 %v21578_v21  ;;  %v20033_v21 = vld [vmem:[%s20977_s27 + $0x1e8c] sm:$0xf]  ;;  %v16550_v47 = vld [vmem:[%s20977_s27 + $0x1d78] sm:$0xf0]  ;;  %v16953_v39 = vor.u32 %v20097_v29, %v16950_v49 }
 0x5ce   : > { %12234 = vmatpush.bf16.msra.mxu2 %v16873_v0  ;;  %12203 = vmatmul.bf16.vlgmr.msrb.gmra.mxu3 %v21647_v12  ;;  %v11957_v12 = vpop.f32.mrf.mxu0  ;;  %v16697_v35 = vor.u32 %v20033_v21, %v16694_v8  ;;  %v19997_v26 = vld [vmem:[%s20977_s27 + $0x1d6c] sm:$0xf]  ;;  %v16678_v40 = vld [vmem:[%s20977_s27 + $0x1e78] sm:$0xf0] }
 0x5cf   : > { %12247 = vmatpush.bf16.msra.mxu3 %v17001_v58  ;;  %v11958_v56 = vadd.f32 %v11957_v12, %v24228_v43  ;;  %v20029_v31 = vld [vmem:[%s20977_s27 + $0x1e6c] sm:$0xf]  ;;  %v16806_v43 = vld [vmem:[%s20977_s27 + $0x1f78] sm:$0xf0]  ;;  %v16553_v18 = vor.u32 %v19997_v26, %v16550_v47 }
 0x5d0   : > { %12209 = vmatpush.bf16.msra.mxu0 %v16601_v50  ;;  %v20061_v36 = vld [vmem:[%s20977_s27 + $0x1f6c] sm:$0xf]  ;;  %v16934_v27 = vld [vmem:[%s20977_s27 + $0x2078] sm:$0xf0]  ;;  %v16681_v33 = vor.u32 %v20029_v31, %v16678_v40  ;;  %v11983_v60 = vpop.f32.mrf.mxu2 }
 0x5d1   : > { %12222 = vmatpush.bf16.msra.mxu1 %v16729_v52  ;;  %v11971_v63 = vadd.f32 %v11970_v3, %v11958_v56  ;;  %v20093_v22 = vld [vmem:[%s20977_s27 + $0x206c] sm:$0xf]  ;;  %v16809_v62 = vor.u32 %v20061_v36, %v16806_v43  ;;  %v16534_v0 = vld [vmem:[%s20977_s27 + $0x1d58] sm:$0xf0]  ;;  %v11996_v5 = vpop.f32.mrf.mxu3  ;;  %v11972_v15 = vpop.f32.mrf.mxu1 }
 0x5d2   : > { %12235 = vmatpush.bf16.msra.mxu2 %v16857_v46  ;;  %v19993_v54 = vld [vmem:[%s20977_s27 + $0x1d4c] sm:$0xf]  ;;  %v16937_v53 = vor.u32 %v20093_v22, %v16934_v27  ;;  %v16662_v58 = vld [vmem:[%s20977_s27 + $0x1e58] sm:$0xf0] }
 0x5d3   : > { %12248 = vmatpush.bf16.msra.mxu3 %v16985_v24  ;;  %v20025_v42 = vld [vmem:[%s20977_s27 + $0x1e4c] sm:$0xf]  ;;  %v16790_v55 = vld [vmem:[%s20977_s27 + $0x1f58] sm:$0xf0]  ;;  %v11984_v41 = vadd.f32 %v11983_v60, %v11971_v63  ;;  %v16537_v46 = vor.u32 %v19993_v54, %v16534_v0 }
 0x5d4   : > { %12210 = vmatpush.bf16.msra.mxu0 %v16585_v17  ;;  %v20057_v13 = vld [vmem:[%s20977_s27 + $0x1f4c] sm:$0xf]  ;;  %v16918_v50 = vld [vmem:[%s20977_s27 + $0x2058] sm:$0xf0]  ;;  %v16665_v2 = vor.u32 %v20025_v42, %v16662_v58 }
 0x5d5   : > { %12223 = vmatpush.bf16.msra.mxu1 %v16713_v59  ;;  %v20089_v57 = vld [vmem:[%s20977_s27 + $0x204c] sm:$0xf]  ;;  %v24299_v9 = vadd.f32 %v11996_v5, %v11984_v41  ;;  %v16793_v24 = vor.u32 %v20057_v13, %v16790_v55  ;;  %v16518_v19 = vld [vmem:[%s20977_s27 + $0x1d38] sm:$0xf0] }
 0x5d6   : > { %12236 = vmatpush.bf16.msra.mxu2 %v16841_v7  ;;  %v11959_v52 = vpop.f32.mrf.mxu0  ;;  %v19989_v11 = vld [vmem:[%s20977_s27 + $0x1d2c] sm:$0xf]  ;;  %v16921_v10 = vor.u32 %v20089_v57, %v16918_v50  ;;  %v16646_v32 = vld [vmem:[%s20977_s27 + $0x1e38] sm:$0xf0] }
 0x5d7   : > { %12249 = vmatpush.bf16.msra.mxu3 %v16969_v16  ;;  %v20021_v14 = vld [vmem:[%s20977_s27 + $0x1e2c] sm:$0xf]  ;;  %v16774_v59 = vld [vmem:[%s20977_s27 + $0x1f38] sm:$0xf0]  ;;  %v16521_v51 = vor.u32 %v19989_v11, %v16518_v19 }
 0x5d8   : > { %12211 = vmatpush.bf16.msra.mxu0 %v16569_v6  ;;  %v20053_v17 = vld [vmem:[%s20977_s27 + $0x1f2c] sm:$0xf]  ;;  %v16902_v34 = vld [vmem:[%s20977_s27 + $0x2038] sm:$0xf0]  ;;  %v16649_v8 = vor.u32 %v20021_v14, %v16646_v32 }
 0x5d9   : > { %12224 = vmatpush.bf16.msra.mxu1 %v16697_v35  ;;  %v20085_v7 = vld [vmem:[%s20977_s27 + $0x202c] sm:$0xf]  ;;  %v16502_v16 = vld [vmem:[%s20977_s27 + $0x1d18] sm:$0xf0]  ;;  %v16777_v45 = vor.u32 %v20053_v17, %v16774_v59  ;;  %v11985_v35 = vpop.f32.mrf.mxu2  ;;  %v11998_v31 = vpop.f32.mrf.mxu3 }
 0x5da   : > { %12237 = vmatpush.bf16.msra.mxu2 %v16825_v37  ;;  %v19985_v21 = vld [vmem:[%s20977_s27 + $0x1d0c] sm:$0xf]  ;;  %v16630_v12 = vld [vmem:[%s20977_s27 + $0x1e18] sm:$0xf0]  ;;  %v16905_v49 = vor.u32 %v20085_v7, %v16902_v34 }
 0x5db   : > { %12250 = vmatpush.bf16.msra.mxu3 %v16953_v39  ;;  %v20017_v28 = vld [vmem:[%s20977_s27 + $0x1e0c] sm:$0xf]  ;;  %v16758_v56 = vld [vmem:[%s20977_s27 + $0x1f18] sm:$0xf0]  ;;  %v16505_v39 = vor.u32 %v19985_v21, %v16502_v16 }
 0x5dc   : > { %12212 = vmatpush.bf16.msra.mxu0 %v16553_v18  ;;  %v20049_v29 = vld [vmem:[%s20977_s27 + $0x1f0c] sm:$0xf]  ;;  %v16886_v3 = vld [vmem:[%s20977_s27 + $0x2018] sm:$0xf0]  ;;  %v16633_v43 = vor.u32 %v20017_v28, %v16630_v12 }
 0x5dd   : > { %12225 = vmatpush.bf16.msra.mxu1 %v16681_v33  ;;  %v20081_v6 = vld [vmem:[%s20977_s27 + $0x200c] sm:$0xf]  ;;  %v17126_v26 = vld [vmem:[%s20977_s27 + $0x21f8] sm:$0xf0]  ;;  %v16761_v22 = vor.u32 %v20049_v29, %v16758_v56 }
 0x5de   : > { %12238 = vmatpush.bf16.msra.mxu2 %v16809_v62  ;;  %v20141_v37 = vld [vmem:[%s20977_s27 + $0x21ec] sm:$0xf]  ;;  %v17254_v63 = vld [vmem:[%s20977_s27 + $0x22f8] sm:$0xf0]  ;;  %v16889_v33 = vor.u32 %v20081_v6, %v16886_v3 }
 0x5df   : > { %12251 = vmatpush.bf16.msra.mxu3 %v16937_v53  ;;  %v20173_v47 = vld [vmem:[%s20977_s27 + $0x22ec] sm:$0xf]  ;;  %v17382_v36 = vld [vmem:[%s20977_s27 + $0x23f8] sm:$0xf0]  ;;  %v17129_v62 = vor.u32 %v20141_v37, %v17126_v26 }
 0x5e0   : > { %12213 = vmatpush.bf16.msra.mxu0 %v16537_v46  ;;  %v20205_v40 = vld [vmem:[%s20977_s27 + $0x23ec] sm:$0xf]  ;;  %v17510_v18 = vld [vmem:[%s20977_s27 + $0x24f8] sm:$0xf0]  ;;  %v17257_v54 = vor.u32 %v20173_v47, %v17254_v63 }
 0x5e1   : > { %12226 = vmatpush.bf16.msra.mxu1 %v16665_v2  ;;  %v20237_v27 = vld [vmem:[%s20977_s27 + $0x24ec] sm:$0xf]  ;;  %v17385_v0 = vor.u32 %v20205_v40, %v17382_v36  ;;  %v17110_v53 = vld [vmem:[%s20977_s27 + $0x21d8] sm:$0xf0] }
 0x5e2   : > { %12239 = vmatpush.bf16.msra.mxu2 %v16793_v24  ;;  %v20137_v42 = vld [vmem:[%s20977_s27 + $0x21cc] sm:$0xf]  ;;  %v17513_v58 = vor.u32 %v20237_v27, %v17510_v18  ;;  %v17238_v13 = vld [vmem:[%s20977_s27 + $0x22d8] sm:$0xf0] }
 0x5e3   : > { %12252 = vmatpush.bf16.msra.mxu3 %v16921_v10  ;;  %v20169_v60 = vld [vmem:[%s20977_s27 + $0x22cc] sm:$0xf]  ;;  %v17366_v41 = vld [vmem:[%s20977_s27 + $0x23d8] sm:$0xf0]  ;;  %v17113_v50 = vor.u32 %v20137_v42, %v17110_v53 }
 0x5e4   : > { %12214 = vmatpush.bf16.msra.mxu0 %v16521_v51  ;;  %v20201_v55 = vld [vmem:[%s20977_s27 + $0x23cc] sm:$0xf]  ;;  %v17494_v57 = vld [vmem:[%s20977_s27 + $0x24d8] sm:$0xf0]  ;;  %v17241_v52 = vor.u32 %v20169_v60, %v17238_v13 }
 0x5e5   : > { %12227 = vmatpush.bf16.msra.mxu1 %v16649_v8  ;;  %v20233_v5 = vld [vmem:[%s20977_s27 + $0x24cc] sm:$0xf]  ;;  %v17369_v46 = vor.u32 %v20201_v55, %v17366_v41  ;;  %v17094_v2 = vld [vmem:[%s20977_s27 + $0x21b8] sm:$0xf0] }
 0x5e6   : > { %12240 = vmatpush.bf16.msra.mxu2 %v16777_v45  ;;  %v20133_v15 = vld [vmem:[%s20977_s27 + $0x21ac] sm:$0xf]  ;;  %v17497_v11 = vor.u32 %v20233_v5, %v17494_v57  ;;  %v17222_v19 = vld [vmem:[%s20977_s27 + $0x22b8] sm:$0xf0] }
 0x5e7   : > { %12253 = vmatpush.bf16.msra.mxu3 %v16905_v49  ;;  %v20165_v24 = vld [vmem:[%s20977_s27 + $0x22ac] sm:$0xf]  ;;  %v17350_v10 = vld [vmem:[%s20977_s27 + $0x23b8] sm:$0xf0] }
 0x5e8   : > { %12215 = vmatpush.bf16.msra.mxu0 %v16505_v39  ;;  %v20197_v14 = vld [vmem:[%s20977_s27 + $0x23ac] sm:$0xf]  ;;  %v17478_v17 = vld [vmem:[%s20977_s27 + $0x24b8] sm:$0xf0]  ;;  %v17225_v59 = vor.u32 %v20165_v24, %v17222_v19 }
 0x5e9   : > { %12228 = vmatpush.bf16.msra.mxu1 %v16633_v43  ;;  %v20229_v32 = vld [vmem:[%s20977_s27 + $0x24ac] sm:$0xf]  ;;  %v17353_v7 = vor.u32 %v20197_v14, %v17350_v10  ;;  %v17078_v51 = vld [vmem:[%s20977_s27 + $0x2198] sm:$0xf0]  ;;  %v12022_v49 = vpop.f32.mrf.mxu1 }
 0x5ea   : > { %12241 = vmatpush.bf16.msra.mxu2 %v16761_v22  ;;  %v20129_v34 = vld [vmem:[%s20977_s27 + $0x218c] sm:$0xf]  ;;  %v17206_v21 = vld [vmem:[%s20977_s27 + $0x2298] sm:$0xf0] }
 0x5eb   : > { %12254 = vmatpush.bf16.msra.mxu3 %v16889_v33  ;;  %12216 = vmatmul.bf16.vlgmr.msra.gmra.mxu0 %v21654_v38  ;;  %v17097_v38 = vor.u32 %v20133_v15, %v17094_v2  ;;  %v20193_v16 = vld [vmem:[%s20977_s27 + $0x238c] sm:$0xf]  ;;  %v17334_v8 = vld [vmem:[%s20977_s27 + $0x2398] sm:$0xf0]  ;;  %v17081_v29 = vor.u32 %v20129_v34, %v17078_v51 }
 0x5ec   : > { %12260 = vmatpush.bf16.msrb.mxu0 %v17129_v62  ;;  %12229 = vmatmul.bf16.vlgmr.msra.gmra.mxu1 %v21652_v30  ;;  %v17481_v30 = vor.u32 %v20229_v32, %v17478_v17  ;;  %v20225_v45 = vld [vmem:[%s20977_s27 + $0x248c] sm:$0xf]  ;;  %v17462_v28 = vld [vmem:[%s20977_s27 + $0x2498] sm:$0xf0]  ;;  %v17337_v6 = vor.u32 %v20193_v16, %v17334_v8 }
 0x5ed   : > { %12273 = vmatpush.bf16.msrb.mxu1 %v17257_v54  ;;  %12242 = vmatmul.bf16.vlgmr.msra.gmra.mxu2 %v21658_v44  ;;  %v20161_v44 = vld [vmem:[%s20977_s27 + $0x228c] sm:$0xf]  ;;  %v17062_v35 = vld [vmem:[%s20977_s27 + $0x2178] sm:$0xf0]  ;;  %v17465_v26 = vor.u32 %v20225_v45, %v17462_v28 }
 0x5ee   : > { %12286 = vmatpush.bf16.msrb.mxu2 %v17385_v0  ;;  %12255 = vmatmul.bf16.vlgmr.msra.gmra.mxu3 %v24694_v1  ;;  %v12009_v1 = vpop.f32.mrf.mxu0  ;;  %v17209_v56 = vor.u32 %v20161_v44, %v17206_v21  ;;  %v20125_v3 = vld [vmem:[%s20977_s27 + $0x216c] sm:$0xf]  ;;  %v17190_v31 = vld [vmem:[%s20977_s27 + $0x2278] sm:$0xf0] }
 0x5ef   : > { %12299 = vmatpush.bf16.msrb.mxu3 %v17513_v58  ;;  %v12010_v12 = vadd.f32 %v12009_v1, %v24299_v9  ;;  %v20157_v37 = vld [vmem:[%s20977_s27 + $0x226c] sm:$0xf]  ;;  %v17318_v9 = vld [vmem:[%s20977_s27 + $0x2378] sm:$0xf0]  ;;  %v17065_v36 = vor.u32 %v20125_v3, %v17062_v35 }
 0x5f0   : > { %12261 = vmatpush.bf16.msrb.mxu0 %v17113_v50  ;;  %v20189_v39 = vld [vmem:[%s20977_s27 + $0x236c] sm:$0xf]  ;;  %v17446_v40 = vld [vmem:[%s20977_s27 + $0x2478] sm:$0xf0]  ;;  %v17193_v43 = vor.u32 %v20157_v37, %v17190_v31  ;;  %v12035_v54 = vpop.f32.mrf.mxu2 }
 0x5f1   : > { %12274 = vmatpush.bf16.msrb.mxu1 %v17241_v52  ;;  %v12023_v47 = vadd.f32 %v12022_v49, %v12010_v12  ;;  %v20221_v63 = vld [vmem:[%s20977_s27 + $0x246c] sm:$0xf]  ;;  %v17321_v22 = vor.u32 %v20189_v39, %v17318_v9  ;;  %v17046_v18 = vld [vmem:[%s20977_s27 + $0x2158] sm:$0xf0]  ;;  %v12048_v58 = vpop.f32.mrf.mxu3  ;;  %v12024_v57 = vpop.f32.mrf.mxu1 }
 0x5f2   : > { %12287 = vmatpush.bf16.msrb.mxu2 %v17369_v46  ;;  %v20121_v27 = vld [vmem:[%s20977_s27 + $0x214c] sm:$0xf]  ;;  %v17449_v62 = vor.u32 %v20221_v63, %v17446_v40  ;;  %v17174_v0 = vld [vmem:[%s20977_s27 + $0x2258] sm:$0xf0] }
 0x5f3   : > { %12300 = vmatpush.bf16.msrb.mxu3 %v17497_v11  ;;  %v20153_v33 = vld [vmem:[%s20977_s27 + $0x224c] sm:$0xf]  ;;  %v17302_v53 = vld [vmem:[%s20977_s27 + $0x2358] sm:$0xf0]  ;;  %v12036_v60 = vadd.f32 %v12035_v54, %v12023_v47  ;;  %v17049_v5 = vor.u32 %v20121_v27, %v17046_v18 }
 0x5f4   : > { %12262 = vmatpush.bf16.msrb.mxu0 %v17097_v38  ;;  %v20185_v42 = vld [vmem:[%s20977_s27 + $0x234c] sm:$0xf]  ;;  %v17430_v55 = vld [vmem:[%s20977_s27 + $0x2458] sm:$0xf0]  ;;  %v17177_v52 = vor.u32 %v20153_v33, %v17174_v0 }
 0x5f5   : > { %12275 = vmatpush.bf16.msrb.mxu1 %v17225_v59  ;;  %v20217_v13 = vld [vmem:[%s20977_s27 + $0x244c] sm:$0xf]  ;;  %v24370_v50 = vadd.f32 %v12048_v58, %v12036_v60  ;;  %v17305_v46 = vor.u32 %v20185_v42, %v17302_v53  ;;  %v17030_v2 = vld [vmem:[%s20977_s27 + $0x2138] sm:$0xf0] }
 0x5f6   : > { %12288 = vmatpush.bf16.msrb.mxu2 %v17353_v7  ;;  %v12011_v41 = vpop.f32.mrf.mxu0  ;;  %v20117_v15 = vld [vmem:[%s20977_s27 + $0x212c] sm:$0xf]  ;;  %v17433_v11 = vor.u32 %v20217_v13, %v17430_v55  ;;  %v17158_v19 = vld [vmem:[%s20977_s27 + $0x2238] sm:$0xf0] }
 0x5f7   : > { %12301 = vmatpush.bf16.msrb.mxu3 %v17481_v30  ;;  %v20149_v24 = vld [vmem:[%s20977_s27 + $0x222c] sm:$0xf]  ;;  %v17286_v10 = vld [vmem:[%s20977_s27 + $0x2338] sm:$0xf0]  ;;  %v17033_v38 = vor.u32 %v20117_v15, %v17030_v2 }
 0x5f8   : > { %12263 = vmatpush.bf16.msrb.mxu0 %v17081_v29  ;;  %v20181_v14 = vld [vmem:[%s20977_s27 + $0x232c] sm:$0xf]  ;;  %v17414_v17 = vld [vmem:[%s20977_s27 + $0x2438] sm:$0xf0]  ;;  %v17161_v34 = vor.u32 %v20149_v24, %v17158_v19  ;;  %v12037_v28 = vpop.f32.mrf.mxu2 }
 0x5f9   : > { %12276 = vmatpush.bf16.msrb.mxu1 %v17209_v56  ;;  %v20213_v32 = vld [vmem:[%s20977_s27 + $0x242c] sm:$0xf]  ;;  %v17014_v7 = vld [vmem:[%s20977_s27 + $0x2118] sm:$0xf0]  ;;  %v17289_v51 = vor.u32 %v20181_v14, %v17286_v10  ;;  %v12050_v56 = vpop.f32.mrf.mxu3  ;;  %v24725_v14 = vld [vmem:[#allocation16_spill] sm:$0xff] }
 0x5fa   : > { %12289 = vmatpush.bf16.msrb.mxu2 %v17337_v6  ;;  %v20113_v59 = vld [vmem:[%s20977_s27 + $0x210c] sm:$0xf]  ;;  %v17142_v30 = vld [vmem:[%s20977_s27 + $0x2218] sm:$0xf0]  ;;  %v17417_v16 = vor.u32 %v20213_v32, %v17414_v17 }
 0x5fb   : > { %12302 = vmatpush.bf16.msrb.mxu3 %v17465_v26  ;;  %v20145_v44 = vld [vmem:[%s20977_s27 + $0x220c] sm:$0xf]  ;;  %v17270_v8 = vld [vmem:[%s20977_s27 + $0x2318] sm:$0xf0]  ;;  %v17017_v6 = vor.u32 %v20113_v59, %v17014_v7 }
 0x5fc   : > { %12264 = vmatpush.bf16.msrb.mxu0 %v17065_v36  ;;  %v20177_v21 = vld [vmem:[%s20977_s27 + $0x230c] sm:$0xf]  ;;  %v17398_v45 = vld [vmem:[%s20977_s27 + $0x2418] sm:$0xf0]  ;;  %v17145_v26 = vor.u32 %v20145_v44, %v17142_v30 }
 0x5fd   : > { %12277 = vmatpush.bf16.msrb.mxu1 %v17193_v43  ;;  %v20209_v1 = vld [vmem:[%s20977_s27 + $0x240c] sm:$0xf]  ;;  %v17638_v29 = vld [vmem:[%s20977_s27 + $0x25f8] sm:$0xf0]  ;;  %v17273_v47 = vor.u32 %v20177_v21, %v17270_v8 }
 0x5fe   : > { %12290 = vmatpush.bf16.msrb.mxu2 %v17321_v22  ;;  %v20269_v12 = vld [vmem:[%s20977_s27 + $0x25ec] sm:$0xf]  ;;  %v17766_v3 = vld [vmem:[%s20977_s27 + $0x26f8] sm:$0xf0]  ;;  %v17401_v9 = vor.u32 %v20209_v1, %v17398_v45 }
 0x5ff   : > { %12303 = vmatpush.bf16.msrb.mxu3 %v17449_v62  ;;  %v20301_v49 = vld [vmem:[%s20977_s27 + $0x26ec] sm:$0xf]  ;;  %v17894_v37 = vld [vmem:[%s20977_s27 + $0x27f8] sm:$0xf0]  ;;  %v17641_v63 = vor.u32 %v20269_v12, %v17638_v29 }
 0x600   : > { %12265 = vmatpush.bf16.msrb.mxu0 %v17049_v5  ;;  %v20333_v35 = vld [vmem:[%s20977_s27 + $0x27ec] sm:$0xf]  ;;  %v18022_v39 = vld [vmem:[%s20977_s27 + $0x28f8] sm:$0xf0]  ;;  %v17769_v40 = vor.u32 %v20301_v49, %v17766_v3  ;;  %v24722_v5 = vld [vmem:[#allocation14_spill] sm:$0xff] }
 0x601   : > { %12278 = vmatpush.bf16.msrb.mxu1 %v17177_v52  ;;  %v20365_v31 = vld [vmem:[%s20977_s27 + $0x28ec] sm:$0xf]  ;;  %v17897_v36 = vor.u32 %v20333_v35, %v17894_v37  ;;  %v17622_v22 = vld [vmem:[%s20977_s27 + $0x25d8] sm:$0xf0] }
 0x602   : > { %12291 = vmatpush.bf16.msrb.mxu2 %v17305_v46  ;;  %v20265_v43 = vld [vmem:[%s20977_s27 + $0x25cc] sm:$0xf]  ;;  %v18025_v18 = vor.u32 %v20365_v31, %v18022_v39  ;;  %v17750_v33 = vld [vmem:[%s20977_s27 + $0x26d8] sm:$0xf0] }
 0x603   : > { %12304 = vmatpush.bf16.msrb.mxu3 %v17433_v11  ;;  %v20297_v27 = vld [vmem:[%s20977_s27 + $0x26cc] sm:$0xf]  ;;  %v17878_v54 = vld [vmem:[%s20977_s27 + $0x27d8] sm:$0xf0]  ;;  %v17625_v53 = vor.u32 %v20265_v43, %v17622_v22 }
 0x604   : > { %12266 = vmatpush.bf16.msrb.mxu0 %v17033_v38  ;;  %v20329_v62 = vld [vmem:[%s20977_s27 + $0x27cc] sm:$0xf]  ;;  %v18006_v42 = vld [vmem:[%s20977_s27 + $0x28d8] sm:$0xf0]  ;;  %v17753_v60 = vor.u32 %v20297_v27, %v17750_v33 }
 0x605   : > { %12279 = vmatpush.bf16.msrb.mxu1 %v17161_v34  ;;  %v20361_v0 = vld [vmem:[%s20977_s27 + $0x28cc] sm:$0xf]  ;;  %v17881_v58 = vor.u32 %v20329_v62, %v17878_v54  ;;  %v17606_v55 = vld [vmem:[%s20977_s27 + $0x25b8] sm:$0xf0] }
 0x606   : > { %12292 = vmatpush.bf16.msrb.mxu2 %v17289_v51  ;;  %v20261_v13 = vld [vmem:[%s20977_s27 + $0x25ac] sm:$0xf]  ;;  %v18009_v57 = vor.u32 %v20361_v0, %v18006_v42  ;;  %v17734_v52 = vld [vmem:[%s20977_s27 + $0x26b8] sm:$0xf0] }
 0x607   : > { %12305 = vmatpush.bf16.msrb.mxu3 %v17417_v16  ;;  %v20293_v41 = vld [vmem:[%s20977_s27 + $0x26ac] sm:$0xf]  ;;  %v17862_v15 = vld [vmem:[%s20977_s27 + $0x27b8] sm:$0xf0]  ;;  %v17609_v10 = vor.u32 %v20261_v13, %v17606_v55 }
 0x608   : > { %12267 = vmatpush.bf16.msrb.mxu0 %v17017_v6  ;;  %v20325_v46 = vld [vmem:[%s20977_s27 + $0x27ac] sm:$0xf]  ;;  %v24724_v24 = vld [vmem:[#allocation13_spill] sm:$0xff]  ;;  %v17737_v32 = vor.u32 %v20293_v41, %v17734_v52  ;;  %v12061_v21 = vpop.f32.mrf.mxu0 }
 0x609   : > { %12280 = vmatpush.bf16.msrb.mxu1 %v17145_v26  ;;  %v24723_v2 = vld [vmem:[#allocation15_spill] sm:$0xff]  ;;  %v17990_v19 = vld [vmem:[%s20977_s27 + $0x28b8] sm:$0xf0]  ;;  %v17865_v17 = vor.u32 %v20325_v46, %v17862_v15  ;;  %v12062_v1 = vadd.f32 %v12061_v21, %v24370_v50  ;;  %v12074_v28 = vpop.f32.mrf.mxu1 }
 0x60a   : > { %12293 = vmatpush.bf16.msrb.mxu2 %v17273_v47  ;;  %v20357_v11 = vld [vmem:[%s20977_s27 + $0x28ac] sm:$0xf]  ;;  %v17590_v59 = vld [vmem:[%s20977_s27 + $0x2598] sm:$0xf0] }
 0x60b   : > { %12306 = vmatpush.bf16.msrb.mxu3 %v17401_v9  ;;  %12268 = vmatmul.bf16.vlgmr.msrb.gmra.mxu0 %v24722_v5  ;;  %v20257_v38 = vld [vmem:[%s20977_s27 + $0x258c] sm:$0xf]  ;;  %v17993_v34 = vor.u32 %v20357_v11, %v17990_v19  ;;  %v17718_v51 = vld [vmem:[%s20977_s27 + $0x2698] sm:$0xf0]  ;;  %v12075_v35 = vadd.f32 %v12074_v28, %v12062_v1 }
 0x60c   : > { %12312 = vmatpush.bf16.msra.mxu0 %v17641_v63  ;;  %12281 = vmatmul.bf16.vlgmr.msrb.gmra.mxu1 %v24724_v24  ;;  %v20289_v7 = vld [vmem:[%s20977_s27 + $0x268c] sm:$0xf]  ;;  %v17846_v30 = vld [vmem:[%s20977_s27 + $0x2798] sm:$0xf0]  ;;  %v17593_v45 = vor.u32 %v20257_v38, %v17590_v59 }
 0x60d   : > { %12325 = vmatpush.bf16.msra.mxu1 %v17769_v40  ;;  %12294 = vmatmul.bf16.vlgmr.msrb.gmra.mxu2 %v24723_v2  ;;  %v20321_v44 = vld [vmem:[%s20977_s27 + $0x278c] sm:$0xf]  ;;  %v17974_v8 = vld [vmem:[%s20977_s27 + $0x2898] sm:$0xf0]  ;;  %v17721_v12 = vor.u32 %v20289_v7, %v17718_v51 }
 0x60e   : > { %12338 = vmatpush.bf16.msra.mxu2 %v17897_v36  ;;  %12307 = vmatmul.bf16.vlgmr.msrb.gmra.mxu3 %v24725_v14  ;;  %v20353_v16 = vld [vmem:[%s20977_s27 + $0x288c] sm:$0xf]  ;;  %v17849_v29 = vor.u32 %v20321_v44, %v17846_v30  ;;  %v17574_v56 = vld [vmem:[%s20977_s27 + $0x2578] sm:$0xf0] }
 0x60f   : > { %12351 = vmatpush.bf16.msra.mxu3 %v18025_v18  ;;  %v20253_v49 = vld [vmem:[%s20977_s27 + $0x256c] sm:$0xf]  ;;  %v17977_v3 = vor.u32 %v20353_v16, %v17974_v8  ;;  %v17702_v37 = vld [vmem:[%s20977_s27 + $0x2678] sm:$0xf0] }
 0x610   : > { %12313 = vmatpush.bf16.msra.mxu0 %v17625_v53  ;;  %v20285_v6 = vld [vmem:[%s20977_s27 + $0x266c] sm:$0xf]  ;;  %v17830_v50 = vld [vmem:[%s20977_s27 + $0x2778] sm:$0xf0]  ;;  %v17577_v39 = vor.u32 %v20253_v49, %v17574_v56  ;;  %v12087_v27 = vpop.f32.mrf.mxu2 }
 0x611   : > { %12326 = vmatpush.bf16.msra.mxu1 %v17753_v60  ;;  %v20317_v26 = vld [vmem:[%s20977_s27 + $0x276c] sm:$0xf]  ;;  %v17958_v31 = vld [vmem:[%s20977_s27 + $0x2878] sm:$0xf0]  ;;  %v17705_v9 = vor.u32 %v20285_v6, %v17702_v37  ;;  %v12088_v54 = vadd.f32 %v12087_v27, %v12075_v35  ;;  %v12100_v0 = vpop.f32.mrf.mxu3  ;;  %v12063_v60 = vpop.f32.mrf.mxu0 }
 0x612   : > { %12339 = vmatpush.bf16.msra.mxu2 %v17881_v58  ;;  %v20349_v47 = vld [vmem:[%s20977_s27 + $0x286c] sm:$0xf]  ;;  %v17833_v63 = vor.u32 %v20317_v26, %v17830_v50  ;;  %v17558_v36 = vld [vmem:[%s20977_s27 + $0x2558] sm:$0xf0]  ;;  %v12076_v13 = vpop.f32.mrf.mxu1 }
 0x613   : > { %12352 = vmatpush.bf16.msra.mxu3 %v18009_v57  ;;  %v20249_v40 = vld [vmem:[%s20977_s27 + $0x254c] sm:$0xf]  ;;  %v17961_v22 = vor.u32 %v20349_v47, %v17958_v31  ;;  %v17686_v18 = vld [vmem:[%s20977_s27 + $0x2658] sm:$0xf0]  ;;  %v24441_v55 = vadd.f32 %v12100_v0, %v12088_v54 }
 0x614   : > { %12314 = vmatpush.bf16.msra.mxu0 %v17609_v10  ;;  %v20281_v43 = vld [vmem:[%s20977_s27 + $0x264c] sm:$0xf]  ;;  %v17814_v62 = vld [vmem:[%s20977_s27 + $0x2758] sm:$0xf0]  ;;  %v17561_v58 = vor.u32 %v20249_v40, %v17558_v36 }
 0x615   : > { %12327 = vmatpush.bf16.msra.mxu1 %v17737_v32  ;;  %v20313_v33 = vld [vmem:[%s20977_s27 + $0x274c] sm:$0xf]  ;;  %v17942_v53 = vld [vmem:[%s20977_s27 + $0x2858] sm:$0xf0]  ;;  %v17689_v41 = vor.u32 %v20281_v43, %v17686_v18 }
 0x616   : > { %12340 = vmatpush.bf16.msra.mxu2 %v17865_v17  ;;  %v20345_v42 = vld [vmem:[%s20977_s27 + $0x284c] sm:$0xf]  ;;  %v17817_v5 = vor.u32 %v20313_v33, %v17814_v62  ;;  %v17542_v52 = vld [vmem:[%s20977_s27 + $0x2538] sm:$0xf0] }
 0x617   : > { %12353 = vmatpush.bf16.msra.mxu3 %v17993_v34  ;;  %v20245_v57 = vld [vmem:[%s20977_s27 + $0x252c] sm:$0xf]  ;;  %v17945_v15 = vor.u32 %v20345_v42, %v17942_v53  ;;  %v17670_v2 = vld [vmem:[%s20977_s27 + $0x2638] sm:$0xf0] }
 0x618   : > { %12315 = vmatpush.bf16.msra.mxu0 %v17593_v45  ;;  %v20277_v46 = vld [vmem:[%s20977_s27 + $0x262c] sm:$0xf]  ;;  %v17798_v11 = vld [vmem:[%s20977_s27 + $0x2738] sm:$0xf0]  ;;  %v17545_v10 = vor.u32 %v20245_v57, %v17542_v52  ;;  %v12089_v8 = vpop.f32.mrf.mxu2 }
 0x619   : > { %12328 = vmatpush.bf16.msra.mxu1 %v17721_v12  ;;  %v20309_v24 = vld [vmem:[%s20977_s27 + $0x272c] sm:$0xf]  ;;  %v17926_v14 = vld [vmem:[%s20977_s27 + $0x2838] sm:$0xf0]  ;;  %v17673_v38 = vor.u32 %v20277_v46, %v17670_v2  ;;  %v12102_v12 = vpop.f32.mrf.mxu3 }
 0x61a   : > { %12341 = vmatpush.bf16.msra.mxu2 %v17849_v29  ;;  %v20341_v19 = vld [vmem:[%s20977_s27 + $0x282c] sm:$0xf]  ;;  %v17526_v17 = vld [vmem:[%s20977_s27 + $0x2518] sm:$0xf0]  ;;  %v17801_v59 = vor.u32 %v20309_v24, %v17798_v11  ;;  %v24729_v24 = vld [vmem:[#allocation20_spill] sm:$0xff] }
 0x61b   : > { %12354 = vmatpush.bf16.msra.mxu3 %v17977_v3  ;;  %v20241_v32 = vld [vmem:[%s20977_s27 + $0x250c] sm:$0xf]  ;;  %v17654_v34 = vld [vmem:[%s20977_s27 + $0x2618] sm:$0xf0]  ;;  %v17929_v44 = vor.u32 %v20341_v19, %v17926_v14 }
 0x61c   : > { %12316 = vmatpush.bf16.msra.mxu0 %v17577_v39  ;;  %v20273_v7 = vld [vmem:[%s20977_s27 + $0x260c] sm:$0xf]  ;;  %v17782_v30 = vld [vmem:[%s20977_s27 + $0x2718] sm:$0xf0]  ;;  %v17529_v29 = vor.u32 %v20241_v32, %v17526_v17 }
 0x61d   : > { %12329 = vmatpush.bf16.msra.mxu1 %v17705_v9  ;;  %v20305_v51 = vld [vmem:[%s20977_s27 + $0x270c] sm:$0xf]  ;;  %v17910_v16 = vld [vmem:[%s20977_s27 + $0x2818] sm:$0xf0]  ;;  %v17657_v3 = vor.u32 %v20273_v7, %v17654_v34 }
 0x61e   : > { %12342 = vmatpush.bf16.msra.mxu2 %v17833_v63  ;;  %v20337_v21 = vld [vmem:[%s20977_s27 + $0x280c] sm:$0xf]  ;;  %v18150_v45 = vld [vmem:[%s20977_s27 + $0x29f8] sm:$0xf0]  ;;  %v17785_v35 = vor.u32 %v20305_v51, %v17782_v30 }
 0x61f   : > { %12355 = vmatpush.bf16.msra.mxu3 %v17961_v22  ;;  %v20397_v1 = vld [vmem:[%s20977_s27 + $0x29ec] sm:$0xf]  ;;  %v18278_v49 = vld [vmem:[%s20977_s27 + $0x2af8] sm:$0xf0]  ;;  %v17913_v50 = vor.u32 %v20337_v21, %v17910_v16 }
 0x620   : > { %12317 = vmatpush.bf16.msra.mxu0 %v17561_v58  ;;  %v20429_v28 = vld [vmem:[%s20977_s27 + $0x2aec] sm:$0xf]  ;;  %v18406_v6 = vld [vmem:[%s20977_s27 + $0x2bf8] sm:$0xf0]  ;;  %v18153_v47 = vor.u32 %v20397_v1, %v18150_v45  ;;  %v24726_v58 = vld [vmem:[#allocation18_spill] sm:$0xff] }
 0x621   : > { %12330 = vmatpush.bf16.msra.mxu1 %v17689_v41  ;;  %v20461_v56 = vld [vmem:[%s20977_s27 + $0x2bec] sm:$0xf]  ;;  %v18534_v26 = vld [vmem:[%s20977_s27 + $0x2cf8] sm:$0xf0]  ;;  %v18281_v31 = vor.u32 %v20429_v28, %v18278_v49 }
 0x622   : > { %12343 = vmatpush.bf16.msra.mxu2 %v17817_v5  ;;  %v20493_v37 = vld [vmem:[%s20977_s27 + $0x2cec] sm:$0xf]  ;;  %v18409_v39 = vor.u32 %v20461_v56, %v18406_v6  ;;  %v18134_v63 = vld [vmem:[%s20977_s27 + $0x29d8] sm:$0xf0] }
 0x623   : > { %12356 = vmatpush.bf16.msra.mxu3 %v17945_v15  ;;  %v20393_v9 = vld [vmem:[%s20977_s27 + $0x29cc] sm:$0xf]  ;;  %v18537_v36 = vor.u32 %v20493_v37, %v18534_v26  ;;  %v18262_v43 = vld [vmem:[%s20977_s27 + $0x2ad8] sm:$0xf0] }
 0x624   : > { %12318 = vmatpush.bf16.msra.mxu0 %v17545_v10  ;;  %v20425_v40 = vld [vmem:[%s20977_s27 + $0x2acc] sm:$0xf]  ;;  %v18390_v27 = vld [vmem:[%s20977_s27 + $0x2bd8] sm:$0xf0]  ;;  %v18137_v62 = vor.u32 %v20393_v9, %v18134_v63 }
 0x625   : > { %12331 = vmatpush.bf16.msra.mxu1 %v17673_v38  ;;  %v20457_v22 = vld [vmem:[%s20977_s27 + $0x2bcc] sm:$0xf]  ;;  %v18518_v33 = vld [vmem:[%s20977_s27 + $0x2cd8] sm:$0xf0]  ;;  %v18265_v54 = vor.u32 %v20425_v40, %v18262_v43 }
 0x626   : > { %12344 = vmatpush.bf16.msra.mxu2 %v17801_v59  ;;  %v20489_v18 = vld [vmem:[%s20977_s27 + $0x2ccc] sm:$0xf]  ;;  %v18393_v0 = vor.u32 %v20457_v22, %v18390_v27  ;;  %v18118_v53 = vld [vmem:[%s20977_s27 + $0x29b8] sm:$0xf0] }
 0x627   : > { %12357 = vmatpush.bf16.msra.mxu3 %v17929_v44  ;;  %v20389_v42 = vld [vmem:[%s20977_s27 + $0x29ac] sm:$0xf]  ;;  %v18521_v13 = vor.u32 %v20489_v18, %v18518_v33  ;;  %v18246_v41 = vld [vmem:[%s20977_s27 + $0x2ab8] sm:$0xf0] }
 0x628   : > { %12319 = vmatpush.bf16.msra.mxu0 %v17529_v29  ;;  %v20421_v60 = vld [vmem:[%s20977_s27 + $0x2aac] sm:$0xf]  ;;  %v18374_v57 = vld [vmem:[%s20977_s27 + $0x2bb8] sm:$0xf0]  ;;  %v18121_v11 = vor.u32 %v20389_v42, %v18118_v53  ;;  %v12113_v51 = vpop.f32.mrf.mxu0 }
 0x629   : > { %12332 = vmatpush.bf16.msra.mxu1 %v17657_v3  ;;  %v20453_v5 = vld [vmem:[%s20977_s27 + $0x2bac] sm:$0xf]  ;;  %v24728_v46 = vld [vmem:[#allocation17_spill] sm:$0xff]  ;;  %v18249_v19 = vor.u32 %v20421_v60, %v18246_v41  ;;  %v12114_v21 = vadd.f32 %v12113_v51, %v24441_v55  ;;  %v12126_v8 = vpop.f32.mrf.mxu1 }
 0x62a   : > { %12345 = vmatpush.bf16.msra.mxu2 %v17785_v35  ;;  %v24727_v52 = vld [vmem:[#allocation19_spill] sm:$0xff]  ;;  %v18502_v2 = vld [vmem:[%s20977_s27 + $0x2cb8] sm:$0xf0]  ;;  %v18377_v14 = vor.u32 %v20453_v5, %v18374_v57 }
 0x62b   : > { %12358 = vmatpush.bf16.msra.mxu3 %v17913_v50  ;;  %12320 = vmatmul.bf16.vlgmr.msra.gmra.mxu0 %v24726_v58  ;;  %v20485_v15 = vld [vmem:[%s20977_s27 + $0x2cac] sm:$0xf]  ;;  %v18102_v32 = vld [vmem:[%s20977_s27 + $0x2998] sm:$0xf0]  ;;  %v12127_v56 = vadd.f32 %v12126_v8, %v12114_v21 }
 0x62c   : > { %12364 = vmatpush.bf16.msrb.mxu0 %v18153_v47  ;;  %12333 = vmatmul.bf16.vlgmr.msra.gmra.mxu1 %v24728_v46  ;;  %v20385_v10 = vld [vmem:[%s20977_s27 + $0x298c] sm:$0xf]  ;;  %v18505_v38 = vor.u32 %v20485_v15, %v18502_v2  ;;  %v18230_v59 = vld [vmem:[%s20977_s27 + $0x2a98] sm:$0xf0] }
 0x62d   : > { %12377 = vmatpush.bf16.msrb.mxu1 %v18281_v31  ;;  %12346 = vmatmul.bf16.vlgmr.msra.gmra.mxu2 %v24727_v52  ;;  %v20417_v17 = vld [vmem:[%s20977_s27 + $0x2a8c] sm:$0xf]  ;;  %v18358_v34 = vld [vmem:[%s20977_s27 + $0x2b98] sm:$0xf0]  ;;  %v18105_v16 = vor.u32 %v20385_v10, %v18102_v32 }
 0x62e   : > { %12390 = vmatpush.bf16.msrb.mxu2 %v18409_v39  ;;  %12359 = vmatmul.bf16.vlgmr.msra.gmra.mxu3 %v24729_v24  ;;  %v20449_v7 = vld [vmem:[%s20977_s27 + $0x2b8c] sm:$0xf]  ;;  %v18486_v30 = vld [vmem:[%s20977_s27 + $0x2c98] sm:$0xf0]  ;;  %v18233_v1 = vor.u32 %v20417_v17, %v18230_v59 }
 0x62f   : > { %12403 = vmatpush.bf16.msrb.mxu3 %v18537_v36  ;;  %v20481_v44 = vld [vmem:[%s20977_s27 + $0x2c8c] sm:$0xf]  ;;  %v18361_v45 = vor.u32 %v20449_v7, %v18358_v34  ;;  %v18086_v12 = vld [vmem:[%s20977_s27 + $0x2978] sm:$0xf0] }
 0x630   : > { %12365 = vmatpush.bf16.msrb.mxu0 %v18137_v62  ;;  %v20381_v28 = vld [vmem:[%s20977_s27 + $0x296c] sm:$0xf]  ;;  %v18489_v49 = vor.u32 %v20481_v44, %v18486_v30  ;;  %v18214_v6 = vld [vmem:[%s20977_s27 + $0x2a78] sm:$0xf0]  ;;  %v12139_v40 = vpop.f32.mrf.mxu2 }
 0x631   : > { %12378 = vmatpush.bf16.msrb.mxu1 %v18265_v54  ;;  %v20413_v29 = vld [vmem:[%s20977_s27 + $0x2a6c] sm:$0xf]  ;;  %v18342_v55 = vld [vmem:[%s20977_s27 + $0x2b78] sm:$0xf0]  ;;  %v18089_v26 = vor.u32 %v20381_v28, %v18086_v12  ;;  %v12140_v27 = vadd.f32 %v12139_v40, %v12127_v56  ;;  %v12152_v18 = vpop.f32.mrf.mxu3  ;;  %v12115_v54 = vpop.f32.mrf.mxu0 }
 0x632   : > { %12391 = vmatpush.bf16.msrb.mxu2 %v18393_v0  ;;  %v20445_v3 = vld [vmem:[%s20977_s27 + $0x2b6c] sm:$0xf]  ;;  %v18470_v37 = vld [vmem:[%s20977_s27 + $0x2c78] sm:$0xf0]  ;;  %v18217_v50 = vor.u32 %v20413_v29, %v18214_v6  ;;  %v12128_v42 = vpop.f32.mrf.mxu1 }
 0x633   : > { %12404 = vmatpush.bf16.msrb.mxu3 %v18521_v13  ;;  %v20477_v35 = vld [vmem:[%s20977_s27 + $0x2c6c] sm:$0xf]  ;;  %v18345_v47 = vor.u32 %v20445_v3, %v18342_v55  ;;  %v18070_v39 = vld [vmem:[%s20977_s27 + $0x2958] sm:$0xf0]  ;;  %v24512_v53 = vadd.f32 %v12152_v18, %v12140_v27 }
 0x634   : > { %12366 = vmatpush.bf16.msrb.mxu0 %v18121_v11  ;;  %v20377_v31 = vld [vmem:[%s20977_s27 + $0x294c] sm:$0xf]  ;;  %v18473_v63 = vor.u32 %v20477_v35, %v18470_v37  ;;  %v18198_v36 = vld [vmem:[%s20977_s27 + $0x2a58] sm:$0xf0] }
 0x635   : > { %12379 = vmatpush.bf16.msrb.mxu1 %v18249_v19  ;;  %v20409_v9 = vld [vmem:[%s20977_s27 + $0x2a4c] sm:$0xf]  ;;  %v18326_v22 = vld [vmem:[%s20977_s27 + $0x2b58] sm:$0xf0]  ;;  %v18073_v0 = vor.u32 %v20377_v31, %v18070_v39 }
 0x636   : > { %12392 = vmatpush.bf16.msrb.mxu2 %v18377_v14  ;;  %v20441_v43 = vld [vmem:[%s20977_s27 + $0x2b4c] sm:$0xf]  ;;  %v18454_v62 = vld [vmem:[%s20977_s27 + $0x2c58] sm:$0xf0]  ;;  %v18201_v60 = vor.u32 %v20409_v9, %v18198_v36 }
 0x637   : > { %12405 = vmatpush.bf16.msrb.mxu3 %v18505_v38  ;;  %v20473_v33 = vld [vmem:[%s20977_s27 + $0x2c4c] sm:$0xf]  ;;  %v18329_v58 = vor.u32 %v20441_v43, %v18326_v22  ;;  %v18054_v41 = vld [vmem:[%s20977_s27 + $0x2938] sm:$0xf0] }
 0x638   : > { %12367 = vmatpush.bf16.msrb.mxu0 %v18105_v16  ;;  %v20373_v13 = vld [vmem:[%s20977_s27 + $0x292c] sm:$0xf]  ;;  %v18457_v57 = vor.u32 %v20473_v33, %v18454_v62  ;;  %v18182_v52 = vld [vmem:[%s20977_s27 + $0x2a38] sm:$0xf0]  ;;  %v12141_v30 = vpop.f32.mrf.mxu2 }
 0x639   : > { %12380 = vmatpush.bf16.msrb.mxu1 %v18233_v1  ;;  %v20405_v5 = vld [vmem:[%s20977_s27 + $0x2a2c] sm:$0xf]  ;;  %v18310_v15 = vld [vmem:[%s20977_s27 + $0x2b38] sm:$0xf0]  ;;  %v18057_v11 = vor.u32 %v20373_v13, %v18054_v41  ;;  %v12154_v1 = vpop.f32.mrf.mxu3 }
 0x63a   : > { %12393 = vmatpush.bf16.msrb.mxu2 %v18361_v45  ;;  %v20437_v46 = vld [vmem:[%s20977_s27 + $0x2b2c] sm:$0xf]  ;;  %v18438_v24 = vld [vmem:[%s20977_s27 + $0x2c38] sm:$0xf0]  ;;  %v18185_v10 = vor.u32 %v20405_v5, %v18182_v52 }
 0x63b   : > { %12406 = vmatpush.bf16.msrb.mxu3 %v18489_v49  ;;  %v20469_v2 = vld [vmem:[%s20977_s27 + $0x2c2c] sm:$0xf]  ;;  %v18038_v14 = vld [vmem:[%s20977_s27 + $0x2918] sm:$0xf0]  ;;  %v18313_v32 = vor.u32 %v20437_v46, %v18310_v15 }
 0x63c   : > { %12368 = vmatpush.bf16.msrb.mxu0 %v18089_v26  ;;  %v20369_v19 = vld [vmem:[%s20977_s27 + $0x290c] sm:$0xf]  ;;  %v18166_v38 = vld [vmem:[%s20977_s27 + $0x2a18] sm:$0xf0]  ;;  %v18441_v7 = vor.u32 %v20469_v2, %v18438_v24 }
 0x63d   : > { %12381 = vmatpush.bf16.msrb.mxu1 %v18217_v50  ;;  %v20401_v17 = vld [vmem:[%s20977_s27 + $0x2a0c] sm:$0xf]  ;;  %v18294_v34 = vld [vmem:[%s20977_s27 + $0x2b18] sm:$0xf0]  ;;  %v18041_v45 = vor.u32 %v20369_v19, %v18038_v14 }
 0x63e   : > { %12394 = vmatpush.bf16.msrb.mxu2 %v18345_v47  ;;  %v20433_v59 = vld [vmem:[%s20977_s27 + $0x2b0c] sm:$0xf]  ;;  %v18422_v44 = vld [vmem:[%s20977_s27 + $0x2c18] sm:$0xf0]  ;;  %v18169_v49 = vor.u32 %v20401_v17, %v18166_v38 }
 0x63f   : > { %12407 = vmatpush.bf16.msrb.mxu3 %v18473_v63  ;;  %v20465_v51 = vld [vmem:[%s20977_s27 + $0x2c0c] sm:$0xf]  ;;  %v18662_v16 = vld [vmem:[%s20977_s27 + $0x2df8] sm:$0xf0]  ;;  %v18297_v56 = vor.u32 %v20433_v59, %v18294_v34 }
 0x640   : > { %12369 = vmatpush.bf16.msrb.mxu0 %v18073_v0  ;;  %v20525_v21 = vld [vmem:[%s20977_s27 + $0x2dec] sm:$0xf]  ;;  %v18790_v28 = vld [vmem:[%s20977_s27 + $0x2ef8] sm:$0xf0]  ;;  %v18425_v55 = vor.u32 %v20465_v51, %v18422_v44  ;;  %v24730_v0 = vld [vmem:[#allocation22_spill] sm:$0xff] }
 0x641   : > { %12382 = vmatpush.bf16.msrb.mxu1 %v18201_v60  ;;  %v20557_v8 = vld [vmem:[%s20977_s27 + $0x2eec] sm:$0xf]  ;;  %v18918_v29 = vld [vmem:[%s20977_s27 + $0x2ff8] sm:$0xf0]  ;;  %v18665_v35 = vor.u32 %v20525_v21, %v18662_v16 }
 0x642   : > { %12395 = vmatpush.bf16.msrb.mxu2 %v18329_v58  ;;  %v20589_v12 = vld [vmem:[%s20977_s27 + $0x2fec] sm:$0xf]  ;;  %v19046_v3 = vld [vmem:[%s20977_s27 + $0x30f8] sm:$0xf0]  ;;  %v18793_v37 = vor.u32 %v20557_v8, %v18790_v28 }
 0x643   : > { %12408 = vmatpush.bf16.msrb.mxu3 %v18457_v57  ;;  %v20621_v6 = vld [vmem:[%s20977_s27 + $0x30ec] sm:$0xf]  ;;  %v18921_v26 = vor.u32 %v20589_v12, %v18918_v29  ;;  %v18646_v47 = vld [vmem:[%s20977_s27 + $0x2dd8] sm:$0xf0]  ;;  %v24731_v57 = vld [vmem:[#allocation24_spill] sm:$0xff] }
 0x644   : > { %12370 = vmatpush.bf16.msrb.mxu0 %v18057_v11  ;;  %v20521_v50 = vld [vmem:[%s20977_s27 + $0x2dcc] sm:$0xf]  ;;  %v19049_v39 = vor.u32 %v20621_v6, %v19046_v3  ;;  %v18774_v9 = vld [vmem:[%s20977_s27 + $0x2ed8] sm:$0xf0] }
 0x645   : > { %12383 = vmatpush.bf16.msrb.mxu1 %v18185_v10  ;;  %v20553_v31 = vld [vmem:[%s20977_s27 + $0x2ecc] sm:$0xf]  ;;  %v18902_v40 = vld [vmem:[%s20977_s27 + $0x2fd8] sm:$0xf0]  ;;  %v18649_v22 = vor.u32 %v20521_v50, %v18646_v47 }
 0x646   : > { %12396 = vmatpush.bf16.msrb.mxu2 %v18313_v32  ;;  %v20585_v63 = vld [vmem:[%s20977_s27 + $0x2fcc] sm:$0xf]  ;;  %v19030_v43 = vld [vmem:[%s20977_s27 + $0x30d8] sm:$0xf0]  ;;  %v18777_v27 = vor.u32 %v20553_v31, %v18774_v9 }
 0x647   : > { %12409 = vmatpush.bf16.msrb.mxu3 %v18441_v7  ;;  %v20617_v36 = vld [vmem:[%s20977_s27 + $0x30cc] sm:$0xf]  ;;  %v18905_v18 = vor.u32 %v20585_v63, %v18902_v40  ;;  %v18630_v62 = vld [vmem:[%s20977_s27 + $0x2db8] sm:$0xf0] }
 0x648   : > { %12371 = vmatpush.bf16.msrb.mxu0 %v18041_v45  ;;  %v20517_v33 = vld [vmem:[%s20977_s27 + $0x2dac] sm:$0xf]  ;;  %v19033_v42 = vor.u32 %v20617_v36, %v19030_v43  ;;  %v18758_v60 = vld [vmem:[%s20977_s27 + $0x2eb8] sm:$0xf0]  ;;  %v12165_v10 = vpop.f32.mrf.mxu0 }
 0x649   : > { %12384 = vmatpush.bf16.msrb.mxu1 %v18169_v49  ;;  %v20549_v54 = vld [vmem:[%s20977_s27 + $0x2eac] sm:$0xf]  ;;  %v18886_v13 = vld [vmem:[%s20977_s27 + $0x2fb8] sm:$0xf0]  ;;  %v18633_v52 = vor.u32 %v20517_v33, %v18630_v62  ;;  %v12166_v38 = vadd.f32 %v12165_v10, %v24512_v53  ;;  %v12178_v7 = vpop.f32.mrf.mxu1 }
 0x64a   : > { %12397 = vmatpush.bf16.msrb.mxu2 %v18297_v56  ;;  %v20581_v58 = vld [vmem:[%s20977_s27 + $0x2fac] sm:$0xf]  ;;  %v19014_v5 = vld [vmem:[%s20977_s27 + $0x30b8] sm:$0xf0]  ;;  %v18761_v46 = vor.u32 %v20549_v54, %v18758_v60 }
 0x64b   : > { %12410 = vmatpush.bf16.msrb.mxu3 %v18425_v55  ;;  %12372 = vmatmul.bf16.vlgmr.msrb.gmra.mxu0 %v24730_v0  ;;  %v20613_v41 = vld [vmem:[%s20977_s27 + $0x30ac] sm:$0xf]  ;;  %v18889_v15 = vor.u32 %v20581_v58, %v18886_v13  ;;  %v18614_v24 = vld [vmem:[%s20977_s27 + $0x2d98] sm:$0xf0]  ;;  %v12179_v8 = vadd.f32 %v12178_v7, %v12166_v38 }
 0x64c   : > { %12416 = vmatpush.bf16.msra.mxu0 %v18665_v35  ;;  %12385 = vmatmul.bf16.vlgmr.msrb.gmra.mxu1 %v24718_v48  ;;  %v20513_v2 = vld [vmem:[%s20977_s27 + $0x2d8c] sm:$0xf]  ;;  %v19017_v48 = vor.u32 %v20613_v41, %v19014_v5  ;;  %v18742_v11 = vld [vmem:[%s20977_s27 + $0x2e98] sm:$0xf0] }
 0x64d   : > { %12429 = vmatpush.bf16.msra.mxu1 %v18793_v37  ;;  %12398 = vmatmul.bf16.vlgmr.msrb.gmra.mxu2 %v24704_v25  ;;  %v20545_v25 = vld [vmem:[%s20977_s27 + $0x2e8c] sm:$0xf]  ;;  %v18870_v14 = vld [vmem:[%s20977_s27 + $0x2f98] sm:$0xf0]  ;;  %v18617_v59 = vor.u32 %v20513_v2, %v18614_v24 }
 0x64e   : > { %12442 = vmatpush.bf16.msra.mxu2 %v18921_v26  ;;  %12411 = vmatmul.bf16.vlgmr.msrb.gmra.mxu3 %v24731_v57  ;;  %v20577_v19 = vld [vmem:[%s20977_s27 + $0x2f8c] sm:$0xf]  ;;  %v18998_v17 = vld [vmem:[%s20977_s27 + $0x3098] sm:$0xf0]  ;;  %v18745_v34 = vor.u32 %v20545_v25, %v18742_v11 }
 0x64f   : > { %12455 = vmatpush.bf16.msra.mxu3 %v19049_v39  ;;  %v20609_v32 = vld [vmem:[%s20977_s27 + $0x308c] sm:$0xf]  ;;  %v18873_v51 = vor.u32 %v20577_v19, %v18870_v14  ;;  %v18598_v30 = vld [vmem:[%s20977_s27 + $0x2d78] sm:$0xf0] }
 0x650   : > { %12417 = vmatpush.bf16.msra.mxu0 %v18649_v22  ;;  %v20509_v44 = vld [vmem:[%s20977_s27 + $0x2d6c] sm:$0xf]  ;;  %v19001_v16 = vor.u32 %v20609_v32, %v18998_v17  ;;  %v18726_v1 = vld [vmem:[%s20977_s27 + $0x2e78] sm:$0xf0]  ;;  %v12191_v37 = vpop.f32.mrf.mxu2  ;;  %v12167_v40 = vpop.f32.mrf.mxu0 }
 0x651   : > { %12430 = vmatpush.bf16.msra.mxu1 %v18777_v27  ;;  %v20541_v21 = vld [vmem:[%s20977_s27 + $0x2e6c] sm:$0xf]  ;;  %v18854_v53 = vld [vmem:[%s20977_s27 + $0x2f78] sm:$0xf0]  ;;  %v18601_v29 = vor.u32 %v20509_v44, %v18598_v30  ;;  %v12192_v31 = vadd.f32 %v12191_v37, %v12179_v8  ;;  %v12204_v39 = vpop.f32.mrf.mxu3  ;;  %v12180_v43 = vpop.f32.mrf.mxu1 }
 0x652   : > { %12443 = vmatpush.bf16.msra.mxu2 %v18905_v18  ;;  %v20573_v45 = vld [vmem:[%s20977_s27 + $0x2f6c] sm:$0xf]  ;;  %v18982_v12 = vld [vmem:[%s20977_s27 + $0x3078] sm:$0xf0]  ;;  %v18729_v49 = vor.u32 %v20541_v21, %v18726_v1 }
 0x653   : > { %12456 = vmatpush.bf16.msra.mxu3 %v19033_v42  ;;  %v20605_v28 = vld [vmem:[%s20977_s27 + $0x306c] sm:$0xf]  ;;  %v18857_v56 = vor.u32 %v20573_v45, %v18854_v53  ;;  %v18582_v3 = vld [vmem:[%s20977_s27 + $0x2d58] sm:$0xf0]  ;;  %v12205_v22 = vadd.f32 %v12204_v39, %v12192_v31 }
 0x654   : > { %12418 = vmatpush.bf16.msra.mxu0 %v18633_v52  ;;  %v20505_v6 = vld [vmem:[%s20977_s27 + $0x2d4c] sm:$0xf]  ;;  %v18985_v35 = vor.u32 %v20605_v28, %v18982_v12  ;;  %v18710_v26 = vld [vmem:[%s20977_s27 + $0x2e58] sm:$0xf0] }
 0x655   : > { %12431 = vmatpush.bf16.msra.mxu1 %v18761_v46  ;;  %v20537_v55 = vld [vmem:[%s20977_s27 + $0x2e4c] sm:$0xf]  ;;  %v18838_v47 = vld [vmem:[%s20977_s27 + $0x2f58] sm:$0xf0]  ;;  %v18585_v36 = vor.u32 %v20505_v6, %v18582_v3 }
 0x656   : > { %12444 = vmatpush.bf16.msra.mxu2 %v18889_v15  ;;  %v20569_v50 = vld [vmem:[%s20977_s27 + $0x2f4c] sm:$0xf]  ;;  %v18966_v63 = vld [vmem:[%s20977_s27 + $0x3058] sm:$0xf0]  ;;  %v18713_v27 = vor.u32 %v20537_v55, %v18710_v26 }
 0x657   : > { %12457 = vmatpush.bf16.msra.mxu3 %v19017_v48  ;;  %v20601_v9 = vld [vmem:[%s20977_s27 + $0x304c] sm:$0xf]  ;;  %v18841_v18 = vor.u32 %v20569_v50, %v18838_v47  ;;  %v18566_v62 = vld [vmem:[%s20977_s27 + $0x2d38] sm:$0xf0] }
 0x658   : > { %12419 = vmatpush.bf16.msra.mxu0 %v18617_v59  ;;  %v20501_v33 = vld [vmem:[%s20977_s27 + $0x2d2c] sm:$0xf]  ;;  %v18969_v0 = vor.u32 %v20601_v9, %v18966_v63  ;;  %v18694_v42 = vld [vmem:[%s20977_s27 + $0x2e38] sm:$0xf0]  ;;  %v12193_v19 = vpop.f32.mrf.mxu2 }
 0x659   : > { %12432 = vmatpush.bf16.msra.mxu1 %v18745_v34  ;;  %v20533_v54 = vld [vmem:[%s20977_s27 + $0x2e2c] sm:$0xf]  ;;  %v18822_v58 = vld [vmem:[%s20977_s27 + $0x2f38] sm:$0xf0]  ;;  %v18569_v5 = vor.u32 %v20501_v33, %v18566_v62  ;;  %v12206_v32 = vpop.f32.mrf.mxu3  ;;  %v24732_v34 = vld [vmem:[#allocation26_spill] sm:$0xff] }
 0x65a   : > { %12445 = vmatpush.bf16.msra.mxu2 %v18873_v51  ;;  %v20565_v60 = vld [vmem:[%s20977_s27 + $0x2f2c] sm:$0xf]  ;;  %v18950_v41 = vld [vmem:[%s20977_s27 + $0x3038] sm:$0xf0]  ;;  %v18697_v57 = vor.u32 %v20533_v54, %v18694_v42 }
 0x65b   : > { %12458 = vmatpush.bf16.msra.mxu3 %v19001_v16  ;;  %v20597_v13 = vld [vmem:[%s20977_s27 + $0x302c] sm:$0xf]  ;;  %v18825_v52 = vor.u32 %v20565_v60, %v18822_v58  ;;  %v18550_v15 = vld [vmem:[%s20977_s27 + $0x2d18] sm:$0xf0] }
 0x65c   : > { %12420 = vmatpush.bf16.msra.mxu0 %v18601_v29  ;;  %v20497_v46 = vld [vmem:[%s20977_s27 + $0x2d0c] sm:$0xf]  ;;  %v18953_v24 = vor.u32 %v20597_v13, %v18950_v41  ;;  %v18678_v25 = vld [vmem:[%s20977_s27 + $0x2e18] sm:$0xf0] }
 0x65d   : > { %12433 = vmatpush.bf16.msra.mxu1 %v18729_v49  ;;  %v20529_v2 = vld [vmem:[%s20977_s27 + $0x2e0c] sm:$0xf]  ;;  %v18806_v11 = vld [vmem:[%s20977_s27 + $0x2f18] sm:$0xf0]  ;;  %v18553_v17 = vor.u32 %v20497_v46, %v18550_v15 }
 0x65e   : > { %12446 = vmatpush.bf16.msra.mxu2 %v18857_v56  ;;  %v20561_v48 = vld [vmem:[%s20977_s27 + $0x2f0c] sm:$0xf]  ;;  %v18934_v10 = vld [vmem:[%s20977_s27 + $0x3018] sm:$0xf0]  ;;  %v18681_v38 = vor.u32 %v20529_v2, %v18678_v25 }
 0x65f   : > { %12459 = vmatpush.bf16.msra.mxu3 %v18985_v35  ;;  %v20593_v14 = vld [vmem:[%s20977_s27 + $0x300c] sm:$0xf]  ;;  %v18809_v59 = vor.u32 %v20561_v48, %v18806_v11 }
 0x660   : > { %12421 = vmatpush.bf16.msra.mxu0 %v18585_v36  ;;  %v18937_v7 = vor.u32 %v20593_v14, %v18934_v10 }
 0x661   : > { %12434 = vmatpush.bf16.msra.mxu1 %v18713_v27 }
 0x662   : > { %12447 = vmatpush.bf16.msra.mxu2 %v18841_v18 }
 0x663   : > { %12460 = vmatpush.bf16.msra.mxu3 %v18969_v0 }
 0x664   : > { %12422 = vmatpush.bf16.msra.mxu0 %v18569_v5 }
 0x665   : > { %12435 = vmatpush.bf16.msra.mxu1 %v18697_v57 }
 0x666   : > { %12448 = vmatpush.bf16.msra.mxu2 %v18825_v52 }
 0x667   : > { %12461 = vmatpush.bf16.msra.mxu3 %v18953_v24 }
 0x668   : > { %12423 = vmatpush.bf16.msra.mxu0 %v18553_v17  ;;  %v12217_v51 = vpop.f32.mrf.mxu0  ;;  %v12473_v17 = vrot.slane %v24082_v61, 4 }
 0x669   : > { %12436 = vmatpush.bf16.msra.mxu1 %v18681_v38  ;;  %v12218_v44 = vadd.f32 %v12217_v51, %v12205_v22  ;;  %v12230_v30 = vpop.f32.mrf.mxu1 }
 0x66a   : > { %12449 = vmatpush.bf16.msra.mxu2 %v18809_v59  ;;  %v511_v59 = vld [vmem:[#allocation2] sm:$0xff] }
 0x66b   : > { %12462 = vmatpush.bf16.msra.mxu3 %v18937_v7  ;;  %12424 = vmatmul.bf16.vlgmr.msra.gmra.mxu0 %v24732_v34  ;;  %v12231_v21 = vadd.f32 %v12230_v30, %v12218_v44  ;;  %v24733_v34 = vld [vmem:[#allocation12_spill] sm:$0xff] }
 0x66c   : > { %12437 = vmatmul.bf16.vlgmr.msra.gmra.mxu1 %v24720_v20 }
 0x66d   : > { %12450 = vmatmul.bf16.vlgmr.msra.gmra.mxu2 %v24706_v4 }
 0x66e   : > { %12463 = vmatmul.bf16.vlgmr.msra.gmra.mxu3 %v22046_v23 }
 0x670   : > { %v12243_v16 = vpop.f32.mrf.mxu2  ;;  %v12219_v45 = vpop.f32.mrf.mxu0 }
 0x671   : > { %v12244_v8 = vadd.f32 %v12243_v16, %v12231_v21  ;;  %v12256_v1 = vpop.f32.mrf.mxu3  ;;  %v12232_v53 = vpop.f32.mrf.mxu1 }
 0x673   : > { %v12257_v28 = vadd.f32 %v12256_v1, %v12244_v8 }
 0x678   : > { %v12245_v12 = vpop.f32.mrf.mxu2 }
 0x679   : > { %v12258_v29 = vpop.f32.mrf.mxu3 }
 0x688   : > { %v12269_v49 = vpop.f32.mrf.mxu0 }
 0x689   : > { %v12270_v56 = vadd.f32 %v12269_v49, %v12257_v28  ;;  %v12282_v6 = vpop.f32.mrf.mxu1 }
 0x68b   : > { %v12283_v20 = vadd.f32 %v12282_v6, %v12270_v56 }
 0x690   : > { %v12295_v3 = vpop.f32.mrf.mxu2  ;;  %v12271_v23 = vpop.f32.mrf.mxu0 }
 0x691   : > { %v12296_v4 = vadd.f32 %v12295_v3, %v12283_v20  ;;  %v12308_v55 = vpop.f32.mrf.mxu3  ;;  %v12284_v35 = vpop.f32.mrf.mxu1 }
 0x693   : > { %v12309_v37 = vadd.f32 %v12308_v55, %v12296_v4 }
 0x698   : > { %v12297_v26 = vpop.f32.mrf.mxu2 }
 0x699   : > { %v12310_v50 = vpop.f32.mrf.mxu3 }
 0x6a8   : > { %v12321_v47 = vpop.f32.mrf.mxu0 }
 0x6a9   : > { %v12334_v31 = vpop.f32.mrf.mxu1  ;;  %v12322_v18 = vadd.f32 %v12321_v47, %v12309_v37 }
 0x6ab   : > { %v12335_v42 = vadd.f32 %v12334_v31, %v12322_v18 }
 0x6b0   : > { %v12347_v39 = vpop.f32.mrf.mxu2  ;;  %v12323_v63 = vpop.f32.mrf.mxu0 }
 0x6b1   : > { %v12360_v9 = vpop.f32.mrf.mxu3  ;;  %v12336_v40 = vpop.f32.mrf.mxu1  ;;  %v12348_v60 = vadd.f32 %v12347_v39, %v12335_v42 }
 0x6b3   : > { %v12361_v41 = vadd.f32 %v12360_v9, %v12348_v60 }
 0x6b8   : > { %v12349_v36 = vpop.f32.mrf.mxu2 }
 0x6b9   : > { %v12362_v43 = vpop.f32.mrf.mxu3 }
 0x6c8   : > { %v12373_v22 = vpop.f32.mrf.mxu0 }
 0x6c9   : > { %v12386_v27 = vpop.f32.mrf.mxu1  ;;  %v12374_v5 = vadd.f32 %v12373_v22, %v12361_v41 }
 0x6cb   : > { %v12387_v57 = vadd.f32 %v12386_v27, %v12374_v5 }
 0x6d0   : > { %v12399_v33 = vpop.f32.mrf.mxu2  ;;  %v12375_v54 = vpop.f32.mrf.mxu0 }
 0x6d1   : > { %v12412_v62 = vpop.f32.mrf.mxu3  ;;  %v12388_v0 = vpop.f32.mrf.mxu1  ;;  %v12400_v52 = vadd.f32 %v12399_v33, %v12387_v57 }
 0x6d3   : > { %v12413_v46 = vadd.f32 %v12412_v62, %v12400_v52 }
 0x6d8   : > { %v12401_v58 = vpop.f32.mrf.mxu2 }
 0x6d9   : > { %v12414_v13 = vpop.f32.mrf.mxu3 }
 0x6e8   : > { %v12425_v15 = vpop.f32.mrf.mxu0 }
 0x6e9   : > { %v12438_v2 = vpop.f32.mrf.mxu1  ;;  %v12426_v24 = vadd.f32 %v12425_v15, %v12413_v46 }
 0x6eb   : > { %v12439_v25 = vadd.f32 %v12438_v2, %v12426_v24 }
 0x6f0   : > { %v12451_v48 = vpop.f32.mrf.mxu2  ;;  %v12427_v14 = vpop.f32.mrf.mxu0 }
 0x6f1   : > { %v12452_v11 = vadd.f32 %v12451_v48, %v12439_v25  ;;  %v12464_v19 = vpop.f32.mrf.mxu3  ;;  %v12440_v10 = vpop.f32.mrf.mxu1 }
 0x6f3   : > { %v12465_v32 = vadd.f32 %v12464_v19, %v12452_v11 }
 0x6f5   : > { %v12474_v38 = vrot.slane %v12465_v32, 2 }
 0x6f7   : > { %v12478_v7 = vsel %vm12477_vm1, %v12473_v17, %v12474_v38  ;;  %12487 = sbr.rel (%p19050_p3) target bundleno = 1958 (0x7a6), region = 56 }
 0x6f8   : > { %v12480_v51 = vsel %vm12479_vm2, %v24733_v34, %v12478_v7  ;;  %v12453_v44 = vpop.f32.mrf.mxu2 }
 0x6f9   : > { %v12482_v30 = vadd.f32 %v12480_v51, %v511_v59  ;;  %v12466_v21 = vpop.f32.mrf.mxu3 }
 0x6fb   : > { %12483 = vst [vmem:[#allocation2] sm:$0xff] %v12482_v30 }
 0x6fc   : > { %v12550_v16 = vld [vmem:[#allocation7 + $0x178] sm:$0xff]  ;;  %v12549_v8 = vld [vmem:[#allocation7 + $0x170] sm:$0xff]  ;;  %v12548_v53 = vld [vmem:[#allocation7 + $0x168] sm:$0xff] }
 0x6fd   : > { %v12566_v1 = vld [vmem:[#allocation7 + $0x1f8] sm:$0xff]  ;;  %12617 = vmatpush.msra.mxu2 %v12550_v16  ;;  %v12565_v28 = vld [vmem:[#allocation7 + $0x1f0] sm:$0xff]  ;;  %v12564_v49 = vld [vmem:[#allocation7 + $0x1e8] sm:$0xff] }
 0x6fe   : > { %12637 = vmatpush.msra.mxu3 %v12566_v1  ;;  %v12518_v61 = vld [vmem:[#allocation7 + $0x78] sm:$0xff]  ;;  %v12517_v12 = vld [vmem:[#allocation7 + $0x70] sm:$0xff]  ;;  %v12516_v56 = vld [vmem:[#allocation7 + $0x68] sm:$0xff] }
 0x6ff   : > { %v12534_v45 = vld [vmem:[#allocation7 + $0xf8] sm:$0xff]  ;;  %12577 = vmatpush.msra.mxu0 %v12518_v61  ;;  %v12533_v29 = vld [vmem:[#allocation7 + $0xf0] sm:$0xff]  ;;  %12618 = vmatpush.msra.mxu2 %v12549_v8  ;;  %v12547_v6 = vld [vmem:[#allocation7 + $0x160] sm:$0xff] }
 0x700   : > { %12597 = vmatpush.msra.mxu1 %v12534_v45  ;;  %12638 = vmatpush.msra.mxu3 %v12565_v28  ;;  %v12532_v20 = vld [vmem:[#allocation7 + $0xe8] sm:$0xff]  ;;  %v12563_v3 = vld [vmem:[#allocation7 + $0x1e0] sm:$0xff]  ;;  %v12546_v23 = vld [vmem:[#allocation7 + $0x158] sm:$0xff] }
 0x701   : > { %12578 = vmatpush.msra.mxu0 %v12517_v12  ;;  %12619 = vmatpush.msra.mxu2 %v12548_v53  ;;  %v12515_v4 = vld [vmem:[#allocation7 + $0x60] sm:$0xff]  ;;  %v12562_v35 = vld [vmem:[#allocation7 + $0x1d8] sm:$0xff]  ;;  %v12545_v50 = vld [vmem:[#allocation7 + $0x150] sm:$0xff] }
 0x702   : > { %12598 = vmatpush.msra.mxu1 %v12533_v29  ;;  %12639 = vmatpush.msra.mxu3 %v12564_v49  ;;  %v12531_v55 = vld [vmem:[#allocation7 + $0xe0] sm:$0xff]  ;;  %v12514_v37 = vld [vmem:[#allocation7 + $0x58] sm:$0xff]  ;;  %v12561_v47 = vld [vmem:[#allocation7 + $0x1d0] sm:$0xff] }
 0x703   : > { %12579 = vmatpush.msra.mxu0 %v12516_v56  ;;  %12620 = vmatpush.msra.mxu2 %v12547_v6  ;;  %v12530_v26 = vld [vmem:[#allocation7 + $0xd8] sm:$0xff]  ;;  %v12513_v31 = vld [vmem:[#allocation7 + $0x50] sm:$0xff]  ;;  %v12544_v9 = vld [vmem:[#allocation7 + $0x148] sm:$0xff] }
 0x704   : > { %12599 = vmatpush.msra.mxu1 %v12532_v20  ;;  %12640 = vmatpush.msra.mxu3 %v12563_v3  ;;  %v12529_v39 = vld [vmem:[#allocation7 + $0xd0] sm:$0xff]  ;;  %v12560_v63 = vld [vmem:[#allocation7 + $0x1c8] sm:$0xff]  ;;  %v12543_v43 = vld [vmem:[#allocation7 + $0x140] sm:$0xff] }
 0x705   : > { %12580 = vmatpush.msra.mxu0 %v12515_v4  ;;  %12621 = vmatpush.msra.mxu2 %v12546_v23  ;;  %v12512_v40 = vld [vmem:[#allocation7 + $0x48] sm:$0xff]  ;;  %v12559_v22 = vld [vmem:[#allocation7 + $0x1c0] sm:$0xff]  ;;  %v12542_v33 = vld [vmem:[#allocation7 + $0x138] sm:$0xff] }
 0x706   : > { %12600 = vmatpush.msra.mxu1 %v12531_v55  ;;  %12641 = vmatpush.msra.mxu3 %v12562_v35  ;;  %v12528_v36 = vld [vmem:[#allocation7 + $0xc8] sm:$0xff]  ;;  %v12511_v27 = vld [vmem:[#allocation7 + $0x40] sm:$0xff]  ;;  %v12558_v62 = vld [vmem:[#allocation7 + $0x1b8] sm:$0xff] }
 0x707   : > { %12581 = vmatpush.msra.mxu0 %v12514_v37  ;;  %12622 = vmatpush.msra.mxu2 %v12545_v50  ;;  %v12527_v18 = vld [vmem:[#allocation7 + $0xc0] sm:$0xff]  ;;  %v12510_v54 = vld [vmem:[#allocation7 + $0x38] sm:$0xff]  ;;  %v12541_v42 = vld [vmem:[#allocation7 + $0x130] sm:$0xff] }
 0x708   : > { %12601 = vmatpush.msra.mxu1 %v12530_v26  ;;  %12642 = vmatpush.msra.mxu3 %v12561_v47  ;;  %v12526_v0 = vld [vmem:[#allocation7 + $0xb8] sm:$0xff]  ;;  %v12557_v60 = vld [vmem:[#allocation7 + $0x1b0] sm:$0xff]  ;;  %v12540_v41 = vld [vmem:[#allocation7 + $0x128] sm:$0xff] }
 0x709   : > { %12582 = vmatpush.msra.mxu0 %v12513_v31  ;;  %12623 = vmatpush.msra.mxu2 %v12544_v9  ;;  %v12509_v58 = vld [vmem:[#allocation7 + $0x30] sm:$0xff]  ;;  %v12556_v5 = vld [vmem:[#allocation7 + $0x1a8] sm:$0xff]  ;;  %v12539_v46 = vld [vmem:[#allocation7 + $0x120] sm:$0xff] }
 0x70a   : > { %12602 = vmatpush.msra.mxu1 %v12529_v39  ;;  %12643 = vmatpush.msra.mxu3 %v12560_v63  ;;  %v12525_v13 = vld [vmem:[#allocation7 + $0xb0] sm:$0xff]  ;;  %v12508_v57 = vld [vmem:[#allocation7 + $0x28] sm:$0xff]  ;;  %v12555_v15 = vld [vmem:[#allocation7 + $0x1a0] sm:$0xff] }
 0x70b   : > { %12583 = vmatpush.msra.mxu0 %v12512_v40  ;;  %12624 = vmatpush.msra.mxu2 %v12543_v43  ;;  %v12524_v52 = vld [vmem:[#allocation7 + $0xa8] sm:$0xff]  ;;  %v12489_v2 = vld [vmem:[#allocation5] sm:$0xf]  ;;  %v12507_v24 = vld [vmem:[#allocation7 + $0x20] sm:$0xff] }
 0x70c   : > { %12603 = vmatpush.msra.mxu1 %v12528_v36  ;;  %12644 = vmatpush.msra.mxu3 %v12559_v22  ;;  %v12523_v25 = vld [vmem:[#allocation7 + $0xa0] sm:$0xff]  ;;  %v12491_v48 = vperm.slane %v12489_v2, 0  ;;  %v12492_v11 = vperm.slane %v12489_v2, 1  ;;  %v12493_v19 = vperm.slane %v12489_v2, 2  ;;  %v12494_v14 = vperm.slane %v12489_v2, 3  ;;  %v12538_v10 = vld [vmem:[#allocation7 + $0x118] sm:$0xff] }
 0x70d   : > { %12584 = vmatpush.msra.mxu0 %v12511_v27  ;;  %12625 = vmatpush.msra.mxu2 %v12542_v33  ;;  %v12554_v32 = vld [vmem:[#allocation7 + $0x198] sm:$0xff]  ;;  %v12537_v51 = vld [vmem:[#allocation7 + $0x110] sm:$0xff]  ;;  %v12536_v61 = vld [vmem:[#allocation7 + $0x108] sm:$0xff] }
 0x70e   : > { %12604 = vmatpush.msra.mxu1 %v12527_v18  ;;  %12645 = vmatpush.msra.mxu3 %v12558_v62  ;;  %v12506_v17 = vld [vmem:[#allocation7 + $0x18] sm:$0xff]  ;;  %v12495_v59 = vrot.slane %v12492_v11, 6  ;;  %v12496_v7 = vrot.slane %v12493_v19, 4  ;;  %v12497_v34 = vrot.slane %v12494_v14, 2  ;;  %v12553_v44 = vld [vmem:[#allocation7 + $0x190] sm:$0xff]  ;;  %v12552_v45 = vld [vmem:[#allocation7 + $0x188] sm:$0xff] }
 0x70f   : > { %12585 = vmatpush.msra.mxu0 %v12510_v54  ;;  %12626 = vmatpush.msra.mxu2 %v12541_v42  ;;  %v12522_v38 = vld [vmem:[#allocation7 + $0x98] sm:$0xff]  ;;  %v12505_v21 = vld [vmem:[#allocation7 + $0x10] sm:$0xff]  ;;  %v12504_v12 = vld [vmem:[#allocation7 + $0x8] sm:$0xff] }
 0x710   : > { %12605 = vmatpush.msra.mxu1 %v12526_v0  ;;  %12646 = vmatpush.msra.mxu3 %v12557_v60  ;;  %v12488_v30 = vld [vmem:[#allocation2] sm:$0xff]  ;;  %v12498_v8 = vsel %vm12475_vm0, %v12491_v48, %v12495_v59  ;;  %v12499_v1 = vsel %vm12477_vm1, %v12496_v7, %v12497_v34  ;;  %v12520_v29 = vld [vmem:[#allocation7 + $0x88] sm:$0xff]  ;;  %v12535_v49 = vld [vmem:[#allocation7 + $0x100] sm:$0xff] }
 0x711   : > { %12586 = vmatpush.msra.mxu0 %v12509_v58  ;;  %12627 = vmatpush.msra.mxu2 %v12540_v41  ;;  %v12521_v16 = vld [vmem:[#allocation7 + $0x90] sm:$0xff]  ;;  %v12500_v53 = vsel %vm12479_vm2, %v12498_v8, %v12499_v1  ;;  %v12551_v56 = vld [vmem:[#allocation7 + $0x180] sm:$0xff] }
 0x712   : > { %12606 = vmatpush.msra.mxu1 %v12525_v13  ;;  %12647 = vmatpush.msra.mxu3 %v12556_v5  ;;  %v12502_v28 = vadd.f32 %v12500_v53, %v12488_v30  ;;  %v12503_v6 = vld [vmem:[#allocation7] sm:$0xff] }
 0x713   : > { %12587 = vmatpush.msra.mxu0 %v12508_v57  ;;  %12628 = vmatpush.msra.mxu2 %v12539_v46  ;;  %v12519_v20 = vld [vmem:[#allocation7 + $0x80] sm:$0xff] }
 0x714   : > { %12607 = vmatpush.msra.mxu1 %v12524_v52  ;;  %12648 = vmatpush.msra.mxu3 %v12555_v15  ;;  %12568 = vst [vmem:[#allocation1] ss:$4 sm:$0xff] %v12502_v28 }
 0x715   : > { %12588 = vmatpush.msra.mxu0 %v12507_v24  ;;  %12629 = vmatpush.msra.mxu2 %v12538_v10 }
 0x716   : > { %12608 = vmatpush.msra.mxu1 %v12523_v25  ;;  %12649 = vmatpush.msra.mxu3 %v12554_v32 }
 0x717   : > { %12589 = vmatpush.msra.mxu0 %v12506_v17  ;;  %12630 = vmatpush.msra.mxu2 %v12537_v51 }
 0x718   : > { %12609 = vmatpush.msra.mxu1 %v12522_v38  ;;  %12650 = vmatpush.msra.mxu3 %v12553_v44 }
 0x719   : > { %12590 = vmatpush.msra.mxu0 %v12505_v21  ;;  %12631 = vmatpush.msra.mxu2 %v12536_v61 }
 0x71a   : > { %12610 = vmatpush.msra.mxu1 %v12521_v16  ;;  %12651 = vmatpush.msra.mxu3 %v12552_v45 }
 0x71b   : > { %12591 = vmatpush.msra.mxu0 %v12504_v12  ;;  %12632 = vmatpush.msra.mxu2 %v12535_v49  ;;  %v12571_v3 = vld.sshfl [vmem:[#allocation1 + $0x10] sm:$0xff pattern:$0x73625140]  ;;  %v12572_v4 = vld.sshfl [vmem:[#allocation1 + $0x18] sm:$0xff pattern:$0x73625140] }
 0x71c   : > { %12611 = vmatpush.msra.mxu1 %v12520_v29  ;;  %12652 = vmatpush.msra.mxu3 %v12551_v56  ;;  %v12569_v55 = vld.sshfl [vmem:[#allocation1] sm:$0xff pattern:$0x73625140]  ;;  %v12570_v23 = vld.sshfl [vmem:[#allocation1 + $0x8] sm:$0xff pattern:$0x73625140] }
 0x71d   : > { %12592 = vmatpush.msra.mxu0 %v12503_v6  ;;  %12633 = vmatmul.f32.vlgmr.msra.gmra.mxu2 %v12571_v3 }
 0x71e   : > { %12612 = vmatpush.msra.mxu1 %v12519_v20  ;;  %12653 = vmatmul.f32.vlgmr.msra.gmra.mxu3 %v12572_v4 }
 0x71f   : > { %12593 = vmatmul.f32.vlgmr.msra.gmra.mxu0 %v12569_v55  ;;  %12613 = vmatmul.f32.vlgmr.msra.gmra.mxu1 %v12570_v23 }
 0x79c   : > { %v12594_v35 = vpop.f32.mrf.mxu0  ;;  %v12614_v37 = vpop.f32.mrf.mxu1 }
 0x79d   : > { %v12615_v26 = vadd.f32 %v12614_v37, %v12594_v35 }
 0x7a0   : > { %v12634_v50 = vpop.f32.mrf.mxu2 }
 0x7a1   : > { %v12654_v47 = vpop.f32.mrf.mxu3  ;;  %v12635_v31 = vadd.f32 %v12634_v50, %v12615_v26 }
 0x7a3   : > { %v12655_v39 = vadd.f32 %v12654_v47, %v12635_v31 }
 0x7a5   : > { %12657 = vst [vmem:[%s24636_s4] sm:$0x3] %v12655_v39 }
 0x7a6 PF: > { %s18_s20 = sadd.s32 1, %s20852_s20   ;;  %s24734_s25 = smov %s24741_s15 }
 0x7a7   : > { %p15_p4 = scmp.ge.s32.totalorder %s18_s20, 6   ;;  %s24735_s15 = smov %s20836_s16 }
 0x7a8   : > { %s24736_s16 = smov %s20840_s17  ;;  %s24737_s17 = smov %s20970_s8 }
 0x7a9   : > { %s24738_s18 = smov %s20848_s19  ;;  %s24739_s19 = smov %s24734_s25 }
 0x7aa   :  { %17 = sbr.rel (!%p15_p4) target bundleno = 5 (0x5), region = 98 }
 0x7af   :  { %12677 = vsyncpa [#allocation4], 1 }
 0x7b0   :  { %12679 = vsyncpa [#allocation4 + $0x1], 1 }
 0x7b1   :  { %12680 = vsyncpa [#allocation6], 1 }

</bundles_post_ra>
